<compile_context>
chip_gen: v7x
topology: tpu7x:2x2x1
jax: 0.10.0
libtpu: 0.0.40
codegen_flags: <defaults>
</compile_context>

<pallas_src>
import functools
import math

import jax
import jax.numpy as jnp
from jax import lax
from jax.experimental import pallas as pl
from jax.experimental.pallas import tpu as pltpu

_EPS = 1e-5      # torch LayerNorm default
_NEG = -1e9      # padding logit bias -> softmax prob exactly 0


# ------------------------------ fused kernel -------------------------------

def _fused_kernel(x_ref, wk_ref, w2_ref, vs_ref, vf_ref, o_ref,
                  hd_scr, mg_scr, *, meta, nh, S, H, dh, dim_ff):
    f32, bf16 = jnp.float32, jnp.bfloat16
    scale = 1.0 / math.sqrt(dh)

    def vrow(i, n):                      # (1, n) f32 bias / LayerNorm row
        return vs_ref[i:i + 1, :n]

    def wcols(off, n):                   # (H, n) bf16 weight slab (lane aligned)
        return wk_ref[:, off:off + n]

    def mm(a, w):                        # bf16 operands -> MXU, f32 accumulate
        return jnp.dot(a.astype(bf16), w, preferred_element_type=f32)

    def layer_norm(h, gi, bi):
        mean = jnp.mean(h, axis=-1, keepdims=True)
        d = h - mean
        var = jnp.mean(d * d, axis=-1, keepdims=True)        # biased, like torch
        return d * lax.rsqrt(var + _EPS) * vrow(gi, H) + vrow(bi, H)

    def attention_core(q, k, v):
        """q, k, v: (S, H) f32 -> (S, H) f32 (before output projection)."""
        # Head split through a VMEM scratch slab -> head-major (nh, S, dh).
        for h in range(nh):
            c = slice(h * dh, (h + 1) * dh)
            hd_scr[0, h, :, :] = q[:, c]
            hd_scr[1, h, :, :] = k[:, c]
            hd_scr[2, h, :, :] = v[:, c]
        qh = hd_scr[0] * scale
        kh = hd_scr[1]
        vh = hd_scr[2]
        # One batched dot_general for scores, one for the AV product; the
        # softmax reductions run once over all heads.
        s = jnp.einsum("hqd,hkd->hqk", qh.astype(bf16), kh.astype(bf16),
                       preferred_element_type=f32)
        s = s - jnp.max(s, axis=-1, keepdims=True)
        e = jnp.exp(s)
        p = e * pl.reciprocal(jnp.sum(e, axis=-1, keepdims=True), approx=True)
        o = jnp.einsum("hqk,hkd->hqd", p.astype(bf16), vh.astype(bf16),
                       preferred_element_type=f32)
        # Merge heads through a VMEM scratch slab (no lane-axis concatenates).
        for h in range(nh):
            mg_scr[:, h * dh:(h + 1) * dh] = o[h]
        return mg_scr[...]

    def self_attention(h, m):
        qkv = mm(h, wcols(m["wqkv"], 3 * H)) + vrow(m["bqkv"], 3 * H)
        a = attention_core(qkv[:, :H], qkv[:, H:2 * H], qkv[:, 2 * H:3 * H])
        return mm(a, wcols(m["wo"], H)) + vrow(m["bo"], H)

    def cross_attention(h, mem, m):
        q = mm(h, wcols(m["wq"], H)) + vrow(m["bq"], H)
        kv = mm(mem, wcols(m["wkv"], 2 * H)) + vrow(m["bkv"], 2 * H)
        a = attention_core(q, kv[:, :H], kv[:, H:2 * H])
        return mm(a, wcols(m["wo"], H)) + vrow(m["bo"], H)

    def ffn(h, m):
        # f32 bias + ReLU (v5e-safe), then the (S, dim_ff) intermediate lives
        # only in bf16 (halves vreg pressure / store bytes across ff2).
        mid = jnp.maximum(mm(h, wcols(m["ff1"], dim_ff))
                          + vf_ref[m["ff1_b"]:m["ff1_b"] + 1, :], 0.0)
        mid = mid.astype(bf16)
        r = m["ff2"] * dim_ff
        w2 = w2_ref[r:r + dim_ff, :]
        return jnp.dot(mid, w2, preferred_element_type=f32) + vrow(m["ff2_b"], H)

    x = x_ref[...].astype(f32)            # (S, H): the only batch element needed

    # ---- encoder (src = x) ----
    mem = x
    for m in meta["enc"]:
        mem = layer_norm(mem + self_attention(mem, m["attn"]), m["ln1g"], m["ln1b"])
        mem = layer_norm(mem + ffn(mem, m), m["ln2g"], m["ln2b"])
    mem = layer_norm(mem, meta["enc_norm_g"], meta["enc_norm_b"])

    # ---- decoder (tgt = x, memory = encoder output) ----
    out = x
    for m in meta["dec"]:
        out = layer_norm(out + self_attention(out, m["self_attn"]), m["ln1g"], m["ln1b"])
        out = layer_norm(out + cross_attention(out, mem, m["cross_attn"]),
                         m["ln2g"], m["ln2b"])
        out = layer_norm(out + ffn(out, m), m["ln3g"], m["ln3b"])
    out = layer_norm(out, meta["dec_norm_g"], meta["dec_norm_b"])

    # ---- fc + softmax (lane-padded to 128; padded logits = -1e9 -> prob 0) ----
    npad = meta["npad"]
    logits = mm(out, wcols(meta["fc_w"], npad)) + vrow(meta["fc_b"], npad)
    logits = logits - jnp.max(logits, axis=-1, keepdims=True)
    e = jnp.exp(logits)
    o_ref[...] = (e / jnp.sum(e, axis=-1, keepdims=True)).astype(o_ref.dtype)


# ------------------------------- wrapper ------------------------------------

def transformer_average_strategy_forward(x, buffers, *, meta, num_heads, num_actions):
    """x: (S, B, H) seq-first (nn.Transformer default). Returns (S, num_actions)."""
    S, B, H = x.shape
    dh = H // num_heads
    dim_ff = buffers["vf"].shape[1]
    npad = meta["npad"]

    # The module's output depends only on x[:, -1, :]'s batch element; there is
    # no cross-batch coupling anywhere, so dropping the other batch is exact.
    x_last = x[:, -1, :]                                           # (S, H)

    kernel = functools.partial(_fused_kernel, meta=meta, nh=num_heads,
                               S=S, H=H, dh=dh, dim_ff=dim_ff)
    vmem = pl.BlockSpec(memory_space=pltpu.MemorySpace.VMEM)
    probs = pl.pallas_call(
        kernel,
        out_shape=jax.ShapeDtypeStruct((S, npad), jnp.float32),
        in_specs=[vmem] * 5,
        out_specs=vmem,
        scratch_shapes=[
            pltpu.VMEM((3, num_heads, S, dh), jnp.float32),  # head-major q/k/v slab
            pltpu.VMEM((S, H), jnp.float32),                 # merged head outputs
        ],
    )(x_last, buffers["wk"], buffers["w2"], buffers["vs"], buffers["vf"])
    return probs[:, :num_actions]


# ----------------------------- parameter init -------------------------------

def _init_linear(key, din, dout):
    w = 0.02 * jax.random.normal(key, (din, dout), dtype=jnp.float32)
    return w, jnp.zeros((dout,), jnp.float32)


def _init_attn(key, h):
    k1, k2 = jax.random.split(key)
    wqkv, bqkv = _init_linear(k1, h, 3 * h)       # packed Q|K|V projection
    wo, bo = _init_linear(k2, h, h)
    return dict(wqkv=wqkv, bqkv=bqkv, wo=wo, bo=bo)


def _ln(h):
    return jnp.ones((h,), jnp.float32), jnp.zeros((h,), jnp.float32)


def init_params(key, hidden_dim, num_layers, num_actions, dim_ff):
    """Logical (unpacked) f32 parameter tree mirroring nn.Transformer + fc."""
    keys = jax.random.split(key, 2 * num_layers + 1)
    enc_layers, dec_layers = [], []
    for i in range(num_layers):
        k = jax.random.split(keys[i], 3)
        g1, b1 = _ln(hidden_dim); g2, b2 = _ln(hidden_dim)
        w1, bb1 = _init_linear(k[1], hidden_dim, dim_ff)
        w2, bb2 = _init_linear(k[2], dim_ff, hidden_dim)
        enc_layers.append(dict(attn=_init_attn(k[0], hidden_dim),
                               ln1_g=g1, ln1_b=b1, ln2_g=g2, ln2_b=b2,
                               ff1_w=w1, ff1_b=bb1, ff2_w=w2, ff2_b=bb2))
    for i in range(num_layers):
        k = jax.random.split(keys[num_layers + i], 4)
        g1, b1 = _ln(hidden_dim); g2, b2 = _ln(hidden_dim); g3, b3 = _ln(hidden_dim)
        w1, bb1 = _init_linear(k[2], hidden_dim, dim_ff)
        w2, bb2 = _init_linear(k[3], dim_ff, hidden_dim)
        dec_layers.append(dict(self_attn=_init_attn(k[0], hidden_dim),
                               cross_attn=_init_attn(k[1], hidden_dim),
                               ln1_g=g1, ln1_b=b1, ln2_g=g2, ln2_b=b2,
                               ln3_g=g3, ln3_b=b3,
                               ff1_w=w1, ff1_b=bb1, ff2_w=w2, ff2_b=bb2))
    eg, eb = _ln(hidden_dim); dg, db = _ln(hidden_dim)
    fc_w, fc_b = _init_linear(keys[-1], hidden_dim, num_actions)
    return dict(encoder_layers=enc_layers, decoder_layers=dec_layers,
                enc_norm_g=eg, enc_norm_b=eb, dec_norm_g=dg, dec_norm_b=db,
                fc_w=fc_w, fc_b=fc_b)


# ----------------------------- host-side packing -----------------------------

def pack_params(params, hidden_dim, num_layers, num_actions, dim_ff):
    """Pack ~66 logical leaves into 4 contiguous buffers + static offset table."""
    del num_layers  # implied by the lists below
    H = hidden_dim
    assert num_actions <= 128, "fc output assumed to fit in one padded lane row"

    wk_segs, wk_cols = [], [0]
    vs_rows, vf_rows, w2_blks = [], [], []

    def add_wk(w):                      # (H, n) -> column offset (128-aligned)
        n = w.shape[1]
        pad = (-n) % 128
        if pad:
            w = jnp.pad(w, ((0, 0), (0, pad)))
        off = wk_cols[0]
        wk_segs.append(w)
        wk_cols[0] += w.shape[1]
        return off

    def add_vs(v):                      # (n<=128,) -> row index in vector table
        v = v.reshape(-1)
        vs_rows.append(jnp.zeros((128,), jnp.float32).at[:v.shape[0]].set(v))
        return len(vs_rows) - 1

    def add_vf(v):                      # (dim_ff,) ff1 bias -> row index
        vf_rows.append(v.reshape(-1))
        return len(vf_rows) - 1

    def add_w2(w):                      # (dim_ff, H) -> block index
        w2_blks.append(w)
        return len(w2_blks) - 1

    def attn_meta(a):
        return dict(wqkv=add_wk(a["wqkv"]), bqkv=add_vs(a["bqkv"]),
                    wo=add_wk(a["wo"]), bo=add_vs(a["bo"]))

    def cross_meta(a):                  # split q / kv so both slabs are aligned
        return dict(wq=add_wk(a["wqkv"][:, :H]), bq=add_vs(a["bqkv"][:H]),
                    wkv=add_wk(a["wqkv"][:, H:]), bkv=add_vs(a["bqkv"][H:]),
                    wo=add_wk(a["wo"]), bo=add_vs(a["bo"]))

    enc_meta = []
    for lp in params["encoder_layers"]:
        enc_meta.append(dict(
            attn=attn_meta(lp["attn"]),
            ff1=add_wk(lp["ff1_w"]), ff1_b=add_vf(lp["ff1_b"]),
            ff2=add_w2(lp["ff2_w"]), ff2_b=add_vs(lp["ff2_b"]),
            ln1g=add_vs(lp["ln1_g"]), ln1b=add_vs(lp["ln1_b"]),
            ln2g=add_vs(lp["ln2_g"]), ln2b=add_vs(lp["ln2_b"])))

    dec_meta = []
    for lp in params["decoder_layers"]:
        dec_meta.append(dict(
            self_attn=attn_meta(lp["self_attn"]),
            cross_attn=cross_meta(lp["cross_attn"]),
            ff1=add_wk(lp["ff1_w"]), ff1_b=add_vf(lp["ff1_b"]),
            ff2=add_w2(lp["ff2_w"]), ff2_b=add_vs(lp["ff2_b"]),
            ln1g=add_vs(lp["ln1_g"]), ln1b=add_vs(lp["ln1_b"]),
            ln2g=add_vs(lp["ln2_g"]), ln2b=add_vs(lp["ln2_b"]),
            ln3g=add_vs(lp["ln3_g"]), ln3b=add_vs(lp["ln3_b"])))

    npad = ((num_actions + 127) // 128) * 128
    fc_w = jnp.zeros((H, npad), jnp.float32).at[:, :num_actions].set(params["fc_w"])
    fc_b = jnp.full((npad,), _NEG, jnp.float32).at[:num_actions].set(params["fc_b"])

    meta = dict(enc=enc_meta, dec=dec_meta,
                enc_norm_g=add_vs(params["enc_norm_g"]),
                enc_norm_b=add_vs(params["enc_norm_b"]),
                dec_norm_g=add_vs(params["dec_norm_g"]),
                dec_norm_b=add_vs(params["dec_norm_b"]),
                fc_w=add_wk(fc_w), fc_b=add_vs(fc_b), npad=npad)

    buffers = dict(
        wk=jnp.concatenate(wk_segs, axis=1).astype(jnp.bfloat16),   # (H, ~10k)
        w2=jnp.concatenate(w2_blks, axis=0).astype(jnp.bfloat16),   # (4*dim_ff, H)
        vs=jnp.stack(vs_rows, axis=0),                              # (n_vec, 128) f32
        vf=jnp.stack(vf_rows, axis=0))                              # (2*layers, dim_ff) f32
    return buffers, meta


# ---------------------------------- main -------------------------------------

if __name__ == "__main__":
    HIDDEN_DIM = 32
    NUM_HEADS = 4
    NUM_LAYERS = 2
    NUM_ACTIONS = 6
    DIM_FF = 2048          # nn.Transformer default dim_feedforward
    SEQ = 8
    BATCH = 2

    key = jax.random.PRNGKey(0)
    k_param, k_x = jax.random.split(key)
    logical = init_params(k_param, HIDDEN_DIM, NUM_LAYERS, NUM_ACTIONS, DIM_FF)
    buffers, meta = pack_params(logical, HIDDEN_DIM, NUM_LAYERS, NUM_ACTIONS, DIM_FF)
    x = jax.random.normal(k_x, (SEQ, BATCH, HIDDEN_DIM), dtype=jnp.float32)

    fwd = jax.jit(functools.partial(transformer_average_strategy_forward,
                                    meta=meta, num_heads=NUM_HEADS,
                                    num_actions=NUM_ACTIONS))
    out = jax.block_until_ready(fwd(x, buffers))

    assert out.shape == (SEQ, NUM_ACTIONS)
    assert bool(jnp.all(jnp.isfinite(out)))
    # softmax rows sum to 1 (padded lanes contribute exactly 0; exact divide)
    assert bool(jnp.allclose(jnp.sum(out, axis=-1), 1.0, atol=1e-5))
    print("KERNEL_OK")
</pallas_src>

<mosaic_0001>
module attributes {stable_mosaic.version = 11 : i64} {
  func.func @_fused_kernel(%arg0: memref<8x32xf32, #tpu.memory_space<vmem>>, %arg1: memref<32x10112xbf16, #tpu.memory_space<vmem>>, %arg2: memref<8192x32xbf16, #tpu.memory_space<vmem>>, %arg3: memref<43x128xf32, #tpu.memory_space<vmem>>, %arg4: memref<4x2048xf32, #tpu.memory_space<vmem>>, %arg5: memref<8x128xf32, #tpu.memory_space<vmem>>, %arg6: memref<3x4x8x8xf32, #tpu.memory_space<vmem>>, %arg7: memref<8x32xf32, #tpu.memory_space<vmem>>) attributes {dimension_semantics = [], scalar_prefetch = 0 : i64, scratch_operands = 2 : i64, tpu.core_type = #tpu.core_type<tc>} {
    %c0 = arith.constant 0 : index
    %c0_0 = arith.constant 0 : index
    %0 = vector.load %arg0[%c0, %c0_0] : memref<8x32xf32, #tpu.memory_space<vmem>>, vector<8x32xf32>
    %c0_1 = arith.constant 0 : index
    %c0_2 = arith.constant 0 : index
    %1 = vector.load %arg1[%c0_1, %c0_2] : memref<32x10112xbf16, #tpu.memory_space<vmem>>, vector<32x96xbf16>
    %2 = arith.truncf %0 : vector<8x32xf32> to vector<8x32xbf16>
    %cst = arith.constant dense<0.000000e+00> : vector<8x96xf32>
    %3 = tpu.matmul %2, %1, %cst {dimension_numbers = #tpu.dot_dimension_numbers<[1], [0], [0], [1], [0, 0, 1, 1], [], []>} : vector<8x32xbf16>, vector<32x96xbf16>, vector<8x96xf32> -> vector<8x96xf32>
    %c0_3 = arith.constant 0 : index
    %c0_4 = arith.constant 0 : index
    %4 = vector.load %arg3[%c0_3, %c0_4] : memref<43x128xf32, #tpu.memory_space<vmem>>, vector<1x96xf32>
    %5 = vector.broadcast %4 : vector<1x96xf32> to vector<8x96xf32>
    %6 = arith.addf %3, %5 : vector<8x96xf32>
    %7 = vector.extract_strided_slice %6 {offsets = [0, 0], sizes = [8, 32], strides = [1, 1]} : vector<8x96xf32> to vector<8x32xf32>
    %8 = vector.extract_strided_slice %6 {offsets = [0, 32], sizes = [8, 32], strides = [1, 1]} : vector<8x96xf32> to vector<8x32xf32>
    %9 = vector.extract_strided_slice %6 {offsets = [0, 64], sizes = [8, 32], strides = [1, 1]} : vector<8x96xf32> to vector<8x32xf32>
    %10 = vector.extract_strided_slice %7 {offsets = [0, 0], sizes = [8, 8], strides = [1, 1]} : vector<8x32xf32> to vector<8x8xf32>
    %c0_5 = arith.constant 0 : index
    %c0_6 = arith.constant 0 : index
    %c0_7 = arith.constant 0 : index
    %c0_8 = arith.constant 0 : index
    %11 = vector.load %arg6[%c0_5, %c0_6, %c0_7, %c0_8] : memref<3x4x8x8xf32, #tpu.memory_space<vmem>>, vector<1x1x8x8xf32>
    %12 = vector.shape_cast %11 : vector<1x1x8x8xf32> to vector<8x8xf32>
    %13 = vector.shape_cast %10 : vector<8x8xf32> to vector<1x1x8x8xf32>
    tpu.vector_store %arg6[%c0_5, %c0_6, %c0_7, %c0_8], %13 {strides = array<i32>} : memref<3x4x8x8xf32, #tpu.memory_space<vmem>>, vector<1x1x8x8xf32>,
    %14 = vector.extract_strided_slice %8 {offsets = [0, 0], sizes = [8, 8], strides = [1, 1]} : vector<8x32xf32> to vector<8x8xf32>
    %c1 = arith.constant 1 : index
    %c0_9 = arith.constant 0 : index
    %c0_10 = arith.constant 0 : index
    %c0_11 = arith.constant 0 : index
    %15 = vector.load %arg6[%c1, %c0_9, %c0_10, %c0_11] : memref<3x4x8x8xf32, #tpu.memory_space<vmem>>, vector<1x1x8x8xf32>
    %16 = vector.shape_cast %15 : vector<1x1x8x8xf32> to vector<8x8xf32>
    %17 = vector.shape_cast %14 : vector<8x8xf32> to vector<1x1x8x8xf32>
    tpu.vector_store %arg6[%c1, %c0_9, %c0_10, %c0_11], %17 {strides = array<i32>} : memref<3x4x8x8xf32, #tpu.memory_space<vmem>>, vector<1x1x8x8xf32>,
    %18 = vector.extract_strided_slice %9 {offsets = [0, 0], sizes = [8, 8], strides = [1, 1]} : vector<8x32xf32> to vector<8x8xf32>
    %c2 = arith.constant 2 : index
    %c0_12 = arith.constant 0 : index
    %c0_13 = arith.constant 0 : index
    %c0_14 = arith.constant 0 : index
    %19 = vector.load %arg6[%c2, %c0_12, %c0_13, %c0_14] : memref<3x4x8x8xf32, #tpu.memory_space<vmem>>, vector<1x1x8x8xf32>
    %20 = vector.shape_cast %19 : vector<1x1x8x8xf32> to vector<8x8xf32>
    %21 = vector.shape_cast %18 : vector<8x8xf32> to vector<1x1x8x8xf32>
    tpu.vector_store %arg6[%c2, %c0_12, %c0_13, %c0_14], %21 {strides = array<i32>} : memref<3x4x8x8xf32, #tpu.memory_space<vmem>>, vector<1x1x8x8xf32>,
    %22 = vector.extract_strided_slice %7 {offsets = [0, 8], sizes = [8, 8], strides = [1, 1]} : vector<8x32xf32> to vector<8x8xf32>
    %c0_15 = arith.constant 0 : index
    %c1_16 = arith.constant 1 : index
    %c0_17 = arith.constant 0 : index
    %c0_18 = arith.constant 0 : index
    %23 = vector.load %arg6[%c0_15, %c1_16, %c0_17, %c0_18] : memref<3x4x8x8xf32, #tpu.memory_space<vmem>>, vector<1x1x8x8xf32>
    %24 = vector.shape_cast %23 : vector<1x1x8x8xf32> to vector<8x8xf32>
    %25 = vector.shape_cast %22 : vector<8x8xf32> to vector<1x1x8x8xf32>
    tpu.vector_store %arg6[%c0_15, %c1_16, %c0_17, %c0_18], %25 {strides = array<i32>} : memref<3x4x8x8xf32, #tpu.memory_space<vmem>>, vector<1x1x8x8xf32>,
    %26 = vector.extract_strided_slice %8 {offsets = [0, 8], sizes = [8, 8], strides = [1, 1]} : vector<8x32xf32> to vector<8x8xf32>
    %c1_19 = arith.constant 1 : index
    %c1_20 = arith.constant 1 : index
    %c0_21 = arith.constant 0 : index
    %c0_22 = arith.constant 0 : index
    %27 = vector.load %arg6[%c1_19, %c1_20, %c0_21, %c0_22] : memref<3x4x8x8xf32, #tpu.memory_space<vmem>>, vector<1x1x8x8xf32>
    %28 = vector.shape_cast %27 : vector<1x1x8x8xf32> to vector<8x8xf32>
    %29 = vector.shape_cast %26 : vector<8x8xf32> to vector<1x1x8x8xf32>
    tpu.vector_store %arg6[%c1_19, %c1_20, %c0_21, %c0_22], %29 {strides = array<i32>} : memref<3x4x8x8xf32, #tpu.memory_space<vmem>>, vector<1x1x8x8xf32>,
    %30 = vector.extract_strided_slice %9 {offsets = [0, 8], sizes = [8, 8], strides = [1, 1]} : vector<8x32xf32> to vector<8x8xf32>
    %c2_23 = arith.constant 2 : index
    %c1_24 = arith.constant 1 : index
    %c0_25 = arith.constant 0 : index
    %c0_26 = arith.constant 0 : index
    %31 = vector.load %arg6[%c2_23, %c1_24, %c0_25, %c0_26] : memref<3x4x8x8xf32, #tpu.memory_space<vmem>>, vector<1x1x8x8xf32>
    %32 = vector.shape_cast %31 : vector<1x1x8x8xf32> to vector<8x8xf32>
    %33 = vector.shape_cast %30 : vector<8x8xf32> to vector<1x1x8x8xf32>
    tpu.vector_store %arg6[%c2_23, %c1_24, %c0_25, %c0_26], %33 {strides = array<i32>} : memref<3x4x8x8xf32, #tpu.memory_space<vmem>>, vector<1x1x8x8xf32>,
    %34 = vector.extract_strided_slice %7 {offsets = [0, 16], sizes = [8, 8], strides = [1, 1]} : vector<8x32xf32> to vector<8x8xf32>
    %c0_27 = arith.constant 0 : index
    %c2_28 = arith.constant 2 : index
    %c0_29 = arith.constant 0 : index
    %c0_30 = arith.constant 0 : index
    %35 = vector.load %arg6[%c0_27, %c2_28, %c0_29, %c0_30] : memref<3x4x8x8xf32, #tpu.memory_space<vmem>>, vector<1x1x8x8xf32>
    %36 = vector.shape_cast %35 : vector<1x1x8x8xf32> to vector<8x8xf32>
    %37 = vector.shape_cast %34 : vector<8x8xf32> to vector<1x1x8x8xf32>
    tpu.vector_store %arg6[%c0_27, %c2_28, %c0_29, %c0_30], %37 {strides = array<i32>} : memref<3x4x8x8xf32, #tpu.memory_space<vmem>>, vector<1x1x8x8xf32>,
    %38 = vector.extract_strided_slice %8 {offsets = [0, 16], sizes = [8, 8], strides = [1, 1]} : vector<8x32xf32> to vector<8x8xf32>
    %c1_31 = arith.constant 1 : index
    %c2_32 = arith.constant 2 : index
    %c0_33 = arith.constant 0 : index
    %c0_34 = arith.constant 0 : index
    %39 = vector.load %arg6[%c1_31, %c2_32, %c0_33, %c0_34] : memref<3x4x8x8xf32, #tpu.memory_space<vmem>>, vector<1x1x8x8xf32>
    %40 = vector.shape_cast %39 : vector<1x1x8x8xf32> to vector<8x8xf32>
    %41 = vector.shape_cast %38 : vector<8x8xf32> to vector<1x1x8x8xf32>
    tpu.vector_store %arg6[%c1_31, %c2_32, %c0_33, %c0_34], %41 {strides = array<i32>} : memref<3x4x8x8xf32, #tpu.memory_space<vmem>>, vector<1x1x8x8xf32>,
    %42 = vector.extract_strided_slice %9 {offsets = [0, 16], sizes = [8, 8], strides = [1, 1]} : vector<8x32xf32> to vector<8x8xf32>
    %c2_35 = arith.constant 2 : index
    %c2_36 = arith.constant 2 : index
    %c0_37 = arith.constant 0 : index
    %c0_38 = arith.constant 0 : index
    %43 = vector.load %arg6[%c2_35, %c2_36, %c0_37, %c0_38] : memref<3x4x8x8xf32, #tpu.memory_space<vmem>>, vector<1x1x8x8xf32>
    %44 = vector.shape_cast %43 : vector<1x1x8x8xf32> to vector<8x8xf32>
    %45 = vector.shape_cast %42 : vector<8x8xf32> to vector<1x1x8x8xf32>
    tpu.vector_store %arg6[%c2_35, %c2_36, %c0_37, %c0_38], %45 {strides = array<i32>} : memref<3x4x8x8xf32, #tpu.memory_space<vmem>>, vector<1x1x8x8xf32>,
    %46 = vector.extract_strided_slice %7 {offsets = [0, 24], sizes = [8, 8], strides = [1, 1]} : vector<8x32xf32> to vector<8x8xf32>
    %c0_39 = arith.constant 0 : index
    %c3 = arith.constant 3 : index
    %c0_40 = arith.constant 0 : index
    %c0_41 = arith.constant 0 : index
    %47 = vector.load %arg6[%c0_39, %c3, %c0_40, %c0_41] : memref<3x4x8x8xf32, #tpu.memory_space<vmem>>, vector<1x1x8x8xf32>
    %48 = vector.shape_cast %47 : vector<1x1x8x8xf32> to vector<8x8xf32>
    %49 = vector.shape_cast %46 : vector<8x8xf32> to vector<1x1x8x8xf32>
    tpu.vector_store %arg6[%c0_39, %c3, %c0_40, %c0_41], %49 {strides = array<i32>} : memref<3x4x8x8xf32, #tpu.memory_space<vmem>>, vector<1x1x8x8xf32>,
    %50 = vector.extract_strided_slice %8 {offsets = [0, 24], sizes = [8, 8], strides = [1, 1]} : vector<8x32xf32> to vector<8x8xf32>
    %c1_42 = arith.constant 1 : index
    %c3_43 = arith.constant 3 : index
    %c0_44 = arith.constant 0 : index
    %c0_45 = arith.constant 0 : index
    %51 = vector.load %arg6[%c1_42, %c3_43, %c0_44, %c0_45] : memref<3x4x8x8xf32, #tpu.memory_space<vmem>>, vector<1x1x8x8xf32>
    %52 = vector.shape_cast %51 : vector<1x1x8x8xf32> to vector<8x8xf32>
    %53 = vector.shape_cast %50 : vector<8x8xf32> to vector<1x1x8x8xf32>
    tpu.vector_store %arg6[%c1_42, %c3_43, %c0_44, %c0_45], %53 {strides = array<i32>} : memref<3x4x8x8xf32, #tpu.memory_space<vmem>>, vector<1x1x8x8xf32>,
    %54 = vector.extract_strided_slice %9 {offsets = [0, 24], sizes = [8, 8], strides = [1, 1]} : vector<8x32xf32> to vector<8x8xf32>
    %c2_46 = arith.constant 2 : index
    %c3_47 = arith.constant 3 : index
    %c0_48 = arith.constant 0 : index
    %c0_49 = arith.constant 0 : index
    %55 = vector.load %arg6[%c2_46, %c3_47, %c0_48, %c0_49] : memref<3x4x8x8xf32, #tpu.memory_space<vmem>>, vector<1x1x8x8xf32>
    %56 = vector.shape_cast %55 : vector<1x1x8x8xf32> to vector<8x8xf32>
    %57 = vector.shape_cast %54 : vector<8x8xf32> to vector<1x1x8x8xf32>
    tpu.vector_store %arg6[%c2_46, %c3_47, %c0_48, %c0_49], %57 {strides = array<i32>} : memref<3x4x8x8xf32, #tpu.memory_space<vmem>>, vector<1x1x8x8xf32>,
    %c0_50 = arith.constant 0 : index
    %c0_51 = arith.constant 0 : index
    %c0_52 = arith.constant 0 : index
    %c0_53 = arith.constant 0 : index
    %58 = vector.load %arg6[%c0_50, %c0_51, %c0_52, %c0_53] : memref<3x4x8x8xf32, #tpu.memory_space<vmem>>, vector<1x4x8x8xf32>
    %59 = vector.shape_cast %58 : vector<1x4x8x8xf32> to vector<4x8x8xf32>
    %cst_54 = arith.constant 0.353553385 : f32
    %60 = vector.broadcast %cst_54 : f32 to vector<4x8x8xf32>
    %61 = arith.mulf %59, %60 : vector<4x8x8xf32>
    %c1_55 = arith.constant 1 : index
    %c0_56 = arith.constant 0 : index
    %c0_57 = arith.constant 0 : index
    %c0_58 = arith.constant 0 : index
    %62 = vector.load %arg6[%c1_55, %c0_56, %c0_57, %c0_58] : memref<3x4x8x8xf32, #tpu.memory_space<vmem>>, vector<1x4x8x8xf32>
    %63 = vector.shape_cast %62 : vector<1x4x8x8xf32> to vector<4x8x8xf32>
    %c2_59 = arith.constant 2 : index
    %c0_60 = arith.constant 0 : index
    %c0_61 = arith.constant 0 : index
    %c0_62 = arith.constant 0 : index
    %64 = vector.load %arg6[%c2_59, %c0_60, %c0_61, %c0_62] : memref<3x4x8x8xf32, #tpu.memory_space<vmem>>, vector<1x4x8x8xf32>
    %65 = vector.shape_cast %64 : vector<1x4x8x8xf32> to vector<4x8x8xf32>
    %66 = arith.truncf %61 : vector<4x8x8xf32> to vector<4x8x8xbf16>
    %67 = arith.truncf %63 : vector<4x8x8xf32> to vector<4x8x8xbf16>
    "tpu.trace_start"() <{level = 10 : i32, message = "hqd,hkd->hqk"}> : () -> ()
    %cst_63 = arith.constant dense<0.000000e+00> : vector<4x8x8xf32>
    %68 = tpu.matmul %66, %67, %cst_63 {dimension_numbers = #tpu.dot_dimension_numbers<[2], [2], [1], [1], [0, 0, 0, 1, 1, 1], [0], [0]>} : vector<4x8x8xbf16>, vector<4x8x8xbf16>, vector<4x8x8xf32> -> vector<4x8x8xf32>
    "tpu.trace_stop"() : () -> ()
    %cst_64 = arith.constant dense<0xFF800000> : vector<4x8xf32>
    %69 = vector.multi_reduction <maximumf>, %68, %cst_64 [2] : vector<4x8x8xf32> to vector<4x8xf32>
    %70 = vector.shape_cast %69 : vector<4x8xf32> to vector<4x8x1xf32>
    %71 = vector.broadcast %70 : vector<4x8x1xf32> to vector<4x8x8xf32>
    %72 = arith.subf %68, %71 : vector<4x8x8xf32>
    %73 = math.exp %72 : vector<4x8x8xf32>
    %cst_65 = arith.constant dense<0.000000e+00> : vector<4x8xf32>
    %74 = vector.multi_reduction <add>, %73, %cst_65 [2] : vector<4x8x8xf32> to vector<4x8xf32>
    %75 = vector.shape_cast %74 : vector<4x8xf32> to vector<4x8x1xf32>
    %76 = tpu.reciprocal %75 {approx = true} : vector<4x8x1xf32> -> vector<4x8x1xf32>
    %77 = vector.broadcast %76 : vector<4x8x1xf32> to vector<4x8x8xf32>
    %78 = arith.mulf %73, %77 : vector<4x8x8xf32>
    %79 = arith.truncf %78 : vector<4x8x8xf32> to vector<4x8x8xbf16>
    %80 = arith.truncf %65 : vector<4x8x8xf32> to vector<4x8x8xbf16>
    "tpu.trace_start"() <{level = 10 : i32, message = "hqk,hkd->hqd"}> : () -> ()
    %cst_66 = arith.constant dense<0.000000e+00> : vector<4x8x8xf32>
    %81 = tpu.matmul %79, %80, %cst_66 {dimension_numbers = #tpu.dot_dimension_numbers<[2], [1], [1], [2], [0, 0, 0, 1, 1, 2], [0], [0]>} : vector<4x8x8xbf16>, vector<4x8x8xbf16>, vector<4x8x8xf32> -> vector<4x8x8xf32>
    "tpu.trace_stop"() : () -> ()
    %82 = vector.extract_strided_slice %81 {offsets = [0, 0, 0], sizes = [1, 8, 8], strides = [1, 1, 1]} : vector<4x8x8xf32> to vector<1x8x8xf32>
    %83 = vector.shape_cast %82 : vector<1x8x8xf32> to vector<8x8xf32>
    %c0_67 = arith.constant 0 : index
    %c0_68 = arith.constant 0 : index
    %84 = vector.load %arg7[%c0_67, %c0_68] : memref<8x32xf32, #tpu.memory_space<vmem>>, vector<8x8xf32>
    tpu.vector_store %arg7[%c0_67, %c0_68], %83 {strides = array<i32>} : memref<8x32xf32, #tpu.memory_space<vmem>>, vector<8x8xf32>,
    %85 = vector.extract_strided_slice %81 {offsets = [1, 0, 0], sizes = [1, 8, 8], strides = [1, 1, 1]} : vector<4x8x8xf32> to vector<1x8x8xf32>
    %86 = vector.shape_cast %85 : vector<1x8x8xf32> to vector<8x8xf32>
    %c0_69 = arith.constant 0 : index
    %c8 = arith.constant 8 : index
    %87 = vector.load %arg7[%c0_69, %c8] : memref<8x32xf32, #tpu.memory_space<vmem>>, vector<8x8xf32>
    tpu.vector_store %arg7[%c0_69, %c8], %86 {strides = array<i32>} : memref<8x32xf32, #tpu.memory_space<vmem>>, vector<8x8xf32>,
    %88 = vector.extract_strided_slice %81 {offsets = [2, 0, 0], sizes = [1, 8, 8], strides = [1, 1, 1]} : vector<4x8x8xf32> to vector<1x8x8xf32>
    %89 = vector.shape_cast %88 : vector<1x8x8xf32> to vector<8x8xf32>
    %c0_70 = arith.constant 0 : index
    %c16 = arith.constant 16 : index
    %90 = vector.load %arg7[%c0_70, %c16] : memref<8x32xf32, #tpu.memory_space<vmem>>, vector<8x8xf32>
    tpu.vector_store %arg7[%c0_70, %c16], %89 {strides = array<i32>} : memref<8x32xf32, #tpu.memory_space<vmem>>, vector<8x8xf32>,
    %91 = vector.extract_strided_slice %81 {offsets = [3, 0, 0], sizes = [1, 8, 8], strides = [1, 1, 1]} : vector<4x8x8xf32> to vector<1x8x8xf32>
    %92 = vector.shape_cast %91 : vector<1x8x8xf32> to vector<8x8xf32>
    %c0_71 = arith.constant 0 : index
    %c24 = arith.constant 24 : index
    %93 = vector.load %arg7[%c0_71, %c24] : memref<8x32xf32, #tpu.memory_space<vmem>>, vector<8x8xf32>
    tpu.vector_store %arg7[%c0_71, %c24], %92 {strides = array<i32>} : memref<8x32xf32, #tpu.memory_space<vmem>>, vector<8x8xf32>,
    %c0_72 = arith.constant 0 : index
    %c0_73 = arith.constant 0 : index
    %94 = vector.load %arg7[%c0_72, %c0_73] : memref<8x32xf32, #tpu.memory_space<vmem>>, vector<8x32xf32>
    %c0_74 = arith.constant 0 : index
    %c128 = arith.constant 128 : index
    %95 = vector.load %arg1[%c0_74, %c128] : memref<32x10112xbf16, #tpu.memory_space<vmem>>, vector<32x32xbf16>
    %96 = arith.truncf %94 : vector<8x32xf32> to vector<8x32xbf16>
    %cst_75 = arith.constant dense<0.000000e+00> : vector<8x32xf32>
    %97 = tpu.matmul %96, %95, %cst_75 {dimension_numbers = #tpu.dot_dimension_numbers<[1], [0], [0], [1], [0, 0, 1, 1], [], []>} : vector<8x32xbf16>, vector<32x32xbf16>, vector<8x32xf32> -> vector<8x32xf32>
    %c1_76 = arith.constant 1 : index
    %c0_77 = arith.constant 0 : index
    %98 = vector.load %arg3[%c1_76, %c0_77] : memref<43x128xf32, #tpu.memory_space<vmem>>, vector<1x32xf32>
    %99 = vector.broadcast %98 : vector<1x32xf32> to vector<8x32xf32>
    %100 = arith.addf %97, %99 : vector<8x32xf32>
    %101 = arith.addf %0, %100 : vector<8x32xf32>
    %cst_78 = arith.constant dense<0.000000e+00> : vector<8xf32>
    %102 = vector.multi_reduction <add>, %101, %cst_78 [1] : vector<8x32xf32> to vector<8xf32>
    %103 = vector.shape_cast %102 : vector<8xf32> to vector<8x1xf32>
    %cst_79 = arith.constant 3.200000e+01 : f32
    %104 = vector.broadcast %cst_79 : f32 to vector<8x1xf32>
    %105 = arith.divf %103, %104 : vector<8x1xf32>
    %106 = vector.broadcast %105 : vector<8x1xf32> to vector<8x32xf32>
    %107 = arith.subf %101, %106 : vector<8x32xf32>
    %108 = arith.mulf %107, %107 : vector<8x32xf32>
    %cst_80 = arith.constant dense<0.000000e+00> : vector<8xf32>
    %109 = vector.multi_reduction <add>, %108, %cst_80 [1] : vector<8x32xf32> to vector<8xf32>
    %110 = vector.shape_cast %109 : vector<8xf32> to vector<8x1xf32>
    %cst_81 = arith.constant 3.200000e+01 : f32
    %111 = vector.broadcast %cst_81 : f32 to vector<8x1xf32>
    %112 = arith.divf %110, %111 : vector<8x1xf32>
    %cst_82 = arith.constant 9.99999974E-6 : f32
    %113 = vector.broadcast %cst_82 : f32 to vector<8x1xf32>
    %114 = arith.addf %112, %113 : vector<8x1xf32>
    %115 = math.rsqrt %114 : vector<8x1xf32>
    %116 = vector.broadcast %115 : vector<8x1xf32> to vector<8x32xf32>
    %117 = arith.mulf %107, %116 : vector<8x32xf32>
    %c3_83 = arith.constant 3 : index
    %c0_84 = arith.constant 0 : index
    %118 = vector.load %arg3[%c3_83, %c0_84] : memref<43x128xf32, #tpu.memory_space<vmem>>, vector<1x32xf32>
    %119 = vector.broadcast %118 : vector<1x32xf32> to vector<8x32xf32>
    %120 = arith.mulf %117, %119 : vector<8x32xf32>
    %c4 = arith.constant 4 : index
    %c0_85 = arith.constant 0 : index
    %121 = vector.load %arg3[%c4, %c0_85] : memref<43x128xf32, #tpu.memory_space<vmem>>, vector<1x32xf32>
    %122 = vector.broadcast %121 : vector<1x32xf32> to vector<8x32xf32>
    %123 = arith.addf %120, %122 : vector<8x32xf32>
    %c0_86 = arith.constant 0 : index
    %c256 = arith.constant 256 : index
    %124 = vector.load %arg1[%c0_86, %c256] : memref<32x10112xbf16, #tpu.memory_space<vmem>>, vector<32x2048xbf16>
    %125 = arith.truncf %123 : vector<8x32xf32> to vector<8x32xbf16>
    %cst_87 = arith.constant dense<0.000000e+00> : vector<8x2048xf32>
    %126 = tpu.matmul %125, %124, %cst_87 {dimension_numbers = #tpu.dot_dimension_numbers<[1], [0], [0], [1], [0, 0, 1, 1], [], []>} : vector<8x32xbf16>, vector<32x2048xbf16>, vector<8x2048xf32> -> vector<8x2048xf32>
    %c0_88 = arith.constant 0 : index
    %c0_89 = arith.constant 0 : index
    %127 = vector.load %arg4[%c0_88, %c0_89] : memref<4x2048xf32, #tpu.memory_space<vmem>>, vector<1x2048xf32>
    %128 = vector.broadcast %127 : vector<1x2048xf32> to vector<8x2048xf32>
    %129 = arith.addf %126, %128 : vector<8x2048xf32>
    %cst_90 = arith.constant 0.000000e+00 : f32
    %130 = vector.broadcast %cst_90 : f32 to vector<8x2048xf32>
    %131 = arith.maximumf %129, %130 : vector<8x2048xf32>
    %132 = arith.truncf %131 : vector<8x2048xf32> to vector<8x2048xbf16>
    %c0_91 = arith.constant 0 : index
    %c0_92 = arith.constant 0 : index
    %133 = vector.load %arg2[%c0_91, %c0_92] : memref<8192x32xbf16, #tpu.memory_space<vmem>>, vector<2048x32xbf16>
    %cst_93 = arith.constant dense<0.000000e+00> : vector<8x32xf32>
    %134 = tpu.matmul %132, %133, %cst_93 {dimension_numbers = #tpu.dot_dimension_numbers<[1], [0], [0], [1], [0, 0, 1, 1], [], []>} : vector<8x2048xbf16>, vector<2048x32xbf16>, vector<8x32xf32> -> vector<8x32xf32>
    %c2_94 = arith.constant 2 : index
    %c0_95 = arith.constant 0 : index
    %135 = vector.load %arg3[%c2_94, %c0_95] : memref<43x128xf32, #tpu.memory_space<vmem>>, vector<1x32xf32>
    %136 = vector.broadcast %135 : vector<1x32xf32> to vector<8x32xf32>
    %137 = arith.addf %134, %136 : vector<8x32xf32>
    %138 = arith.addf %123, %137 : vector<8x32xf32>
    %cst_96 = arith.constant dense<0.000000e+00> : vector<8xf32>
    %139 = vector.multi_reduction <add>, %138, %cst_96 [1] : vector<8x32xf32> to vector<8xf32>
    %140 = vector.shape_cast %139 : vector<8xf32> to vector<8x1xf32>
    %cst_97 = arith.constant 3.200000e+01 : f32
    %141 = vector.broadcast %cst_97 : f32 to vector<8x1xf32>
    %142 = arith.divf %140, %141 : vector<8x1xf32>
    %143 = vector.broadcast %142 : vector<8x1xf32> to vector<8x32xf32>
    %144 = arith.subf %138, %143 : vector<8x32xf32>
    %145 = arith.mulf %144, %144 : vector<8x32xf32>
    %cst_98 = arith.constant dense<0.000000e+00> : vector<8xf32>
    %146 = vector.multi_reduction <add>, %145, %cst_98 [1] : vector<8x32xf32> to vector<8xf32>
    %147 = vector.shape_cast %146 : vector<8xf32> to vector<8x1xf32>
    %cst_99 = arith.constant 3.200000e+01 : f32
    %148 = vector.broadcast %cst_99 : f32 to vector<8x1xf32>
    %149 = arith.divf %147, %148 : vector<8x1xf32>
    %cst_100 = arith.constant 9.99999974E-6 : f32
    %150 = vector.broadcast %cst_100 : f32 to vector<8x1xf32>
    %151 = arith.addf %149, %150 : vector<8x1xf32>
    %152 = math.rsqrt %151 : vector<8x1xf32>
    %153 = vector.broadcast %152 : vector<8x1xf32> to vector<8x32xf32>
    %154 = arith.mulf %144, %153 : vector<8x32xf32>
    %c5 = arith.constant 5 : index
    %c0_101 = arith.constant 0 : index
    %155 = vector.load %arg3[%c5, %c0_101] : memref<43x128xf32, #tpu.memory_space<vmem>>, vector<1x32xf32>
    %156 = vector.broadcast %155 : vector<1x32xf32> to vector<8x32xf32>
    %157 = arith.mulf %154, %156 : vector<8x32xf32>
    %c6 = arith.constant 6 : index
    %c0_102 = arith.constant 0 : index
    %158 = vector.load %arg3[%c6, %c0_102] : memref<43x128xf32, #tpu.memory_space<vmem>>, vector<1x32xf32>
    %159 = vector.broadcast %158 : vector<1x32xf32> to vector<8x32xf32>
    %160 = arith.addf %157, %159 : vector<8x32xf32>
    %c0_103 = arith.constant 0 : index
    %c2304 = arith.constant 2304 : index
    %161 = vector.load %arg1[%c0_103, %c2304] : memref<32x10112xbf16, #tpu.memory_space<vmem>>, vector<32x96xbf16>
    %162 = arith.truncf %160 : vector<8x32xf32> to vector<8x32xbf16>
    %cst_104 = arith.constant dense<0.000000e+00> : vector<8x96xf32>
    %163 = tpu.matmul %162, %161, %cst_104 {dimension_numbers = #tpu.dot_dimension_numbers<[1], [0], [0], [1], [0, 0, 1, 1], [], []>} : vector<8x32xbf16>, vector<32x96xbf16>, vector<8x96xf32> -> vector<8x96xf32>
    %c7 = arith.constant 7 : index
    %c0_105 = arith.constant 0 : index
    %164 = vector.load %arg3[%c7, %c0_105] : memref<43x128xf32, #tpu.memory_space<vmem>>, vector<1x96xf32>
    %165 = vector.broadcast %164 : vector<1x96xf32> to vector<8x96xf32>
    %166 = arith.addf %163, %165 : vector<8x96xf32>
    %167 = vector.extract_strided_slice %166 {offsets = [0, 0], sizes = [8, 32], strides = [1, 1]} : vector<8x96xf32> to vector<8x32xf32>
    %168 = vector.extract_strided_slice %166 {offsets = [0, 32], sizes = [8, 32], strides = [1, 1]} : vector<8x96xf32> to vector<8x32xf32>
    %169 = vector.extract_strided_slice %166 {offsets = [0, 64], sizes = [8, 32], strides = [1, 1]} : vector<8x96xf32> to vector<8x32xf32>
    %170 = vector.extract_strided_slice %167 {offsets = [0, 0], sizes = [8, 8], strides = [1, 1]} : vector<8x32xf32> to vector<8x8xf32>
    %c0_106 = arith.constant 0 : index
    %c0_107 = arith.constant 0 : index
    %c0_108 = arith.constant 0 : index
    %c0_109 = arith.constant 0 : index
    %171 = vector.load %arg6[%c0_106, %c0_107, %c0_108, %c0_109] : memref<3x4x8x8xf32, #tpu.memory_space<vmem>>, vector<1x1x8x8xf32>
    %172 = vector.shape_cast %171 : vector<1x1x8x8xf32> to vector<8x8xf32>
    %173 = vector.shape_cast %170 : vector<8x8xf32> to vector<1x1x8x8xf32>
    tpu.vector_store %arg6[%c0_106, %c0_107, %c0_108, %c0_109], %173 {strides = array<i32>} : memref<3x4x8x8xf32, #tpu.memory_space<vmem>>, vector<1x1x8x8xf32>,
    %174 = vector.extract_strided_slice %168 {offsets = [0, 0], sizes = [8, 8], strides = [1, 1]} : vector<8x32xf32> to vector<8x8xf32>
    %c1_110 = arith.constant 1 : index
    %c0_111 = arith.constant 0 : index
    %c0_112 = arith.constant 0 : index
    %c0_113 = arith.constant 0 : index
    %175 = vector.load %arg6[%c1_110, %c0_111, %c0_112, %c0_113] : memref<3x4x8x8xf32, #tpu.memory_space<vmem>>, vector<1x1x8x8xf32>
    %176 = vector.shape_cast %175 : vector<1x1x8x8xf32> to vector<8x8xf32>
    %177 = vector.shape_cast %174 : vector<8x8xf32> to vector<1x1x8x8xf32>
    tpu.vector_store %arg6[%c1_110, %c0_111, %c0_112, %c0_113], %177 {strides = array<i32>} : memref<3x4x8x8xf32, #tpu.memory_space<vmem>>, vector<1x1x8x8xf32>,
    %178 = vector.extract_strided_slice %169 {offsets = [0, 0], sizes = [8, 8], strides = [1, 1]} : vector<8x32xf32> to vector<8x8xf32>
    %c2_114 = arith.constant 2 : index
    %c0_115 = arith.constant 0 : index
    %c0_116 = arith.constant 0 : index
    %c0_117 = arith.constant 0 : index
    %179 = vector.load %arg6[%c2_114, %c0_115, %c0_116, %c0_117] : memref<3x4x8x8xf32, #tpu.memory_space<vmem>>, vector<1x1x8x8xf32>
    %180 = vector.shape_cast %179 : vector<1x1x8x8xf32> to vector<8x8xf32>
    %181 = vector.shape_cast %178 : vector<8x8xf32> to vector<1x1x8x8xf32>
    tpu.vector_store %arg6[%c2_114, %c0_115, %c0_116, %c0_117], %181 {strides = array<i32>} : memref<3x4x8x8xf32, #tpu.memory_space<vmem>>, vector<1x1x8x8xf32>,
    %182 = vector.extract_strided_slice %167 {offsets = [0, 8], sizes = [8, 8], strides = [1, 1]} : vector<8x32xf32> to vector<8x8xf32>
    %c0_118 = arith.constant 0 : index
    %c1_119 = arith.constant 1 : index
    %c0_120 = arith.constant 0 : index
    %c0_121 = arith.constant 0 : index
    %183 = vector.load %arg6[%c0_118, %c1_119, %c0_120, %c0_121] : memref<3x4x8x8xf32, #tpu.memory_space<vmem>>, vector<1x1x8x8xf32>
    %184 = vector.shape_cast %183 : vector<1x1x8x8xf32> to vector<8x8xf32>
    %185 = vector.shape_cast %182 : vector<8x8xf32> to vector<1x1x8x8xf32>
    tpu.vector_store %arg6[%c0_118, %c1_119, %c0_120, %c0_121], %185 {strides = array<i32>} : memref<3x4x8x8xf32, #tpu.memory_space<vmem>>, vector<1x1x8x8xf32>,
    %186 = vector.extract_strided_slice %168 {offsets = [0, 8], sizes = [8, 8], strides = [1, 1]} : vector<8x32xf32> to vector<8x8xf32>
    %c1_122 = arith.constant 1 : index
    %c1_123 = arith.constant 1 : index
    %c0_124 = arith.constant 0 : index
    %c0_125 = arith.constant 0 : index
    %187 = vector.load %arg6[%c1_122, %c1_123, %c0_124, %c0_125] : memref<3x4x8x8xf32, #tpu.memory_space<vmem>>, vector<1x1x8x8xf32>
    %188 = vector.shape_cast %187 : vector<1x1x8x8xf32> to vector<8x8xf32>
    %189 = vector.shape_cast %186 : vector<8x8xf32> to vector<1x1x8x8xf32>
    tpu.vector_store %arg6[%c1_122, %c1_123, %c0_124, %c0_125], %189 {strides = array<i32>} : memref<3x4x8x8xf32, #tpu.memory_space<vmem>>, vector<1x1x8x8xf32>,
    %190 = vector.extract_strided_slice %169 {offsets = [0, 8], sizes = [8, 8], strides = [1, 1]} : vector<8x32xf32> to vector<8x8xf32>
    %c2_126 = arith.constant 2 : index
    %c1_127 = arith.constant 1 : index
    %c0_128 = arith.constant 0 : index
    %c0_129 = arith.constant 0 : index
    %191 = vector.load %arg6[%c2_126, %c1_127, %c0_128, %c0_129] : memref<3x4x8x8xf32, #tpu.memory_space<vmem>>, vector<1x1x8x8xf32>
    %192 = vector.shape_cast %191 : vector<1x1x8x8xf32> to vector<8x8xf32>
    %193 = vector.shape_cast %190 : vector<8x8xf32> to vector<1x1x8x8xf32>
    tpu.vector_store %arg6[%c2_126, %c1_127, %c0_128, %c0_129], %193 {strides = array<i32>} : memref<3x4x8x8xf32, #tpu.memory_space<vmem>>, vector<1x1x8x8xf32>,
    %194 = vector.extract_strided_slice %167 {offsets = [0, 16], sizes = [8, 8], strides = [1, 1]} : vector<8x32xf32> to vector<8x8xf32>
    %c0_130 = arith.constant 0 : index
    %c2_131 = arith.constant 2 : index
    %c0_132 = arith.constant 0 : index
    %c0_133 = arith.constant 0 : index
    %195 = vector.load %arg6[%c0_130, %c2_131, %c0_132, %c0_133] : memref<3x4x8x8xf32, #tpu.memory_space<vmem>>, vector<1x1x8x8xf32>
    %196 = vector.shape_cast %195 : vector<1x1x8x8xf32> to vector<8x8xf32>
    %197 = vector.shape_cast %194 : vector<8x8xf32> to vector<1x1x8x8xf32>
    tpu.vector_store %arg6[%c0_130, %c2_131, %c0_132, %c0_133], %197 {strides = array<i32>} : memref<3x4x8x8xf32, #tpu.memory_space<vmem>>, vector<1x1x8x8xf32>,
    %198 = vector.extract_strided_slice %168 {offsets = [0, 16], sizes = [8, 8], strides = [1, 1]} : vector<8x32xf32> to vector<8x8xf32>
    %c1_134 = arith.constant 1 : index
    %c2_135 = arith.constant 2 : index
    %c0_136 = arith.constant 0 : index
    %c0_137 = arith.constant 0 : index
    %199 = vector.load %arg6[%c1_134, %c2_135, %c0_136, %c0_137] : memref<3x4x8x8xf32, #tpu.memory_space<vmem>>, vector<1x1x8x8xf32>
    %200 = vector.shape_cast %199 : vector<1x1x8x8xf32> to vector<8x8xf32>
    %201 = vector.shape_cast %198 : vector<8x8xf32> to vector<1x1x8x8xf32>
    tpu.vector_store %arg6[%c1_134, %c2_135, %c0_136, %c0_137], %201 {strides = array<i32>} : memref<3x4x8x8xf32, #tpu.memory_space<vmem>>, vector<1x1x8x8xf32>,
    %202 = vector.extract_strided_slice %169 {offsets = [0, 16], sizes = [8, 8], strides = [1, 1]} : vector<8x32xf32> to vector<8x8xf32>
    %c2_138 = arith.constant 2 : index
    %c2_139 = arith.constant 2 : index
    %c0_140 = arith.constant 0 : index
    %c0_141 = arith.constant 0 : index
    %203 = vector.load %arg6[%c2_138, %c2_139, %c0_140, %c0_141] : memref<3x4x8x8xf32, #tpu.memory_space<vmem>>, vector<1x1x8x8xf32>
    %204 = vector.shape_cast %203 : vector<1x1x8x8xf32> to vector<8x8xf32>
    %205 = vector.shape_cast %202 : vector<8x8xf32> to vector<1x1x8x8xf32>
    tpu.vector_store %arg6[%c2_138, %c2_139, %c0_140, %c0_141], %205 {strides = array<i32>} : memref<3x4x8x8xf32, #tpu.memory_space<vmem>>, vector<1x1x8x8xf32>,
    %206 = vector.extract_strided_slice %167 {offsets = [0, 24], sizes = [8, 8], strides = [1, 1]} : vector<8x32xf32> to vector<8x8xf32>
    %c0_142 = arith.constant 0 : index
    %c3_143 = arith.constant 3 : index
    %c0_144 = arith.constant 0 : index
    %c0_145 = arith.constant 0 : index
    %207 = vector.load %arg6[%c0_142, %c3_143, %c0_144, %c0_145] : memref<3x4x8x8xf32, #tpu.memory_space<vmem>>, vector<1x1x8x8xf32>
    %208 = vector.shape_cast %207 : vector<1x1x8x8xf32> to vector<8x8xf32>
    %209 = vector.shape_cast %206 : vector<8x8xf32> to vector<1x1x8x8xf32>
    tpu.vector_store %arg6[%c0_142, %c3_143, %c0_144, %c0_145], %209 {strides = array<i32>} : memref<3x4x8x8xf32, #tpu.memory_space<vmem>>, vector<1x1x8x8xf32>,
    %210 = vector.extract_strided_slice %168 {offsets = [0, 24], sizes = [8, 8], strides = [1, 1]} : vector<8x32xf32> to vector<8x8xf32>
    %c1_146 = arith.constant 1 : index
    %c3_147 = arith.constant 3 : index
    %c0_148 = arith.constant 0 : index
    %c0_149 = arith.constant 0 : index
    %211 = vector.load %arg6[%c1_146, %c3_147, %c0_148, %c0_149] : memref<3x4x8x8xf32, #tpu.memory_space<vmem>>, vector<1x1x8x8xf32>
    %212 = vector.shape_cast %211 : vector<1x1x8x8xf32> to vector<8x8xf32>
    %213 = vector.shape_cast %210 : vector<8x8xf32> to vector<1x1x8x8xf32>
    tpu.vector_store %arg6[%c1_146, %c3_147, %c0_148, %c0_149], %213 {strides = array<i32>} : memref<3x4x8x8xf32, #tpu.memory_space<vmem>>, vector<1x1x8x8xf32>,
    %214 = vector.extract_strided_slice %169 {offsets = [0, 24], sizes = [8, 8], strides = [1, 1]} : vector<8x32xf32> to vector<8x8xf32>
    %c2_150 = arith.constant 2 : index
    %c3_151 = arith.constant 3 : index
    %c0_152 = arith.constant 0 : index
    %c0_153 = arith.constant 0 : index
    %215 = vector.load %arg6[%c2_150, %c3_151, %c0_152, %c0_153] : memref<3x4x8x8xf32, #tpu.memory_space<vmem>>, vector<1x1x8x8xf32>
    %216 = vector.shape_cast %215 : vector<1x1x8x8xf32> to vector<8x8xf32>
    %217 = vector.shape_cast %214 : vector<8x8xf32> to vector<1x1x8x8xf32>
    tpu.vector_store %arg6[%c2_150, %c3_151, %c0_152, %c0_153], %217 {strides = array<i32>} : memref<3x4x8x8xf32, #tpu.memory_space<vmem>>, vector<1x1x8x8xf32>,
    %c0_154 = arith.constant 0 : index
    %c0_155 = arith.constant 0 : index
    %c0_156 = arith.constant 0 : index
    %c0_157 = arith.constant 0 : index
    %218 = vector.load %arg6[%c0_154, %c0_155, %c0_156, %c0_157] : memref<3x4x8x8xf32, #tpu.memory_space<vmem>>, vector<1x4x8x8xf32>
    %219 = vector.shape_cast %218 : vector<1x4x8x8xf32> to vector<4x8x8xf32>
    %cst_158 = arith.constant 0.353553385 : f32
    %220 = vector.broadcast %cst_158 : f32 to vector<4x8x8xf32>
    %221 = arith.mulf %219, %220 : vector<4x8x8xf32>
    %c1_159 = arith.constant 1 : index
    %c0_160 = arith.constant 0 : index
    %c0_161 = arith.constant 0 : index
    %c0_162 = arith.constant 0 : index
    %222 = vector.load %arg6[%c1_159, %c0_160, %c0_161, %c0_162] : memref<3x4x8x8xf32, #tpu.memory_space<vmem>>, vector<1x4x8x8xf32>
    %223 = vector.shape_cast %222 : vector<1x4x8x8xf32> to vector<4x8x8xf32>
    %c2_163 = arith.constant 2 : index
    %c0_164 = arith.constant 0 : index
    %c0_165 = arith.constant 0 : index
    %c0_166 = arith.constant 0 : index
    %224 = vector.load %arg6[%c2_163, %c0_164, %c0_165, %c0_166] : memref<3x4x8x8xf32, #tpu.memory_space<vmem>>, vector<1x4x8x8xf32>
    %225 = vector.shape_cast %224 : vector<1x4x8x8xf32> to vector<4x8x8xf32>
    %226 = arith.truncf %221 : vector<4x8x8xf32> to vector<4x8x8xbf16>
    %227 = arith.truncf %223 : vector<4x8x8xf32> to vector<4x8x8xbf16>
    "tpu.trace_start"() <{level = 10 : i32, message = "hqd,hkd->hqk"}> : () -> ()
    %cst_167 = arith.constant dense<0.000000e+00> : vector<4x8x8xf32>
    %228 = tpu.matmul %226, %227, %cst_167 {dimension_numbers = #tpu.dot_dimension_numbers<[2], [2], [1], [1], [0, 0, 0, 1, 1, 1], [0], [0]>} : vector<4x8x8xbf16>, vector<4x8x8xbf16>, vector<4x8x8xf32> -> vector<4x8x8xf32>
    "tpu.trace_stop"() : () -> ()
    %cst_168 = arith.constant dense<0xFF800000> : vector<4x8xf32>
    %229 = vector.multi_reduction <maximumf>, %228, %cst_168 [2] : vector<4x8x8xf32> to vector<4x8xf32>
    %230 = vector.shape_cast %229 : vector<4x8xf32> to vector<4x8x1xf32>
    %231 = vector.broadcast %230 : vector<4x8x1xf32> to vector<4x8x8xf32>
    %232 = arith.subf %228, %231 : vector<4x8x8xf32>
    %233 = math.exp %232 : vector<4x8x8xf32>
    %cst_169 = arith.constant dense<0.000000e+00> : vector<4x8xf32>
    %234 = vector.multi_reduction <add>, %233, %cst_169 [2] : vector<4x8x8xf32> to vector<4x8xf32>
    %235 = vector.shape_cast %234 : vector<4x8xf32> to vector<4x8x1xf32>
    %236 = tpu.reciprocal %235 {approx = true} : vector<4x8x1xf32> -> vector<4x8x1xf32>
    %237 = vector.broadcast %236 : vector<4x8x1xf32> to vector<4x8x8xf32>
    %238 = arith.mulf %233, %237 : vector<4x8x8xf32>
    %239 = arith.truncf %238 : vector<4x8x8xf32> to vector<4x8x8xbf16>
    %240 = arith.truncf %225 : vector<4x8x8xf32> to vector<4x8x8xbf16>
    "tpu.trace_start"() <{level = 10 : i32, message = "hqk,hkd->hqd"}> : () -> ()
    %cst_170 = arith.constant dense<0.000000e+00> : vector<4x8x8xf32>
    %241 = tpu.matmul %239, %240, %cst_170 {dimension_numbers = #tpu.dot_dimension_numbers<[2], [1], [1], [2], [0, 0, 0, 1, 1, 2], [0], [0]>} : vector<4x8x8xbf16>, vector<4x8x8xbf16>, vector<4x8x8xf32> -> vector<4x8x8xf32>
    "tpu.trace_stop"() : () -> ()
    %242 = vector.extract_strided_slice %241 {offsets = [0, 0, 0], sizes = [1, 8, 8], strides = [1, 1, 1]} : vector<4x8x8xf32> to vector<1x8x8xf32>
    %243 = vector.shape_cast %242 : vector<1x8x8xf32> to vector<8x8xf32>
    %c0_171 = arith.constant 0 : index
    %c0_172 = arith.constant 0 : index
    %244 = vector.load %arg7[%c0_171, %c0_172] : memref<8x32xf32, #tpu.memory_space<vmem>>, vector<8x8xf32>
    tpu.vector_store %arg7[%c0_171, %c0_172], %243 {strides = array<i32>} : memref<8x32xf32, #tpu.memory_space<vmem>>, vector<8x8xf32>,
    %245 = vector.extract_strided_slice %241 {offsets = [1, 0, 0], sizes = [1, 8, 8], strides = [1, 1, 1]} : vector<4x8x8xf32> to vector<1x8x8xf32>
    %246 = vector.shape_cast %245 : vector<1x8x8xf32> to vector<8x8xf32>
    %c0_173 = arith.constant 0 : index
    %c8_174 = arith.constant 8 : index
    %247 = vector.load %arg7[%c0_173, %c8_174] : memref<8x32xf32, #tpu.memory_space<vmem>>, vector<8x8xf32>
    tpu.vector_store %arg7[%c0_173, %c8_174], %246 {strides = array<i32>} : memref<8x32xf32, #tpu.memory_space<vmem>>, vector<8x8xf32>,
    %248 = vector.extract_strided_slice %241 {offsets = [2, 0, 0], sizes = [1, 8, 8], strides = [1, 1, 1]} : vector<4x8x8xf32> to vector<1x8x8xf32>
    %249 = vector.shape_cast %248 : vector<1x8x8xf32> to vector<8x8xf32>
    %c0_175 = arith.constant 0 : index
    %c16_176 = arith.constant 16 : index
    %250 = vector.load %arg7[%c0_175, %c16_176] : memref<8x32xf32, #tpu.memory_space<vmem>>, vector<8x8xf32>
    tpu.vector_store %arg7[%c0_175, %c16_176], %249 {strides = array<i32>} : memref<8x32xf32, #tpu.memory_space<vmem>>, vector<8x8xf32>,
    %251 = vector.extract_strided_slice %241 {offsets = [3, 0, 0], sizes = [1, 8, 8], strides = [1, 1, 1]} : vector<4x8x8xf32> to vector<1x8x8xf32>
    %252 = vector.shape_cast %251 : vector<1x8x8xf32> to vector<8x8xf32>
    %c0_177 = arith.constant 0 : index
    %c24_178 = arith.constant 24 : index
    %253 = vector.load %arg7[%c0_177, %c24_178] : memref<8x32xf32, #tpu.memory_space<vmem>>, vector<8x8xf32>
    tpu.vector_store %arg7[%c0_177, %c24_178], %252 {strides = array<i32>} : memref<8x32xf32, #tpu.memory_space<vmem>>, vector<8x8xf32>,
    %c0_179 = arith.constant 0 : index
    %c0_180 = arith.constant 0 : index
    %254 = vector.load %arg7[%c0_179, %c0_180] : memref<8x32xf32, #tpu.memory_space<vmem>>, vector<8x32xf32>
    %c0_181 = arith.constant 0 : index
    %c2432 = arith.constant 2432 : index
    %255 = vector.load %arg1[%c0_181, %c2432] : memref<32x10112xbf16, #tpu.memory_space<vmem>>, vector<32x32xbf16>
    %256 = arith.truncf %254 : vector<8x32xf32> to vector<8x32xbf16>
    %cst_182 = arith.constant dense<0.000000e+00> : vector<8x32xf32>
    %257 = tpu.matmul %256, %255, %cst_182 {dimension_numbers = #tpu.dot_dimension_numbers<[1], [0], [0], [1], [0, 0, 1, 1], [], []>} : vector<8x32xbf16>, vector<32x32xbf16>, vector<8x32xf32> -> vector<8x32xf32>
    %c8_183 = arith.constant 8 : index
    %c0_184 = arith.constant 0 : index
    %258 = vector.load %arg3[%c8_183, %c0_184] : memref<43x128xf32, #tpu.memory_space<vmem>>, vector<1x32xf32>
    %259 = vector.broadcast %258 : vector<1x32xf32> to vector<8x32xf32>
    %260 = arith.addf %257, %259 : vector<8x32xf32>
    %261 = arith.addf %160, %260 : vector<8x32xf32>
    %cst_185 = arith.constant dense<0.000000e+00> : vector<8xf32>
    %262 = vector.multi_reduction <add>, %261, %cst_185 [1] : vector<8x32xf32> to vector<8xf32>
    %263 = vector.shape_cast %262 : vector<8xf32> to vector<8x1xf32>
    %cst_186 = arith.constant 3.200000e+01 : f32
    %264 = vector.broadcast %cst_186 : f32 to vector<8x1xf32>
    %265 = arith.divf %263, %264 : vector<8x1xf32>
    %266 = vector.broadcast %265 : vector<8x1xf32> to vector<8x32xf32>
    %267 = arith.subf %261, %266 : vector<8x32xf32>
    %268 = arith.mulf %267, %267 : vector<8x32xf32>
    %cst_187 = arith.constant dense<0.000000e+00> : vector<8xf32>
    %269 = vector.multi_reduction <add>, %268, %cst_187 [1] : vector<8x32xf32> to vector<8xf32>
    %270 = vector.shape_cast %269 : vector<8xf32> to vector<8x1xf32>
    %cst_188 = arith.constant 3.200000e+01 : f32
    %271 = vector.broadcast %cst_188 : f32 to vector<8x1xf32>
    %272 = arith.divf %270, %271 : vector<8x1xf32>
    %cst_189 = arith.constant 9.99999974E-6 : f32
    %273 = vector.broadcast %cst_189 : f32 to vector<8x1xf32>
    %274 = arith.addf %272, %273 : vector<8x1xf32>
    %275 = math.rsqrt %274 : vector<8x1xf32>
    %276 = vector.broadcast %275 : vector<8x1xf32> to vector<8x32xf32>
    %277 = arith.mulf %267, %276 : vector<8x32xf32>
    %c10 = arith.constant 10 : index
    %c0_190 = arith.constant 0 : index
    %278 = vector.load %arg3[%c10, %c0_190] : memref<43x128xf32, #tpu.memory_space<vmem>>, vector<1x32xf32>
    %279 = vector.broadcast %278 : vector<1x32xf32> to vector<8x32xf32>
    %280 = arith.mulf %277, %279 : vector<8x32xf32>
    %c11 = arith.constant 11 : index
    %c0_191 = arith.constant 0 : index
    %281 = vector.load %arg3[%c11, %c0_191] : memref<43x128xf32, #tpu.memory_space<vmem>>, vector<1x32xf32>
    %282 = vector.broadcast %281 : vector<1x32xf32> to vector<8x32xf32>
    %283 = arith.addf %280, %282 : vector<8x32xf32>
    %c0_192 = arith.constant 0 : index
    %c2560 = arith.constant 2560 : index
    %284 = vector.load %arg1[%c0_192, %c2560] : memref<32x10112xbf16, #tpu.memory_space<vmem>>, vector<32x2048xbf16>
    %285 = arith.truncf %283 : vector<8x32xf32> to vector<8x32xbf16>
    %cst_193 = arith.constant dense<0.000000e+00> : vector<8x2048xf32>
    %286 = tpu.matmul %285, %284, %cst_193 {dimension_numbers = #tpu.dot_dimension_numbers<[1], [0], [0], [1], [0, 0, 1, 1], [], []>} : vector<8x32xbf16>, vector<32x2048xbf16>, vector<8x2048xf32> -> vector<8x2048xf32>
    %c1_194 = arith.constant 1 : index
    %c0_195 = arith.constant 0 : index
    %287 = vector.load %arg4[%c1_194, %c0_195] : memref<4x2048xf32, #tpu.memory_space<vmem>>, vector<1x2048xf32>
    %288 = vector.broadcast %287 : vector<1x2048xf32> to vector<8x2048xf32>
    %289 = arith.addf %286, %288 : vector<8x2048xf32>
    %cst_196 = arith.constant 0.000000e+00 : f32
    %290 = vector.broadcast %cst_196 : f32 to vector<8x2048xf32>
    %291 = arith.maximumf %289, %290 : vector<8x2048xf32>
    %292 = arith.truncf %291 : vector<8x2048xf32> to vector<8x2048xbf16>
    %c2048 = arith.constant 2048 : index
    %c0_197 = arith.constant 0 : index
    %293 = vector.load %arg2[%c2048, %c0_197] : memref<8192x32xbf16, #tpu.memory_space<vmem>>, vector<2048x32xbf16>
    %cst_198 = arith.constant dense<0.000000e+00> : vector<8x32xf32>
    %294 = tpu.matmul %292, %293, %cst_198 {dimension_numbers = #tpu.dot_dimension_numbers<[1], [0], [0], [1], [0, 0, 1, 1], [], []>} : vector<8x2048xbf16>, vector<2048x32xbf16>, vector<8x32xf32> -> vector<8x32xf32>
    %c9 = arith.constant 9 : index
    %c0_199 = arith.constant 0 : index
    %295 = vector.load %arg3[%c9, %c0_199] : memref<43x128xf32, #tpu.memory_space<vmem>>, vector<1x32xf32>
    %296 = vector.broadcast %295 : vector<1x32xf32> to vector<8x32xf32>
    %297 = arith.addf %294, %296 : vector<8x32xf32>
    %298 = arith.addf %283, %297 : vector<8x32xf32>
    %cst_200 = arith.constant dense<0.000000e+00> : vector<8xf32>
    %299 = vector.multi_reduction <add>, %298, %cst_200 [1] : vector<8x32xf32> to vector<8xf32>
    %300 = vector.shape_cast %299 : vector<8xf32> to vector<8x1xf32>
    %cst_201 = arith.constant 3.200000e+01 : f32
    %301 = vector.broadcast %cst_201 : f32 to vector<8x1xf32>
    %302 = arith.divf %300, %301 : vector<8x1xf32>
    %303 = vector.broadcast %302 : vector<8x1xf32> to vector<8x32xf32>
    %304 = arith.subf %298, %303 : vector<8x32xf32>
    %305 = arith.mulf %304, %304 : vector<8x32xf32>
    %cst_202 = arith.constant dense<0.000000e+00> : vector<8xf32>
    %306 = vector.multi_reduction <add>, %305, %cst_202 [1] : vector<8x32xf32> to vector<8xf32>
    %307 = vector.shape_cast %306 : vector<8xf32> to vector<8x1xf32>
    %cst_203 = arith.constant 3.200000e+01 : f32
    %308 = vector.broadcast %cst_203 : f32 to vector<8x1xf32>
    %309 = arith.divf %307, %308 : vector<8x1xf32>
    %cst_204 = arith.constant 9.99999974E-6 : f32
    %310 = vector.broadcast %cst_204 : f32 to vector<8x1xf32>
    %311 = arith.addf %309, %310 : vector<8x1xf32>
    %312 = math.rsqrt %311 : vector<8x1xf32>
    %313 = vector.broadcast %312 : vector<8x1xf32> to vector<8x32xf32>
    %314 = arith.mulf %304, %313 : vector<8x32xf32>
    %c12 = arith.constant 12 : index
    %c0_205 = arith.constant 0 : index
    %315 = vector.load %arg3[%c12, %c0_205] : memref<43x128xf32, #tpu.memory_space<vmem>>, vector<1x32xf32>
    %316 = vector.broadcast %315 : vector<1x32xf32> to vector<8x32xf32>
    %317 = arith.mulf %314, %316 : vector<8x32xf32>
    %c13 = arith.constant 13 : index
    %c0_206 = arith.constant 0 : index
    %318 = vector.load %arg3[%c13, %c0_206] : memref<43x128xf32, #tpu.memory_space<vmem>>, vector<1x32xf32>
    %319 = vector.broadcast %318 : vector<1x32xf32> to vector<8x32xf32>
    %320 = arith.addf %317, %319 : vector<8x32xf32>
    %cst_207 = arith.constant dense<0.000000e+00> : vector<8xf32>
    %321 = vector.multi_reduction <add>, %320, %cst_207 [1] : vector<8x32xf32> to vector<8xf32>
    %322 = vector.shape_cast %321 : vector<8xf32> to vector<8x1xf32>
    %cst_208 = arith.constant 3.200000e+01 : f32
    %323 = vector.broadcast %cst_208 : f32 to vector<8x1xf32>
    %324 = arith.divf %322, %323 : vector<8x1xf32>
    %325 = vector.broadcast %324 : vector<8x1xf32> to vector<8x32xf32>
    %326 = arith.subf %320, %325 : vector<8x32xf32>
    %327 = arith.mulf %326, %326 : vector<8x32xf32>
    %cst_209 = arith.constant dense<0.000000e+00> : vector<8xf32>
    %328 = vector.multi_reduction <add>, %327, %cst_209 [1] : vector<8x32xf32> to vector<8xf32>
    %329 = vector.shape_cast %328 : vector<8xf32> to vector<8x1xf32>
    %cst_210 = arith.constant 3.200000e+01 : f32
    %330 = vector.broadcast %cst_210 : f32 to vector<8x1xf32>
    %331 = arith.divf %329, %330 : vector<8x1xf32>
    %cst_211 = arith.constant 9.99999974E-6 : f32
    %332 = vector.broadcast %cst_211 : f32 to vector<8x1xf32>
    %333 = arith.addf %331, %332 : vector<8x1xf32>
    %334 = math.rsqrt %333 : vector<8x1xf32>
    %335 = vector.broadcast %334 : vector<8x1xf32> to vector<8x32xf32>
    %336 = arith.mulf %326, %335 : vector<8x32xf32>
    %c38 = arith.constant 38 : index
    %c0_212 = arith.constant 0 : index
    %337 = vector.load %arg3[%c38, %c0_212] : memref<43x128xf32, #tpu.memory_space<vmem>>, vector<1x32xf32>
    %338 = vector.broadcast %337 : vector<1x32xf32> to vector<8x32xf32>
    %339 = arith.mulf %336, %338 : vector<8x32xf32>
    %c39 = arith.constant 39 : index
    %c0_213 = arith.constant 0 : index
    %340 = vector.load %arg3[%c39, %c0_213] : memref<43x128xf32, #tpu.memory_space<vmem>>, vector<1x32xf32>
    %341 = vector.broadcast %340 : vector<1x32xf32> to vector<8x32xf32>
    %342 = arith.addf %339, %341 : vector<8x32xf32>
    %c0_214 = arith.constant 0 : index
    %c4608 = arith.constant 4608 : index
    %343 = vector.load %arg1[%c0_214, %c4608] : memref<32x10112xbf16, #tpu.memory_space<vmem>>, vector<32x96xbf16>
    %344 = arith.truncf %0 : vector<8x32xf32> to vector<8x32xbf16>
    %cst_215 = arith.constant dense<0.000000e+00> : vector<8x96xf32>
    %345 = tpu.matmul %344, %343, %cst_215 {dimension_numbers = #tpu.dot_dimension_numbers<[1], [0], [0], [1], [0, 0, 1, 1], [], []>} : vector<8x32xbf16>, vector<32x96xbf16>, vector<8x96xf32> -> vector<8x96xf32>
    %c14 = arith.constant 14 : index
    %c0_216 = arith.constant 0 : index
    %346 = vector.load %arg3[%c14, %c0_216] : memref<43x128xf32, #tpu.memory_space<vmem>>, vector<1x96xf32>
    %347 = vector.broadcast %346 : vector<1x96xf32> to vector<8x96xf32>
    %348 = arith.addf %345, %347 : vector<8x96xf32>
    %349 = vector.extract_strided_slice %348 {offsets = [0, 0], sizes = [8, 32], strides = [1, 1]} : vector<8x96xf32> to vector<8x32xf32>
    %350 = vector.extract_strided_slice %348 {offsets = [0, 32], sizes = [8, 32], strides = [1, 1]} : vector<8x96xf32> to vector<8x32xf32>
    %351 = vector.extract_strided_slice %348 {offsets = [0, 64], sizes = [8, 32], strides = [1, 1]} : vector<8x96xf32> to vector<8x32xf32>
    %352 = vector.extract_strided_slice %349 {offsets = [0, 0], sizes = [8, 8], strides = [1, 1]} : vector<8x32xf32> to vector<8x8xf32>
    %c0_217 = arith.constant 0 : index
    %c0_218 = arith.constant 0 : index
    %c0_219 = arith.constant 0 : index
    %c0_220 = arith.constant 0 : index
    %353 = vector.load %arg6[%c0_217, %c0_218, %c0_219, %c0_220] : memref<3x4x8x8xf32, #tpu.memory_space<vmem>>, vector<1x1x8x8xf32>
    %354 = vector.shape_cast %353 : vector<1x1x8x8xf32> to vector<8x8xf32>
    %355 = vector.shape_cast %352 : vector<8x8xf32> to vector<1x1x8x8xf32>
    tpu.vector_store %arg6[%c0_217, %c0_218, %c0_219, %c0_220], %355 {strides = array<i32>} : memref<3x4x8x8xf32, #tpu.memory_space<vmem>>, vector<1x1x8x8xf32>,
    %356 = vector.extract_strided_slice %350 {offsets = [0, 0], sizes = [8, 8], strides = [1, 1]} : vector<8x32xf32> to vector<8x8xf32>
    %c1_221 = arith.constant 1 : index
    %c0_222 = arith.constant 0 : index
    %c0_223 = arith.constant 0 : index
    %c0_224 = arith.constant 0 : index
    %357 = vector.load %arg6[%c1_221, %c0_222, %c0_223, %c0_224] : memref<3x4x8x8xf32, #tpu.memory_space<vmem>>, vector<1x1x8x8xf32>
    %358 = vector.shape_cast %357 : vector<1x1x8x8xf32> to vector<8x8xf32>
    %359 = vector.shape_cast %356 : vector<8x8xf32> to vector<1x1x8x8xf32>
    tpu.vector_store %arg6[%c1_221, %c0_222, %c0_223, %c0_224], %359 {strides = array<i32>} : memref<3x4x8x8xf32, #tpu.memory_space<vmem>>, vector<1x1x8x8xf32>,
    %360 = vector.extract_strided_slice %351 {offsets = [0, 0], sizes = [8, 8], strides = [1, 1]} : vector<8x32xf32> to vector<8x8xf32>
    %c2_225 = arith.constant 2 : index
    %c0_226 = arith.constant 0 : index
    %c0_227 = arith.constant 0 : index
    %c0_228 = arith.constant 0 : index
    %361 = vector.load %arg6[%c2_225, %c0_226, %c0_227, %c0_228] : memref<3x4x8x8xf32, #tpu.memory_space<vmem>>, vector<1x1x8x8xf32>
    %362 = vector.shape_cast %361 : vector<1x1x8x8xf32> to vector<8x8xf32>
    %363 = vector.shape_cast %360 : vector<8x8xf32> to vector<1x1x8x8xf32>
    tpu.vector_store %arg6[%c2_225, %c0_226, %c0_227, %c0_228], %363 {strides = array<i32>} : memref<3x4x8x8xf32, #tpu.memory_space<vmem>>, vector<1x1x8x8xf32>,
    %364 = vector.extract_strided_slice %349 {offsets = [0, 8], sizes = [8, 8], strides = [1, 1]} : vector<8x32xf32> to vector<8x8xf32>
    %c0_229 = arith.constant 0 : index
    %c1_230 = arith.constant 1 : index
    %c0_231 = arith.constant 0 : index
    %c0_232 = arith.constant 0 : index
    %365 = vector.load %arg6[%c0_229, %c1_230, %c0_231, %c0_232] : memref<3x4x8x8xf32, #tpu.memory_space<vmem>>, vector<1x1x8x8xf32>
    %366 = vector.shape_cast %365 : vector<1x1x8x8xf32> to vector<8x8xf32>
    %367 = vector.shape_cast %364 : vector<8x8xf32> to vector<1x1x8x8xf32>
    tpu.vector_store %arg6[%c0_229, %c1_230, %c0_231, %c0_232], %367 {strides = array<i32>} : memref<3x4x8x8xf32, #tpu.memory_space<vmem>>, vector<1x1x8x8xf32>,
    %368 = vector.extract_strided_slice %350 {offsets = [0, 8], sizes = [8, 8], strides = [1, 1]} : vector<8x32xf32> to vector<8x8xf32>
    %c1_233 = arith.constant 1 : index
    %c1_234 = arith.constant 1 : index
    %c0_235 = arith.constant 0 : index
    %c0_236 = arith.constant 0 : index
    %369 = vector.load %arg6[%c1_233, %c1_234, %c0_235, %c0_236] : memref<3x4x8x8xf32, #tpu.memory_space<vmem>>, vector<1x1x8x8xf32>
    %370 = vector.shape_cast %369 : vector<1x1x8x8xf32> to vector<8x8xf32>
    %371 = vector.shape_cast %368 : vector<8x8xf32> to vector<1x1x8x8xf32>
    tpu.vector_store %arg6[%c1_233, %c1_234, %c0_235, %c0_236], %371 {strides = array<i32>} : memref<3x4x8x8xf32, #tpu.memory_space<vmem>>, vector<1x1x8x8xf32>,
    %372 = vector.extract_strided_slice %351 {offsets = [0, 8], sizes = [8, 8], strides = [1, 1]} : vector<8x32xf32> to vector<8x8xf32>
    %c2_237 = arith.constant 2 : index
    %c1_238 = arith.constant 1 : index
    %c0_239 = arith.constant 0 : index
    %c0_240 = arith.constant 0 : index
    %373 = vector.load %arg6[%c2_237, %c1_238, %c0_239, %c0_240] : memref<3x4x8x8xf32, #tpu.memory_space<vmem>>, vector<1x1x8x8xf32>
    %374 = vector.shape_cast %373 : vector<1x1x8x8xf32> to vector<8x8xf32>
    %375 = vector.shape_cast %372 : vector<8x8xf32> to vector<1x1x8x8xf32>
    tpu.vector_store %arg6[%c2_237, %c1_238, %c0_239, %c0_240], %375 {strides = array<i32>} : memref<3x4x8x8xf32, #tpu.memory_space<vmem>>, vector<1x1x8x8xf32>,
    %376 = vector.extract_strided_slice %349 {offsets = [0, 16], sizes = [8, 8], strides = [1, 1]} : vector<8x32xf32> to vector<8x8xf32>
    %c0_241 = arith.constant 0 : index
    %c2_242 = arith.constant 2 : index
    %c0_243 = arith.constant 0 : index
    %c0_244 = arith.constant 0 : index
    %377 = vector.load %arg6[%c0_241, %c2_242, %c0_243, %c0_244] : memref<3x4x8x8xf32, #tpu.memory_space<vmem>>, vector<1x1x8x8xf32>
    %378 = vector.shape_cast %377 : vector<1x1x8x8xf32> to vector<8x8xf32>
    %379 = vector.shape_cast %376 : vector<8x8xf32> to vector<1x1x8x8xf32>
    tpu.vector_store %arg6[%c0_241, %c2_242, %c0_243, %c0_244], %379 {strides = array<i32>} : memref<3x4x8x8xf32, #tpu.memory_space<vmem>>, vector<1x1x8x8xf32>,
    %380 = vector.extract_strided_slice %350 {offsets = [0, 16], sizes = [8, 8], strides = [1, 1]} : vector<8x32xf32> to vector<8x8xf32>
    %c1_245 = arith.constant 1 : index
    %c2_246 = arith.constant 2 : index
    %c0_247 = arith.constant 0 : index
    %c0_248 = arith.constant 0 : index
    %381 = vector.load %arg6[%c1_245, %c2_246, %c0_247, %c0_248] : memref<3x4x8x8xf32, #tpu.memory_space<vmem>>, vector<1x1x8x8xf32>
    %382 = vector.shape_cast %381 : vector<1x1x8x8xf32> to vector<8x8xf32>
    %383 = vector.shape_cast %380 : vector<8x8xf32> to vector<1x1x8x8xf32>
    tpu.vector_store %arg6[%c1_245, %c2_246, %c0_247, %c0_248], %383 {strides = array<i32>} : memref<3x4x8x8xf32, #tpu.memory_space<vmem>>, vector<1x1x8x8xf32>,
    %384 = vector.extract_strided_slice %351 {offsets = [0, 16], sizes = [8, 8], strides = [1, 1]} : vector<8x32xf32> to vector<8x8xf32>
    %c2_249 = arith.constant 2 : index
    %c2_250 = arith.constant 2 : index
    %c0_251 = arith.constant 0 : index
    %c0_252 = arith.constant 0 : index
    %385 = vector.load %arg6[%c2_249, %c2_250, %c0_251, %c0_252] : memref<3x4x8x8xf32, #tpu.memory_space<vmem>>, vector<1x1x8x8xf32>
    %386 = vector.shape_cast %385 : vector<1x1x8x8xf32> to vector<8x8xf32>
    %387 = vector.shape_cast %384 : vector<8x8xf32> to vector<1x1x8x8xf32>
    tpu.vector_store %arg6[%c2_249, %c2_250, %c0_251, %c0_252], %387 {strides = array<i32>} : memref<3x4x8x8xf32, #tpu.memory_space<vmem>>, vector<1x1x8x8xf32>,
    %388 = vector.extract_strided_slice %349 {offsets = [0, 24], sizes = [8, 8], strides = [1, 1]} : vector<8x32xf32> to vector<8x8xf32>
    %c0_253 = arith.constant 0 : index
    %c3_254 = arith.constant 3 : index
    %c0_255 = arith.constant 0 : index
    %c0_256 = arith.constant 0 : index
    %389 = vector.load %arg6[%c0_253, %c3_254, %c0_255, %c0_256] : memref<3x4x8x8xf32, #tpu.memory_space<vmem>>, vector<1x1x8x8xf32>
    %390 = vector.shape_cast %389 : vector<1x1x8x8xf32> to vector<8x8xf32>
    %391 = vector.shape_cast %388 : vector<8x8xf32> to vector<1x1x8x8xf32>
    tpu.vector_store %arg6[%c0_253, %c3_254, %c0_255, %c0_256], %391 {strides = array<i32>} : memref<3x4x8x8xf32, #tpu.memory_space<vmem>>, vector<1x1x8x8xf32>,
    %392 = vector.extract_strided_slice %350 {offsets = [0, 24], sizes = [8, 8], strides = [1, 1]} : vector<8x32xf32> to vector<8x8xf32>
    %c1_257 = arith.constant 1 : index
    %c3_258 = arith.constant 3 : index
    %c0_259 = arith.constant 0 : index
    %c0_260 = arith.constant 0 : index
    %393 = vector.load %arg6[%c1_257, %c3_258, %c0_259, %c0_260] : memref<3x4x8x8xf32, #tpu.memory_space<vmem>>, vector<1x1x8x8xf32>
    %394 = vector.shape_cast %393 : vector<1x1x8x8xf32> to vector<8x8xf32>
    %395 = vector.shape_cast %392 : vector<8x8xf32> to vector<1x1x8x8xf32>
    tpu.vector_store %arg6[%c1_257, %c3_258, %c0_259, %c0_260], %395 {strides = array<i32>} : memref<3x4x8x8xf32, #tpu.memory_space<vmem>>, vector<1x1x8x8xf32>,
    %396 = vector.extract_strided_slice %351 {offsets = [0, 24], sizes = [8, 8], strides = [1, 1]} : vector<8x32xf32> to vector<8x8xf32>
    %c2_261 = arith.constant 2 : index
    %c3_262 = arith.constant 3 : index
    %c0_263 = arith.constant 0 : index
    %c0_264 = arith.constant 0 : index
    %397 = vector.load %arg6[%c2_261, %c3_262, %c0_263, %c0_264] : memref<3x4x8x8xf32, #tpu.memory_space<vmem>>, vector<1x1x8x8xf32>
    %398 = vector.shape_cast %397 : vector<1x1x8x8xf32> to vector<8x8xf32>
    %399 = vector.shape_cast %396 : vector<8x8xf32> to vector<1x1x8x8xf32>
    tpu.vector_store %arg6[%c2_261, %c3_262, %c0_263, %c0_264], %399 {strides = array<i32>} : memref<3x4x8x8xf32, #tpu.memory_space<vmem>>, vector<1x1x8x8xf32>,
    %c0_265 = arith.constant 0 : index
    %c0_266 = arith.constant 0 : index
    %c0_267 = arith.constant 0 : index
    %c0_268 = arith.constant 0 : index
    %400 = vector.load %arg6[%c0_265, %c0_266, %c0_267, %c0_268] : memref<3x4x8x8xf32, #tpu.memory_space<vmem>>, vector<1x4x8x8xf32>
    %401 = vector.shape_cast %400 : vector<1x4x8x8xf32> to vector<4x8x8xf32>
    %cst_269 = arith.constant 0.353553385 : f32
    %402 = vector.broadcast %cst_269 : f32 to vector<4x8x8xf32>
    %403 = arith.mulf %401, %402 : vector<4x8x8xf32>
    %c1_270 = arith.constant 1 : index
    %c0_271 = arith.constant 0 : index
    %c0_272 = arith.constant 0 : index
    %c0_273 = arith.constant 0 : index
    %404 = vector.load %arg6[%c1_270, %c0_271, %c0_272, %c0_273] : memref<3x4x8x8xf32, #tpu.memory_space<vmem>>, vector<1x4x8x8xf32>
    %405 = vector.shape_cast %404 : vector<1x4x8x8xf32> to vector<4x8x8xf32>
    %c2_274 = arith.constant 2 : index
    %c0_275 = arith.constant 0 : index
    %c0_276 = arith.constant 0 : index
    %c0_277 = arith.constant 0 : index
    %406 = vector.load %arg6[%c2_274, %c0_275, %c0_276, %c0_277] : memref<3x4x8x8xf32, #tpu.memory_space<vmem>>, vector<1x4x8x8xf32>
    %407 = vector.shape_cast %406 : vector<1x4x8x8xf32> to vector<4x8x8xf32>
    %408 = arith.truncf %403 : vector<4x8x8xf32> to vector<4x8x8xbf16>
    %409 = arith.truncf %405 : vector<4x8x8xf32> to vector<4x8x8xbf16>
    "tpu.trace_start"() <{level = 10 : i32, message = "hqd,hkd->hqk"}> : () -> ()
    %cst_278 = arith.constant dense<0.000000e+00> : vector<4x8x8xf32>
    %410 = tpu.matmul %408, %409, %cst_278 {dimension_numbers = #tpu.dot_dimension_numbers<[2], [2], [1], [1], [0, 0, 0, 1, 1, 1], [0], [0]>} : vector<4x8x8xbf16>, vector<4x8x8xbf16>, vector<4x8x8xf32> -> vector<4x8x8xf32>
    "tpu.trace_stop"() : () -> ()
    %cst_279 = arith.constant dense<0xFF800000> : vector<4x8xf32>
    %411 = vector.multi_reduction <maximumf>, %410, %cst_279 [2] : vector<4x8x8xf32> to vector<4x8xf32>
    %412 = vector.shape_cast %411 : vector<4x8xf32> to vector<4x8x1xf32>
    %413 = vector.broadcast %412 : vector<4x8x1xf32> to vector<4x8x8xf32>
    %414 = arith.subf %410, %413 : vector<4x8x8xf32>
    %415 = math.exp %414 : vector<4x8x8xf32>
    %cst_280 = arith.constant dense<0.000000e+00> : vector<4x8xf32>
    %416 = vector.multi_reduction <add>, %415, %cst_280 [2] : vector<4x8x8xf32> to vector<4x8xf32>
    %417 = vector.shape_cast %416 : vector<4x8xf32> to vector<4x8x1xf32>
    %418 = tpu.reciprocal %417 {approx = true} : vector<4x8x1xf32> -> vector<4x8x1xf32>
    %419 = vector.broadcast %418 : vector<4x8x1xf32> to vector<4x8x8xf32>
    %420 = arith.mulf %415, %419 : vector<4x8x8xf32>
    %421 = arith.truncf %420 : vector<4x8x8xf32> to vector<4x8x8xbf16>
    %422 = arith.truncf %407 : vector<4x8x8xf32> to vector<4x8x8xbf16>
    "tpu.trace_start"() <{level = 10 : i32, message = "hqk,hkd->hqd"}> : () -> ()
    %cst_281 = arith.constant dense<0.000000e+00> : vector<4x8x8xf32>
    %423 = tpu.matmul %421, %422, %cst_281 {dimension_numbers = #tpu.dot_dimension_numbers<[2], [1], [1], [2], [0, 0, 0, 1, 1, 2], [0], [0]>} : vector<4x8x8xbf16>, vector<4x8x8xbf16>, vector<4x8x8xf32> -> vector<4x8x8xf32>
    "tpu.trace_stop"() : () -> ()
    %424 = vector.extract_strided_slice %423 {offsets = [0, 0, 0], sizes = [1, 8, 8], strides = [1, 1, 1]} : vector<4x8x8xf32> to vector<1x8x8xf32>
    %425 = vector.shape_cast %424 : vector<1x8x8xf32> to vector<8x8xf32>
    %c0_282 = arith.constant 0 : index
    %c0_283 = arith.constant 0 : index
    %426 = vector.load %arg7[%c0_282, %c0_283] : memref<8x32xf32, #tpu.memory_space<vmem>>, vector<8x8xf32>
    tpu.vector_store %arg7[%c0_282, %c0_283], %425 {strides = array<i32>} : memref<8x32xf32, #tpu.memory_space<vmem>>, vector<8x8xf32>,
    %427 = vector.extract_strided_slice %423 {offsets = [1, 0, 0], sizes = [1, 8, 8], strides = [1, 1, 1]} : vector<4x8x8xf32> to vector<1x8x8xf32>
    %428 = vector.shape_cast %427 : vector<1x8x8xf32> to vector<8x8xf32>
    %c0_284 = arith.constant 0 : index
    %c8_285 = arith.constant 8 : index
    %429 = vector.load %arg7[%c0_284, %c8_285] : memref<8x32xf32, #tpu.memory_space<vmem>>, vector<8x8xf32>
    tpu.vector_store %arg7[%c0_284, %c8_285], %428 {strides = array<i32>} : memref<8x32xf32, #tpu.memory_space<vmem>>, vector<8x8xf32>,
    %430 = vector.extract_strided_slice %423 {offsets = [2, 0, 0], sizes = [1, 8, 8], strides = [1, 1, 1]} : vector<4x8x8xf32> to vector<1x8x8xf32>
    %431 = vector.shape_cast %430 : vector<1x8x8xf32> to vector<8x8xf32>
    %c0_286 = arith.constant 0 : index
    %c16_287 = arith.constant 16 : index
    %432 = vector.load %arg7[%c0_286, %c16_287] : memref<8x32xf32, #tpu.memory_space<vmem>>, vector<8x8xf32>
    tpu.vector_store %arg7[%c0_286, %c16_287], %431 {strides = array<i32>} : memref<8x32xf32, #tpu.memory_space<vmem>>, vector<8x8xf32>,
    %433 = vector.extract_strided_slice %423 {offsets = [3, 0, 0], sizes = [1, 8, 8], strides = [1, 1, 1]} : vector<4x8x8xf32> to vector<1x8x8xf32>
    %434 = vector.shape_cast %433 : vector<1x8x8xf32> to vector<8x8xf32>
    %c0_288 = arith.constant 0 : index
    %c24_289 = arith.constant 24 : index
    %435 = vector.load %arg7[%c0_288, %c24_289] : memref<8x32xf32, #tpu.memory_space<vmem>>, vector<8x8xf32>
    tpu.vector_store %arg7[%c0_288, %c24_289], %434 {strides = array<i32>} : memref<8x32xf32, #tpu.memory_space<vmem>>, vector<8x8xf32>,
    %c0_290 = arith.constant 0 : index
    %c0_291 = arith.constant 0 : index
    %436 = vector.load %arg7[%c0_290, %c0_291] : memref<8x32xf32, #tpu.memory_space<vmem>>, vector<8x32xf32>
    %c0_292 = arith.constant 0 : index
    %c4736 = arith.constant 4736 : index
    %437 = vector.load %arg1[%c0_292, %c4736] : memref<32x10112xbf16, #tpu.memory_space<vmem>>, vector<32x32xbf16>
    %438 = arith.truncf %436 : vector<8x32xf32> to vector<8x32xbf16>
    %cst_293 = arith.constant dense<0.000000e+00> : vector<8x32xf32>
    %439 = tpu.matmul %438, %437, %cst_293 {dimension_numbers = #tpu.dot_dimension_numbers<[1], [0], [0], [1], [0, 0, 1, 1], [], []>} : vector<8x32xbf16>, vector<32x32xbf16>, vector<8x32xf32> -> vector<8x32xf32>
    %c15 = arith.constant 15 : index
    %c0_294 = arith.constant 0 : index
    %440 = vector.load %arg3[%c15, %c0_294] : memref<43x128xf32, #tpu.memory_space<vmem>>, vector<1x32xf32>
    %441 = vector.broadcast %440 : vector<1x32xf32> to vector<8x32xf32>
    %442 = arith.addf %439, %441 : vector<8x32xf32>
    %443 = arith.addf %0, %442 : vector<8x32xf32>
    %cst_295 = arith.constant dense<0.000000e+00> : vector<8xf32>
    %444 = vector.multi_reduction <add>, %443, %cst_295 [1] : vector<8x32xf32> to vector<8xf32>
    %445 = vector.shape_cast %444 : vector<8xf32> to vector<8x1xf32>
    %cst_296 = arith.constant 3.200000e+01 : f32
    %446 = vector.broadcast %cst_296 : f32 to vector<8x1xf32>
    %447 = arith.divf %445, %446 : vector<8x1xf32>
    %448 = vector.broadcast %447 : vector<8x1xf32> to vector<8x32xf32>
    %449 = arith.subf %443, %448 : vector<8x32xf32>
    %450 = arith.mulf %449, %449 : vector<8x32xf32>
    %cst_297 = arith.constant dense<0.000000e+00> : vector<8xf32>
    %451 = vector.multi_reduction <add>, %450, %cst_297 [1] : vector<8x32xf32> to vector<8xf32>
    %452 = vector.shape_cast %451 : vector<8xf32> to vector<8x1xf32>
    %cst_298 = arith.constant 3.200000e+01 : f32
    %453 = vector.broadcast %cst_298 : f32 to vector<8x1xf32>
    %454 = arith.divf %452, %453 : vector<8x1xf32>
    %cst_299 = arith.constant 9.99999974E-6 : f32
    %455 = vector.broadcast %cst_299 : f32 to vector<8x1xf32>
    %456 = arith.addf %454, %455 : vector<8x1xf32>
    %457 = math.rsqrt %456 : vector<8x1xf32>
    %458 = vector.broadcast %457 : vector<8x1xf32> to vector<8x32xf32>
    %459 = arith.mulf %449, %458 : vector<8x32xf32>
    %c20 = arith.constant 20 : index
    %c0_300 = arith.constant 0 : index
    %460 = vector.load %arg3[%c20, %c0_300] : memref<43x128xf32, #tpu.memory_space<vmem>>, vector<1x32xf32>
    %461 = vector.broadcast %460 : vector<1x32xf32> to vector<8x32xf32>
    %462 = arith.mulf %459, %461 : vector<8x32xf32>
    %c21 = arith.constant 21 : index
    %c0_301 = arith.constant 0 : index
    %463 = vector.load %arg3[%c21, %c0_301] : memref<43x128xf32, #tpu.memory_space<vmem>>, vector<1x32xf32>
    %464 = vector.broadcast %463 : vector<1x32xf32> to vector<8x32xf32>
    %465 = arith.addf %462, %464 : vector<8x32xf32>
    %c0_302 = arith.constant 0 : index
    %c4864 = arith.constant 4864 : index
    %466 = vector.load %arg1[%c0_302, %c4864] : memref<32x10112xbf16, #tpu.memory_space<vmem>>, vector<32x32xbf16>
    %467 = arith.truncf %465 : vector<8x32xf32> to vector<8x32xbf16>
    %cst_303 = arith.constant dense<0.000000e+00> : vector<8x32xf32>
    %468 = tpu.matmul %467, %466, %cst_303 {dimension_numbers = #tpu.dot_dimension_numbers<[1], [0], [0], [1], [0, 0, 1, 1], [], []>} : vector<8x32xbf16>, vector<32x32xbf16>, vector<8x32xf32> -> vector<8x32xf32>
    %c16_304 = arith.constant 16 : index
    %c0_305 = arith.constant 0 : index
    %469 = vector.load %arg3[%c16_304, %c0_305] : memref<43x128xf32, #tpu.memory_space<vmem>>, vector<1x32xf32>
    %470 = vector.broadcast %469 : vector<1x32xf32> to vector<8x32xf32>
    %471 = arith.addf %468, %470 : vector<8x32xf32>
    %c0_306 = arith.constant 0 : index
    %c4992 = arith.constant 4992 : index
    %472 = vector.load %arg1[%c0_306, %c4992] : memref<32x10112xbf16, #tpu.memory_space<vmem>>, vector<32x64xbf16>
    %473 = arith.truncf %342 : vector<8x32xf32> to vector<8x32xbf16>
    %cst_307 = arith.constant dense<0.000000e+00> : vector<8x64xf32>
    %474 = tpu.matmul %473, %472, %cst_307 {dimension_numbers = #tpu.dot_dimension_numbers<[1], [0], [0], [1], [0, 0, 1, 1], [], []>} : vector<8x32xbf16>, vector<32x64xbf16>, vector<8x64xf32> -> vector<8x64xf32>
    %c17 = arith.constant 17 : index
    %c0_308 = arith.constant 0 : index
    %475 = vector.load %arg3[%c17, %c0_308] : memref<43x128xf32, #tpu.memory_space<vmem>>, vector<1x64xf32>
    %476 = vector.broadcast %475 : vector<1x64xf32> to vector<8x64xf32>
    %477 = arith.addf %474, %476 : vector<8x64xf32>
    %478 = vector.extract_strided_slice %477 {offsets = [0, 0], sizes = [8, 32], strides = [1, 1]} : vector<8x64xf32> to vector<8x32xf32>
    %479 = vector.extract_strided_slice %477 {offsets = [0, 32], sizes = [8, 32], strides = [1, 1]} : vector<8x64xf32> to vector<8x32xf32>
    %480 = vector.extract_strided_slice %471 {offsets = [0, 0], sizes = [8, 8], strides = [1, 1]} : vector<8x32xf32> to vector<8x8xf32>
    %c0_309 = arith.constant 0 : index
    %c0_310 = arith.constant 0 : index
    %c0_311 = arith.constant 0 : index
    %c0_312 = arith.constant 0 : index
    %481 = vector.load %arg6[%c0_309, %c0_310, %c0_311, %c0_312] : memref<3x4x8x8xf32, #tpu.memory_space<vmem>>, vector<1x1x8x8xf32>
    %482 = vector.shape_cast %481 : vector<1x1x8x8xf32> to vector<8x8xf32>
    %483 = vector.shape_cast %480 : vector<8x8xf32> to vector<1x1x8x8xf32>
    tpu.vector_store %arg6[%c0_309, %c0_310, %c0_311, %c0_312], %483 {strides = array<i32>} : memref<3x4x8x8xf32, #tpu.memory_space<vmem>>, vector<1x1x8x8xf32>,
    %484 = vector.extract_strided_slice %478 {offsets = [0, 0], sizes = [8, 8], strides = [1, 1]} : vector<8x32xf32> to vector<8x8xf32>
    %c1_313 = arith.constant 1 : index
    %c0_314 = arith.constant 0 : index
    %c0_315 = arith.constant 0 : index
    %c0_316 = arith.constant 0 : index
    %485 = vector.load %arg6[%c1_313, %c0_314, %c0_315, %c0_316] : memref<3x4x8x8xf32, #tpu.memory_space<vmem>>, vector<1x1x8x8xf32>
    %486 = vector.shape_cast %485 : vector<1x1x8x8xf32> to vector<8x8xf32>
    %487 = vector.shape_cast %484 : vector<8x8xf32> to vector<1x1x8x8xf32>
    tpu.vector_store %arg6[%c1_313, %c0_314, %c0_315, %c0_316], %487 {strides = array<i32>} : memref<3x4x8x8xf32, #tpu.memory_space<vmem>>, vector<1x1x8x8xf32>,
    %488 = vector.extract_strided_slice %479 {offsets = [0, 0], sizes = [8, 8], strides = [1, 1]} : vector<8x32xf32> to vector<8x8xf32>
    %c2_317 = arith.constant 2 : index
    %c0_318 = arith.constant 0 : index
    %c0_319 = arith.constant 0 : index
    %c0_320 = arith.constant 0 : index
    %489 = vector.load %arg6[%c2_317, %c0_318, %c0_319, %c0_320] : memref<3x4x8x8xf32, #tpu.memory_space<vmem>>, vector<1x1x8x8xf32>
    %490 = vector.shape_cast %489 : vector<1x1x8x8xf32> to vector<8x8xf32>
    %491 = vector.shape_cast %488 : vector<8x8xf32> to vector<1x1x8x8xf32>
    tpu.vector_store %arg6[%c2_317, %c0_318, %c0_319, %c0_320], %491 {strides = array<i32>} : memref<3x4x8x8xf32, #tpu.memory_space<vmem>>, vector<1x1x8x8xf32>,
    %492 = vector.extract_strided_slice %471 {offsets = [0, 8], sizes = [8, 8], strides = [1, 1]} : vector<8x32xf32> to vector<8x8xf32>
    %c0_321 = arith.constant 0 : index
    %c1_322 = arith.constant 1 : index
    %c0_323 = arith.constant 0 : index
    %c0_324 = arith.constant 0 : index
    %493 = vector.load %arg6[%c0_321, %c1_322, %c0_323, %c0_324] : memref<3x4x8x8xf32, #tpu.memory_space<vmem>>, vector<1x1x8x8xf32>
    %494 = vector.shape_cast %493 : vector<1x1x8x8xf32> to vector<8x8xf32>
    %495 = vector.shape_cast %492 : vector<8x8xf32> to vector<1x1x8x8xf32>
    tpu.vector_store %arg6[%c0_321, %c1_322, %c0_323, %c0_324], %495 {strides = array<i32>} : memref<3x4x8x8xf32, #tpu.memory_space<vmem>>, vector<1x1x8x8xf32>,
    %496 = vector.extract_strided_slice %478 {offsets = [0, 8], sizes = [8, 8], strides = [1, 1]} : vector<8x32xf32> to vector<8x8xf32>
    %c1_325 = arith.constant 1 : index
    %c1_326 = arith.constant 1 : index
    %c0_327 = arith.constant 0 : index
    %c0_328 = arith.constant 0 : index
    %497 = vector.load %arg6[%c1_325, %c1_326, %c0_327, %c0_328] : memref<3x4x8x8xf32, #tpu.memory_space<vmem>>, vector<1x1x8x8xf32>
    %498 = vector.shape_cast %497 : vector<1x1x8x8xf32> to vector<8x8xf32>
    %499 = vector.shape_cast %496 : vector<8x8xf32> to vector<1x1x8x8xf32>
    tpu.vector_store %arg6[%c1_325, %c1_326, %c0_327, %c0_328], %499 {strides = array<i32>} : memref<3x4x8x8xf32, #tpu.memory_space<vmem>>, vector<1x1x8x8xf32>,
    %500 = vector.extract_strided_slice %479 {offsets = [0, 8], sizes = [8, 8], strides = [1, 1]} : vector<8x32xf32> to vector<8x8xf32>
    %c2_329 = arith.constant 2 : index
    %c1_330 = arith.constant 1 : index
    %c0_331 = arith.constant 0 : index
    %c0_332 = arith.constant 0 : index
    %501 = vector.load %arg6[%c2_329, %c1_330, %c0_331, %c0_332] : memref<3x4x8x8xf32, #tpu.memory_space<vmem>>, vector<1x1x8x8xf32>
    %502 = vector.shape_cast %501 : vector<1x1x8x8xf32> to vector<8x8xf32>
    %503 = vector.shape_cast %500 : vector<8x8xf32> to vector<1x1x8x8xf32>
    tpu.vector_store %arg6[%c2_329, %c1_330, %c0_331, %c0_332], %503 {strides = array<i32>} : memref<3x4x8x8xf32, #tpu.memory_space<vmem>>, vector<1x1x8x8xf32>,
    %504 = vector.extract_strided_slice %471 {offsets = [0, 16], sizes = [8, 8], strides = [1, 1]} : vector<8x32xf32> to vector<8x8xf32>
    %c0_333 = arith.constant 0 : index
    %c2_334 = arith.constant 2 : index
    %c0_335 = arith.constant 0 : index
    %c0_336 = arith.constant 0 : index
    %505 = vector.load %arg6[%c0_333, %c2_334, %c0_335, %c0_336] : memref<3x4x8x8xf32, #tpu.memory_space<vmem>>, vector<1x1x8x8xf32>
    %506 = vector.shape_cast %505 : vector<1x1x8x8xf32> to vector<8x8xf32>
    %507 = vector.shape_cast %504 : vector<8x8xf32> to vector<1x1x8x8xf32>
    tpu.vector_store %arg6[%c0_333, %c2_334, %c0_335, %c0_336], %507 {strides = array<i32>} : memref<3x4x8x8xf32, #tpu.memory_space<vmem>>, vector<1x1x8x8xf32>,
    %508 = vector.extract_strided_slice %478 {offsets = [0, 16], sizes = [8, 8], strides = [1, 1]} : vector<8x32xf32> to vector<8x8xf32>
    %c1_337 = arith.constant 1 : index
    %c2_338 = arith.constant 2 : index
    %c0_339 = arith.constant 0 : index
    %c0_340 = arith.constant 0 : index
    %509 = vector.load %arg6[%c1_337, %c2_338, %c0_339, %c0_340] : memref<3x4x8x8xf32, #tpu.memory_space<vmem>>, vector<1x1x8x8xf32>
    %510 = vector.shape_cast %509 : vector<1x1x8x8xf32> to vector<8x8xf32>
    %511 = vector.shape_cast %508 : vector<8x8xf32> to vector<1x1x8x8xf32>
    tpu.vector_store %arg6[%c1_337, %c2_338, %c0_339, %c0_340], %511 {strides = array<i32>} : memref<3x4x8x8xf32, #tpu.memory_space<vmem>>, vector<1x1x8x8xf32>,
    %512 = vector.extract_strided_slice %479 {offsets = [0, 16], sizes = [8, 8], strides = [1, 1]} : vector<8x32xf32> to vector<8x8xf32>
    %c2_341 = arith.constant 2 : index
    %c2_342 = arith.constant 2 : index
    %c0_343 = arith.constant 0 : index
    %c0_344 = arith.constant 0 : index
    %513 = vector.load %arg6[%c2_341, %c2_342, %c0_343, %c0_344] : memref<3x4x8x8xf32, #tpu.memory_space<vmem>>, vector<1x1x8x8xf32>
    %514 = vector.shape_cast %513 : vector<1x1x8x8xf32> to vector<8x8xf32>
    %515 = vector.shape_cast %512 : vector<8x8xf32> to vector<1x1x8x8xf32>
    tpu.vector_store %arg6[%c2_341, %c2_342, %c0_343, %c0_344], %515 {strides = array<i32>} : memref<3x4x8x8xf32, #tpu.memory_space<vmem>>, vector<1x1x8x8xf32>,
    %516 = vector.extract_strided_slice %471 {offsets = [0, 24], sizes = [8, 8], strides = [1, 1]} : vector<8x32xf32> to vector<8x8xf32>
    %c0_345 = arith.constant 0 : index
    %c3_346 = arith.constant 3 : index
    %c0_347 = arith.constant 0 : index
    %c0_348 = arith.constant 0 : index
    %517 = vector.load %arg6[%c0_345, %c3_346, %c0_347, %c0_348] : memref<3x4x8x8xf32, #tpu.memory_space<vmem>>, vector<1x1x8x8xf32>
    %518 = vector.shape_cast %517 : vector<1x1x8x8xf32> to vector<8x8xf32>
    %519 = vector.shape_cast %516 : vector<8x8xf32> to vector<1x1x8x8xf32>
    tpu.vector_store %arg6[%c0_345, %c3_346, %c0_347, %c0_348], %519 {strides = array<i32>} : memref<3x4x8x8xf32, #tpu.memory_space<vmem>>, vector<1x1x8x8xf32>,
    %520 = vector.extract_strided_slice %478 {offsets = [0, 24], sizes = [8, 8], strides = [1, 1]} : vector<8x32xf32> to vector<8x8xf32>
    %c1_349 = arith.constant 1 : index
    %c3_350 = arith.constant 3 : index
    %c0_351 = arith.constant 0 : index
    %c0_352 = arith.constant 0 : index
    %521 = vector.load %arg6[%c1_349, %c3_350, %c0_351, %c0_352] : memref<3x4x8x8xf32, #tpu.memory_space<vmem>>, vector<1x1x8x8xf32>
    %522 = vector.shape_cast %521 : vector<1x1x8x8xf32> to vector<8x8xf32>
    %523 = vector.shape_cast %520 : vector<8x8xf32> to vector<1x1x8x8xf32>
    tpu.vector_store %arg6[%c1_349, %c3_350, %c0_351, %c0_352], %523 {strides = array<i32>} : memref<3x4x8x8xf32, #tpu.memory_space<vmem>>, vector<1x1x8x8xf32>,
    %524 = vector.extract_strided_slice %479 {offsets = [0, 24], sizes = [8, 8], strides = [1, 1]} : vector<8x32xf32> to vector<8x8xf32>
    %c2_353 = arith.constant 2 : index
    %c3_354 = arith.constant 3 : index
    %c0_355 = arith.constant 0 : index
    %c0_356 = arith.constant 0 : index
    %525 = vector.load %arg6[%c2_353, %c3_354, %c0_355, %c0_356] : memref<3x4x8x8xf32, #tpu.memory_space<vmem>>, vector<1x1x8x8xf32>
    %526 = vector.shape_cast %525 : vector<1x1x8x8xf32> to vector<8x8xf32>
    %527 = vector.shape_cast %524 : vector<8x8xf32> to vector<1x1x8x8xf32>
    tpu.vector_store %arg6[%c2_353, %c3_354, %c0_355, %c0_356], %527 {strides = array<i32>} : memref<3x4x8x8xf32, #tpu.memory_space<vmem>>, vector<1x1x8x8xf32>,
    %c0_357 = arith.constant 0 : index
    %c0_358 = arith.constant 0 : index
    %c0_359 = arith.constant 0 : index
    %c0_360 = arith.constant 0 : index
    %528 = vector.load %arg6[%c0_357, %c0_358, %c0_359, %c0_360] : memref<3x4x8x8xf32, #tpu.memory_space<vmem>>, vector<1x4x8x8xf32>
    %529 = vector.shape_cast %528 : vector<1x4x8x8xf32> to vector<4x8x8xf32>
    %cst_361 = arith.constant 0.353553385 : f32
    %530 = vector.broadcast %cst_361 : f32 to vector<4x8x8xf32>
    %531 = arith.mulf %529, %530 : vector<4x8x8xf32>
    %c1_362 = arith.constant 1 : index
    %c0_363 = arith.constant 0 : index
    %c0_364 = arith.constant 0 : index
    %c0_365 = arith.constant 0 : index
    %532 = vector.load %arg6[%c1_362, %c0_363, %c0_364, %c0_365] : memref<3x4x8x8xf32, #tpu.memory_space<vmem>>, vector<1x4x8x8xf32>
    %533 = vector.shape_cast %532 : vector<1x4x8x8xf32> to vector<4x8x8xf32>
    %c2_366 = arith.constant 2 : index
    %c0_367 = arith.constant 0 : index
    %c0_368 = arith.constant 0 : index
    %c0_369 = arith.constant 0 : index
    %534 = vector.load %arg6[%c2_366, %c0_367, %c0_368, %c0_369] : memref<3x4x8x8xf32, #tpu.memory_space<vmem>>, vector<1x4x8x8xf32>
    %535 = vector.shape_cast %534 : vector<1x4x8x8xf32> to vector<4x8x8xf32>
    %536 = arith.truncf %531 : vector<4x8x8xf32> to vector<4x8x8xbf16>
    %537 = arith.truncf %533 : vector<4x8x8xf32> to vector<4x8x8xbf16>
    "tpu.trace_start"() <{level = 10 : i32, message = "hqd,hkd->hqk"}> : () -> ()
    %cst_370 = arith.constant dense<0.000000e+00> : vector<4x8x8xf32>
    %538 = tpu.matmul %536, %537, %cst_370 {dimension_numbers = #tpu.dot_dimension_numbers<[2], [2], [1], [1], [0, 0, 0, 1, 1, 1], [0], [0]>} : vector<4x8x8xbf16>, vector<4x8x8xbf16>, vector<4x8x8xf32> -> vector<4x8x8xf32>
    "tpu.trace_stop"() : () -> ()
    %cst_371 = arith.constant dense<0xFF800000> : vector<4x8xf32>
    %539 = vector.multi_reduction <maximumf>, %538, %cst_371 [2] : vector<4x8x8xf32> to vector<4x8xf32>
    %540 = vector.shape_cast %539 : vector<4x8xf32> to vector<4x8x1xf32>
    %541 = vector.broadcast %540 : vector<4x8x1xf32> to vector<4x8x8xf32>
    %542 = arith.subf %538, %541 : vector<4x8x8xf32>
    %543 = math.exp %542 : vector<4x8x8xf32>
    %cst_372 = arith.constant dense<0.000000e+00> : vector<4x8xf32>
    %544 = vector.multi_reduction <add>, %543, %cst_372 [2] : vector<4x8x8xf32> to vector<4x8xf32>
    %545 = vector.shape_cast %544 : vector<4x8xf32> to vector<4x8x1xf32>
    %546 = tpu.reciprocal %545 {approx = true} : vector<4x8x1xf32> -> vector<4x8x1xf32>
    %547 = vector.broadcast %546 : vector<4x8x1xf32> to vector<4x8x8xf32>
    %548 = arith.mulf %543, %547 : vector<4x8x8xf32>
    %549 = arith.truncf %548 : vector<4x8x8xf32> to vector<4x8x8xbf16>
    %550 = arith.truncf %535 : vector<4x8x8xf32> to vector<4x8x8xbf16>
    "tpu.trace_start"() <{level = 10 : i32, message = "hqk,hkd->hqd"}> : () -> ()
    %cst_373 = arith.constant dense<0.000000e+00> : vector<4x8x8xf32>
    %551 = tpu.matmul %549, %550, %cst_373 {dimension_numbers = #tpu.dot_dimension_numbers<[2], [1], [1], [2], [0, 0, 0, 1, 1, 2], [0], [0]>} : vector<4x8x8xbf16>, vector<4x8x8xbf16>, vector<4x8x8xf32> -> vector<4x8x8xf32>
    "tpu.trace_stop"() : () -> ()
    %552 = vector.extract_strided_slice %551 {offsets = [0, 0, 0], sizes = [1, 8, 8], strides = [1, 1, 1]} : vector<4x8x8xf32> to vector<1x8x8xf32>
    %553 = vector.shape_cast %552 : vector<1x8x8xf32> to vector<8x8xf32>
    %c0_374 = arith.constant 0 : index
    %c0_375 = arith.constant 0 : index
    %554 = vector.load %arg7[%c0_374, %c0_375] : memref<8x32xf32, #tpu.memory_space<vmem>>, vector<8x8xf32>
    tpu.vector_store %arg7[%c0_374, %c0_375], %553 {strides = array<i32>} : memref<8x32xf32, #tpu.memory_space<vmem>>, vector<8x8xf32>,
    %555 = vector.extract_strided_slice %551 {offsets = [1, 0, 0], sizes = [1, 8, 8], strides = [1, 1, 1]} : vector<4x8x8xf32> to vector<1x8x8xf32>
    %556 = vector.shape_cast %555 : vector<1x8x8xf32> to vector<8x8xf32>
    %c0_376 = arith.constant 0 : index
    %c8_377 = arith.constant 8 : index
    %557 = vector.load %arg7[%c0_376, %c8_377] : memref<8x32xf32, #tpu.memory_space<vmem>>, vector<8x8xf32>
    tpu.vector_store %arg7[%c0_376, %c8_377], %556 {strides = array<i32>} : memref<8x32xf32, #tpu.memory_space<vmem>>, vector<8x8xf32>,
    %558 = vector.extract_strided_slice %551 {offsets = [2, 0, 0], sizes = [1, 8, 8], strides = [1, 1, 1]} : vector<4x8x8xf32> to vector<1x8x8xf32>
    %559 = vector.shape_cast %558 : vector<1x8x8xf32> to vector<8x8xf32>
    %c0_378 = arith.constant 0 : index
    %c16_379 = arith.constant 16 : index
    %560 = vector.load %arg7[%c0_378, %c16_379] : memref<8x32xf32, #tpu.memory_space<vmem>>, vector<8x8xf32>
    tpu.vector_store %arg7[%c0_378, %c16_379], %559 {strides = array<i32>} : memref<8x32xf32, #tpu.memory_space<vmem>>, vector<8x8xf32>,
    %561 = vector.extract_strided_slice %551 {offsets = [3, 0, 0], sizes = [1, 8, 8], strides = [1, 1, 1]} : vector<4x8x8xf32> to vector<1x8x8xf32>
    %562 = vector.shape_cast %561 : vector<1x8x8xf32> to vector<8x8xf32>
    %c0_380 = arith.constant 0 : index
    %c24_381 = arith.constant 24 : index
    %563 = vector.load %arg7[%c0_380, %c24_381] : memref<8x32xf32, #tpu.memory_space<vmem>>, vector<8x8xf32>
    tpu.vector_store %arg7[%c0_380, %c24_381], %562 {strides = array<i32>} : memref<8x32xf32, #tpu.memory_space<vmem>>, vector<8x8xf32>,
    %c0_382 = arith.constant 0 : index
    %c0_383 = arith.constant 0 : index
    %564 = vector.load %arg7[%c0_382, %c0_383] : memref<8x32xf32, #tpu.memory_space<vmem>>, vector<8x32xf32>
    %c0_384 = arith.constant 0 : index
    %c5120 = arith.constant 5120 : index
    %565 = vector.load %arg1[%c0_384, %c5120] : memref<32x10112xbf16, #tpu.memory_space<vmem>>, vector<32x32xbf16>
    %566 = arith.truncf %564 : vector<8x32xf32> to vector<8x32xbf16>
    %cst_385 = arith.constant dense<0.000000e+00> : vector<8x32xf32>
    %567 = tpu.matmul %566, %565, %cst_385 {dimension_numbers = #tpu.dot_dimension_numbers<[1], [0], [0], [1], [0, 0, 1, 1], [], []>} : vector<8x32xbf16>, vector<32x32xbf16>, vector<8x32xf32> -> vector<8x32xf32>
    %c18 = arith.constant 18 : index
    %c0_386 = arith.constant 0 : index
    %568 = vector.load %arg3[%c18, %c0_386] : memref<43x128xf32, #tpu.memory_space<vmem>>, vector<1x32xf32>
    %569 = vector.broadcast %568 : vector<1x32xf32> to vector<8x32xf32>
    %570 = arith.addf %567, %569 : vector<8x32xf32>
    %571 = arith.addf %465, %570 : vector<8x32xf32>
    %cst_387 = arith.constant dense<0.000000e+00> : vector<8xf32>
    %572 = vector.multi_reduction <add>, %571, %cst_387 [1] : vector<8x32xf32> to vector<8xf32>
    %573 = vector.shape_cast %572 : vector<8xf32> to vector<8x1xf32>
    %cst_388 = arith.constant 3.200000e+01 : f32
    %574 = vector.broadcast %cst_388 : f32 to vector<8x1xf32>
    %575 = arith.divf %573, %574 : vector<8x1xf32>
    %576 = vector.broadcast %575 : vector<8x1xf32> to vector<8x32xf32>
    %577 = arith.subf %571, %576 : vector<8x32xf32>
    %578 = arith.mulf %577, %577 : vector<8x32xf32>
    %cst_389 = arith.constant dense<0.000000e+00> : vector<8xf32>
    %579 = vector.multi_reduction <add>, %578, %cst_389 [1] : vector<8x32xf32> to vector<8xf32>
    %580 = vector.shape_cast %579 : vector<8xf32> to vector<8x1xf32>
    %cst_390 = arith.constant 3.200000e+01 : f32
    %581 = vector.broadcast %cst_390 : f32 to vector<8x1xf32>
    %582 = arith.divf %580, %581 : vector<8x1xf32>
    %cst_391 = arith.constant 9.99999974E-6 : f32
    %583 = vector.broadcast %cst_391 : f32 to vector<8x1xf32>
    %584 = arith.addf %582, %583 : vector<8x1xf32>
    %585 = math.rsqrt %584 : vector<8x1xf32>
    %586 = vector.broadcast %585 : vector<8x1xf32> to vector<8x32xf32>
    %587 = arith.mulf %577, %586 : vector<8x32xf32>
    %c22 = arith.constant 22 : index
    %c0_392 = arith.constant 0 : index
    %588 = vector.load %arg3[%c22, %c0_392] : memref<43x128xf32, #tpu.memory_space<vmem>>, vector<1x32xf32>
    %589 = vector.broadcast %588 : vector<1x32xf32> to vector<8x32xf32>
    %590 = arith.mulf %587, %589 : vector<8x32xf32>
    %c23 = arith.constant 23 : index
    %c0_393 = arith.constant 0 : index
    %591 = vector.load %arg3[%c23, %c0_393] : memref<43x128xf32, #tpu.memory_space<vmem>>, vector<1x32xf32>
    %592 = vector.broadcast %591 : vector<1x32xf32> to vector<8x32xf32>
    %593 = arith.addf %590, %592 : vector<8x32xf32>
    %c0_394 = arith.constant 0 : index
    %c5248 = arith.constant 5248 : index
    %594 = vector.load %arg1[%c0_394, %c5248] : memref<32x10112xbf16, #tpu.memory_space<vmem>>, vector<32x2048xbf16>
    %595 = arith.truncf %593 : vector<8x32xf32> to vector<8x32xbf16>
    %cst_395 = arith.constant dense<0.000000e+00> : vector<8x2048xf32>
    %596 = tpu.matmul %595, %594, %cst_395 {dimension_numbers = #tpu.dot_dimension_numbers<[1], [0], [0], [1], [0, 0, 1, 1], [], []>} : vector<8x32xbf16>, vector<32x2048xbf16>, vector<8x2048xf32> -> vector<8x2048xf32>
    %c2_396 = arith.constant 2 : index
    %c0_397 = arith.constant 0 : index
    %597 = vector.load %arg4[%c2_396, %c0_397] : memref<4x2048xf32, #tpu.memory_space<vmem>>, vector<1x2048xf32>
    %598 = vector.broadcast %597 : vector<1x2048xf32> to vector<8x2048xf32>
    %599 = arith.addf %596, %598 : vector<8x2048xf32>
    %cst_398 = arith.constant 0.000000e+00 : f32
    %600 = vector.broadcast %cst_398 : f32 to vector<8x2048xf32>
    %601 = arith.maximumf %599, %600 : vector<8x2048xf32>
    %602 = arith.truncf %601 : vector<8x2048xf32> to vector<8x2048xbf16>
    %c4096 = arith.constant 4096 : index
    %c0_399 = arith.constant 0 : index
    %603 = vector.load %arg2[%c4096, %c0_399] : memref<8192x32xbf16, #tpu.memory_space<vmem>>, vector<2048x32xbf16>
    %cst_400 = arith.constant dense<0.000000e+00> : vector<8x32xf32>
    %604 = tpu.matmul %602, %603, %cst_400 {dimension_numbers = #tpu.dot_dimension_numbers<[1], [0], [0], [1], [0, 0, 1, 1], [], []>} : vector<8x2048xbf16>, vector<2048x32xbf16>, vector<8x32xf32> -> vector<8x32xf32>
    %c19 = arith.constant 19 : index
    %c0_401 = arith.constant 0 : index
    %605 = vector.load %arg3[%c19, %c0_401] : memref<43x128xf32, #tpu.memory_space<vmem>>, vector<1x32xf32>
    %606 = vector.broadcast %605 : vector<1x32xf32> to vector<8x32xf32>
    %607 = arith.addf %604, %606 : vector<8x32xf32>
    %608 = arith.addf %593, %607 : vector<8x32xf32>
    %cst_402 = arith.constant dense<0.000000e+00> : vector<8xf32>
    %609 = vector.multi_reduction <add>, %608, %cst_402 [1] : vector<8x32xf32> to vector<8xf32>
    %610 = vector.shape_cast %609 : vector<8xf32> to vector<8x1xf32>
    %cst_403 = arith.constant 3.200000e+01 : f32
    %611 = vector.broadcast %cst_403 : f32 to vector<8x1xf32>
    %612 = arith.divf %610, %611 : vector<8x1xf32>
    %613 = vector.broadcast %612 : vector<8x1xf32> to vector<8x32xf32>
    %614 = arith.subf %608, %613 : vector<8x32xf32>
    %615 = arith.mulf %614, %614 : vector<8x32xf32>
    %cst_404 = arith.constant dense<0.000000e+00> : vector<8xf32>
    %616 = vector.multi_reduction <add>, %615, %cst_404 [1] : vector<8x32xf32> to vector<8xf32>
    %617 = vector.shape_cast %616 : vector<8xf32> to vector<8x1xf32>
    %cst_405 = arith.constant 3.200000e+01 : f32
    %618 = vector.broadcast %cst_405 : f32 to vector<8x1xf32>
    %619 = arith.divf %617, %618 : vector<8x1xf32>
    %cst_406 = arith.constant 9.99999974E-6 : f32
    %620 = vector.broadcast %cst_406 : f32 to vector<8x1xf32>
    %621 = arith.addf %619, %620 : vector<8x1xf32>
    %622 = math.rsqrt %621 : vector<8x1xf32>
    %623 = vector.broadcast %622 : vector<8x1xf32> to vector<8x32xf32>
    %624 = arith.mulf %614, %623 : vector<8x32xf32>
    %c24_407 = arith.constant 24 : index
    %c0_408 = arith.constant 0 : index
    %625 = vector.load %arg3[%c24_407, %c0_408] : memref<43x128xf32, #tpu.memory_space<vmem>>, vector<1x32xf32>
    %626 = vector.broadcast %625 : vector<1x32xf32> to vector<8x32xf32>
    %627 = arith.mulf %624, %626 : vector<8x32xf32>
    %c25 = arith.constant 25 : index
    %c0_409 = arith.constant 0 : index
    %628 = vector.load %arg3[%c25, %c0_409] : memref<43x128xf32, #tpu.memory_space<vmem>>, vector<1x32xf32>
    %629 = vector.broadcast %628 : vector<1x32xf32> to vector<8x32xf32>
    %630 = arith.addf %627, %629 : vector<8x32xf32>
    %c0_410 = arith.constant 0 : index
    %c7296 = arith.constant 7296 : index
    %631 = vector.load %arg1[%c0_410, %c7296] : memref<32x10112xbf16, #tpu.memory_space<vmem>>, vector<32x96xbf16>
    %632 = arith.truncf %630 : vector<8x32xf32> to vector<8x32xbf16>
    %cst_411 = arith.constant dense<0.000000e+00> : vector<8x96xf32>
    %633 = tpu.matmul %632, %631, %cst_411 {dimension_numbers = #tpu.dot_dimension_numbers<[1], [0], [0], [1], [0, 0, 1, 1], [], []>} : vector<8x32xbf16>, vector<32x96xbf16>, vector<8x96xf32> -> vector<8x96xf32>
    %c26 = arith.constant 26 : index
    %c0_412 = arith.constant 0 : index
    %634 = vector.load %arg3[%c26, %c0_412] : memref<43x128xf32, #tpu.memory_space<vmem>>, vector<1x96xf32>
    %635 = vector.broadcast %634 : vector<1x96xf32> to vector<8x96xf32>
    %636 = arith.addf %633, %635 : vector<8x96xf32>
    %637 = vector.extract_strided_slice %636 {offsets = [0, 0], sizes = [8, 32], strides = [1, 1]} : vector<8x96xf32> to vector<8x32xf32>
    %638 = vector.extract_strided_slice %636 {offsets = [0, 32], sizes = [8, 32], strides = [1, 1]} : vector<8x96xf32> to vector<8x32xf32>
    %639 = vector.extract_strided_slice %636 {offsets = [0, 64], sizes = [8, 32], strides = [1, 1]} : vector<8x96xf32> to vector<8x32xf32>
    %640 = vector.extract_strided_slice %637 {offsets = [0, 0], sizes = [8, 8], strides = [1, 1]} : vector<8x32xf32> to vector<8x8xf32>
    %c0_413 = arith.constant 0 : index
    %c0_414 = arith.constant 0 : index
    %c0_415 = arith.constant 0 : index
    %c0_416 = arith.constant 0 : index
    %641 = vector.load %arg6[%c0_413, %c0_414, %c0_415, %c0_416] : memref<3x4x8x8xf32, #tpu.memory_space<vmem>>, vector<1x1x8x8xf32>
    %642 = vector.shape_cast %641 : vector<1x1x8x8xf32> to vector<8x8xf32>
    %643 = vector.shape_cast %640 : vector<8x8xf32> to vector<1x1x8x8xf32>
    tpu.vector_store %arg6[%c0_413, %c0_414, %c0_415, %c0_416], %643 {strides = array<i32>} : memref<3x4x8x8xf32, #tpu.memory_space<vmem>>, vector<1x1x8x8xf32>,
    %644 = vector.extract_strided_slice %638 {offsets = [0, 0], sizes = [8, 8], strides = [1, 1]} : vector<8x32xf32> to vector<8x8xf32>
    %c1_417 = arith.constant 1 : index
    %c0_418 = arith.constant 0 : index
    %c0_419 = arith.constant 0 : index
    %c0_420 = arith.constant 0 : index
    %645 = vector.load %arg6[%c1_417, %c0_418, %c0_419, %c0_420] : memref<3x4x8x8xf32, #tpu.memory_space<vmem>>, vector<1x1x8x8xf32>
    %646 = vector.shape_cast %645 : vector<1x1x8x8xf32> to vector<8x8xf32>
    %647 = vector.shape_cast %644 : vector<8x8xf32> to vector<1x1x8x8xf32>
    tpu.vector_store %arg6[%c1_417, %c0_418, %c0_419, %c0_420], %647 {strides = array<i32>} : memref<3x4x8x8xf32, #tpu.memory_space<vmem>>, vector<1x1x8x8xf32>,
    %648 = vector.extract_strided_slice %639 {offsets = [0, 0], sizes = [8, 8], strides = [1, 1]} : vector<8x32xf32> to vector<8x8xf32>
    %c2_421 = arith.constant 2 : index
    %c0_422 = arith.constant 0 : index
    %c0_423 = arith.constant 0 : index
    %c0_424 = arith.constant 0 : index
    %649 = vector.load %arg6[%c2_421, %c0_422, %c0_423, %c0_424] : memref<3x4x8x8xf32, #tpu.memory_space<vmem>>, vector<1x1x8x8xf32>
    %650 = vector.shape_cast %649 : vector<1x1x8x8xf32> to vector<8x8xf32>
    %651 = vector.shape_cast %648 : vector<8x8xf32> to vector<1x1x8x8xf32>
    tpu.vector_store %arg6[%c2_421, %c0_422, %c0_423, %c0_424], %651 {strides = array<i32>} : memref<3x4x8x8xf32, #tpu.memory_space<vmem>>, vector<1x1x8x8xf32>,
    %652 = vector.extract_strided_slice %637 {offsets = [0, 8], sizes = [8, 8], strides = [1, 1]} : vector<8x32xf32> to vector<8x8xf32>
    %c0_425 = arith.constant 0 : index
    %c1_426 = arith.constant 1 : index
    %c0_427 = arith.constant 0 : index
    %c0_428 = arith.constant 0 : index
    %653 = vector.load %arg6[%c0_425, %c1_426, %c0_427, %c0_428] : memref<3x4x8x8xf32, #tpu.memory_space<vmem>>, vector<1x1x8x8xf32>
    %654 = vector.shape_cast %653 : vector<1x1x8x8xf32> to vector<8x8xf32>
    %655 = vector.shape_cast %652 : vector<8x8xf32> to vector<1x1x8x8xf32>
    tpu.vector_store %arg6[%c0_425, %c1_426, %c0_427, %c0_428], %655 {strides = array<i32>} : memref<3x4x8x8xf32, #tpu.memory_space<vmem>>, vector<1x1x8x8xf32>,
    %656 = vector.extract_strided_slice %638 {offsets = [0, 8], sizes = [8, 8], strides = [1, 1]} : vector<8x32xf32> to vector<8x8xf32>
    %c1_429 = arith.constant 1 : index
    %c1_430 = arith.constant 1 : index
    %c0_431 = arith.constant 0 : index
    %c0_432 = arith.constant 0 : index
    %657 = vector.load %arg6[%c1_429, %c1_430, %c0_431, %c0_432] : memref<3x4x8x8xf32, #tpu.memory_space<vmem>>, vector<1x1x8x8xf32>
    %658 = vector.shape_cast %657 : vector<1x1x8x8xf32> to vector<8x8xf32>
    %659 = vector.shape_cast %656 : vector<8x8xf32> to vector<1x1x8x8xf32>
    tpu.vector_store %arg6[%c1_429, %c1_430, %c0_431, %c0_432], %659 {strides = array<i32>} : memref<3x4x8x8xf32, #tpu.memory_space<vmem>>, vector<1x1x8x8xf32>,
    %660 = vector.extract_strided_slice %639 {offsets = [0, 8], sizes = [8, 8], strides = [1, 1]} : vector<8x32xf32> to vector<8x8xf32>
    %c2_433 = arith.constant 2 : index
    %c1_434 = arith.constant 1 : index
    %c0_435 = arith.constant 0 : index
    %c0_436 = arith.constant 0 : index
    %661 = vector.load %arg6[%c2_433, %c1_434, %c0_435, %c0_436] : memref<3x4x8x8xf32, #tpu.memory_space<vmem>>, vector<1x1x8x8xf32>
    %662 = vector.shape_cast %661 : vector<1x1x8x8xf32> to vector<8x8xf32>
    %663 = vector.shape_cast %660 : vector<8x8xf32> to vector<1x1x8x8xf32>
    tpu.vector_store %arg6[%c2_433, %c1_434, %c0_435, %c0_436], %663 {strides = array<i32>} : memref<3x4x8x8xf32, #tpu.memory_space<vmem>>, vector<1x1x8x8xf32>,
    %664 = vector.extract_strided_slice %637 {offsets = [0, 16], sizes = [8, 8], strides = [1, 1]} : vector<8x32xf32> to vector<8x8xf32>
    %c0_437 = arith.constant 0 : index
    %c2_438 = arith.constant 2 : index
    %c0_439 = arith.constant 0 : index
    %c0_440 = arith.constant 0 : index
    %665 = vector.load %arg6[%c0_437, %c2_438, %c0_439, %c0_440] : memref<3x4x8x8xf32, #tpu.memory_space<vmem>>, vector<1x1x8x8xf32>
    %666 = vector.shape_cast %665 : vector<1x1x8x8xf32> to vector<8x8xf32>
    %667 = vector.shape_cast %664 : vector<8x8xf32> to vector<1x1x8x8xf32>
    tpu.vector_store %arg6[%c0_437, %c2_438, %c0_439, %c0_440], %667 {strides = array<i32>} : memref<3x4x8x8xf32, #tpu.memory_space<vmem>>, vector<1x1x8x8xf32>,
    %668 = vector.extract_strided_slice %638 {offsets = [0, 16], sizes = [8, 8], strides = [1, 1]} : vector<8x32xf32> to vector<8x8xf32>
    %c1_441 = arith.constant 1 : index
    %c2_442 = arith.constant 2 : index
    %c0_443 = arith.constant 0 : index
    %c0_444 = arith.constant 0 : index
    %669 = vector.load %arg6[%c1_441, %c2_442, %c0_443, %c0_444] : memref<3x4x8x8xf32, #tpu.memory_space<vmem>>, vector<1x1x8x8xf32>
    %670 = vector.shape_cast %669 : vector<1x1x8x8xf32> to vector<8x8xf32>
    %671 = vector.shape_cast %668 : vector<8x8xf32> to vector<1x1x8x8xf32>
    tpu.vector_store %arg6[%c1_441, %c2_442, %c0_443, %c0_444], %671 {strides = array<i32>} : memref<3x4x8x8xf32, #tpu.memory_space<vmem>>, vector<1x1x8x8xf32>,
    %672 = vector.extract_strided_slice %639 {offsets = [0, 16], sizes = [8, 8], strides = [1, 1]} : vector<8x32xf32> to vector<8x8xf32>
    %c2_445 = arith.constant 2 : index
    %c2_446 = arith.constant 2 : index
    %c0_447 = arith.constant 0 : index
    %c0_448 = arith.constant 0 : index
    %673 = vector.load %arg6[%c2_445, %c2_446, %c0_447, %c0_448] : memref<3x4x8x8xf32, #tpu.memory_space<vmem>>, vector<1x1x8x8xf32>
    %674 = vector.shape_cast %673 : vector<1x1x8x8xf32> to vector<8x8xf32>
    %675 = vector.shape_cast %672 : vector<8x8xf32> to vector<1x1x8x8xf32>
    tpu.vector_store %arg6[%c2_445, %c2_446, %c0_447, %c0_448], %675 {strides = array<i32>} : memref<3x4x8x8xf32, #tpu.memory_space<vmem>>, vector<1x1x8x8xf32>,
    %676 = vector.extract_strided_slice %637 {offsets = [0, 24], sizes = [8, 8], strides = [1, 1]} : vector<8x32xf32> to vector<8x8xf32>
    %c0_449 = arith.constant 0 : index
    %c3_450 = arith.constant 3 : index
    %c0_451 = arith.constant 0 : index
    %c0_452 = arith.constant 0 : index
    %677 = vector.load %arg6[%c0_449, %c3_450, %c0_451, %c0_452] : memref<3x4x8x8xf32, #tpu.memory_space<vmem>>, vector<1x1x8x8xf32>
    %678 = vector.shape_cast %677 : vector<1x1x8x8xf32> to vector<8x8xf32>
    %679 = vector.shape_cast %676 : vector<8x8xf32> to vector<1x1x8x8xf32>
    tpu.vector_store %arg6[%c0_449, %c3_450, %c0_451, %c0_452], %679 {strides = array<i32>} : memref<3x4x8x8xf32, #tpu.memory_space<vmem>>, vector<1x1x8x8xf32>,
    %680 = vector.extract_strided_slice %638 {offsets = [0, 24], sizes = [8, 8], strides = [1, 1]} : vector<8x32xf32> to vector<8x8xf32>
    %c1_453 = arith.constant 1 : index
    %c3_454 = arith.constant 3 : index
    %c0_455 = arith.constant 0 : index
    %c0_456 = arith.constant 0 : index
    %681 = vector.load %arg6[%c1_453, %c3_454, %c0_455, %c0_456] : memref<3x4x8x8xf32, #tpu.memory_space<vmem>>, vector<1x1x8x8xf32>
    %682 = vector.shape_cast %681 : vector<1x1x8x8xf32> to vector<8x8xf32>
    %683 = vector.shape_cast %680 : vector<8x8xf32> to vector<1x1x8x8xf32>
    tpu.vector_store %arg6[%c1_453, %c3_454, %c0_455, %c0_456], %683 {strides = array<i32>} : memref<3x4x8x8xf32, #tpu.memory_space<vmem>>, vector<1x1x8x8xf32>,
    %684 = vector.extract_strided_slice %639 {offsets = [0, 24], sizes = [8, 8], strides = [1, 1]} : vector<8x32xf32> to vector<8x8xf32>
    %c2_457 = arith.constant 2 : index
    %c3_458 = arith.constant 3 : index
    %c0_459 = arith.constant 0 : index
    %c0_460 = arith.constant 0 : index
    %685 = vector.load %arg6[%c2_457, %c3_458, %c0_459, %c0_460] : memref<3x4x8x8xf32, #tpu.memory_space<vmem>>, vector<1x1x8x8xf32>
    %686 = vector.shape_cast %685 : vector<1x1x8x8xf32> to vector<8x8xf32>
    %687 = vector.shape_cast %684 : vector<8x8xf32> to vector<1x1x8x8xf32>
    tpu.vector_store %arg6[%c2_457, %c3_458, %c0_459, %c0_460], %687 {strides = array<i32>} : memref<3x4x8x8xf32, #tpu.memory_space<vmem>>, vector<1x1x8x8xf32>,
    %c0_461 = arith.constant 0 : index
    %c0_462 = arith.constant 0 : index
    %c0_463 = arith.constant 0 : index
    %c0_464 = arith.constant 0 : index
    %688 = vector.load %arg6[%c0_461, %c0_462, %c0_463, %c0_464] : memref<3x4x8x8xf32, #tpu.memory_space<vmem>>, vector<1x4x8x8xf32>
    %689 = vector.shape_cast %688 : vector<1x4x8x8xf32> to vector<4x8x8xf32>
    %cst_465 = arith.constant 0.353553385 : f32
    %690 = vector.broadcast %cst_465 : f32 to vector<4x8x8xf32>
    %691 = arith.mulf %689, %690 : vector<4x8x8xf32>
    %c1_466 = arith.constant 1 : index
    %c0_467 = arith.constant 0 : index
    %c0_468 = arith.constant 0 : index
    %c0_469 = arith.constant 0 : index
    %692 = vector.load %arg6[%c1_466, %c0_467, %c0_468, %c0_469] : memref<3x4x8x8xf32, #tpu.memory_space<vmem>>, vector<1x4x8x8xf32>
    %693 = vector.shape_cast %692 : vector<1x4x8x8xf32> to vector<4x8x8xf32>
    %c2_470 = arith.constant 2 : index
    %c0_471 = arith.constant 0 : index
    %c0_472 = arith.constant 0 : index
    %c0_473 = arith.constant 0 : index
    %694 = vector.load %arg6[%c2_470, %c0_471, %c0_472, %c0_473] : memref<3x4x8x8xf32, #tpu.memory_space<vmem>>, vector<1x4x8x8xf32>
    %695 = vector.shape_cast %694 : vector<1x4x8x8xf32> to vector<4x8x8xf32>
    %696 = arith.truncf %691 : vector<4x8x8xf32> to vector<4x8x8xbf16>
    %697 = arith.truncf %693 : vector<4x8x8xf32> to vector<4x8x8xbf16>
    "tpu.trace_start"() <{level = 10 : i32, message = "hqd,hkd->hqk"}> : () -> ()
    %cst_474 = arith.constant dense<0.000000e+00> : vector<4x8x8xf32>
    %698 = tpu.matmul %696, %697, %cst_474 {dimension_numbers = #tpu.dot_dimension_numbers<[2], [2], [1], [1], [0, 0, 0, 1, 1, 1], [0], [0]>} : vector<4x8x8xbf16>, vector<4x8x8xbf16>, vector<4x8x8xf32> -> vector<4x8x8xf32>
    "tpu.trace_stop"() : () -> ()
    %cst_475 = arith.constant dense<0xFF800000> : vector<4x8xf32>
    %699 = vector.multi_reduction <maximumf>, %698, %cst_475 [2] : vector<4x8x8xf32> to vector<4x8xf32>
    %700 = vector.shape_cast %699 : vector<4x8xf32> to vector<4x8x1xf32>
    %701 = vector.broadcast %700 : vector<4x8x1xf32> to vector<4x8x8xf32>
    %702 = arith.subf %698, %701 : vector<4x8x8xf32>
    %703 = math.exp %702 : vector<4x8x8xf32>
    %cst_476 = arith.constant dense<0.000000e+00> : vector<4x8xf32>
    %704 = vector.multi_reduction <add>, %703, %cst_476 [2] : vector<4x8x8xf32> to vector<4x8xf32>
    %705 = vector.shape_cast %704 : vector<4x8xf32> to vector<4x8x1xf32>
    %706 = tpu.reciprocal %705 {approx = true} : vector<4x8x1xf32> -> vector<4x8x1xf32>
    %707 = vector.broadcast %706 : vector<4x8x1xf32> to vector<4x8x8xf32>
    %708 = arith.mulf %703, %707 : vector<4x8x8xf32>
    %709 = arith.truncf %708 : vector<4x8x8xf32> to vector<4x8x8xbf16>
    %710 = arith.truncf %695 : vector<4x8x8xf32> to vector<4x8x8xbf16>
    "tpu.trace_start"() <{level = 10 : i32, message = "hqk,hkd->hqd"}> : () -> ()
    %cst_477 = arith.constant dense<0.000000e+00> : vector<4x8x8xf32>
    %711 = tpu.matmul %709, %710, %cst_477 {dimension_numbers = #tpu.dot_dimension_numbers<[2], [1], [1], [2], [0, 0, 0, 1, 1, 2], [0], [0]>} : vector<4x8x8xbf16>, vector<4x8x8xbf16>, vector<4x8x8xf32> -> vector<4x8x8xf32>
    "tpu.trace_stop"() : () -> ()
    %712 = vector.extract_strided_slice %711 {offsets = [0, 0, 0], sizes = [1, 8, 8], strides = [1, 1, 1]} : vector<4x8x8xf32> to vector<1x8x8xf32>
    %713 = vector.shape_cast %712 : vector<1x8x8xf32> to vector<8x8xf32>
    %c0_478 = arith.constant 0 : index
    %c0_479 = arith.constant 0 : index
    %714 = vector.load %arg7[%c0_478, %c0_479] : memref<8x32xf32, #tpu.memory_space<vmem>>, vector<8x8xf32>
    tpu.vector_store %arg7[%c0_478, %c0_479], %713 {strides = array<i32>} : memref<8x32xf32, #tpu.memory_space<vmem>>, vector<8x8xf32>,
    %715 = vector.extract_strided_slice %711 {offsets = [1, 0, 0], sizes = [1, 8, 8], strides = [1, 1, 1]} : vector<4x8x8xf32> to vector<1x8x8xf32>
    %716 = vector.shape_cast %715 : vector<1x8x8xf32> to vector<8x8xf32>
    %c0_480 = arith.constant 0 : index
    %c8_481 = arith.constant 8 : index
    %717 = vector.load %arg7[%c0_480, %c8_481] : memref<8x32xf32, #tpu.memory_space<vmem>>, vector<8x8xf32>
    tpu.vector_store %arg7[%c0_480, %c8_481], %716 {strides = array<i32>} : memref<8x32xf32, #tpu.memory_space<vmem>>, vector<8x8xf32>,
    %718 = vector.extract_strided_slice %711 {offsets = [2, 0, 0], sizes = [1, 8, 8], strides = [1, 1, 1]} : vector<4x8x8xf32> to vector<1x8x8xf32>
    %719 = vector.shape_cast %718 : vector<1x8x8xf32> to vector<8x8xf32>
    %c0_482 = arith.constant 0 : index
    %c16_483 = arith.constant 16 : index
    %720 = vector.load %arg7[%c0_482, %c16_483] : memref<8x32xf32, #tpu.memory_space<vmem>>, vector<8x8xf32>
    tpu.vector_store %arg7[%c0_482, %c16_483], %719 {strides = array<i32>} : memref<8x32xf32, #tpu.memory_space<vmem>>, vector<8x8xf32>,
    %721 = vector.extract_strided_slice %711 {offsets = [3, 0, 0], sizes = [1, 8, 8], strides = [1, 1, 1]} : vector<4x8x8xf32> to vector<1x8x8xf32>
    %722 = vector.shape_cast %721 : vector<1x8x8xf32> to vector<8x8xf32>
    %c0_484 = arith.constant 0 : index
    %c24_485 = arith.constant 24 : index
    %723 = vector.load %arg7[%c0_484, %c24_485] : memref<8x32xf32, #tpu.memory_space<vmem>>, vector<8x8xf32>
    tpu.vector_store %arg7[%c0_484, %c24_485], %722 {strides = array<i32>} : memref<8x32xf32, #tpu.memory_space<vmem>>, vector<8x8xf32>,
    %c0_486 = arith.constant 0 : index
    %c0_487 = arith.constant 0 : index
    %724 = vector.load %arg7[%c0_486, %c0_487] : memref<8x32xf32, #tpu.memory_space<vmem>>, vector<8x32xf32>
    %c0_488 = arith.constant 0 : index
    %c7424 = arith.constant 7424 : index
    %725 = vector.load %arg1[%c0_488, %c7424] : memref<32x10112xbf16, #tpu.memory_space<vmem>>, vector<32x32xbf16>
    %726 = arith.truncf %724 : vector<8x32xf32> to vector<8x32xbf16>
    %cst_489 = arith.constant dense<0.000000e+00> : vector<8x32xf32>
    %727 = tpu.matmul %726, %725, %cst_489 {dimension_numbers = #tpu.dot_dimension_numbers<[1], [0], [0], [1], [0, 0, 1, 1], [], []>} : vector<8x32xbf16>, vector<32x32xbf16>, vector<8x32xf32> -> vector<8x32xf32>
    %c27 = arith.constant 27 : index
    %c0_490 = arith.constant 0 : index
    %728 = vector.load %arg3[%c27, %c0_490] : memref<43x128xf32, #tpu.memory_space<vmem>>, vector<1x32xf32>
    %729 = vector.broadcast %728 : vector<1x32xf32> to vector<8x32xf32>
    %730 = arith.addf %727, %729 : vector<8x32xf32>
    %731 = arith.addf %630, %730 : vector<8x32xf32>
    %cst_491 = arith.constant dense<0.000000e+00> : vector<8xf32>
    %732 = vector.multi_reduction <add>, %731, %cst_491 [1] : vector<8x32xf32> to vector<8xf32>
    %733 = vector.shape_cast %732 : vector<8xf32> to vector<8x1xf32>
    %cst_492 = arith.constant 3.200000e+01 : f32
    %734 = vector.broadcast %cst_492 : f32 to vector<8x1xf32>
    %735 = arith.divf %733, %734 : vector<8x1xf32>
    %736 = vector.broadcast %735 : vector<8x1xf32> to vector<8x32xf32>
    %737 = arith.subf %731, %736 : vector<8x32xf32>
    %738 = arith.mulf %737, %737 : vector<8x32xf32>
    %cst_493 = arith.constant dense<0.000000e+00> : vector<8xf32>
    %739 = vector.multi_reduction <add>, %738, %cst_493 [1] : vector<8x32xf32> to vector<8xf32>
    %740 = vector.shape_cast %739 : vector<8xf32> to vector<8x1xf32>
    %cst_494 = arith.constant 3.200000e+01 : f32
    %741 = vector.broadcast %cst_494 : f32 to vector<8x1xf32>
    %742 = arith.divf %740, %741 : vector<8x1xf32>
    %cst_495 = arith.constant 9.99999974E-6 : f32
    %743 = vector.broadcast %cst_495 : f32 to vector<8x1xf32>
    %744 = arith.addf %742, %743 : vector<8x1xf32>
    %745 = math.rsqrt %744 : vector<8x1xf32>
    %746 = vector.broadcast %745 : vector<8x1xf32> to vector<8x32xf32>
    %747 = arith.mulf %737, %746 : vector<8x32xf32>
    %c32 = arith.constant 32 : index
    %c0_496 = arith.constant 0 : index
    %748 = vector.load %arg3[%c32, %c0_496] : memref<43x128xf32, #tpu.memory_space<vmem>>, vector<1x32xf32>
    %749 = vector.broadcast %748 : vector<1x32xf32> to vector<8x32xf32>
    %750 = arith.mulf %747, %749 : vector<8x32xf32>
    %c33 = arith.constant 33 : index
    %c0_497 = arith.constant 0 : index
    %751 = vector.load %arg3[%c33, %c0_497] : memref<43x128xf32, #tpu.memory_space<vmem>>, vector<1x32xf32>
    %752 = vector.broadcast %751 : vector<1x32xf32> to vector<8x32xf32>
    %753 = arith.addf %750, %752 : vector<8x32xf32>
    %c0_498 = arith.constant 0 : index
    %c7552 = arith.constant 7552 : index
    %754 = vector.load %arg1[%c0_498, %c7552] : memref<32x10112xbf16, #tpu.memory_space<vmem>>, vector<32x32xbf16>
    %755 = arith.truncf %753 : vector<8x32xf32> to vector<8x32xbf16>
    %cst_499 = arith.constant dense<0.000000e+00> : vector<8x32xf32>
    %756 = tpu.matmul %755, %754, %cst_499 {dimension_numbers = #tpu.dot_dimension_numbers<[1], [0], [0], [1], [0, 0, 1, 1], [], []>} : vector<8x32xbf16>, vector<32x32xbf16>, vector<8x32xf32> -> vector<8x32xf32>
    %c28 = arith.constant 28 : index
    %c0_500 = arith.constant 0 : index
    %757 = vector.load %arg3[%c28, %c0_500] : memref<43x128xf32, #tpu.memory_space<vmem>>, vector<1x32xf32>
    %758 = vector.broadcast %757 : vector<1x32xf32> to vector<8x32xf32>
    %759 = arith.addf %756, %758 : vector<8x32xf32>
    %c0_501 = arith.constant 0 : index
    %c7680 = arith.constant 7680 : index
    %760 = vector.load %arg1[%c0_501, %c7680] : memref<32x10112xbf16, #tpu.memory_space<vmem>>, vector<32x64xbf16>
    %761 = arith.truncf %342 : vector<8x32xf32> to vector<8x32xbf16>
    %cst_502 = arith.constant dense<0.000000e+00> : vector<8x64xf32>
    %762 = tpu.matmul %761, %760, %cst_502 {dimension_numbers = #tpu.dot_dimension_numbers<[1], [0], [0], [1], [0, 0, 1, 1], [], []>} : vector<8x32xbf16>, vector<32x64xbf16>, vector<8x64xf32> -> vector<8x64xf32>
    %c29 = arith.constant 29 : index
    %c0_503 = arith.constant 0 : index
    %763 = vector.load %arg3[%c29, %c0_503] : memref<43x128xf32, #tpu.memory_space<vmem>>, vector<1x64xf32>
    %764 = vector.broadcast %763 : vector<1x64xf32> to vector<8x64xf32>
    %765 = arith.addf %762, %764 : vector<8x64xf32>
    %766 = vector.extract_strided_slice %765 {offsets = [0, 0], sizes = [8, 32], strides = [1, 1]} : vector<8x64xf32> to vector<8x32xf32>
    %767 = vector.extract_strided_slice %765 {offsets = [0, 32], sizes = [8, 32], strides = [1, 1]} : vector<8x64xf32> to vector<8x32xf32>
    %768 = vector.extract_strided_slice %759 {offsets = [0, 0], sizes = [8, 8], strides = [1, 1]} : vector<8x32xf32> to vector<8x8xf32>
    %c0_504 = arith.constant 0 : index
    %c0_505 = arith.constant 0 : index
    %c0_506 = arith.constant 0 : index
    %c0_507 = arith.constant 0 : index
    %769 = vector.load %arg6[%c0_504, %c0_505, %c0_506, %c0_507] : memref<3x4x8x8xf32, #tpu.memory_space<vmem>>, vector<1x1x8x8xf32>
    %770 = vector.shape_cast %769 : vector<1x1x8x8xf32> to vector<8x8xf32>
    %771 = vector.shape_cast %768 : vector<8x8xf32> to vector<1x1x8x8xf32>
    tpu.vector_store %arg6[%c0_504, %c0_505, %c0_506, %c0_507], %771 {strides = array<i32>} : memref<3x4x8x8xf32, #tpu.memory_space<vmem>>, vector<1x1x8x8xf32>,
    %772 = vector.extract_strided_slice %766 {offsets = [0, 0], sizes = [8, 8], strides = [1, 1]} : vector<8x32xf32> to vector<8x8xf32>
    %c1_508 = arith.constant 1 : index
    %c0_509 = arith.constant 0 : index
    %c0_510 = arith.constant 0 : index
    %c0_511 = arith.constant 0 : index
    %773 = vector.load %arg6[%c1_508, %c0_509, %c0_510, %c0_511] : memref<3x4x8x8xf32, #tpu.memory_space<vmem>>, vector<1x1x8x8xf32>
    %774 = vector.shape_cast %773 : vector<1x1x8x8xf32> to vector<8x8xf32>
    %775 = vector.shape_cast %772 : vector<8x8xf32> to vector<1x1x8x8xf32>
    tpu.vector_store %arg6[%c1_508, %c0_509, %c0_510, %c0_511], %775 {strides = array<i32>} : memref<3x4x8x8xf32, #tpu.memory_space<vmem>>, vector<1x1x8x8xf32>,
    %776 = vector.extract_strided_slice %767 {offsets = [0, 0], sizes = [8, 8], strides = [1, 1]} : vector<8x32xf32> to vector<8x8xf32>
    %c2_512 = arith.constant 2 : index
    %c0_513 = arith.constant 0 : index
    %c0_514 = arith.constant 0 : index
    %c0_515 = arith.constant 0 : index
    %777 = vector.load %arg6[%c2_512, %c0_513, %c0_514, %c0_515] : memref<3x4x8x8xf32, #tpu.memory_space<vmem>>, vector<1x1x8x8xf32>
    %778 = vector.shape_cast %777 : vector<1x1x8x8xf32> to vector<8x8xf32>
    %779 = vector.shape_cast %776 : vector<8x8xf32> to vector<1x1x8x8xf32>
    tpu.vector_store %arg6[%c2_512, %c0_513, %c0_514, %c0_515], %779 {strides = array<i32>} : memref<3x4x8x8xf32, #tpu.memory_space<vmem>>, vector<1x1x8x8xf32>,
    %780 = vector.extract_strided_slice %759 {offsets = [0, 8], sizes = [8, 8], strides = [1, 1]} : vector<8x32xf32> to vector<8x8xf32>
    %c0_516 = arith.constant 0 : index
    %c1_517 = arith.constant 1 : index
    %c0_518 = arith.constant 0 : index
    %c0_519 = arith.constant 0 : index
    %781 = vector.load %arg6[%c0_516, %c1_517, %c0_518, %c0_519] : memref<3x4x8x8xf32, #tpu.memory_space<vmem>>, vector<1x1x8x8xf32>
    %782 = vector.shape_cast %781 : vector<1x1x8x8xf32> to vector<8x8xf32>
    %783 = vector.shape_cast %780 : vector<8x8xf32> to vector<1x1x8x8xf32>
    tpu.vector_store %arg6[%c0_516, %c1_517, %c0_518, %c0_519], %783 {strides = array<i32>} : memref<3x4x8x8xf32, #tpu.memory_space<vmem>>, vector<1x1x8x8xf32>,
    %784 = vector.extract_strided_slice %766 {offsets = [0, 8], sizes = [8, 8], strides = [1, 1]} : vector<8x32xf32> to vector<8x8xf32>
    %c1_520 = arith.constant 1 : index
    %c1_521 = arith.constant 1 : index
    %c0_522 = arith.constant 0 : index
    %c0_523 = arith.constant 0 : index
    %785 = vector.load %arg6[%c1_520, %c1_521, %c0_522, %c0_523] : memref<3x4x8x8xf32, #tpu.memory_space<vmem>>, vector<1x1x8x8xf32>
    %786 = vector.shape_cast %785 : vector<1x1x8x8xf32> to vector<8x8xf32>
    %787 = vector.shape_cast %784 : vector<8x8xf32> to vector<1x1x8x8xf32>
    tpu.vector_store %arg6[%c1_520, %c1_521, %c0_522, %c0_523], %787 {strides = array<i32>} : memref<3x4x8x8xf32, #tpu.memory_space<vmem>>, vector<1x1x8x8xf32>,
    %788 = vector.extract_strided_slice %767 {offsets = [0, 8], sizes = [8, 8], strides = [1, 1]} : vector<8x32xf32> to vector<8x8xf32>
    %c2_524 = arith.constant 2 : index
    %c1_525 = arith.constant 1 : index
    %c0_526 = arith.constant 0 : index
    %c0_527 = arith.constant 0 : index
    %789 = vector.load %arg6[%c2_524, %c1_525, %c0_526, %c0_527] : memref<3x4x8x8xf32, #tpu.memory_space<vmem>>, vector<1x1x8x8xf32>
    %790 = vector.shape_cast %789 : vector<1x1x8x8xf32> to vector<8x8xf32>
    %791 = vector.shape_cast %788 : vector<8x8xf32> to vector<1x1x8x8xf32>
    tpu.vector_store %arg6[%c2_524, %c1_525, %c0_526, %c0_527], %791 {strides = array<i32>} : memref<3x4x8x8xf32, #tpu.memory_space<vmem>>, vector<1x1x8x8xf32>,
    %792 = vector.extract_strided_slice %759 {offsets = [0, 16], sizes = [8, 8], strides = [1, 1]} : vector<8x32xf32> to vector<8x8xf32>
    %c0_528 = arith.constant 0 : index
    %c2_529 = arith.constant 2 : index
    %c0_530 = arith.constant 0 : index
    %c0_531 = arith.constant 0 : index
    %793 = vector.load %arg6[%c0_528, %c2_529, %c0_530, %c0_531] : memref<3x4x8x8xf32, #tpu.memory_space<vmem>>, vector<1x1x8x8xf32>
    %794 = vector.shape_cast %793 : vector<1x1x8x8xf32> to vector<8x8xf32>
    %795 = vector.shape_cast %792 : vector<8x8xf32> to vector<1x1x8x8xf32>
    tpu.vector_store %arg6[%c0_528, %c2_529, %c0_530, %c0_531], %795 {strides = array<i32>} : memref<3x4x8x8xf32, #tpu.memory_space<vmem>>, vector<1x1x8x8xf32>,
    %796 = vector.extract_strided_slice %766 {offsets = [0, 16], sizes = [8, 8], strides = [1, 1]} : vector<8x32xf32> to vector<8x8xf32>
    %c1_532 = arith.constant 1 : index
    %c2_533 = arith.constant 2 : index
    %c0_534 = arith.constant 0 : index
    %c0_535 = arith.constant 0 : index
    %797 = vector.load %arg6[%c1_532, %c2_533, %c0_534, %c0_535] : memref<3x4x8x8xf32, #tpu.memory_space<vmem>>, vector<1x1x8x8xf32>
    %798 = vector.shape_cast %797 : vector<1x1x8x8xf32> to vector<8x8xf32>
    %799 = vector.shape_cast %796 : vector<8x8xf32> to vector<1x1x8x8xf32>
    tpu.vector_store %arg6[%c1_532, %c2_533, %c0_534, %c0_535], %799 {strides = array<i32>} : memref<3x4x8x8xf32, #tpu.memory_space<vmem>>, vector<1x1x8x8xf32>,
    %800 = vector.extract_strided_slice %767 {offsets = [0, 16], sizes = [8, 8], strides = [1, 1]} : vector<8x32xf32> to vector<8x8xf32>
    %c2_536 = arith.constant 2 : index
    %c2_537 = arith.constant 2 : index
    %c0_538 = arith.constant 0 : index
    %c0_539 = arith.constant 0 : index
    %801 = vector.load %arg6[%c2_536, %c2_537, %c0_538, %c0_539] : memref<3x4x8x8xf32, #tpu.memory_space<vmem>>, vector<1x1x8x8xf32>
    %802 = vector.shape_cast %801 : vector<1x1x8x8xf32> to vector<8x8xf32>
    %803 = vector.shape_cast %800 : vector<8x8xf32> to vector<1x1x8x8xf32>
    tpu.vector_store %arg6[%c2_536, %c2_537, %c0_538, %c0_539], %803 {strides = array<i32>} : memref<3x4x8x8xf32, #tpu.memory_space<vmem>>, vector<1x1x8x8xf32>,
    %804 = vector.extract_strided_slice %759 {offsets = [0, 24], sizes = [8, 8], strides = [1, 1]} : vector<8x32xf32> to vector<8x8xf32>
    %c0_540 = arith.constant 0 : index
    %c3_541 = arith.constant 3 : index
    %c0_542 = arith.constant 0 : index
    %c0_543 = arith.constant 0 : index
    %805 = vector.load %arg6[%c0_540, %c3_541, %c0_542, %c0_543] : memref<3x4x8x8xf32, #tpu.memory_space<vmem>>, vector<1x1x8x8xf32>
    %806 = vector.shape_cast %805 : vector<1x1x8x8xf32> to vector<8x8xf32>
    %807 = vector.shape_cast %804 : vector<8x8xf32> to vector<1x1x8x8xf32>
    tpu.vector_store %arg6[%c0_540, %c3_541, %c0_542, %c0_543], %807 {strides = array<i32>} : memref<3x4x8x8xf32, #tpu.memory_space<vmem>>, vector<1x1x8x8xf32>,
    %808 = vector.extract_strided_slice %766 {offsets = [0, 24], sizes = [8, 8], strides = [1, 1]} : vector<8x32xf32> to vector<8x8xf32>
    %c1_544 = arith.constant 1 : index
    %c3_545 = arith.constant 3 : index
    %c0_546 = arith.constant 0 : index
    %c0_547 = arith.constant 0 : index
    %809 = vector.load %arg6[%c1_544, %c3_545, %c0_546, %c0_547] : memref<3x4x8x8xf32, #tpu.memory_space<vmem>>, vector<1x1x8x8xf32>
    %810 = vector.shape_cast %809 : vector<1x1x8x8xf32> to vector<8x8xf32>
    %811 = vector.shape_cast %808 : vector<8x8xf32> to vector<1x1x8x8xf32>
    tpu.vector_store %arg6[%c1_544, %c3_545, %c0_546, %c0_547], %811 {strides = array<i32>} : memref<3x4x8x8xf32, #tpu.memory_space<vmem>>, vector<1x1x8x8xf32>,
    %812 = vector.extract_strided_slice %767 {offsets = [0, 24], sizes = [8, 8], strides = [1, 1]} : vector<8x32xf32> to vector<8x8xf32>
    %c2_548 = arith.constant 2 : index
    %c3_549 = arith.constant 3 : index
    %c0_550 = arith.constant 0 : index
    %c0_551 = arith.constant 0 : index
    %813 = vector.load %arg6[%c2_548, %c3_549, %c0_550, %c0_551] : memref<3x4x8x8xf32, #tpu.memory_space<vmem>>, vector<1x1x8x8xf32>
    %814 = vector.shape_cast %813 : vector<1x1x8x8xf32> to vector<8x8xf32>
    %815 = vector.shape_cast %812 : vector<8x8xf32> to vector<1x1x8x8xf32>
    tpu.vector_store %arg6[%c2_548, %c3_549, %c0_550, %c0_551], %815 {strides = array<i32>} : memref<3x4x8x8xf32, #tpu.memory_space<vmem>>, vector<1x1x8x8xf32>,
    %c0_552 = arith.constant 0 : index
    %c0_553 = arith.constant 0 : index
    %c0_554 = arith.constant 0 : index
    %c0_555 = arith.constant 0 : index
    %816 = vector.load %arg6[%c0_552, %c0_553, %c0_554, %c0_555] : memref<3x4x8x8xf32, #tpu.memory_space<vmem>>, vector<1x4x8x8xf32>
    %817 = vector.shape_cast %816 : vector<1x4x8x8xf32> to vector<4x8x8xf32>
    %cst_556 = arith.constant 0.353553385 : f32
    %818 = vector.broadcast %cst_556 : f32 to vector<4x8x8xf32>
    %819 = arith.mulf %817, %818 : vector<4x8x8xf32>
    %c1_557 = arith.constant 1 : index
    %c0_558 = arith.constant 0 : index
    %c0_559 = arith.constant 0 : index
    %c0_560 = arith.constant 0 : index
    %820 = vector.load %arg6[%c1_557, %c0_558, %c0_559, %c0_560] : memref<3x4x8x8xf32, #tpu.memory_space<vmem>>, vector<1x4x8x8xf32>
    %821 = vector.shape_cast %820 : vector<1x4x8x8xf32> to vector<4x8x8xf32>
    %c2_561 = arith.constant 2 : index
    %c0_562 = arith.constant 0 : index
    %c0_563 = arith.constant 0 : index
    %c0_564 = arith.constant 0 : index
    %822 = vector.load %arg6[%c2_561, %c0_562, %c0_563, %c0_564] : memref<3x4x8x8xf32, #tpu.memory_space<vmem>>, vector<1x4x8x8xf32>
    %823 = vector.shape_cast %822 : vector<1x4x8x8xf32> to vector<4x8x8xf32>
    %824 = arith.truncf %819 : vector<4x8x8xf32> to vector<4x8x8xbf16>
    %825 = arith.truncf %821 : vector<4x8x8xf32> to vector<4x8x8xbf16>
    "tpu.trace_start"() <{level = 10 : i32, message = "hqd,hkd->hqk"}> : () -> ()
    %cst_565 = arith.constant dense<0.000000e+00> : vector<4x8x8xf32>
    %826 = tpu.matmul %824, %825, %cst_565 {dimension_numbers = #tpu.dot_dimension_numbers<[2], [2], [1], [1], [0, 0, 0, 1, 1, 1], [0], [0]>} : vector<4x8x8xbf16>, vector<4x8x8xbf16>, vector<4x8x8xf32> -> vector<4x8x8xf32>
    "tpu.trace_stop"() : () -> ()
    %cst_566 = arith.constant dense<0xFF800000> : vector<4x8xf32>
    %827 = vector.multi_reduction <maximumf>, %826, %cst_566 [2] : vector<4x8x8xf32> to vector<4x8xf32>
    %828 = vector.shape_cast %827 : vector<4x8xf32> to vector<4x8x1xf32>
    %829 = vector.broadcast %828 : vector<4x8x1xf32> to vector<4x8x8xf32>
    %830 = arith.subf %826, %829 : vector<4x8x8xf32>
    %831 = math.exp %830 : vector<4x8x8xf32>
    %cst_567 = arith.constant dense<0.000000e+00> : vector<4x8xf32>
    %832 = vector.multi_reduction <add>, %831, %cst_567 [2] : vector<4x8x8xf32> to vector<4x8xf32>
    %833 = vector.shape_cast %832 : vector<4x8xf32> to vector<4x8x1xf32>
    %834 = tpu.reciprocal %833 {approx = true} : vector<4x8x1xf32> -> vector<4x8x1xf32>
    %835 = vector.broadcast %834 : vector<4x8x1xf32> to vector<4x8x8xf32>
    %836 = arith.mulf %831, %835 : vector<4x8x8xf32>
    %837 = arith.truncf %836 : vector<4x8x8xf32> to vector<4x8x8xbf16>
    %838 = arith.truncf %823 : vector<4x8x8xf32> to vector<4x8x8xbf16>
    "tpu.trace_start"() <{level = 10 : i32, message = "hqk,hkd->hqd"}> : () -> ()
    %cst_568 = arith.constant dense<0.000000e+00> : vector<4x8x8xf32>
    %839 = tpu.matmul %837, %838, %cst_568 {dimension_numbers = #tpu.dot_dimension_numbers<[2], [1], [1], [2], [0, 0, 0, 1, 1, 2], [0], [0]>} : vector<4x8x8xbf16>, vector<4x8x8xbf16>, vector<4x8x8xf32> -> vector<4x8x8xf32>
    "tpu.trace_stop"() : () -> ()
    %840 = vector.extract_strided_slice %839 {offsets = [0, 0, 0], sizes = [1, 8, 8], strides = [1, 1, 1]} : vector<4x8x8xf32> to vector<1x8x8xf32>
    %841 = vector.shape_cast %840 : vector<1x8x8xf32> to vector<8x8xf32>
    %c0_569 = arith.constant 0 : index
    %c0_570 = arith.constant 0 : index
    %842 = vector.load %arg7[%c0_569, %c0_570] : memref<8x32xf32, #tpu.memory_space<vmem>>, vector<8x8xf32>
    tpu.vector_store %arg7[%c0_569, %c0_570], %841 {strides = array<i32>} : memref<8x32xf32, #tpu.memory_space<vmem>>, vector<8x8xf32>,
    %843 = vector.extract_strided_slice %839 {offsets = [1, 0, 0], sizes = [1, 8, 8], strides = [1, 1, 1]} : vector<4x8x8xf32> to vector<1x8x8xf32>
    %844 = vector.shape_cast %843 : vector<1x8x8xf32> to vector<8x8xf32>
    %c0_571 = arith.constant 0 : index
    %c8_572 = arith.constant 8 : index
    %845 = vector.load %arg7[%c0_571, %c8_572] : memref<8x32xf32, #tpu.memory_space<vmem>>, vector<8x8xf32>
    tpu.vector_store %arg7[%c0_571, %c8_572], %844 {strides = array<i32>} : memref<8x32xf32, #tpu.memory_space<vmem>>, vector<8x8xf32>,
    %846 = vector.extract_strided_slice %839 {offsets = [2, 0, 0], sizes = [1, 8, 8], strides = [1, 1, 1]} : vector<4x8x8xf32> to vector<1x8x8xf32>
    %847 = vector.shape_cast %846 : vector<1x8x8xf32> to vector<8x8xf32>
    %c0_573 = arith.constant 0 : index
    %c16_574 = arith.constant 16 : index
    %848 = vector.load %arg7[%c0_573, %c16_574] : memref<8x32xf32, #tpu.memory_space<vmem>>, vector<8x8xf32>
    tpu.vector_store %arg7[%c0_573, %c16_574], %847 {strides = array<i32>} : memref<8x32xf32, #tpu.memory_space<vmem>>, vector<8x8xf32>,
    %849 = vector.extract_strided_slice %839 {offsets = [3, 0, 0], sizes = [1, 8, 8], strides = [1, 1, 1]} : vector<4x8x8xf32> to vector<1x8x8xf32>
    %850 = vector.shape_cast %849 : vector<1x8x8xf32> to vector<8x8xf32>
    %c0_575 = arith.constant 0 : index
    %c24_576 = arith.constant 24 : index
    %851 = vector.load %arg7[%c0_575, %c24_576] : memref<8x32xf32, #tpu.memory_space<vmem>>, vector<8x8xf32>
    tpu.vector_store %arg7[%c0_575, %c24_576], %850 {strides = array<i32>} : memref<8x32xf32, #tpu.memory_space<vmem>>, vector<8x8xf32>,
    %c0_577 = arith.constant 0 : index
    %c0_578 = arith.constant 0 : index
    %852 = vector.load %arg7[%c0_577, %c0_578] : memref<8x32xf32, #tpu.memory_space<vmem>>, vector<8x32xf32>
    %c0_579 = arith.constant 0 : index
    %c7808 = arith.constant 7808 : index
    %853 = vector.load %arg1[%c0_579, %c7808] : memref<32x10112xbf16, #tpu.memory_space<vmem>>, vector<32x32xbf16>
    %854 = arith.truncf %852 : vector<8x32xf32> to vector<8x32xbf16>
    %cst_580 = arith.constant dense<0.000000e+00> : vector<8x32xf32>
    %855 = tpu.matmul %854, %853, %cst_580 {dimension_numbers = #tpu.dot_dimension_numbers<[1], [0], [0], [1], [0, 0, 1, 1], [], []>} : vector<8x32xbf16>, vector<32x32xbf16>, vector<8x32xf32> -> vector<8x32xf32>
    %c30 = arith.constant 30 : index
    %c0_581 = arith.constant 0 : index
    %856 = vector.load %arg3[%c30, %c0_581] : memref<43x128xf32, #tpu.memory_space<vmem>>, vector<1x32xf32>
    %857 = vector.broadcast %856 : vector<1x32xf32> to vector<8x32xf32>
    %858 = arith.addf %855, %857 : vector<8x32xf32>
    %859 = arith.addf %753, %858 : vector<8x32xf32>
    %cst_582 = arith.constant dense<0.000000e+00> : vector<8xf32>
    %860 = vector.multi_reduction <add>, %859, %cst_582 [1] : vector<8x32xf32> to vector<8xf32>
    %861 = vector.shape_cast %860 : vector<8xf32> to vector<8x1xf32>
    %cst_583 = arith.constant 3.200000e+01 : f32
    %862 = vector.broadcast %cst_583 : f32 to vector<8x1xf32>
    %863 = arith.divf %861, %862 : vector<8x1xf32>
    %864 = vector.broadcast %863 : vector<8x1xf32> to vector<8x32xf32>
    %865 = arith.subf %859, %864 : vector<8x32xf32>
    %866 = arith.mulf %865, %865 : vector<8x32xf32>
    %cst_584 = arith.constant dense<0.000000e+00> : vector<8xf32>
    %867 = vector.multi_reduction <add>, %866, %cst_584 [1] : vector<8x32xf32> to vector<8xf32>
    %868 = vector.shape_cast %867 : vector<8xf32> to vector<8x1xf32>
    %cst_585 = arith.constant 3.200000e+01 : f32
    %869 = vector.broadcast %cst_585 : f32 to vector<8x1xf32>
    %870 = arith.divf %868, %869 : vector<8x1xf32>
    %cst_586 = arith.constant 9.99999974E-6 : f32
    %871 = vector.broadcast %cst_586 : f32 to vector<8x1xf32>
    %872 = arith.addf %870, %871 : vector<8x1xf32>
    %873 = math.rsqrt %872 : vector<8x1xf32>
    %874 = vector.broadcast %873 : vector<8x1xf32> to vector<8x32xf32>
    %875 = arith.mulf %865, %874 : vector<8x32xf32>
    %c34 = arith.constant 34 : index
    %c0_587 = arith.constant 0 : index
    %876 = vector.load %arg3[%c34, %c0_587] : memref<43x128xf32, #tpu.memory_space<vmem>>, vector<1x32xf32>
    %877 = vector.broadcast %876 : vector<1x32xf32> to vector<8x32xf32>
    %878 = arith.mulf %875, %877 : vector<8x32xf32>
    %c35 = arith.constant 35 : index
    %c0_588 = arith.constant 0 : index
    %879 = vector.load %arg3[%c35, %c0_588] : memref<43x128xf32, #tpu.memory_space<vmem>>, vector<1x32xf32>
    %880 = vector.broadcast %879 : vector<1x32xf32> to vector<8x32xf32>
    %881 = arith.addf %878, %880 : vector<8x32xf32>
    %c0_589 = arith.constant 0 : index
    %c7936 = arith.constant 7936 : index
    %882 = vector.load %arg1[%c0_589, %c7936] : memref<32x10112xbf16, #tpu.memory_space<vmem>>, vector<32x2048xbf16>
    %883 = arith.truncf %881 : vector<8x32xf32> to vector<8x32xbf16>
    %cst_590 = arith.constant dense<0.000000e+00> : vector<8x2048xf32>
    %884 = tpu.matmul %883, %882, %cst_590 {dimension_numbers = #tpu.dot_dimension_numbers<[1], [0], [0], [1], [0, 0, 1, 1], [], []>} : vector<8x32xbf16>, vector<32x2048xbf16>, vector<8x2048xf32> -> vector<8x2048xf32>
    %c3_591 = arith.constant 3 : index
    %c0_592 = arith.constant 0 : index
    %885 = vector.load %arg4[%c3_591, %c0_592] : memref<4x2048xf32, #tpu.memory_space<vmem>>, vector<1x2048xf32>
    %886 = vector.broadcast %885 : vector<1x2048xf32> to vector<8x2048xf32>
    %887 = arith.addf %884, %886 : vector<8x2048xf32>
    %cst_593 = arith.constant 0.000000e+00 : f32
    %888 = vector.broadcast %cst_593 : f32 to vector<8x2048xf32>
    %889 = arith.maximumf %887, %888 : vector<8x2048xf32>
    %890 = arith.truncf %889 : vector<8x2048xf32> to vector<8x2048xbf16>
    %c6144 = arith.constant 6144 : index
    %c0_594 = arith.constant 0 : index
    %891 = vector.load %arg2[%c6144, %c0_594] : memref<8192x32xbf16, #tpu.memory_space<vmem>>, vector<2048x32xbf16>
    %cst_595 = arith.constant dense<0.000000e+00> : vector<8x32xf32>
    %892 = tpu.matmul %890, %891, %cst_595 {dimension_numbers = #tpu.dot_dimension_numbers<[1], [0], [0], [1], [0, 0, 1, 1], [], []>} : vector<8x2048xbf16>, vector<2048x32xbf16>, vector<8x32xf32> -> vector<8x32xf32>
    %c31 = arith.constant 31 : index
    %c0_596 = arith.constant 0 : index
    %893 = vector.load %arg3[%c31, %c0_596] : memref<43x128xf32, #tpu.memory_space<vmem>>, vector<1x32xf32>
    %894 = vector.broadcast %893 : vector<1x32xf32> to vector<8x32xf32>
    %895 = arith.addf %892, %894 : vector<8x32xf32>
    %896 = arith.addf %881, %895 : vector<8x32xf32>
    %cst_597 = arith.constant dense<0.000000e+00> : vector<8xf32>
    %897 = vector.multi_reduction <add>, %896, %cst_597 [1] : vector<8x32xf32> to vector<8xf32>
    %898 = vector.shape_cast %897 : vector<8xf32> to vector<8x1xf32>
    %cst_598 = arith.constant 3.200000e+01 : f32
    %899 = vector.broadcast %cst_598 : f32 to vector<8x1xf32>
    %900 = arith.divf %898, %899 : vector<8x1xf32>
    %901 = vector.broadcast %900 : vector<8x1xf32> to vector<8x32xf32>
    %902 = arith.subf %896, %901 : vector<8x32xf32>
    %903 = arith.mulf %902, %902 : vector<8x32xf32>
    %cst_599 = arith.constant dense<0.000000e+00> : vector<8xf32>
    %904 = vector.multi_reduction <add>, %903, %cst_599 [1] : vector<8x32xf32> to vector<8xf32>
    %905 = vector.shape_cast %904 : vector<8xf32> to vector<8x1xf32>
    %cst_600 = arith.constant 3.200000e+01 : f32
    %906 = vector.broadcast %cst_600 : f32 to vector<8x1xf32>
    %907 = arith.divf %905, %906 : vector<8x1xf32>
    %cst_601 = arith.constant 9.99999974E-6 : f32
    %908 = vector.broadcast %cst_601 : f32 to vector<8x1xf32>
    %909 = arith.addf %907, %908 : vector<8x1xf32>
    %910 = math.rsqrt %909 : vector<8x1xf32>
    %911 = vector.broadcast %910 : vector<8x1xf32> to vector<8x32xf32>
    %912 = arith.mulf %902, %911 : vector<8x32xf32>
    %c36 = arith.constant 36 : index
    %c0_602 = arith.constant 0 : index
    %913 = vector.load %arg3[%c36, %c0_602] : memref<43x128xf32, #tpu.memory_space<vmem>>, vector<1x32xf32>
    %914 = vector.broadcast %913 : vector<1x32xf32> to vector<8x32xf32>
    %915 = arith.mulf %912, %914 : vector<8x32xf32>
    %c37 = arith.constant 37 : index
    %c0_603 = arith.constant 0 : index
    %916 = vector.load %arg3[%c37, %c0_603] : memref<43x128xf32, #tpu.memory_space<vmem>>, vector<1x32xf32>
    %917 = vector.broadcast %916 : vector<1x32xf32> to vector<8x32xf32>
    %918 = arith.addf %915, %917 : vector<8x32xf32>
    %cst_604 = arith.constant dense<0.000000e+00> : vector<8xf32>
    %919 = vector.multi_reduction <add>, %918, %cst_604 [1] : vector<8x32xf32> to vector<8xf32>
    %920 = vector.shape_cast %919 : vector<8xf32> to vector<8x1xf32>
    %cst_605 = arith.constant 3.200000e+01 : f32
    %921 = vector.broadcast %cst_605 : f32 to vector<8x1xf32>
    %922 = arith.divf %920, %921 : vector<8x1xf32>
    %923 = vector.broadcast %922 : vector<8x1xf32> to vector<8x32xf32>
    %924 = arith.subf %918, %923 : vector<8x32xf32>
    %925 = arith.mulf %924, %924 : vector<8x32xf32>
    %cst_606 = arith.constant dense<0.000000e+00> : vector<8xf32>
    %926 = vector.multi_reduction <add>, %925, %cst_606 [1] : vector<8x32xf32> to vector<8xf32>
    %927 = vector.shape_cast %926 : vector<8xf32> to vector<8x1xf32>
    %cst_607 = arith.constant 3.200000e+01 : f32
    %928 = vector.broadcast %cst_607 : f32 to vector<8x1xf32>
    %929 = arith.divf %927, %928 : vector<8x1xf32>
    %cst_608 = arith.constant 9.99999974E-6 : f32
    %930 = vector.broadcast %cst_608 : f32 to vector<8x1xf32>
    %931 = arith.addf %929, %930 : vector<8x1xf32>
    %932 = math.rsqrt %931 : vector<8x1xf32>
    %933 = vector.broadcast %932 : vector<8x1xf32> to vector<8x32xf32>
    %934 = arith.mulf %924, %933 : vector<8x32xf32>
    %c40 = arith.constant 40 : index
    %c0_609 = arith.constant 0 : index
    %935 = vector.load %arg3[%c40, %c0_609] : memref<43x128xf32, #tpu.memory_space<vmem>>, vector<1x32xf32>
    %936 = vector.broadcast %935 : vector<1x32xf32> to vector<8x32xf32>
    %937 = arith.mulf %934, %936 : vector<8x32xf32>
    %c41 = arith.constant 41 : index
    %c0_610 = arith.constant 0 : index
    %938 = vector.load %arg3[%c41, %c0_610] : memref<43x128xf32, #tpu.memory_space<vmem>>, vector<1x32xf32>
    %939 = vector.broadcast %938 : vector<1x32xf32> to vector<8x32xf32>
    %940 = arith.addf %937, %939 : vector<8x32xf32>
    %c0_611 = arith.constant 0 : index
    %c9984 = arith.constant 9984 : index
    %941 = vector.load %arg1[%c0_611, %c9984] : memref<32x10112xbf16, #tpu.memory_space<vmem>>, vector<32x128xbf16>
    %942 = arith.truncf %940 : vector<8x32xf32> to vector<8x32xbf16>
    %cst_612 = arith.constant dense<0.000000e+00> : vector<8x128xf32>
    %943 = tpu.matmul %942, %941, %cst_612 {dimension_numbers = #tpu.dot_dimension_numbers<[1], [0], [0], [1], [0, 0, 1, 1], [], []>} : vector<8x32xbf16>, vector<32x128xbf16>, vector<8x128xf32> -> vector<8x128xf32>
    %c42 = arith.constant 42 : index
    %c0_613 = arith.constant 0 : index
    %944 = vector.load %arg3[%c42, %c0_613] : memref<43x128xf32, #tpu.memory_space<vmem>>, vector<1x128xf32>
    %945 = vector.broadcast %944 : vector<1x128xf32> to vector<8x128xf32>
    %946 = arith.addf %943, %945 : vector<8x128xf32>
    %cst_614 = arith.constant dense<0xFF800000> : vector<8xf32>
    %947 = vector.multi_reduction <maximumf>, %946, %cst_614 [1] : vector<8x128xf32> to vector<8xf32>
    %948 = vector.shape_cast %947 : vector<8xf32> to vector<8x1xf32>
    %949 = vector.broadcast %948 : vector<8x1xf32> to vector<8x128xf32>
    %950 = arith.subf %946, %949 : vector<8x128xf32>
    %951 = math.exp %950 : vector<8x128xf32>
    %cst_615 = arith.constant dense<0.000000e+00> : vector<8xf32>
    %952 = vector.multi_reduction <add>, %951, %cst_615 [1] : vector<8x128xf32> to vector<8xf32>
    %953 = vector.shape_cast %952 : vector<8xf32> to vector<8x1xf32>
    %954 = vector.broadcast %953 : vector<8x1xf32> to vector<8x128xf32>
    %955 = arith.divf %951, %954 : vector<8x128xf32>
    %c0_616 = arith.constant 0 : index
    %c0_617 = arith.constant 0 : index
    %956 = vector.load %arg5[%c0_616, %c0_617] : memref<8x128xf32, #tpu.memory_space<vmem>>, vector<8x128xf32>
    tpu.vector_store %arg5[%c0_616, %c0_617], %955 {strides = array<i32>} : memref<8x128xf32, #tpu.memory_space<vmem>>, vector<8x128xf32>,
    return
  }
}

</mosaic_0001>

<bundles_post_ra>
// kernel: transformer_average_strategy_forward.1
= control target key start
LH: loop header
LB: loop body
LE: loop exit
PB: predicated region body
PF: predicated region fallthrough
CT: control target
= control target key end

     0   :  { %v15313_v0 = vmov 0.0   ;;  %vm15314_vm0 = vmmov 0   ;;  %vm45_vm1 = vcmask 261120   ;;  %vm89_vm2 = vcmask 64512   ;;  %s15315_s26 = smov 120   ;;  %s15316_s27 = smov 96   ;;  %s18607_s0 = inlined_call_operand.vmem [shape: f32[8,32], index: 0, kind: input, shape index: {}]   ;;  %s18608_s1 = inlined_call_operand.vmem [shape: bf16[32,10112], index: 1, kind: input, shape index: {}]   ;;  %s18609_s2 = inlined_call_operand.vmem [shape: bf16[8192,32], index: 2, kind: input, shape index: {}]   ;;  %s18610_s3 = inlined_call_operand.vmem [shape: f32[43,128], index: 3, kind: input, shape index: {}]   ;;  %s18611_s4 = inlined_call_operand.vmem [shape: f32[4,2048], index: 4, kind: input, shape index: {}]   ;;  %s18612_s5 = inlined_call_operand.hbm [shape: f32[8,128], index: 5, kind: output, shape index: {}]  }
   0x1   :  { %14003 = vmatprep.subr.bf16.mxu0 %v15313_v0  ;;  %v14429_v1 = vld [vmem:[%s18608_s1] ss:$316 sps:$4 sm:$0xff]   ;;  %14007 = vmatprep.mubr.msk.bf16.mxu0 %vm15314_vm0, %v15313_v0  ;;  %v14430_v2 = vld [vmem:[%s18608_s1 + $0x278] ss:$316 sps:$4 sm:$0xff]   ;;  %s15317_s28 = smov 80   ;;  %s15318_s29 = smov 88  }
   0x2   :  { %v22_v3 = vld [vmem:[%s18607_s0] sm:$0xff]  ;;  %14011 = vmatprep.subr.bf16.mxu1 %v15313_v0  ;;  %14013 = vmatprep.mubr.msk.bf16.mxu1 %vm15314_vm0, %v15313_v0  ;;  %s15319_s30 = smov 112   ;;  %s15320_s6 = smov 72  }
   0x3   :  { %14004 = vmatpush3.bf16.msra.mxu0 %v14429_v1  ;;  %v15377_v4 = vpack.c.bf16 %v22_v3, %v22_v3  ;;  %v12343_v5 = vld [vmem:[%s18610_s3] ss:$0 sm:$0xff]  ;;  %s15321_s7 = smov 104  }
   0x4   :  { %14005 = vmatprep.subr.bf16.mxu0 %v15313_v0 }
   0x7   :  { %14006 = vmatpush3.bf16.msra.mxu0 %v14430_v2 }
   0x8   :  { %14017 = vmatprep.subr.bf16.mxu0 %v15313_v0 }
   0xa   :  { %14008 = vmatmul.mubr.msk.bf16.vlgmr.msra.gmra.mrb[0].mxu0 %vm45_vm1, %v15377_v4 }
   0xb   :  { %14019 = vmatprep.mubr.msk.bf16.mxu0 %vm15314_vm0, %v15313_v0 }
  0xdd   :  { %v83_v6 = vpop.f32.mrb[0].mxu0 }
  0xde   :  { %v15387_v7 = vadd.f32 %v12343_v5, %v83_v6  ;;  %v14009_v8 = vpop.f32.mrb[1].mxu0 }
  0xdf   :  { %v86_v9 = vpop.f32.mrb[2].mxu0 }
  0xe0   :  { %102 = vrot.lane.b32.xlu1 %v15387_v7, %s15315_s26  ;;  %92 = vrot.lane.b32.xlu0 %v15387_v7, %s15316_s27  ;;  %v14010_v10 = vpop.f32.mrb[3].mxu0  ;;  %90 = vst.msk [vmem:[#allocation2] sm:$0xff] %vm89_vm2, %v15387_v7 }
  0xe4   :  { %122 = vrot.lane.b32.xlu1 %v15387_v7, %s15317_s28  ;;  %107 = vrot.lane.b32.xlu0 %v15387_v7, %s15318_s29 }
  0xe7   :  { %v147_v19 = vld [vmem:[#allocation2] sm:$0xff] }
  0xe8   :  { %117 = vrot.lane.b32.xlu1 %v15387_v7, %s15319_s30  ;;  %137 = vrot.lane.b32.xlu0 %v15387_v7, %s15320_s6  ;;  %v151_v24 = vmul.f32 0.35355338, %v147_v19 }
  0xea   :  { %v163_v32 = vpack.c.bf16 %v151_v24, %v151_v24 }
  0xec   :  { %132 = vrot.lane.b32.xlu0 %v15387_v7, %s15321_s7 }
 0x152   :  { %v103_v11 = vpop.permute.xlu1 %102  ;;  %v93_v12 = vpop.permute.xlu0 %92 }
 0x153   :  { %106 = vst.msk [vmem:[#allocation2 + $0x8] sm:$0xff] %vm89_vm2, %v103_v11  ;;  %96 = vst.msk [vmem:[#allocation2 + $0x20] sm:$0xff] %vm89_vm2, %v93_v12 }
 0x156   :  { %v123_v13 = vpop.permute.xlu1 %122  ;;  %v108_v14 = vpop.permute.xlu0 %107 }
 0x157   :  { %126 = vst.msk [vmem:[#allocation2 + $0x30] sm:$0xff] %vm89_vm2, %v123_v13  ;;  %111 = vst.msk [vmem:[#allocation2 + $0x28] sm:$0xff] %vm89_vm2, %v108_v14 }
 0x15a   :  { %v118_v15 = vpop.permute.xlu1 %117  ;;  %v138_v16 = vpop.permute.xlu0 %137  ;;  %v155_v17 = vld [vmem:[#allocation2 + $0x20] sm:$0xff]  ;;  %v148_v21 = vld [vmem:[#allocation2 + $0x8] sm:$0xff] }
 0x15b   :  { %121 = vst.msk [vmem:[#allocation2 + $0x10] sm:$0xff] %vm89_vm2, %v118_v15  ;;  %141 = vst.msk [vmem:[#allocation2 + $0x38] sm:$0xff] %vm89_vm2, %v138_v16  ;;  %v167_v18 = vpack.c.bf16 %v155_v17, %v155_v17  ;;  %v152_v29 = vmul.f32 0.35355338, %v148_v21 }
 0x15d   :  { %v175_v20 = vsel %vm89_vm2, %v167_v18, 0  ;;  %v164_v38 = vpack.c.bf16 %v152_v29, %v152_v29 }
 0x15e   :  { %14012 = vmatpush3.bf16.xpose.msra.mxu1 %v175_v20  ;;  %v133_v22 = vpop.permute.xlu0 %132  ;;  %v156_v23 = vld [vmem:[#allocation2 + $0x28] sm:$0xff]  ;;  %v157_v25 = vld [vmem:[#allocation2 + $0x30] sm:$0xff] }
 0x15f   :  { %136 = vst.msk [vmem:[#allocation2 + $0x18] sm:$0xff] %vm89_vm2, %v133_v22  ;;  %v168_v26 = vpack.c.bf16 %v156_v23, %v156_v23  ;;  %14023 = vmatprep.subr.bf16.mxu1 %v15313_v0  ;;  %v169_v27 = vpack.c.bf16 %v157_v25, %v157_v25 }
 0x161   :  { %v221_v28 = vsel %vm89_vm2, %v168_v26, 0  ;;  %v267_v33 = vsel %vm89_vm2, %v169_v27, 0 }
 0x162   :  { %14018 = vmatpush3.bf16.xpose.msra.mxu0 %v221_v28  ;;  %v158_v30 = vld [vmem:[#allocation2 + $0x38] sm:$0xff]  ;;  %v149_v31 = vld [vmem:[#allocation2 + $0x10] sm:$0xff] }
 0x163   :  { %14029 = vmatprep.subr.bf16.mxu0 %v15313_v0  ;;  %v170_v34 = vpack.c.bf16 %v158_v30, %v158_v30  ;;  %v153_v35 = vmul.f32 0.35355338, %v149_v31 }
 0x165   :  { %14014 = vmatmul.mubr.msk.bf16.vlgmr.msra.gmra.mrb[0].mxu1 %vm89_vm2, %v163_v32  ;;  %v313_v36 = vsel %vm89_vm2, %v170_v34, 0  ;;  %v165_v40 = vpack.c.bf16 %v153_v35, %v153_v35 }
 0x166   :  { %14024 = vmatpush3.bf16.xpose.msra.mxu1 %v267_v33  ;;  %14025 = vmatprep.mubr.msk.bf16.mxu1 %vm15314_vm0, %v15313_v0  ;;  %v150_v37 = vld [vmem:[#allocation2 + $0x18] sm:$0xff] }
 0x167   :  { %v154_v39 = vmul.f32 0.35355338, %v150_v37  ;;  %14035 = vmatprep.subr.bf16.mxu1 %v15313_v0 }
 0x169   :  { %14020 = vmatmul.mubr.msk.bf16.vlgmr.msra.gmra.mrb[4].mxu0 %vm89_vm2, %v164_v38  ;;  %v166_v41 = vpack.c.bf16 %v154_v39, %v154_v39 }
 0x16a   :  { %14030 = vmatpush3.bf16.xpose.msra.mxu0 %v313_v36  ;;  %14031 = vmatprep.mubr.msk.bf16.mxu0 %vm15314_vm0, %v15313_v0 }
 0x16b   :  { %14041 = vmatprep.subr.bf16.mxu0 %v15313_v0 }
 0x16d   :  { %14026 = vmatmul.mubr.msk.bf16.vlgmr.msra.gmra.mrb[4].mxu1 %vm89_vm2, %v165_v40 }
 0x16e   :  { %14037 = vmatprep.mubr.msk.bf16.mxu1 %vm15314_vm0, %v15313_v0 }
 0x171   :  { %14032 = vmatmul.mubr.msk.bf16.vlgmr.msra.gmra.mrb[8].mxu0 %vm89_vm2, %v166_v41 }
 0x172   :  { %14043 = vmatprep.mubr.msk.bf16.mxu0 %vm15314_vm0, %v15313_v0 }
 0x173   :  { %10 = vsyncpa [#allocation5], 0  ;;  %s15322_s8 = smov 56   ;;  %s15323_s9 = smov 64   ;;  %vm410_vm3 = vcmask 1043456   ;;  %vm597_vm4 = vcmask 130112  }
 0x174   :  { %s15324_s10 = smov 48   ;;  %s15325_s11 = smov 40   ;;  %vm603_vm5 = vcmask 195712   ;;  %vm609_vm6 = vcmask 261312  }
 0x175   :  { %s15326_s14 = smov 8   ;;  %s15327_s17 = smov 24  }
 0x176   :  { %s15328_s18 = smov 16  }
 0x238   :  { %v211_v42 = vpop.f32.mrb[0].mxu1 }
 0x239   :  { %v14015_v43 = vpop.f32.mrb[1].mxu1  ;;  %v355_v44 = vsel %vm89_vm2, %v211_v42, -inf }
 0x23a   :  { %356 = vmax.xlane.f32.xlu1 %v355_v44  ;;  %v214_v45 = vpop.f32.mrb[2].mxu1 }
 0x23b   :  { %v14016_v46 = vpop.f32.mrb[3].mxu1 }
 0x23c   :  { %v257_v47 = vpop.f32.mrb[4].mxu0 }
 0x23d   :  { %v14021_v48 = vpop.f32.mrb[5].mxu0  ;;  %v358_v49 = vsel %vm89_vm2, %v257_v47, -inf }
 0x23e   :  { %359 = vmax.xlane.f32.xlu0 %v358_v49  ;;  %v260_v50 = vpop.f32.mrb[6].mxu0 }
 0x23f   :  { %v14022_v51 = vpop.f32.mrb[7].mxu0 }
 0x240   :  { %v303_v52 = vpop.f32.mrb[4].mxu1 }
 0x241   :  { %v14027_v53 = vpop.f32.mrb[5].mxu1  ;;  %v361_v54 = vsel %vm89_vm2, %v303_v52, -inf }
 0x242   :  { %v306_v55 = vpop.f32.mrb[6].mxu1  ;;  %362 = vmax.xlane.f32.xlu0 %v361_v54 }
 0x243   :  { %v14028_v56 = vpop.f32.mrb[7].mxu1 }
 0x244   :  { %v349_v57 = vpop.f32.mrb[8].mxu0 }
 0x245   :  { %v14033_v58 = vpop.f32.mrb[9].mxu0  ;;  %v364_v59 = vsel %vm89_vm2, %v349_v57, -inf }
 0x246   :  { %365 = vmax.xlane.f32.xlu1 %v364_v59  ;;  %v352_v60 = vpop.f32.mrb[10].mxu0 }
 0x247   :  { %v14034_v61 = vpop.f32.mrb[11].mxu0  ;;  %v14432_v60 = vld [vmem:[%s18608_s1 + $0x27c] ss:$316 sps:$4 sm:$0xff]  }
 0x257   :  { %112 = vrot.lane.b32.xlu1 %v15387_v7, %s15322_s8 }
 0x258   :  { %97 = vrot.lane.b32.xlu0 %v15387_v7, %s15323_s9 }
 0x2c7   :  { %v357_v62 = vpop.xlane.xlu1 %356 }
 0x2c8   :  { %v367_v63 = vsub.f32 %v211_v42, %v357_v62 }
 0x2ca   :  { %v371_v1 = vmul.f32 1.442695, %v367_v63 }
 0x2cb   :  { %v360_v2 = vpop.xlane.xlu0 %359 }
 0x2cc   :  { %15163 = vpow2.f32 %v371_v1  ;;  %v368_v3 = vsub.f32 %v257_v47, %v360_v2 }
 0x2ce   :  { %v373_v5 = vmul.f32 1.442695, %v368_v3 }
 0x2cf   :  { %v363_v6 = vpop.xlane.xlu0 %362 }
 0x2d0   :  { %15165 = vpow2.f32 %v373_v5  ;;  %v369_v8 = vsub.f32 %v303_v52, %v363_v6 }
 0x2d2   :  { %v375_v9 = vmul.f32 1.442695, %v369_v8 }
 0x2d3   :  { %v98_v10 = vpop.permute.xlu0 %97  ;;  %v366_v11 = vpop.xlane.xlu1 %365 }
 0x2d4   :  { %15167 = vpow2.f32 %v375_v9  ;;  %101 = vst.msk [vmem:[#allocation2 + $0x40] sm:$0xff] %vm89_vm2, %v98_v10  ;;  %v370_v12 = vsub.f32 %v349_v57, %v366_v11  ;;  %v14431_v57 = vld [vmem:[%s18608_s1 + $0x4] ss:$316 sps:$4 sm:$0xff]  }
 0x2d6   :  { %v15164_v13 = vpop.eup %15163  ;;  %v377_v14 = vmul.f32 1.442695, %v370_v12 }
 0x2d7   :  { %v113_v15 = vpop.permute.xlu1 %112  ;;  %v379_v16 = vsel %vm89_vm2, %v15164_v13, 0.0 }
 0x2d8   :  { %15169 = vpow2.f32 %v377_v14  ;;  %116 = vst.msk [vmem:[#allocation2 + $0x48] sm:$0xff] %vm89_vm2, %v113_v15  ;;  %380 = vadd.xlane.f32.xlu0 %v379_v16  ;;  %v12355_v14 = vld [vmem:[%s18610_s3 + $0x1] ss:$0 sm:$0xff] }
 0x2da   :  { %v15166_v17 = vpop.eup %15165 }
 0x2db   :  { %v382_v18 = vsel %vm89_vm2, %v15166_v17, 0.0  ;;  %v159_v19 = vld [vmem:[#allocation2 + $0x40] sm:$0xff] }
 0x2dc   :  { %383 = vadd.xlane.f32.xlu1 %v382_v18  ;;  %v403_v20 = vpack.c.bf16 %v159_v19, %v159_v19 }
 0x2de   :  { %v15168_v21 = vpop.eup %15167  ;;  %v412_v22 = vsel %vm410_vm3, %v403_v20, 0  ;;  %v15287_v20 = vld [vmem:[%s18607_s0] sm:$0xff] }
 0x2df   :  { %14036 = vmatpush3.bf16.msra.mxu1 %v412_v22  ;;  %v385_v23 = vsel %vm89_vm2, %v15168_v21, 0.0  ;;  %v160_v24 = vld [vmem:[#allocation2 + $0x48] sm:$0xff] }
 0x2e0   :  { %386 = vadd.xlane.f32.xlu0 %v385_v23  ;;  %v404_v25 = vpack.c.bf16 %v160_v24, %v160_v24  ;;  %14047 = vmatprep.subr.bf16.mxu1 %v15313_v0 }
 0x2e2   :  { %v15170_v26 = vpop.eup %15169  ;;  %v458_v27 = vsel %vm410_vm3, %v404_v25, 0 }
 0x2e3   :  { %14042 = vmatpush3.bf16.msra.mxu0 %v458_v27  ;;  %v388_v28 = vsel %vm89_vm2, %v15170_v26, 0.0 }
 0x2e4   :  { %389 = vadd.xlane.f32.xlu1 %v388_v28  ;;  %14053 = vmatprep.subr.bf16.mxu0 %v15313_v0  ;;  %v14435_v28 = vld [vmem:[%s18608_s1 + $0xc] ss:$316 sps:$4 sm:$0xff]  }
 0x2f5   :  { %127 = vrot.lane.b32.xlu1 %v15387_v7, %s15324_s10 }
 0x2f6   :  { %142 = vrot.lane.b32.xlu0 %v15387_v7, %s15325_s11 }
 0x365   :  { %v381_v29 = vpop.xlane.xlu0 %380 }
 0x366   :  { %15171 = vrcp.f32 %v381_v29  ;;  %v14438_v29 = vld [vmem:[%s18608_s1 + $0x14] ss:$316 sps:$4 sm:$0xff]  }
 0x369   :  { %v384_v30 = vpop.xlane.xlu1 %383 }
 0x36a   :  { %15173 = vrcp.f32 %v384_v30  ;;  %v14433_v30 = vld [vmem:[%s18608_s1 + $0x8] ss:$316 sps:$4 sm:$0xff]  }
 0x36d   :  { %v387_v31 = vpop.xlane.xlu0 %386 }
 0x36e   :  { %15175 = vrcp.f32 %v387_v31  ;;  %v14436_v31 = vld [vmem:[%s18608_s1 + $0x10] ss:$316 sps:$4 sm:$0xff]  }
 0x370   :  { %v15172_v32 = vpop.eup %15171 }
 0x371   :  { %v143_v33 = vpop.permute.xlu0 %142  ;;  %v390_v34 = vpop.xlane.xlu1 %389  ;;  %v395_v35 = vmul.f32 %v15172_v32, %v15164_v13  ;;  %v14441_v32 = vld [vmem:[%s18608_s1 + $0x284] ss:$316 sps:$4 sm:$0xff]  }
 0x372   :  { %146 = vst.msk [vmem:[#allocation2 + $0x58] sm:$0xff] %vm89_vm2, %v143_v33  ;;  %15177 = vrcp.f32 %v390_v34  ;;  %v14444_v33 = vld [vmem:[%s18608_s1 + $0x28c] ss:$316 sps:$4 sm:$0xff]   ;;  %v14439_v34 = vld [vmem:[%s18608_s1 + $0x280] ss:$316 sps:$4 sm:$0xff]  }
 0x373   :  { %v399_v36 = vpack.c.bf16 %v395_v35, %v395_v35  ;;  %v14442_v35 = vld [vmem:[%s18608_s1 + $0x288] ss:$316 sps:$4 sm:$0xff]  }
 0x374   :  { %v15174_v37 = vpop.eup %15173 }
 0x375   :  { %14038 = vmatmul.mubr.msk.bf16.vlgmr.msra.gmra.mrb[8].mxu1 %vm89_vm2, %v399_v36  ;;  %v128_v38 = vpop.permute.xlu1 %127  ;;  %v396_v39 = vmul.f32 %v15174_v37, %v15166_v17  ;;  %v14447_v36 = vld [vmem:[%s18608_s1 + $0x1c] ss:$316 sps:$4 sm:$0xff]   ;;  %v14450_v37 = vld [vmem:[%s18608_s1 + $0x24] ss:$316 sps:$4 sm:$0xff]  }
 0x376   :  { %131 = vst.msk [vmem:[#allocation2 + $0x50] sm:$0xff] %vm89_vm2, %v128_v38  ;;  %14049 = vmatprep.mubr.msk.bf16.mxu1 %vm15314_vm0, %v15313_v0  ;;  %v15329_v38 = vmov 0  }
 0x377   :  { %v400_v7 = vpack.c.bf16 %v396_v39, %v396_v39 }
 0x378   :  { %v15176_v42 = vpop.eup %15175 }
 0x379   :  { %14044 = vmatmul.mubr.msk.bf16.vlgmr.msra.gmra.mrb[12].mxu0 %vm89_vm2, %v400_v7  ;;  %v162_v40 = vld [vmem:[#allocation2 + $0x58] sm:$0xff]  ;;  %v397_v48 = vmul.f32 %v15176_v42, %v15168_v21  ;;  %v12359_v42 = vld [vmem:[%s18610_s3 + $0x3] ss:$0 sm:$0xff] }
 0x37a   :  { %v406_v41 = vpack.c.bf16 %v162_v40, %v162_v40  ;;  %14055 = vmatprep.mubr.msk.bf16.mxu0 %vm15314_vm0, %v15313_v0 }
 0x37b   :  { %v401_v51 = vpack.c.bf16 %v397_v48, %v397_v48  ;;  %v14448_v48 = vld [vmem:[%s18608_s1 + $0x20] ss:$316 sps:$4 sm:$0xff]  }
 0x37c   :  { %v15178_v43 = vpop.eup %15177  ;;  %v550_v44 = vsel %vm410_vm3, %v406_v41, 0 }
 0x37d   :  { %14054 = vmatpush3.bf16.msra.mxu0 %v550_v44  ;;  %v161_v45 = vld [vmem:[#allocation2 + $0x50] sm:$0xff]  ;;  %v398_v46 = vmul.f32 %v15178_v43, %v15170_v26  ;;  %v12360_v44 = vld [vmem:[%s18610_s3 + $0x4] ss:$0 sm:$0xff] }
 0x37e   :  { %v405_v47 = vpack.c.bf16 %v161_v45, %v161_v45  ;;  %985 = vmatprep.subr.bf16.mxu0 %v14435_v28  ;;  %v14500_v28 = vld [vmem:[%s18609_s2 + $0xa0] sm:$0xff]  }
 0x37f   :  { %v402_v49 = vpack.c.bf16 %v398_v46, %v398_v46 }
 0x380   :  { %v504_v50 = vsel %vm410_vm3, %v405_v47, 0  ;;  %v14445_v47 = vld [vmem:[%s18608_s1 + $0x18] ss:$316 sps:$4 sm:$0xff]  }
 0x381   :  { %14048 = vmatpush3.bf16.msra.mxu1 %v504_v50  ;;  %14056 = vmatmul.mubr.msk.bf16.vlgmr.msra.gmra.mrb[16].mxu0 %vm89_vm2, %v402_v49  ;;  %v14453_v50 = vld [vmem:[%s18608_s1 + $0x294] ss:$316 sps:$4 sm:$0xff]  }
 0x382   :  { %14059 = vmatprep.subr.bf16.mxu1 %v15313_v0  ;;  %986 = vmatpush1.bf16.msra.mxu0 %v14433_v30  ;;  %v14502_v30 = vld [vmem:[%s18609_s2 + $0xe8] sm:$0xff]  }
 0x383   :  { %987 = vmatprep.subr.bf16.mxu0 %v14441_v32  ;;  %1017 = vmatprep.mubr.bf16.mxu0 %v15329_v38  ;;  %v14504_v32 = vld [vmem:[%s18609_s2 + $0xa8] sm:$0xff]  }
 0x384   :  { %14050 = vmatmul.mubr.msk.bf16.vlgmr.msra.gmra.mrb[12].mxu1 %vm89_vm2, %v401_v51  ;;  %v14456_v51 = vld [vmem:[%s18608_s1 + $0x29c] ss:$316 sps:$4 sm:$0xff]  }
 0x385   :  { %14063 = vmatprep.mubr.msk.bf16.mxu1 %vm15314_vm0, %v15313_v0  ;;  %14060 = vmatpush3.bf16.msra.mxu1 %v14431_v57  ;;  %v14460_v57 = vld [vmem:[%s18608_s1 + $0x30] ss:$316 sps:$4 sm:$0xff]  }
 0x386   :  { %14061 = vmatprep.subr.bf16.mxu1 %v15313_v0  ;;  %988 = vmatpush1.bf16.msra.mxu0 %v14439_v34  ;;  %v14506_v34 = vld [vmem:[%s18609_s2 + $0xf0] sm:$0xff]  }
 0x387   :  { %1067 = vmatprep.subr.bf16.mxu0 %v14447_v36  ;;  %v14508_v36 = vld [vmem:[%s18609_s2 + $0xb0] sm:$0xff]  }
 0x389   :  { %14062 = vmatpush3.bf16.msra.mxu1 %v14432_v60  ;;  %v14463_v60 = vld [vmem:[%s18608_s1 + $0x2a0] ss:$316 sps:$4 sm:$0xff]  }
 0x38a   :  { %1026 = vmatprep.subr.bf16.mxu1 %v14438_v29  ;;  %v14501_v29 = vld [vmem:[%s18609_s2 + $0x68] sm:$0xff]  }
 0x448   :  { %v448_v52 = vpop.f32.mrb[8].mxu1 }
 0x449   :  { %592 = vst.msk [vmem:[#allocation3] sm:$0xff] %vm89_vm2, %v448_v52  ;;  %v14039_v53 = vpop.f32.mrb[9].mxu1  ;;  %v14451_v52 = vld [vmem:[%s18608_s1 + $0x290] ss:$316 sps:$4 sm:$0xff]  }
 0x44a   :  { %v451_v54 = vpop.f32.mrb[10].mxu1  ;;  %v14454_v53 = vld [vmem:[%s18608_s1 + $0x298] ss:$316 sps:$4 sm:$0xff]  }
 0x44b   :  { %v14040_v55 = vpop.f32.mrb[11].mxu1  ;;  %v14459_v54 = vld [vmem:[%s18608_s1 + $0x2c] ss:$316 sps:$4 sm:$0xff]  }
 0x44c   :  { %v494_v56 = vpop.f32.mrb[12].mxu0  ;;  %v14462_v55 = vld [vmem:[%s18608_s1 + $0x34] ss:$316 sps:$4 sm:$0xff]  }
 0x44d   :  { %594 = vrot.lane.b32.xlu1 %v494_v56, %s15326_s14  ;;  %v14045_v58 = vpop.f32.mrb[13].mxu0  ;;  %v14457_v56 = vld [vmem:[%s18608_s1 + $0x28] ss:$316 sps:$4 sm:$0xff]  }
 0x44e   :  { %v497_v59 = vpop.f32.mrb[14].mxu0  ;;  %v14465_v58 = vld [vmem:[%s18608_s1 + $0x2a4] ss:$316 sps:$4 sm:$0xff]  }
 0x44f   :  { %v14046_v61 = vpop.f32.mrb[15].mxu0  ;;  %v14468_v59 = vld [vmem:[%s18608_s1 + $0x2ac] ss:$316 sps:$4 sm:$0xff]  }
 0x450   :  { %v14466_v61 = vld [vmem:[%s18608_s1 + $0x2a8] ss:$316 sps:$4 sm:$0xff]  }
 0x454   :  { %v586_v62 = vpop.f32.mrb[16].mxu0 }
 0x455   :  { %606 = vrot.lane.b32.xlu1 %v586_v62, %s15327_s17  ;;  %v14057_v63 = vpop.f32.mrb[17].mxu0  ;;  %v14471_v62 = vld [vmem:[%s18608_s1 + $0x3c] ss:$316 sps:$4 sm:$0xff]  }
 0x456   :  { %v589_v1 = vpop.f32.mrb[18].mxu0  ;;  %v14474_v63 = vld [vmem:[%s18608_s1 + $0x44] ss:$316 sps:$4 sm:$0xff]  }
 0x457   :  { %v540_v2 = vpop.f32.mrb[12].mxu1  ;;  %v14058_v3 = vpop.f32.mrb[19].mxu0  ;;  %v14469_v1 = vld [vmem:[%s18608_s1 + $0x38] ss:$316 sps:$4 sm:$0xff]  }
 0x458   :  { %600 = vrot.lane.b32.xlu0 %v540_v2, %s15328_s18  ;;  %v14051_v5 = vpop.f32.mrb[13].mxu1  ;;  %v14472_v2 = vld [vmem:[%s18608_s1 + $0x40] ss:$316 sps:$4 sm:$0xff]   ;;  %v14477_v3 = vld [vmem:[%s18608_s1 + $0x2b4] ss:$316 sps:$4 sm:$0xff]  }
 0x459   :  { %v543_v6 = vpop.f32.mrb[14].mxu1  ;;  %v14480_v5 = vld [vmem:[%s18608_s1 + $0x2bc] ss:$316 sps:$4 sm:$0xff]  }
 0x45a   :  { %v14052_v8 = vpop.f32.mrb[15].mxu1  ;;  %v14475_v6 = vld [vmem:[%s18608_s1 + $0x2b0] ss:$316 sps:$4 sm:$0xff]  }
 0x45b   :  { %v14478_v8 = vld [vmem:[%s18608_s1 + $0x2b8] ss:$316 sps:$4 sm:$0xff]  }
 0x4bf   :  { %v595_v9 = vpop.permute.xlu1 %594 }
 0x4c0   :  { %598 = vst.msk [vmem:[#allocation3] sm:$0xff] %vm597_vm4, %v595_v9  ;;  %v14481_v9 = vld [vmem:[%s18609_s2 + $0x40] sm:$0xff]  }
 0x4c7   :  { %v607_v11 = vpop.permute.xlu1 %606 }
 0x4ca   :  { %v601_v10 = vpop.permute.xlu0 %600 }
 0x4cb   :  { %604 = vst.msk [vmem:[#allocation3] sm:$0xff] %vm603_vm5, %v601_v10  ;;  %v14482_v10 = vld [vmem:[%s18609_s2 + $0xc0] sm:$0xff]  }
 0x4cc   :  { %610 = vst.msk [vmem:[#allocation3] sm:$0xff] %vm609_vm6, %v607_v11  ;;  %v14483_v11 = vld [vmem:[%s18609_s2] sm:$0xff]  }
 0x4d3   :  { %v611_v12 = vld [vmem:[#allocation3] sm:$0xff] }
 0x4d4   :  { %v616_v13 = vpack.c.bf16 %v611_v12, %v611_v12  ;;  %v14484_v12 = vld [vmem:[%s18609_s2 + $0x80] sm:$0xff]  }
 0x4d6   :  { %14064 = vmatmul.mubr.msk.bf16.vlgmr.msra.gmra.mrb[16].mxu1 %vm45_vm1, %v616_v13  ;;  %v14485_v13 = vld [vmem:[%s18609_s2 + $0x48] sm:$0xff]  }
 0x4d7   :  { %1027 = vmatpush1.bf16.msra.mxu1 %v14436_v31  ;;  %1058 = vmatprep.mubr.bf16.mxu1 %v15329_v38  ;;  %v14503_v31 = vld [vmem:[%s18609_s2 + $0x28] sm:$0xff]  }
 0x4d8   :  { %1028 = vmatprep.subr.bf16.mxu1 %v14444_v33  ;;  %v14505_v33 = vld [vmem:[%s18609_s2 + $0x70] sm:$0xff]  }
 0x4db   :  { %1029 = vmatpush1.bf16.msra.mxu1 %v14442_v35  ;;  %v14507_v35 = vld [vmem:[%s18609_s2 + $0x30] sm:$0xff]  }
 0x4dc   :  { %1108 = vmatprep.subr.bf16.mxu1 %v14450_v37  ;;  %v14509_v37 = vld [vmem:[%s18609_s2 + $0x78] sm:$0xff]  }
 0x5a9   :  { %v671_v15 = vpop.f32.mrb[16].mxu1 }
 0x5aa   :  { %v672_v16 = vadd.f32 %v12355_v14, %v671_v15  ;;  %v14065_v17 = vpop.f32.mrb[17].mxu1  ;;  %v14486_v14 = vld [vmem:[%s18609_s2 + $0xc8] sm:$0xff]  }
 0x5ab   :  { %v674_v18 = vpop.f32.mrb[18].mxu1  ;;  %v14487_v15 = vld [vmem:[%s18609_s2 + $0x8] sm:$0xff]   ;;  %v14489_v17 = vld [vmem:[%s18609_s2 + $0x50] sm:$0xff]  }
 0x5ac   :  { %v14066_v19 = vpop.f32.mrb[19].mxu1  ;;  %v677_v21 = vadd.f32 %v15287_v20, %v672_v16  ;;  %v14488_v16 = vld [vmem:[%s18609_s2 + $0x88] sm:$0xff]   ;;  %v14490_v18 = vld [vmem:[%s18609_s2 + $0xd0] sm:$0xff]  }
 0x5ad   :  { %v14491_v19 = vld [vmem:[%s18609_s2 + $0x10] sm:$0xff]  }
 0x5ae   :  { %v678_v22 = vsel %vm45_vm1, %v677_v21, 0.0  ;;  %v14492_v20 = vld [vmem:[%s18609_s2 + $0x90] sm:$0xff]  }
 0x5af   :  { %679 = vadd.xlane.f32.xlu0 %v678_v22  ;;  %v14494_v22 = vld [vmem:[%s18609_s2 + $0xd8] sm:$0xff]  }
 0x63c   :  { %v680_v23 = vpop.xlane.xlu0 %679 }
 0x63d   :  { %v682_v24 = vmul.f32 0.03125, %v680_v23  ;;  %v14495_v23 = vld [vmem:[%s18609_s2 + $0x18] sm:$0xff]  }
 0x63f   :  { %v683_v25 = vsub.f32 %v677_v21, %v682_v24  ;;  %v14493_v21 = vld [vmem:[%s18609_s2 + $0x58] sm:$0xff]  }
 0x640   :  { %v14496_v24 = vld [vmem:[%s18609_s2 + $0x98] sm:$0xff]  }
 0x641   :  { %v684_v26 = vmul.f32 %v683_v25, %v683_v25 }
 0x643   :  { %v685_v27 = vsel %vm45_vm1, %v684_v26, 0.0  ;;  %v14498_v26 = vld [vmem:[%s18609_s2 + $0xe0] sm:$0xff]  }
 0x644   :  { %686 = vadd.xlane.f32.xlu1 %v685_v27  ;;  %v14499_v27 = vld [vmem:[%s18609_s2 + $0x20] sm:$0xff]  }
 0x6d1   :  { %v687_v39 = vpop.xlane.xlu1 %686 }
 0x6d2   :  { %v688_v7 = vmul.f32 0.03125, %v687_v39  ;;  %v14510_v39 = vld [vmem:[%s18609_s2 + $0xf8] sm:$0xff]  }
 0x6d4   :  { %v689_v40 = vadd.f32 1e-05, %v688_v7  ;;  %v14511_v7 = vld [vmem:[%s18609_s2 + $0x38] sm:$0xff]  }
 0x6d6   :  { %15179 = vrsqrt.f32 %v689_v40  ;;  %v14512_v40 = vld [vmem:[%s18609_s2 + $0xb8] sm:$0xff]  }
 0x6e0   :  { %v15180_v41 = vpop.eup %15179 }
 0x6e1   :  { %v691_v43 = vmul.f32 %v15180_v41, %v683_v25  ;;  %v14497_v25 = vld [vmem:[%s18609_s2 + $0x60] sm:$0xff]  }
 0x6e2   :  { %v14513_v41 = vld [vmem:[%s18609_s2 + $0x140] sm:$0xff]  }
 0x6e3   :  { %v697_v45 = vmul.f32 %v12359_v42, %v691_v43  ;;  %v14514_v42 = vld [vmem:[%s18609_s2 + $0x1c0] sm:$0xff]   ;;  %v742_v43 = vlaneseq }
 0x6e5   :  { %v15530_v46 = vadd.f32 %v12360_v44, %v697_v45  ;;  %v15726_v44 = vshrl.u32 %v742_v43, 7  ;;  %v14526_v43 = vld [vmem:[%s18609_s2 + $0x1d8] sm:$0xff]  }
 0x6e7   :  { %v15540_v49 = vpack.c.bf16 %v15530_v46, %v15530_v46  ;;  %v15729_v45 = vsub.s32 0, %v15726_v44 }
 0x6e9   :  { %12394 = vmatmul.mubr.msk.bf16.vlgmr.msra.gmra.mrb[20].mxu0 %vm45_vm1, %v15540_v49  ;;  %12395 = vmatmul.mubr.msk.bf16.vlgmr.msra.gmra.mrb[20].mxu1 %vm45_vm1, %v15540_v49 }
 0x6ea   :  { %1068 = vmatpush1.bf16.msra.mxu0 %v14445_v47  ;;  %1109 = vmatpush1.bf16.msra.mxu1 %v14448_v48  ;;  %v15732_v47 = vsub.s32 2, %v15726_v44  ;;  %v15737_v48 = vld [vmem:[%s18611_s4] ss:$4 sm:$0xff] }
 0x6eb   :  { %1069 = vmatprep.subr.bf16.mxu0 %v14453_v50  ;;  %1110 = vmatprep.subr.bf16.mxu1 %v14456_v51  ;;  %v15743_v50 = vsub.s32 3, %v15726_v44  ;;  %v745_v51 = vrot.slane %v15737_v48, %v15729_v45 }
 0x6ec   :  { %1099 = vmatprep.mubr.bf16.mxu0 %v15329_v38  ;;  %1140 = vmatprep.mubr.bf16.mxu1 %v15329_v38 }
 0x6ee   :  { %1070 = vmatpush1.bf16.msra.mxu0 %v14451_v52  ;;  %1111 = vmatpush1.bf16.msra.mxu1 %v14454_v53  ;;  %v753_v52 = vrot.slane %v15737_v48, %v15732_v47 }
 0x6ef   :  { %1149 = vmatprep.subr.bf16.mxu0 %v14459_v54  ;;  %1190 = vmatprep.subr.bf16.mxu1 %v14462_v55  ;;  %v757_v54 = vrot.slane %v15737_v48, %v15743_v50 }
 0x6f1   :  { %12396 = vmatmul.mubr.msk.bf16.vlgmr.msra.gmra.mrb[24].mxu0 %vm45_vm1, %v15540_v49  ;;  %12397 = vmatmul.mubr.msk.bf16.vlgmr.msra.gmra.mrb[24].mxu1 %vm45_vm1, %v15540_v49 }
 0x6f2   :  { %1150 = vmatpush1.bf16.msra.mxu0 %v14457_v56  ;;  %1191 = vmatpush1.bf16.msra.mxu1 %v14460_v57 }
 0x6f3   :  { %1151 = vmatprep.subr.bf16.mxu0 %v14465_v58  ;;  %1192 = vmatprep.subr.bf16.mxu1 %v14468_v59 }
 0x6f4   :  { %1181 = vmatprep.mubr.bf16.mxu0 %v15329_v38  ;;  %1222 = vmatprep.mubr.bf16.mxu1 %v15329_v38 }
 0x6f6   :  { %1152 = vmatpush1.bf16.msra.mxu0 %v14463_v60  ;;  %1193 = vmatpush1.bf16.msra.mxu1 %v14466_v61 }
 0x6f7   :  { %1231 = vmatprep.subr.bf16.mxu0 %v14471_v62  ;;  %1272 = vmatprep.subr.bf16.mxu1 %v14474_v63 }
 0x6f9   :  { %12398 = vmatmul.mubr.msk.bf16.vlgmr.msra.gmra.mrb[28].mxu0 %vm45_vm1, %v15540_v49  ;;  %12399 = vmatmul.mubr.msk.bf16.vlgmr.msra.gmra.mrb[28].mxu1 %vm45_vm1, %v15540_v49 }
 0x6fa   :  { %1232 = vmatpush1.bf16.msra.mxu0 %v14469_v1  ;;  %1273 = vmatpush1.bf16.msra.mxu1 %v14472_v2  ;;  %v15754_v2 = vsub.s32 5, %v15726_v44 }
 0x6fb   :  { %1233 = vmatprep.subr.bf16.mxu0 %v14477_v3  ;;  %1274 = vmatprep.subr.bf16.mxu1 %v14480_v5  ;;  %v15757_v3 = vsub.s32 7, %v15726_v44 }
 0x6fc   :  { %1263 = vmatprep.mubr.bf16.mxu0 %v15329_v38  ;;  %1304 = vmatprep.mubr.bf16.mxu1 %v15329_v38 }
 0x6fe   :  { %1234 = vmatpush1.bf16.msra.mxu0 %v14475_v6  ;;  %1275 = vmatpush1.bf16.msra.mxu1 %v14478_v8 }
 0x6ff   :  { %13180 = vmatprep.subr.bf16.mxu0 %v14481_v9  ;;  %13202 = vmatprep.subr.bf16.mxu1 %v14482_v10 }
 0x701   :  { %12400 = vmatmul.mubr.msk.bf16.vlgmr.msra.gmra.mrb[32].mxu0 %vm45_vm1, %v15540_v49  ;;  %12401 = vmatmul.mubr.msk.bf16.vlgmr.msra.gmra.mrb[32].mxu1 %vm45_vm1, %v15540_v49  ;;  %v15740_v49 = vsub.s32 1, %v15726_v44 }
 0x702   :  { %13181 = vmatpush3.bf16.msra.mxu0 %v14483_v11  ;;  %13203 = vmatpush3.bf16.msra.mxu1 %v14484_v12 }
 0x703   :  { %13182 = vmatprep.subr.bf16.mxu0 %v14485_v13  ;;  %13204 = vmatprep.subr.bf16.mxu1 %v14486_v14  ;;  %v749_v53 = vrot.slane %v15737_v48, %v15740_v49  ;;  %v765_v14 = vrot.slane %v15737_v48, %v15754_v2 }
 0x706   :  { %13183 = vmatpush3.bf16.msra.mxu0 %v14487_v15  ;;  %13205 = vmatpush3.bf16.msra.mxu1 %v14488_v16  ;;  %v773_v15 = vrot.slane %v15737_v48, %v15757_v3  ;;  %v14515_v16 = vld [vmem:[%s18609_s2 + $0x100] sm:$0xff]  }
 0x707   :  { %13184 = vmatprep.subr.bf16.mxu0 %v14489_v17  ;;  %13206 = vmatprep.subr.bf16.mxu1 %v14490_v18  ;;  %v14516_v17 = vld [vmem:[%s18609_s2 + $0x180] sm:$0xff]  }
 0x70a   :  { %13185 = vmatpush3.bf16.msra.mxu0 %v14491_v19  ;;  %13207 = vmatpush3.bf16.msra.mxu1 %v14492_v20  ;;  %v14517_v20 = vld [vmem:[%s18609_s2 + $0x148] sm:$0xff]  }
 0x70b   :  { %13186 = vmatprep.subr.bf16.mxu0 %v14493_v21  ;;  %13208 = vmatprep.subr.bf16.mxu1 %v14494_v22  ;;  %v14518_v21 = vld [vmem:[%s18609_s2 + $0x1c8] sm:$0xff]  }
 0x70e   :  { %13187 = vmatpush3.bf16.msra.mxu0 %v14495_v23  ;;  %13209 = vmatpush3.bf16.msra.mxu1 %v14496_v24 }
 0x70f   :  { %13188 = vmatprep.subr.bf16.mxu0 %v14497_v25  ;;  %13210 = vmatprep.subr.bf16.mxu1 %v14498_v26 }
 0x712   :  { %13189 = vmatpush3.bf16.msra.mxu0 %v14499_v27  ;;  %13211 = vmatpush3.bf16.msra.mxu1 %v14500_v28 }
 0x713   :  { %13190 = vmatprep.subr.bf16.mxu0 %v14501_v29  ;;  %13212 = vmatprep.subr.bf16.mxu1 %v14502_v30  ;;  %v14519_v30 = vld [vmem:[%s18609_s2 + $0x108] sm:$0xff]  }
 0x716   :  { %13191 = vmatpush3.bf16.msra.mxu0 %v14503_v31  ;;  %13213 = vmatpush3.bf16.msra.mxu1 %v14504_v32  ;;  %v14520_v31 = vld [vmem:[%s18609_s2 + $0x188] sm:$0xff]  }
 0x717   :  { %13192 = vmatprep.subr.bf16.mxu0 %v14505_v33  ;;  %13214 = vmatprep.subr.bf16.mxu1 %v14506_v34  ;;  %v14521_v34 = vld [vmem:[%s18609_s2 + $0x150] sm:$0xff]  }
 0x71a   :  { %13193 = vmatpush3.bf16.msra.mxu0 %v14507_v35  ;;  %13215 = vmatpush3.bf16.msra.mxu1 %v14508_v36  ;;  %v14522_v35 = vld [vmem:[%s18609_s2 + $0x1d0] sm:$0xff]  }
 0x71b   :  { %13194 = vmatprep.subr.bf16.mxu0 %v14509_v37  ;;  %13216 = vmatprep.subr.bf16.mxu1 %v14510_v39 }
 0x71e   :  { %13195 = vmatpush3.bf16.msra.mxu0 %v14511_v7  ;;  %13217 = vmatpush3.bf16.msra.mxu1 %v14512_v40  ;;  %v14523_v40 = vld [vmem:[%s18609_s2 + $0x110] sm:$0xff]  }
 0x71f   :  { %13224 = vmatprep.subr.bf16.mxu0 %v14513_v41  ;;  %13246 = vmatprep.subr.bf16.mxu1 %v14514_v42  ;;  %v14524_v41 = vld [vmem:[%s18609_s2 + $0x190] sm:$0xff]   ;;  %v14525_v42 = vld [vmem:[%s18609_s2 + $0x158] sm:$0xff]  }
 0x7bc   :  { %v1019_v55 = vpop.f32.mrb[20].mxu0  ;;  %v1060_v56 = vpop.f32.mrb[20].mxu1 }
 0x7bd   :  { %v1020_v57 = vadd.f32 %v1019_v55, %v745_v51  ;;  %v1061_v58 = vadd.f32 %v1060_v56, %v753_v52  ;;  %v1021_v59 = vpop.f32.mrb[21].mxu0  ;;  %v1062_v60 = vpop.f32.mrb[21].mxu1 }
 0x7be   :  { %v1022_v61 = vadd.f32 %v1021_v59, %v749_v53  ;;  %v1063_v62 = vadd.f32 %v1062_v60, %v757_v54  ;;  %v1023_v63 = vpop.f32.mrb[22].mxu0  ;;  %v1064_v1 = vpop.f32.mrb[22].mxu1  ;;  %v15814_v59 = vsub.s32 6, %v15726_v44 }
 0x7bf   :  { %v1313_v5 = vmax.f32 %v1020_v57, 0.0  ;;  %v1315_v6 = vmax.f32 %v1061_v58, 0.0  ;;  %v1024_v8 = vpop.f32.mrb[23].mxu0  ;;  %v1065_v9 = vpop.f32.mrb[23].mxu1  ;;  %v14527_v57 = vld [vmem:[%s18609_s2 + $0x118] sm:$0xff]   ;;  %v14530_v63 = vld [vmem:[%s18609_s2 + $0x1e0] sm:$0xff]  }
 0x7c0   :  { %v1314_v10 = vmax.f32 %v1022_v61, 0.0  ;;  %v1316_v11 = vmax.f32 %v1063_v62, 0.0  ;;  %v14528_v58 = vld [vmem:[%s18609_s2 + $0x198] sm:$0xff]   ;;  %v14529_v62 = vld [vmem:[%s18609_s2 + $0x160] sm:$0xff]   ;;  %v15836_v9 = vsub.s32 4, %v15726_v44 }
 0x7c1   :  { %v1329_v18 = vpack.c.bf16 %v1313_v5, %v1313_v5  ;;  %v1331_v19 = vpack.c.bf16 %v1315_v6, %v1315_v6  ;;  %v15825_v1 = vld [vmem:[%s18611_s4 + $0x20] ss:$4 sm:$0xff] }
 0x7c2   :  { %v1330_v12 = vpack.c.bf16 %v1314_v10, %v1314_v10  ;;  %v1332_v13 = vpack.c.bf16 %v1316_v11, %v1316_v11  ;;  %v801_v5 = vrot.slane %v15825_v1, %v15814_v59  ;;  %v14531_v6 = vld [vmem:[%s18609_s2 + $0x120] sm:$0xff]   ;;  %v14533_v10 = vld [vmem:[%s18609_s2 + $0x168] sm:$0xff]  }
 0x7c3   :  { %v14532_v8 = vld [vmem:[%s18609_s2 + $0x1a0] sm:$0xff]   ;;  %v14534_v11 = vld [vmem:[%s18609_s2 + $0x1e8] sm:$0xff]  }
 0x7c4   :  { %v15775_v22 = vpop.f32.mrb[24].mxu0  ;;  %v15777_v23 = vpop.f32.mrb[24].mxu1  ;;  %2406 = vmatprep.mubr.bf16.mxu0 %v1330_v12  ;;  %2446 = vmatprep.mubr.bf16.mxu1 %v1332_v13 }
 0x7c5   :  { %v1103_v24 = vpop.f32.mrb[25].mxu0  ;;  %v1144_v25 = vpop.f32.mrb[25].mxu1  ;;  %2407 = vmatmul.mubr.bf16.vlgmr.msra.gmra.mrb[36].mxu0 %v1329_v18  ;;  %2447 = vmatmul.mubr.bf16.vlgmr.msra.gmra.mrb[36].mxu1 %v1331_v19  ;;  %v14535_v18 = vld [vmem:[%s18609_s2 + $0x128] sm:$0xff]  }
 0x7c6   :  { %v1104_v26 = vadd.f32 %v1103_v24, %v765_v14  ;;  %v1145_v27 = vadd.f32 %v1144_v25, %v773_v15  ;;  %13225 = vmatpush3.bf16.msra.mxu0 %v14515_v16  ;;  %13247 = vmatpush3.bf16.msra.mxu1 %v14516_v17  ;;  %v1105_v28 = vpop.f32.mrb[26].mxu0  ;;  %v1146_v29 = vpop.f32.mrb[26].mxu1  ;;  %v14536_v19 = vld [vmem:[%s18609_s2 + $0x1a8] sm:$0xff]  }
 0x7c7   :  { %v1106_v32 = vpop.f32.mrb[27].mxu0  ;;  %v1147_v33 = vpop.f32.mrb[27].mxu1  ;;  %13226 = vmatprep.subr.bf16.mxu0 %v14517_v20  ;;  %13248 = vmatprep.subr.bf16.mxu1 %v14518_v21  ;;  %v761_v20 = vrot.slane %v15737_v48, %v15836_v9  ;;  %v769_v21 = vrot.slane %v15737_v48, %v15814_v59  ;;  %v781_v28 = vrot.slane %v15825_v1, %v15740_v49  ;;  %v14539_v48 = vld [vmem:[%s18609_s2 + $0x130] sm:$0xff]  }
 0x7c8   :  { %v1318_v36 = vmax.f32 %v1104_v26, 0.0  ;;  %v1320_v37 = vmax.f32 %v1145_v27, 0.0  ;;  %v14537_v26 = vld [vmem:[%s18609_s2 + $0x170] sm:$0xff]   ;;  %v789_v29 = vrot.slane %v15825_v1, %v15743_v50  ;;  %v14541_v33 = vld [vmem:[%s18609_s2 + $0x178] sm:$0xff]  }
 0x7c9   :  { %v14538_v27 = vld [vmem:[%s18609_s2 + $0x1f0] sm:$0xff]   ;;  %v1143_v32 = vadd.f32 %v15777_v23, %v769_v21  ;;  %v14544_v23 = vld [vmem:[%s18609_s2 + $0x1b8] sm:$0xff]   ;;  %v14565_v21 = vld [vmem:[%s18609_s2 + $0x268] sm:$0xff]  }
 0x7ca   :  { %v1334_v39 = vpack.c.bf16 %v1318_v36, %v1318_v36  ;;  %v1336_v7 = vpack.c.bf16 %v1320_v37, %v1320_v37  ;;  %13227 = vmatpush3.bf16.msra.mxu0 %v14519_v30  ;;  %13249 = vmatpush3.bf16.msra.mxu1 %v14520_v31  ;;  %v14540_v30 = vld [vmem:[%s18609_s2 + $0x1b0] sm:$0xff]   ;;  %v1102_v31 = vadd.f32 %v15775_v22, %v761_v20  ;;  %v14543_v22 = vld [vmem:[%s18609_s2 + $0x138] sm:$0xff]   ;;  %v14564_v20 = vld [vmem:[%s18609_s2 + $0x2a0] sm:$0xff]  }
 0x7cb   :  { %13228 = vmatprep.subr.bf16.mxu0 %v14521_v34  ;;  %13250 = vmatprep.subr.bf16.mxu1 %v14522_v35  ;;  %v14542_v34 = vld [vmem:[%s18609_s2 + $0x1f8] sm:$0xff]  }
 0x7cc   :  { %v15803_v51 = vpop.f32.mrb[28].mxu0  ;;  %v15805_v52 = vpop.f32.mrb[28].mxu1  ;;  %2486 = vmatprep.mubr.bf16.mxu0 %v1334_v39  ;;  %2526 = vmatprep.mubr.bf16.mxu1 %v1336_v7  ;;  %v1317_v37 = vmax.f32 %v1102_v31, 0.0  ;;  %v1319_v39 = vmax.f32 %v1143_v32, 0.0  ;;  %v14545_v7 = vld [vmem:[%s18609_s2 + $0x240] sm:$0xff]   ;;  %v805_v31 = vrot.slane %v15825_v1, %v15757_v3  ;;  %v14571_v32 = vld [vmem:[%s18609_s2 + $0x230] sm:$0xff]  }
 0x7cd   :  { %v1185_v53 = vpop.f32.mrb[29].mxu0  ;;  %v1226_v54 = vpop.f32.mrb[29].mxu1 }
 0x7ce   :  { %13229 = vmatpush3.bf16.msra.mxu0 %v14523_v40  ;;  %13251 = vmatpush3.bf16.msra.mxu1 %v14524_v41  ;;  %v1187_v55 = vpop.f32.mrb[30].mxu0  ;;  %v1228_v56 = vpop.f32.mrb[30].mxu1  ;;  %v1186_v35 = vadd.f32 %v1185_v53, %v781_v28  ;;  %v1227_v36 = vadd.f32 %v1226_v54, %v789_v29  ;;  %v14546_v40 = vld [vmem:[%s18609_s2 + $0x2c0] sm:$0xff]   ;;  %v1333_v53 = vpack.c.bf16 %v1317_v37, %v1317_v37  ;;  %v14569_v28 = vld [vmem:[%s18609_s2 + $0x270] sm:$0xff]   ;;  %v14575_v37 = vld [vmem:[%s18609_s2 + $0x238] sm:$0xff]  }
 0x7cf   :  { %v1188_v60 = vpop.f32.mrb[31].mxu0  ;;  %v1229_v61 = vpop.f32.mrb[31].mxu1  ;;  %13230 = vmatprep.subr.bf16.mxu0 %v14525_v42  ;;  %13252 = vmatprep.subr.bf16.mxu1 %v14526_v43  ;;  %v14547_v43 = vld [vmem:[%s18609_s2 + $0x200] sm:$0xff]   ;;  %v1335_v54 = vpack.c.bf16 %v1319_v39, %v1319_v39  ;;  %v785_v29 = vrot.slane %v15825_v1, %v15732_v47 }
 0x7d0   :  { %v1322_v41 = vmax.f32 %v1186_v35, 0.0  ;;  %v1324_v42 = vmax.f32 %v1227_v36, 0.0  ;;  %v14548_v55 = vld [vmem:[%s18609_s2 + $0x280] sm:$0xff]   ;;  %v14551_v61 = vld [vmem:[%s18609_s2 + $0x208] sm:$0xff]   ;;  %v14573_v35 = vld [vmem:[%s18609_s2 + $0x278] sm:$0xff]  }
 0x7d1   :  { %v1225_v36 = vadd.f32 %v15805_v52, %v785_v29  ;;  %v14576_v52 = vld [vmem:[%s18609_s2 + $0x2b8] sm:$0xff]  }
 0x7d2   :  { %13231 = vmatpush3.bf16.msra.mxu0 %v14527_v57  ;;  %13253 = vmatpush3.bf16.msra.mxu1 %v14528_v58  ;;  %v1338_v56 = vpack.c.bf16 %v1322_v41, %v1322_v41  ;;  %v14549_v57 = vld [vmem:[%s18609_s2 + $0x248] sm:$0xff]   ;;  %v1340_v60 = vpack.c.bf16 %v1324_v42, %v1324_v42  ;;  %v14579_v42 = vld [vmem:[%s18609_s2 + $0x300] sm:$0xff]  }
 0x7d3   :  { %13232 = vmatprep.subr.bf16.mxu0 %v14529_v62  ;;  %13254 = vmatprep.subr.bf16.mxu1 %v14530_v63  ;;  %v14550_v58 = vld [vmem:[%s18609_s2 + $0x2c8] sm:$0xff]   ;;  %v14553_v63 = vld [vmem:[%s18609_s2 + $0x250] sm:$0xff]  }
 0x7d4   :  { %v15844_v12 = vpop.f32.mrb[32].mxu0  ;;  %v1306_v13 = vpop.f32.mrb[32].mxu1  ;;  %v14552_v62 = vld [vmem:[%s18609_s2 + $0x288] sm:$0xff]  }
 0x7d5   :  { %v15846_v14 = vadd.f32 %v1306_v13, %v801_v5  ;;  %v15848_v15 = vpop.f32.mrb[33].mxu0  ;;  %v15850_v16 = vpop.f32.mrb[33].mxu1  ;;  %v14554_v5 = vld [vmem:[%s18609_s2 + $0x2d0] sm:$0xff]   ;;  %v14559_v13 = vld [vmem:[%s18609_s2 + $0x218] sm:$0xff]  }
 0x7d6   :  { %13233 = vmatpush3.bf16.msra.mxu0 %v14531_v6  ;;  %13255 = vmatpush3.bf16.msra.mxu1 %v14532_v8  ;;  %v1269_v44 = vpop.f32.mrb[34].mxu0  ;;  %v1310_v17 = vpop.f32.mrb[34].mxu1  ;;  %v14555_v6 = vld [vmem:[%s18609_s2 + $0x210] sm:$0xff]  }
 0x7d7   :  { %v1270_v24 = vpop.f32.mrb[35].mxu0  ;;  %v1311_v25 = vpop.f32.mrb[35].mxu1  ;;  %13234 = vmatprep.subr.bf16.mxu0 %v14533_v10  ;;  %13256 = vmatprep.subr.bf16.mxu1 %v14534_v11  ;;  %v14556_v8 = vld [vmem:[%s18609_s2 + $0x290] sm:$0xff]   ;;  %v14557_v10 = vld [vmem:[%s18609_s2 + $0x258] sm:$0xff]   ;;  %v14561_v17 = vld [vmem:[%s18609_s2 + $0x260] sm:$0xff]  }
 0x7d8   :  { %v14558_v11 = vld [vmem:[%s18609_s2 + $0x2d8] sm:$0xff]   ;;  %v14566_v24 = vld [vmem:[%s18609_s2 + $0x2e8] sm:$0xff]  }
 0x7d9   :  { %v14560_v44 = vld [vmem:[%s18609_s2 + $0x298] sm:$0xff]   ;;  %v14567_v25 = vld [vmem:[%s18609_s2 + $0x228] sm:$0xff]  }
 0x7da   :  { %13235 = vmatpush3.bf16.msra.mxu0 %v14535_v18  ;;  %13257 = vmatpush3.bf16.msra.mxu1 %v14536_v19  ;;  %v14562_v18 = vld [vmem:[%s18609_s2 + $0x2e0] sm:$0xff]  }
 0x7db   :  { %13236 = vmatprep.subr.bf16.mxu0 %v14537_v26  ;;  %13258 = vmatprep.subr.bf16.mxu1 %v14538_v27  ;;  %v14563_v19 = vld [vmem:[%s18609_s2 + $0x220] sm:$0xff]   ;;  %v777_v26 = vrot.slane %v15825_v1, %v15729_v45  ;;  %v14568_v27 = vld [vmem:[%s18609_s2 + $0x2a8] sm:$0xff]  }
 0x7de   :  { %13237 = vmatpush3.bf16.msra.mxu0 %v14539_v48  ;;  %13259 = vmatpush3.bf16.msra.mxu1 %v14540_v30  ;;  %v14570_v48 = vld [vmem:[%s18609_s2 + $0x2f0] sm:$0xff]   ;;  %v797_v30 = vrot.slane %v15825_v1, %v15754_v2 }
 0x7df   :  { %13238 = vmatprep.subr.bf16.mxu0 %v14541_v33  ;;  %13260 = vmatprep.subr.bf16.mxu1 %v14542_v34  ;;  %v1184_v33 = vadd.f32 %v15803_v51, %v777_v26  ;;  %v14572_v34 = vld [vmem:[%s18609_s2 + $0x2b0] sm:$0xff]   ;;  %v1309_v51 = vadd.f32 %v15850_v16, %v805_v31  ;;  %v14600_v26 = vld [vmem:[%s18609_s2 + $0x3a8] sm:$0xff]   ;;  %v14606_v31 = vld [vmem:[%s18609_s2 + $0x3f8] sm:$0xff]  }
 0x7e1   :  { %v1321_v39 = vmax.f32 %v1184_v33, 0.0  ;;  %v1328_v41 = vmax.f32 %v1309_v51, 0.0  ;;  %v14608_v33 = vld [vmem:[%s18609_s2 + $0x3b8] sm:$0xff]  }
 0x7e2   :  { %13239 = vmatpush3.bf16.msra.mxu0 %v14543_v22  ;;  %13261 = vmatpush3.bf16.msra.mxu1 %v14544_v23  ;;  %v14574_v22 = vld [vmem:[%s18609_s2 + $0x2f8] sm:$0xff]   ;;  %v1268_v23 = vadd.f32 %v15848_v15, %v797_v30  ;;  %v14578_v15 = vld [vmem:[%s18609_s2 + $0x3c0] sm:$0xff]  }
 0x7e3   :  { %13268 = vmatprep.subr.bf16.mxu0 %v14545_v7  ;;  %13290 = vmatprep.subr.bf16.mxu1 %v14546_v40  ;;  %v14577_v7 = vld [vmem:[%s18609_s2 + $0x340] sm:$0xff]   ;;  %v1323_v40 = vmax.f32 %v1225_v36, 0.0  ;;  %v14605_v30 = vld [vmem:[%s18609_s2 + $0x378] sm:$0xff]  }
 0x7e4   :  { %v1326_v16 = vmax.f32 %v1268_v23, 0.0 }
 0x7e5   :  { %2487 = vmatmul.mubr.bf16.vlgmr.msra.gmra.mrb[40].mxu0 %v1333_v53  ;;  %2527 = vmatmul.mubr.bf16.vlgmr.msra.gmra.mrb[40].mxu1 %v1335_v54  ;;  %v14580_v53 = vld [vmem:[%s18609_s2 + $0x380] sm:$0xff]   ;;  %v1339_v54 = vpack.c.bf16 %v1323_v40, %v1323_v40 }
 0x7e6   :  { %13269 = vmatpush3.bf16.msra.mxu0 %v14547_v43  ;;  %2566 = vmatprep.mubr.bf16.mxu0 %v1338_v56  ;;  %v1337_v43 = vpack.c.bf16 %v1321_v39, %v1321_v39  ;;  %v1342_v56 = vpack.c.bf16 %v1326_v16, %v1326_v16 }
 0x7e7   :  { %13291 = vmatpush3.bf16.msra.mxu1 %v14548_v55  ;;  %2606 = vmatprep.mubr.bf16.mxu1 %v1340_v60  ;;  %v14581_v55 = vld [vmem:[%s18609_s2 + $0x348] sm:$0xff]  }
 0x7e8   :  { %13270 = vmatprep.subr.bf16.mxu0 %v14549_v57  ;;  %13292 = vmatprep.subr.bf16.mxu1 %v14550_v58  ;;  %v14582_v57 = vld [vmem:[%s18609_s2 + $0x3c8] sm:$0xff]   ;;  %v1344_v58 = vpack.c.bf16 %v1328_v41, %v1328_v41 }
 0x7e9   :  { %v14583_v60 = vld [vmem:[%s18609_s2 + $0x308] sm:$0xff]  }
 0x7ea   :  { %13271 = vmatpush3.bf16.msra.mxu0 %v14551_v61  ;;  %v14584_v61 = vld [vmem:[%s18609_s2 + $0x388] sm:$0xff]  }
 0x7eb   :  { %13293 = vmatpush3.bf16.msra.mxu1 %v14552_v62  ;;  %13272 = vmatprep.subr.bf16.mxu0 %v14553_v63  ;;  %v14585_v62 = vld [vmem:[%s18609_s2 + $0x350] sm:$0xff]  }
 0x7ec   :  { %13294 = vmatprep.subr.bf16.mxu1 %v14554_v5  ;;  %v14586_v63 = vld [vmem:[%s18609_s2 + $0x3d0] sm:$0xff]  }
 0x7ed   :  { %v14587_v5 = vld [vmem:[%s18609_s2 + $0x310] sm:$0xff]  }
 0x7ee   :  { %13273 = vmatpush3.bf16.msra.mxu0 %v14555_v6  ;;  %v14588_v6 = vld [vmem:[%s18609_s2 + $0x390] sm:$0xff]  }
 0x7ef   :  { %13295 = vmatpush3.bf16.msra.mxu1 %v14556_v8  ;;  %13274 = vmatprep.subr.bf16.mxu0 %v14557_v10  ;;  %v14589_v8 = vld [vmem:[%s18609_s2 + $0x358] sm:$0xff]  }
 0x7f0   :  { %13296 = vmatprep.subr.bf16.mxu1 %v14558_v11  ;;  %v14590_v10 = vld [vmem:[%s18609_s2 + $0x3d8] sm:$0xff]  }
 0x7f1   :  { %v14591_v11 = vld [vmem:[%s18609_s2 + $0x318] sm:$0xff]  }
 0x7f2   :  { %13275 = vmatpush3.bf16.msra.mxu0 %v14559_v13  ;;  %v14592_v13 = vld [vmem:[%s18609_s2 + $0x398] sm:$0xff]  }
 0x7f3   :  { %13297 = vmatpush3.bf16.msra.mxu1 %v14560_v44  ;;  %13276 = vmatprep.subr.bf16.mxu0 %v14561_v17  ;;  %v14593_v44 = vld [vmem:[%s18609_s2 + $0x360] sm:$0xff]  }
 0x7f4   :  { %13298 = vmatprep.subr.bf16.mxu1 %v14562_v18  ;;  %v14594_v17 = vld [vmem:[%s18609_s2 + $0x3e0] sm:$0xff]  }
 0x7f5   :  { %v14595_v18 = vld [vmem:[%s18609_s2 + $0x320] sm:$0xff]  }
 0x7f6   :  { %13277 = vmatpush3.bf16.msra.mxu0 %v14563_v19  ;;  %v14596_v19 = vld [vmem:[%s18609_s2 + $0x3a0] sm:$0xff]  }
 0x7f7   :  { %13299 = vmatpush3.bf16.msra.mxu1 %v14564_v20  ;;  %13278 = vmatprep.subr.bf16.mxu0 %v14565_v21  ;;  %v14597_v20 = vld [vmem:[%s18609_s2 + $0x368] sm:$0xff]  }
 0x7f8   :  { %13300 = vmatprep.subr.bf16.mxu1 %v14566_v24  ;;  %v14598_v21 = vld [vmem:[%s18609_s2 + $0x3e8] sm:$0xff]  }
 0x7f9   :  { %v14599_v24 = vld [vmem:[%s18609_s2 + $0x328] sm:$0xff]  }
 0x7fa   :  { %13279 = vmatpush3.bf16.msra.mxu0 %v14567_v25  ;;  %v793_v25 = vrot.slane %v15825_v1, %v15836_v9  ;;  %v14603_v1 = vld [vmem:[%s18609_s2 + $0x330] sm:$0xff]  }
 0x7fb   :  { %13301 = vmatpush3.bf16.msra.mxu1 %v14568_v27  ;;  %13280 = vmatprep.subr.bf16.mxu0 %v14569_v28  ;;  %v14601_v27 = vld [vmem:[%s18609_s2 + $0x370] sm:$0xff]  }
 0x7fc   :  { %13302 = vmatprep.subr.bf16.mxu1 %v14570_v48  ;;  %v14602_v28 = vld [vmem:[%s18609_s2 + $0x3f0] sm:$0xff]   ;;  %v1266_v29 = vadd.f32 %v15844_v12, %v793_v25  ;;  %v14607_v12 = vld [vmem:[%s18609_s2 + $0x338] sm:$0xff]  }
 0x7fd   :  { %v14604_v48 = vld [vmem:[%s18609_s2 + $0x3b0] sm:$0xff]  }
 0x7fe   :  { %13281 = vmatpush3.bf16.msra.mxu0 %v14571_v32  ;;  %v1325_v32 = vmax.f32 %v1266_v29, 0.0 }
 0x7ff   :  { %13303 = vmatpush3.bf16.msra.mxu1 %v14572_v34  ;;  %13282 = vmatprep.subr.bf16.mxu0 %v14573_v35  ;;  %v1327_v34 = vmax.f32 %v15846_v14, 0.0  ;;  %v12402_v14 = vld [vmem:[%s18610_s3 + $0x2] ss:$0 sm:$0xff] }
 0x800   :  { %13304 = vmatprep.subr.bf16.mxu1 %v14574_v22  ;;  %v1341_v35 = vpack.c.bf16 %v1325_v32, %v1325_v32 }
 0x801   :  { %v1343_v36 = vpack.c.bf16 %v1327_v34, %v1327_v34 }
 0x802   :  { %13283 = vmatpush3.bf16.msra.mxu0 %v14575_v37 }
 0x803   :  { %13305 = vmatpush3.bf16.msra.mxu1 %v14576_v52  ;;  %13312 = vmatprep.subr.bf16.mxu0 %v14577_v7 }
 0x804   :  { %13334 = vmatprep.subr.bf16.mxu1 %v14578_v15 }
 0x805   :  { %2567 = vmatmul.mubr.bf16.vlgmr.msra.gmra.mrb[44].mxu0 %v1337_v43 }
 0x806   :  { %2607 = vmatmul.mubr.bf16.vlgmr.msra.gmra.mrb[44].mxu1 %v1339_v54  ;;  %13313 = vmatpush3.bf16.msra.mxu0 %v14579_v42 }
 0x807   :  { %2646 = vmatprep.mubr.bf16.mxu0 %v1342_v56  ;;  %13335 = vmatpush3.bf16.msra.mxu1 %v14580_v53 }
 0x808   :  { %2686 = vmatprep.mubr.bf16.mxu1 %v1344_v58  ;;  %13314 = vmatprep.subr.bf16.mxu0 %v14581_v55 }
 0x809   :  { %13336 = vmatprep.subr.bf16.mxu1 %v14582_v57 }
 0x80a   :  { %13315 = vmatpush3.bf16.msra.mxu0 %v14583_v60 }
 0x80b   :  { %13337 = vmatpush3.bf16.msra.mxu1 %v14584_v61  ;;  %13316 = vmatprep.subr.bf16.mxu0 %v14585_v62 }
 0x80c   :  { %13338 = vmatprep.subr.bf16.mxu1 %v14586_v63 }
 0x80e   :  { %13317 = vmatpush3.bf16.msra.mxu0 %v14587_v5 }
 0x80f   :  { %13339 = vmatpush3.bf16.msra.mxu1 %v14588_v6  ;;  %13318 = vmatprep.subr.bf16.mxu0 %v14589_v8 }
 0x810   :  { %13340 = vmatprep.subr.bf16.mxu1 %v14590_v10 }
 0x812   :  { %13319 = vmatpush3.bf16.msra.mxu0 %v14591_v11 }
 0x813   :  { %13341 = vmatpush3.bf16.msra.mxu1 %v14592_v13  ;;  %13320 = vmatprep.subr.bf16.mxu0 %v14593_v44 }
 0x814   :  { %13342 = vmatprep.subr.bf16.mxu1 %v14594_v17 }
 0x816   :  { %13321 = vmatpush3.bf16.msra.mxu0 %v14595_v18 }
 0x817   :  { %13343 = vmatpush3.bf16.msra.mxu1 %v14596_v19  ;;  %13322 = vmatprep.subr.bf16.mxu0 %v14597_v20 }
 0x818   :  { %13344 = vmatprep.subr.bf16.mxu1 %v14598_v21 }
 0x81a   :  { %13323 = vmatpush3.bf16.msra.mxu0 %v14599_v24 }
 0x81b   :  { %13345 = vmatpush3.bf16.msra.mxu1 %v14600_v26  ;;  %13324 = vmatprep.subr.bf16.mxu0 %v14601_v27 }
 0x81c   :  { %13346 = vmatprep.subr.bf16.mxu1 %v14602_v28 }
 0x81e   :  { %13325 = vmatpush3.bf16.msra.mxu0 %v14603_v1 }
 0x81f   :  { %13347 = vmatpush3.bf16.msra.mxu1 %v14604_v48  ;;  %13326 = vmatprep.subr.bf16.mxu0 %v14605_v30 }
 0x820   :  { %13348 = vmatprep.subr.bf16.mxu1 %v14606_v31 }
 0x822   :  { %13327 = vmatpush3.bf16.msra.mxu0 %v14607_v12 }
 0x823   :  { %13349 = vmatpush3.bf16.msra.mxu1 %v14608_v33  ;;  %14067 = vmatprep.subr.bf16.mxu0 %v15313_v0 }
 0x824   :  { %14075 = vmatprep.subr.bf16.mxu1 %v15313_v0 }
 0x825   :  { %2647 = vmatmul.mubr.bf16.vlgmr.msra.gmra.mrb[48].mxu0 %v1341_v35 }
 0x826   :  { %2687 = vmatmul.mubr.bf16.vlgmr.msra.gmra.mrb[48].mxu1 %v1343_v36  ;;  %14071 = vmatprep.mubr.msk.bf16.mxu0 %vm15314_vm0, %v15313_v0 }
 0x827   :  { %14077 = vmatprep.mubr.msk.bf16.mxu1 %vm15314_vm0, %v15313_v0 }
 0x898   :  { %v13196_v22 = vpop.f32.mrb[36].mxu0  ;;  %v13218_v23 = vpop.f32.mrb[36].mxu1 }
 0x899   :  { %v13197_v51 = vpop.f32.mrb[37].mxu0  ;;  %v13219_v37 = vpop.f32.mrb[37].mxu1 }
 0x89a   :  { %v13198_v39 = vadd.f32 %v13197_v51, %v13196_v22  ;;  %v13220_v52 = vadd.f32 %v13219_v37, %v13218_v23  ;;  %v13199_v7 = vpop.f32.mrb[38].mxu0  ;;  %v13221_v40 = vpop.f32.mrb[38].mxu1  ;;  %v14609_v37 = vld [vmem:[%s18608_s1 + $0x48] ss:$316 sps:$4 sm:$0xff]  }
 0x89b   :  { %v13200_v15 = vpop.f32.mrb[39].mxu0  ;;  %v13222_v16 = vpop.f32.mrb[39].mxu1  ;;  %14068 = vmatpush3.bf16.msra.mxu0 %v14609_v37 }
 0x89c   :  { %v2409_v41 = vadd.f32 %v13198_v39, %v12402_v14  ;;  %v14610_v39 = vld [vmem:[%s18608_s1 + $0x2c0] ss:$316 sps:$4 sm:$0xff]   ;;  %14069 = vmatprep.subr.bf16.mxu0 %v15313_v0  ;;  %v12531_v15 = vld [vmem:[%s18610_s3 + $0x5] ss:$0 sm:$0xff] }
 0x89e   :  { %v2449_v42 = vadd.f32 %v13220_v52, %v2409_v41  ;;  %v12532_v41 = vld [vmem:[%s18610_s3 + $0x6] ss:$0 sm:$0xff] }
 0x89f   :  { %14070 = vmatpush3.bf16.msra.mxu0 %v14610_v39 }
 0x8a0   :  { %14081 = vmatprep.subr.bf16.mxu0 %v15313_v0 }
 0x8b8   :  { %v13240_v43 = vpop.f32.mrb[40].mxu0  ;;  %v13262_v53 = vpop.f32.mrb[40].mxu1 }
 0x8b9   :  { %v13241_v54 = vpop.f32.mrb[41].mxu0  ;;  %v13263_v55 = vpop.f32.mrb[41].mxu1 }
 0x8ba   :  { %v13242_v56 = vadd.f32 %v13241_v54, %v13240_v43  ;;  %v13264_v57 = vadd.f32 %v13263_v55, %v13262_v53  ;;  %v13243_v58 = vpop.f32.mrb[42].mxu0  ;;  %v13265_v60 = vpop.f32.mrb[42].mxu1  ;;  %v12533_v54 = vld [vmem:[%s18610_s3 + $0x7] ss:$0 sm:$0xff] }
 0x8bb   :  { %v13244_v61 = vpop.f32.mrb[43].mxu0  ;;  %v13266_v62 = vpop.f32.mrb[43].mxu1 }
 0x8bc   :  { %v2489_v63 = vadd.f32 %v13242_v56, %v2449_v42 }
 0x8be   :  { %v2529_v5 = vadd.f32 %v13264_v57, %v2489_v63 }
 0x8d8   :  { %v13284_v6 = vpop.f32.mrb[44].mxu0 }
 0x8d9   :  { %v13306_v8 = vpop.f32.mrb[44].mxu1  ;;  %v13285_v10 = vpop.f32.mrb[45].mxu0 }
 0x8da   :  { %v13286_v11 = vadd.f32 %v13285_v10, %v13284_v6  ;;  %v13307_v13 = vpop.f32.mrb[45].mxu1  ;;  %v13287_v44 = vpop.f32.mrb[46].mxu0 }
 0x8db   :  { %v13308_v17 = vadd.f32 %v13307_v13, %v13306_v8  ;;  %v13309_v18 = vpop.f32.mrb[46].mxu1  ;;  %v13288_v19 = vpop.f32.mrb[47].mxu0 }
 0x8dc   :  { %v2569_v20 = vadd.f32 %v13286_v11, %v2529_v5  ;;  %v13310_v21 = vpop.f32.mrb[47].mxu1 }
 0x8de   :  { %v2609_v24 = vadd.f32 %v13308_v17, %v2569_v20 }
 0x8f8   :  { %v13328_v25 = vpop.f32.mrb[48].mxu0 }
 0x8f9   :  { %v13350_v26 = vpop.f32.mrb[48].mxu1  ;;  %v13329_v27 = vpop.f32.mrb[49].mxu0 }
 0x8fa   :  { %v13330_v28 = vadd.f32 %v13329_v27, %v13328_v25  ;;  %v13351_v1 = vpop.f32.mrb[49].mxu1  ;;  %v13331_v29 = vpop.f32.mrb[50].mxu0 }
 0x8fb   :  { %v13352_v48 = vadd.f32 %v13351_v1, %v13350_v26  ;;  %v13353_v30 = vpop.f32.mrb[50].mxu1  ;;  %v13332_v31 = vpop.f32.mrb[51].mxu0 }
 0x8fc   :  { %v2649_v12 = vadd.f32 %v13330_v28, %v2609_v24  ;;  %v13354_v32 = vpop.f32.mrb[51].mxu1 }
 0x8fe   :  { %v2689_v33 = vadd.f32 %v13352_v48, %v2649_v12 }
 0x900   :  { %v2694_v34 = vadd.f32 %v2689_v33, %v15530_v46 }
 0x902   :  { %v2695_v35 = vsel %vm45_vm1, %v2694_v34, 0.0 }
 0x903   :  { %2696 = vadd.xlane.f32.xlu0 %v2695_v35 }
 0x990   :  { %v2697_v36 = vpop.xlane.xlu0 %2696 }
 0x991   :  { %v2698_v22 = vmul.f32 0.03125, %v2697_v36 }
 0x993   :  { %v2699_v23 = vsub.f32 %v2694_v34, %v2698_v22 }
 0x995   :  { %v2700_v14 = vmul.f32 %v2699_v23, %v2699_v23 }
 0x997   :  { %v2701_v51 = vsel %vm45_vm1, %v2700_v14, 0.0 }
 0x998   :  { %2702 = vadd.xlane.f32.xlu0 %v2701_v51 }
 0xa25   :  { %v2703_v46 = vpop.xlane.xlu0 %2702 }
 0xa26   :  { %v2704_v52 = vmul.f32 0.03125, %v2703_v46 }
 0xa28   :  { %v2705_v7 = vadd.f32 1e-05, %v2704_v52 }
 0xa2a   :  { %15181 = vrsqrt.f32 %v2705_v7 }
 0xa34   :  { %v15182_v40 = vpop.eup %15181 }
 0xa35   :  { %v2707_v16 = vmul.f32 %v15182_v40, %v2699_v23 }
 0xa37   :  { %v2713_v42 = vmul.f32 %v12531_v15, %v2707_v16 }
 0xa39   :  { %v16126_v43 = vadd.f32 %v12532_v41, %v2713_v42 }
 0xa3b   :  { %v2724_v53 = vpack.c.bf16 %v16126_v43, %v16126_v43 }
 0xa3d   :  { %14072 = vmatmul.mubr.msk.bf16.vlgmr.msra.gmra.mrb[52].mxu0 %vm45_vm1, %v2724_v53 }
 0xa3e   :  { %14083 = vmatprep.mubr.msk.bf16.mxu0 %vm15314_vm0, %v15313_v0 }
 0xb10   :  { %v2779_v55 = vpop.f32.mrb[52].mxu0 }
 0xb11   :  { %v16136_v56 = vadd.f32 %v12533_v54, %v2779_v55  ;;  %v14073_v57 = vpop.f32.mrb[53].mxu0 }
 0xb12   :  { %v2782_v58 = vpop.f32.mrb[54].mxu0 }
 0xb13   :  { %2785 = vst.msk [vmem:[#allocation2] sm:$0xff] %vm89_vm2, %v16136_v56  ;;  %2799 = vrot.lane.b32.xlu0 %v16136_v56, %s15318_s29  ;;  %2787 = vrot.lane.b32.xlu1 %v16136_v56, %s15316_s27  ;;  %v14074_v60 = vpop.f32.mrb[55].mxu0 }
 0xb17   :  { %2823 = vrot.lane.b32.xlu0 %v16136_v56, %s15320_s6  ;;  %2795 = vrot.lane.b32.xlu1 %v16136_v56, %s15315_s26 }
 0xb1a   :  { %v2831_v17 = vld [vmem:[#allocation2] sm:$0xff] }
 0xb1b   :  { %2819 = vrot.lane.b32.xlu0 %v16136_v56, %s15321_s7  ;;  %2811 = vrot.lane.b32.xlu1 %v16136_v56, %s15317_s28  ;;  %v2835_v25 = vmul.f32 0.35355338, %v2831_v17 }
 0xb1d   :  { %v2847_v1 = vpack.c.bf16 %v2835_v25, %v2835_v25 }
 0xb1f   :  { %2807 = vrot.lane.b32.xlu1 %v16136_v56, %s15319_s30 }
 0xb85   :  { %v2800_v61 = vpop.permute.xlu0 %2799  ;;  %v2788_v62 = vpop.permute.xlu1 %2787 }
 0xb86   :  { %2802 = vst.msk [vmem:[#allocation2 + $0x28] sm:$0xff] %vm89_vm2, %v2800_v61  ;;  %2790 = vst.msk [vmem:[#allocation2 + $0x20] sm:$0xff] %vm89_vm2, %v2788_v62 }
 0xb89   :  { %v2824_v63 = vpop.permute.xlu0 %2823  ;;  %v2796_v5 = vpop.permute.xlu1 %2795 }
 0xb8a   :  { %2826 = vst.msk [vmem:[#allocation2 + $0x38] sm:$0xff] %vm89_vm2, %v2824_v63  ;;  %2798 = vst.msk [vmem:[#allocation2 + $0x8] sm:$0xff] %vm89_vm2, %v2796_v5 }
 0xb8d   :  { %v2820_v6 = vpop.permute.xlu0 %2819  ;;  %v2812_v8 = vpop.permute.xlu1 %2811  ;;  %v2839_v10 = vld [vmem:[#allocation2 + $0x20] sm:$0xff]  ;;  %v2840_v11 = vld [vmem:[#allocation2 + $0x28] sm:$0xff] }
 0xb8e   :  { %2822 = vst.msk [vmem:[#allocation2 + $0x18] sm:$0xff] %vm89_vm2, %v2820_v6  ;;  %2814 = vst.msk [vmem:[#allocation2 + $0x30] sm:$0xff] %vm89_vm2, %v2812_v8  ;;  %v2851_v13 = vpack.c.bf16 %v2839_v10, %v2839_v10  ;;  %v2852_v44 = vpack.c.bf16 %v2840_v11, %v2840_v11 }
 0xb90   :  { %v2859_v18 = vsel %vm89_vm2, %v2851_v13, 0  ;;  %v2905_v19 = vsel %vm89_vm2, %v2852_v44, 0 }
 0xb91   :  { %14076 = vmatpush3.bf16.xpose.msra.mxu1 %v2859_v18  ;;  %14082 = vmatpush3.bf16.xpose.msra.mxu0 %v2905_v19  ;;  %v2808_v20 = vpop.permute.xlu1 %2807  ;;  %v2832_v21 = vld [vmem:[#allocation2 + $0x8] sm:$0xff]  ;;  %v2842_v24 = vld [vmem:[#allocation2 + $0x38] sm:$0xff] }
 0xb92   :  { %2810 = vst.msk [vmem:[#allocation2 + $0x10] sm:$0xff] %vm89_vm2, %v2808_v20  ;;  %v2836_v26 = vmul.f32 0.35355338, %v2832_v21  ;;  %14087 = vmatprep.subr.bf16.mxu1 %v15313_v0  ;;  %14093 = vmatprep.subr.bf16.mxu0 %v15313_v0  ;;  %v2854_v27 = vpack.c.bf16 %v2842_v24, %v2842_v24 }
 0xb94   :  { %v2848_v29 = vpack.c.bf16 %v2836_v26, %v2836_v26  ;;  %v2997_v12 = vsel %vm89_vm2, %v2854_v27, 0 }
 0xb95   :  { %v2841_v28 = vld [vmem:[#allocation2 + $0x30] sm:$0xff]  ;;  %v2834_v30 = vld [vmem:[#allocation2 + $0x18] sm:$0xff] }
 0xb96   :  { %v2853_v48 = vpack.c.bf16 %v2841_v28, %v2841_v28  ;;  %v2838_v34 = vmul.f32 0.35355338, %v2834_v30 }
 0xb98   :  { %14078 = vmatmul.mubr.msk.bf16.vlgmr.msra.gmra.mrb[52].mxu1 %vm89_vm2, %v2847_v1  ;;  %14084 = vmatmul.mubr.msk.bf16.vlgmr.msra.gmra.mrb[56].mxu0 %vm89_vm2, %v2848_v29  ;;  %v2951_v31 = vsel %vm89_vm2, %v2853_v48, 0  ;;  %v2850_v36 = vpack.c.bf16 %v2838_v34, %v2838_v34 }
 0xb99   :  { %14088 = vmatpush3.bf16.xpose.msra.mxu1 %v2951_v31  ;;  %14094 = vmatpush3.bf16.xpose.msra.mxu0 %v2997_v12  ;;  %v2833_v32 = vld [vmem:[#allocation2 + $0x10] sm:$0xff] }
 0xb9a   :  { %14089 = vmatprep.mubr.msk.bf16.mxu1 %vm15314_vm0, %v15313_v0  ;;  %14095 = vmatprep.mubr.msk.bf16.mxu0 %vm15314_vm0, %v15313_v0  ;;  %v2837_v33 = vmul.f32 0.35355338, %v2833_v32 }
 0xb9b   :  { %14099 = vmatprep.subr.bf16.mxu1 %v15313_v0  ;;  %14105 = vmatprep.subr.bf16.mxu0 %v15313_v0 }
 0xb9c   :  { %v2849_v35 = vpack.c.bf16 %v2837_v33, %v2837_v33 }
 0xba0   :  { %14090 = vmatmul.mubr.msk.bf16.vlgmr.msra.gmra.mrb[56].mxu1 %vm89_vm2, %v2849_v35  ;;  %14096 = vmatmul.mubr.msk.bf16.vlgmr.msra.gmra.mrb[60].mxu0 %vm89_vm2, %v2850_v36 }
 0xba1   :  { %14101 = vmatprep.mubr.msk.bf16.mxu1 %vm15314_vm0, %v15313_v0  ;;  %14107 = vmatprep.mubr.msk.bf16.mxu0 %vm15314_vm0, %v15313_v0 }
 0xc6b   :  { %v2895_v22 = vpop.f32.mrb[52].mxu1  ;;  %v2941_v23 = vpop.f32.mrb[56].mxu0 }
 0xc6c   :  { %v14079_v14 = vpop.f32.mrb[53].mxu1  ;;  %v14085_v51 = vpop.f32.mrb[57].mxu0  ;;  %v3039_v37 = vsel %vm89_vm2, %v2895_v22, -inf  ;;  %v3042_v39 = vsel %vm89_vm2, %v2941_v23, -inf }
 0xc6d   :  { %3040 = vmax.xlane.f32.xlu1 %v3039_v37  ;;  %v2898_v46 = vpop.f32.mrb[54].mxu1  ;;  %3043 = vmax.xlane.f32.xlu0 %v3042_v39  ;;  %v2944_v52 = vpop.f32.mrb[58].mxu0 }
 0xc6e   :  { %v14080_v7 = vpop.f32.mrb[55].mxu1  ;;  %v14086_v40 = vpop.f32.mrb[59].mxu0 }
 0xc73   :  { %v2987_v15 = vpop.f32.mrb[56].mxu1  ;;  %v3033_v16 = vpop.f32.mrb[60].mxu0 }
 0xc74   :  { %v14091_v41 = vpop.f32.mrb[57].mxu1  ;;  %v14097_v42 = vpop.f32.mrb[61].mxu0  ;;  %v3045_v53 = vsel %vm89_vm2, %v2987_v15, -inf  ;;  %v3048_v54 = vsel %vm89_vm2, %v3033_v16, -inf }
 0xc75   :  { %v2990_v55 = vpop.f32.mrb[58].mxu1  ;;  %3046 = vmax.xlane.f32.xlu0 %v3045_v53  ;;  %3049 = vmax.xlane.f32.xlu1 %v3048_v54  ;;  %v3036_v57 = vpop.f32.mrb[62].mxu0 }
 0xc76   :  { %v14092_v58 = vpop.f32.mrb[59].mxu1  ;;  %v14098_v60 = vpop.f32.mrb[63].mxu0 }
 0xc86   :  { %2803 = vrot.lane.b32.xlu1 %v16136_v56, %s15322_s8 }
 0xc8b   :  { %2791 = vrot.lane.b32.xlu0 %v16136_v56, %s15323_s9 }
 0xcfa   :  { %v3041_v61 = vpop.xlane.xlu1 %3040  ;;  %v3044_v62 = vpop.xlane.xlu0 %3043 }
 0xcfb   :  { %v3051_v63 = vsub.f32 %v2895_v22, %v3041_v61  ;;  %v3052_v5 = vsub.f32 %v2941_v23, %v3044_v62 }
 0xcfd   :  { %v3055_v6 = vmul.f32 1.442695, %v3051_v63  ;;  %v3057_v8 = vmul.f32 1.442695, %v3052_v5  ;;  %v14611_v5 = vld [vmem:[%s18608_s1 + $0x4c] ss:$316 sps:$4 sm:$0xff]  }
 0xcff   :  { %15183 = vpow2.f32 %v3055_v6 }
 0xd00   :  { %15185 = vpow2.f32 %v3057_v8 }
 0xd02   :  { %v3047_v10 = vpop.xlane.xlu0 %3046  ;;  %v3050_v11 = vpop.xlane.xlu1 %3049 }
 0xd03   :  { %v3053_v13 = vsub.f32 %v2987_v15, %v3047_v10  ;;  %v3054_v44 = vsub.f32 %v3033_v16, %v3050_v11 }
 0xd05   :  { %v3059_v17 = vmul.f32 1.442695, %v3053_v13  ;;  %v3061_v18 = vmul.f32 1.442695, %v3054_v44  ;;  %v14612_v13 = vld [vmem:[%s18608_s1 + $0x2c4] ss:$316 sps:$4 sm:$0xff]  }
 0xd06   :  { %v2792_v19 = vpop.permute.xlu0 %2791  ;;  %v2804_v20 = vpop.permute.xlu1 %2803 }
 0xd07   :  { %15187 = vpow2.f32 %v3059_v17  ;;  %2794 = vst.msk [vmem:[#allocation2 + $0x40] sm:$0xff] %vm89_vm2, %v2792_v19  ;;  %2806 = vst.msk [vmem:[#allocation2 + $0x48] sm:$0xff] %vm89_vm2, %v2804_v20 }
 0xd08   :  { %15189 = vpow2.f32 %v3061_v18 }
 0xd09   :  { %v15184_v21 = vpop.eup %15183 }
 0xd0a   :  { %v15186_v24 = vpop.eup %15185  ;;  %v3063_v25 = vsel %vm89_vm2, %v15184_v21, 0.0 }
 0xd0b   :  { %3064 = vadd.xlane.f32.xlu0 %v3063_v25  ;;  %v3066_v26 = vsel %vm89_vm2, %v15186_v24, 0.0 }
 0xd0c   :  { %3067 = vadd.xlane.f32.xlu1 %v3066_v26 }
 0xd0e   :  { %v2843_v27 = vld [vmem:[#allocation2 + $0x40] sm:$0xff]  ;;  %v2844_v28 = vld [vmem:[#allocation2 + $0x48] sm:$0xff] }
 0xd0f   :  { %v3087_v1 = vpack.c.bf16 %v2843_v27, %v2843_v27  ;;  %v3088_v29 = vpack.c.bf16 %v2844_v28, %v2844_v28 }
 0xd11   :  { %v15188_v48 = vpop.eup %15187  ;;  %v3095_v30 = vsel %vm410_vm3, %v3087_v1, 0  ;;  %v3141_v31 = vsel %vm410_vm3, %v3088_v29, 0 }
 0xd12   :  { %v15190_v12 = vpop.eup %15189  ;;  %14100 = vmatpush3.bf16.msra.mxu1 %v3095_v30  ;;  %14106 = vmatpush3.bf16.msra.mxu0 %v3141_v31  ;;  %v3069_v32 = vsel %vm89_vm2, %v15188_v48, 0.0  ;;  %v12545_v30 = vld [vmem:[%s18610_s3 + $0x8] ss:$0 sm:$0xff] }
 0xd13   :  { %3070 = vadd.xlane.f32.xlu0 %v3069_v32  ;;  %v3072_v33 = vsel %vm89_vm2, %v15190_v12, 0.0  ;;  %14111 = vmatprep.subr.bf16.mxu1 %v15313_v0 }
 0xd14   :  { %3073 = vadd.xlane.f32.xlu1 %v3072_v33  ;;  %14117 = vmatprep.subr.bf16.mxu0 %v15313_v0 }
 0xd25   :  { %2815 = vrot.lane.b32.xlu1 %v16136_v56, %s15324_s10 }
 0xd29   :  { %2827 = vrot.lane.b32.xlu0 %v16136_v56, %s15325_s11 }
 0xd98   :  { %v3065_v34 = vpop.xlane.xlu0 %3064 }
 0xd99   :  { %15191 = vrcp.f32 %v3065_v34  ;;  %v3068_v35 = vpop.xlane.xlu1 %3067 }
 0xd9a   :  { %15193 = vrcp.f32 %v3068_v35 }
 0xda0   :  { %v3071_v36 = vpop.xlane.xlu0 %3070 }
 0xda1   :  { %15195 = vrcp.f32 %v3071_v36  ;;  %v3074_v22 = vpop.xlane.xlu1 %3073 }
 0xda2   :  { %15197 = vrcp.f32 %v3074_v22 }
 0xda3   :  { %v15192_v23 = vpop.eup %15191 }
 0xda4   :  { %v15194_v14 = vpop.eup %15193  ;;  %v2828_v51 = vpop.permute.xlu0 %2827  ;;  %v3079_v37 = vmul.f32 %v15192_v23, %v15184_v21 }
 0xda5   :  { %2830 = vst.msk [vmem:[#allocation2 + $0x58] sm:$0xff] %vm89_vm2, %v2828_v51  ;;  %v2816_v39 = vpop.permute.xlu1 %2815  ;;  %v3080_v46 = vmul.f32 %v15194_v14, %v15186_v24 }
 0xda6   :  { %2818 = vst.msk [vmem:[#allocation2 + $0x50] sm:$0xff] %vm89_vm2, %v2816_v39  ;;  %v3083_v52 = vpack.c.bf16 %v3079_v37, %v3079_v37  ;;  %v14615_v39 = vld [vmem:[%s18608_s1 + $0x54] ss:$316 sps:$4 sm:$0xff]  }
 0xda7   :  { %v3084_v56 = vpack.c.bf16 %v3080_v46, %v3080_v46  ;;  %v14618_v46 = vld [vmem:[%s18608_s1 + $0x5c] ss:$316 sps:$4 sm:$0xff]  }
 0xda8   :  { %14102 = vmatmul.mubr.msk.bf16.vlgmr.msra.gmra.mrb[60].mxu1 %vm89_vm2, %v3083_v52  ;;  %v14616_v52 = vld [vmem:[%s18608_s1 + $0x58] ss:$316 sps:$4 sm:$0xff]  }
 0xda9   :  { %14108 = vmatmul.mubr.msk.bf16.vlgmr.msra.gmra.mrb[64].mxu0 %vm89_vm2, %v3084_v56  ;;  %14113 = vmatprep.mubr.msk.bf16.mxu1 %vm15314_vm0, %v15313_v0  ;;  %v14621_v56 = vld [vmem:[%s18608_s1 + $0x2cc] ss:$316 sps:$4 sm:$0xff]  }
 0xdaa   :  { %14119 = vmatprep.mubr.msk.bf16.mxu0 %vm15314_vm0, %v15313_v0 }
 0xdab   :  { %v15196_v7 = vpop.eup %15195 }
 0xdac   :  { %v15198_v40 = vpop.eup %15197  ;;  %v2846_v15 = vld [vmem:[#allocation2 + $0x58] sm:$0xff]  ;;  %v3081_v54 = vmul.f32 %v15196_v7, %v15188_v48  ;;  %v14624_v7 = vld [vmem:[%s18608_s1 + $0x2d4] ss:$316 sps:$4 sm:$0xff]  }
 0xdad   :  { %v2845_v16 = vld [vmem:[#allocation2 + $0x50] sm:$0xff]  ;;  %v3090_v41 = vpack.c.bf16 %v2846_v15, %v2846_v15  ;;  %v3082_v42 = vmul.f32 %v15198_v40, %v15190_v12  ;;  %v14619_v40 = vld [vmem:[%s18608_s1 + $0x2c8] ss:$316 sps:$4 sm:$0xff]  }
 0xdae   :  { %v3089_v53 = vpack.c.bf16 %v2845_v16, %v2845_v16  ;;  %v3085_v60 = vpack.c.bf16 %v3081_v54, %v3081_v54  ;;  %v14622_v15 = vld [vmem:[%s18608_s1 + $0x2d0] ss:$316 sps:$4 sm:$0xff]   ;;  %v14627_v16 = vld [vmem:[%s18608_s1 + $0x64] ss:$316 sps:$4 sm:$0xff]  }
 0xdaf   :  { %v3233_v55 = vsel %vm410_vm3, %v3090_v41, 0  ;;  %v3086_v58 = vpack.c.bf16 %v3082_v42, %v3082_v42  ;;  %v14630_v41 = vld [vmem:[%s18608_s1 + $0x6c] ss:$316 sps:$4 sm:$0xff]  }
 0xdb0   :  { %v3187_v57 = vsel %vm410_vm3, %v3089_v53, 0  ;;  %14118 = vmatpush3.bf16.msra.mxu0 %v3233_v55 }
 0xdb1   :  { %14112 = vmatpush3.bf16.msra.mxu1 %v3187_v57  ;;  %3665 = vmatprep.subr.bf16.mxu0 %v14615_v39  ;;  %v12549_v57 = vld [vmem:[%s18610_s3 + $0xa] ss:$0 sm:$0xff]  ;;  %v14672_v39 = vld [vmem:[%s18609_s2 + $0x490] sm:$0xff]  }
 0xdb2   :  { %14123 = vmatprep.subr.bf16.mxu1 %v15313_v0 }
 0xdb3   :  { %14120 = vmatmul.mubr.msk.bf16.vlgmr.msra.gmra.mrb[68].mxu0 %vm89_vm2, %v3086_v58 }
 0xdb4   :  { %14114 = vmatmul.mubr.msk.bf16.vlgmr.msra.gmra.mrb[64].mxu1 %vm89_vm2, %v3085_v60  ;;  %3697 = vmatprep.mubr.bf16.mxu0 %v15329_v38  ;;  %v12550_v60 = vld [vmem:[%s18610_s3 + $0xb] ss:$0 sm:$0xff] }
 0xdb5   :  { %14127 = vmatprep.mubr.msk.bf16.mxu1 %vm15314_vm0, %v15313_v0  ;;  %14124 = vmatpush3.bf16.msra.mxu1 %v14611_v5  ;;  %v14628_v5 = vld [vmem:[%s18608_s1 + $0x68] ss:$316 sps:$4 sm:$0xff]  }
 0xdb6   :  { %14125 = vmatprep.subr.bf16.mxu1 %v15313_v0 }
 0xdb9   :  { %14126 = vmatpush3.bf16.msra.mxu1 %v14612_v13  ;;  %v14634_v13 = vld [vmem:[%s18608_s1 + $0x2e0] ss:$316 sps:$4 sm:$0xff]  }
 0xdba   :  { %3706 = vmatprep.subr.bf16.mxu1 %v14618_v46  ;;  %v14673_v46 = vld [vmem:[%s18609_s2 + $0x458] sm:$0xff]  }
 0xe7b   :  { %v3131_v61 = vpop.f32.mrb[60].mxu1 }
 0xe7c   :  { %3275 = vst.msk [vmem:[#allocation3] sm:$0xff] %vm89_vm2, %v3131_v61  ;;  %v3177_v62 = vpop.f32.mrb[64].mxu0  ;;  %v14103_v63 = vpop.f32.mrb[61].mxu1 }
 0xe7d   :  { %3277 = vrot.lane.b32.xlu1 %v3177_v62, %s15326_s14  ;;  %v14109_v6 = vpop.f32.mrb[65].mxu0  ;;  %v3134_v8 = vpop.f32.mrb[62].mxu1  ;;  %v14625_v63 = vld [vmem:[%s18608_s1 + $0x60] ss:$316 sps:$4 sm:$0xff]  }
 0xe7e   :  { %v3180_v10 = vpop.f32.mrb[66].mxu0  ;;  %v14104_v11 = vpop.f32.mrb[63].mxu1  ;;  %v14633_v8 = vld [vmem:[%s18608_s1 + $0x2dc] ss:$316 sps:$4 sm:$0xff]  }
 0xe7f   :  { %v14110_v44 = vpop.f32.mrb[67].mxu0  ;;  %v14636_v10 = vld [vmem:[%s18608_s1 + $0x2e4] ss:$316 sps:$4 sm:$0xff]   ;;  %v14631_v11 = vld [vmem:[%s18608_s1 + $0x2d8] ss:$316 sps:$4 sm:$0xff]  }
 0xe80   :  { %v14639_v44 = vld [vmem:[%s18608_s1 + $0x74] ss:$316 sps:$4 sm:$0xff]  }
 0xe86   :  { %v3269_v17 = vpop.f32.mrb[68].mxu0 }
 0xe87   :  { %v3223_v18 = vpop.f32.mrb[64].mxu1  ;;  %3287 = vrot.lane.b32.xlu1 %v3269_v17, %s15327_s17  ;;  %v14121_v19 = vpop.f32.mrb[69].mxu0  ;;  %v14642_v17 = vld [vmem:[%s18608_s1 + $0x7c] ss:$316 sps:$4 sm:$0xff]  }
 0xe88   :  { %3282 = vrot.lane.b32.xlu0 %v3223_v18, %s15328_s18  ;;  %v14115_v20 = vpop.f32.mrb[65].mxu1  ;;  %v3272_v21 = vpop.f32.mrb[70].mxu0  ;;  %v14637_v18 = vld [vmem:[%s18608_s1 + $0x70] ss:$316 sps:$4 sm:$0xff]   ;;  %v14640_v19 = vld [vmem:[%s18608_s1 + $0x78] ss:$316 sps:$4 sm:$0xff]  }
 0xe89   :  { %v3226_v24 = vpop.f32.mrb[66].mxu1  ;;  %v14122_v25 = vpop.f32.mrb[71].mxu0  ;;  %v14645_v20 = vld [vmem:[%s18608_s1 + $0x2ec] ss:$316 sps:$4 sm:$0xff]   ;;  %v14648_v21 = vld [vmem:[%s18608_s1 + $0x2f4] ss:$316 sps:$4 sm:$0xff]  }
 0xe8a   :  { %v14116_v26 = vpop.f32.mrb[67].mxu1  ;;  %v14643_v24 = vld [vmem:[%s18608_s1 + $0x2e8] ss:$316 sps:$4 sm:$0xff]   ;;  %v14646_v25 = vld [vmem:[%s18608_s1 + $0x2f0] ss:$316 sps:$4 sm:$0xff]  }
 0xe8b   :  { %v14651_v26 = vld [vmem:[%s18608_s1 + $0x84] ss:$316 sps:$4 sm:$0xff]  }
 0xeef   :  { %v3278_v27 = vpop.permute.xlu1 %3277 }
 0xef0   :  { %3280 = vst.msk [vmem:[#allocation3] sm:$0xff] %vm597_vm4, %v3278_v27  ;;  %v14654_v27 = vld [vmem:[%s18608_s1 + $0x8c] ss:$316 sps:$4 sm:$0xff]  }
 0xef9   :  { %v3288_v28 = vpop.permute.xlu1 %3287 }
 0xefa   :  { %v3283_v1 = vpop.permute.xlu0 %3282 }
 0xefb   :  { %3285 = vst.msk [vmem:[#allocation3] sm:$0xff] %vm603_vm5, %v3283_v1  ;;  %v14652_v1 = vld [vmem:[%s18608_s1 + $0x88] ss:$316 sps:$4 sm:$0xff]  }
 0xefc   :  { %3290 = vst.msk [vmem:[#allocation3] sm:$0xff] %vm609_vm6, %v3288_v28  ;;  %v14649_v28 = vld [vmem:[%s18608_s1 + $0x80] ss:$316 sps:$4 sm:$0xff]  }
 0xf03   :  { %v3291_v29 = vld [vmem:[#allocation3] sm:$0xff] }
 0xf04   :  { %v3296_v48 = vpack.c.bf16 %v3291_v29, %v3291_v29  ;;  %v14657_v29 = vld [vmem:[%s18608_s1 + $0x2fc] ss:$316 sps:$4 sm:$0xff]  }
 0xf06   :  { %14128 = vmatmul.mubr.msk.bf16.vlgmr.msra.gmra.mrb[68].mxu1 %vm45_vm1, %v3296_v48  ;;  %v14660_v48 = vld [vmem:[%s18608_s1 + $0x304] ss:$316 sps:$4 sm:$0xff]  }
 0xf07   :  { %3738 = vmatprep.mubr.bf16.mxu1 %v15329_v38  ;;  %3707 = vmatpush1.bf16.msra.mxu1 %v14616_v52  ;;  %v14675_v52 = vld [vmem:[%s18609_s2 + $0x418] sm:$0xff]  }
 0xf08   :  { %3708 = vmatprep.subr.bf16.mxu1 %v14624_v7  ;;  %v14677_v7 = vld [vmem:[%s18609_s2 + $0x460] sm:$0xff]  }
 0xf0b   :  { %3709 = vmatpush1.bf16.msra.mxu1 %v14622_v15  ;;  %v14679_v15 = vld [vmem:[%s18609_s2 + $0x420] sm:$0xff]  }
 0xf0c   :  { %3788 = vmatprep.subr.bf16.mxu1 %v14630_v41  ;;  %v14681_v41 = vld [vmem:[%s18609_s2 + $0x468] sm:$0xff]  }
 0xfd9   :  { %v3351_v31 = vpop.f32.mrb[68].mxu1 }
 0xfda   :  { %v3352_v12 = vadd.f32 %v12545_v30, %v3351_v31  ;;  %v14129_v32 = vpop.f32.mrb[69].mxu1  ;;  %v14655_v30 = vld [vmem:[%s18608_s1 + $0x2f8] ss:$316 sps:$4 sm:$0xff]   ;;  %v14658_v31 = vld [vmem:[%s18608_s1 + $0x300] ss:$316 sps:$4 sm:$0xff]  }
 0xfdb   :  { %v3354_v33 = vpop.f32.mrb[70].mxu1  ;;  %v14662_v32 = vld [vmem:[%s18609_s2 + $0x4c0] sm:$0xff]  }
 0xfdc   :  { %v14130_v34 = vpop.f32.mrb[71].mxu1  ;;  %v3357_v35 = vadd.f32 %v3352_v12, %v16126_v43  ;;  %v14613_v43 = vld [vmem:[%s18608_s1 + $0x50] ss:$316 sps:$4 sm:$0xff]   ;;  %v14661_v12 = vld [vmem:[%s18609_s2 + $0x440] sm:$0xff]  }
 0xfdd   :  { %3666 = vmatpush1.bf16.msra.mxu0 %v14613_v43  ;;  %v14663_v33 = vld [vmem:[%s18609_s2 + $0x400] sm:$0xff]   ;;  %v14674_v43 = vld [vmem:[%s18609_s2 + $0x4d8] sm:$0xff]  }
 0xfde   :  { %v3358_v36 = vsel %vm45_vm1, %v3357_v35, 0.0  ;;  %3667 = vmatprep.subr.bf16.mxu0 %v14621_v56  ;;  %v14664_v34 = vld [vmem:[%s18609_s2 + $0x480] sm:$0xff]   ;;  %v14676_v56 = vld [vmem:[%s18609_s2 + $0x498] sm:$0xff]  }
 0xfdf   :  { %3359 = vadd.xlane.f32.xlu0 %v3358_v36  ;;  %v14666_v36 = vld [vmem:[%s18609_s2 + $0x4c8] sm:$0xff]  }
 0xfe1   :  { %3668 = vmatpush1.bf16.msra.mxu0 %v14619_v40  ;;  %v14678_v40 = vld [vmem:[%s18609_s2 + $0x4e0] sm:$0xff]  }
 0xfe2   :  { %3747 = vmatprep.subr.bf16.mxu0 %v14627_v16  ;;  %v14680_v16 = vld [vmem:[%s18609_s2 + $0x4a0] sm:$0xff]  }
0x106c   :  { %v3360_v22 = vpop.xlane.xlu0 %3359 }
0x106d   :  { %v3361_v23 = vmul.f32 0.03125, %v3360_v22  ;;  %v14667_v22 = vld [vmem:[%s18609_s2 + $0x408] sm:$0xff]  }
0x106f   :  { %v3362_v14 = vsub.f32 %v3357_v35, %v3361_v23  ;;  %v14665_v35 = vld [vmem:[%s18609_s2 + $0x448] sm:$0xff]  }
0x1070   :  { %v14668_v23 = vld [vmem:[%s18609_s2 + $0x488] sm:$0xff]  }
0x1071   :  { %v3363_v51 = vmul.f32 %v3362_v14, %v3362_v14 }
0x1073   :  { %v3364_v37 = vsel %vm45_vm1, %v3363_v51, 0.0  ;;  %v14670_v51 = vld [vmem:[%s18609_s2 + $0x4d0] sm:$0xff]  }
0x1074   :  { %3365 = vadd.xlane.f32.xlu1 %v3364_v37  ;;  %v14671_v37 = vld [vmem:[%s18609_s2 + $0x410] sm:$0xff]  }
0x1101   :  { %v3366_v42 = vpop.xlane.xlu1 %3365 }
0x1102   :  { %v3367_v53 = vmul.f32 0.03125, %v3366_v42  ;;  %v14682_v42 = vld [vmem:[%s18609_s2 + $0x4e8] sm:$0xff]  }
0x1104   :  { %v3368_v54 = vadd.f32 1e-05, %v3367_v53  ;;  %v14683_v53 = vld [vmem:[%s18609_s2 + $0x428] sm:$0xff]  }
0x1106   :  { %15199 = vrsqrt.f32 %v3368_v54  ;;  %v14684_v54 = vld [vmem:[%s18609_s2 + $0x4a8] sm:$0xff]  }
0x1110   :  { %v15200_v55 = vpop.eup %15199 }
0x1111   :  { %v3370_v58 = vmul.f32 %v15200_v55, %v3362_v14  ;;  %v14669_v14 = vld [vmem:[%s18609_s2 + $0x450] sm:$0xff]  }
0x1112   :  { %v14685_v55 = vld [vmem:[%s18609_s2 + $0x470] sm:$0xff]  }
0x1113   :  { %v3376_v61 = vmul.f32 %v12549_v57, %v3370_v58  ;;  %v14686_v57 = vld [vmem:[%s18609_s2 + $0x4f0] sm:$0xff]  }
0x1114   :  { %v14687_v58 = vld [vmem:[%s18609_s2 + $0x430] sm:$0xff]  }
0x1115   :  { %v16277_v62 = vadd.f32 %v12550_v60, %v3376_v61  ;;  %v14688_v60 = vld [vmem:[%s18609_s2 + $0x4b0] sm:$0xff]   ;;  %v14689_v61 = vld [vmem:[%s18609_s2 + $0x478] sm:$0xff]  }
0x1117   :  { %v16287_v6 = vpack.c.bf16 %v16277_v62, %v16277_v62 }
0x1119   :  { %12585 = vmatmul.mubr.msk.bf16.vlgmr.msra.gmra.mrb[72].mxu0 %vm45_vm1, %v16287_v6  ;;  %12586 = vmatmul.mubr.msk.bf16.vlgmr.msra.gmra.mrb[72].mxu1 %vm45_vm1, %v16287_v6 }
0x111a   :  { %3748 = vmatpush1.bf16.msra.mxu0 %v14625_v63  ;;  %3789 = vmatpush1.bf16.msra.mxu1 %v14628_v5  ;;  %v14690_v63 = vld [vmem:[%s18609_s2 + $0x4f8] sm:$0xff]  }
0x111b   :  { %3749 = vmatprep.subr.bf16.mxu0 %v14633_v8  ;;  %3790 = vmatprep.subr.bf16.mxu1 %v14636_v10  ;;  %v14691_v5 = vld [vmem:[%s18609_s2 + $0x438] sm:$0xff]   ;;  %v14693_v8 = vld [vmem:[%s18609_s2 + $0x540] sm:$0xff]  }
0x111c   :  { %3779 = vmatprep.mubr.bf16.mxu0 %v15329_v38  ;;  %3820 = vmatprep.mubr.bf16.mxu1 %v15329_v38  ;;  %v14694_v10 = vld [vmem:[%s18609_s2 + $0x5c0] sm:$0xff]  }
0x111e   :  { %3750 = vmatpush1.bf16.msra.mxu0 %v14631_v11  ;;  %3791 = vmatpush1.bf16.msra.mxu1 %v14634_v13  ;;  %v16476_v11 = vld [vmem:[%s18611_s4 + $0x1] ss:$4 sm:$0xff] }
0x111f   :  { %3829 = vmatprep.subr.bf16.mxu0 %v14639_v44  ;;  %3870 = vmatprep.subr.bf16.mxu1 %v14642_v17  ;;  %v3425_v13 = vrot.slane %v16476_v11, %v15729_v45  ;;  %v3433_v44 = vrot.slane %v16476_v11, %v15732_v47  ;;  %v3429_v17 = vrot.slane %v16476_v11, %v15740_v49 }
0x1121   :  { %12587 = vmatmul.mubr.msk.bf16.vlgmr.msra.gmra.mrb[76].mxu0 %vm45_vm1, %v16287_v6  ;;  %12588 = vmatmul.mubr.msk.bf16.vlgmr.msra.gmra.mrb[76].mxu1 %vm45_vm1, %v16287_v6 }
0x1122   :  { %3830 = vmatpush1.bf16.msra.mxu0 %v14637_v18  ;;  %3871 = vmatpush1.bf16.msra.mxu1 %v14640_v19  ;;  %v3437_v18 = vrot.slane %v16476_v11, %v15743_v50 }
0x1123   :  { %3831 = vmatprep.subr.bf16.mxu0 %v14645_v20  ;;  %3872 = vmatprep.subr.bf16.mxu1 %v14648_v21 }
0x1124   :  { %3861 = vmatprep.mubr.bf16.mxu0 %v15329_v38  ;;  %3902 = vmatprep.mubr.bf16.mxu1 %v15329_v38 }
0x1126   :  { %3832 = vmatpush1.bf16.msra.mxu0 %v14643_v24  ;;  %3873 = vmatpush1.bf16.msra.mxu1 %v14646_v25 }
0x1127   :  { %3911 = vmatprep.subr.bf16.mxu0 %v14651_v26  ;;  %3952 = vmatprep.subr.bf16.mxu1 %v14654_v27 }
0x1129   :  { %12589 = vmatmul.mubr.msk.bf16.vlgmr.msra.gmra.mrb[80].mxu0 %vm45_vm1, %v16287_v6  ;;  %12590 = vmatmul.mubr.msk.bf16.vlgmr.msra.gmra.mrb[80].mxu1 %vm45_vm1, %v16287_v6 }
0x112a   :  { %3912 = vmatpush1.bf16.msra.mxu0 %v14649_v28  ;;  %3953 = vmatpush1.bf16.msra.mxu1 %v14652_v1 }
0x112b   :  { %3913 = vmatprep.subr.bf16.mxu0 %v14657_v29  ;;  %3954 = vmatprep.subr.bf16.mxu1 %v14660_v48 }
0x112c   :  { %3943 = vmatprep.mubr.bf16.mxu0 %v15329_v38  ;;  %3984 = vmatprep.mubr.bf16.mxu1 %v15329_v38 }
0x112e   :  { %3914 = vmatpush1.bf16.msra.mxu0 %v14655_v30  ;;  %3955 = vmatpush1.bf16.msra.mxu1 %v14658_v31 }
0x112f   :  { %13378 = vmatprep.subr.bf16.mxu0 %v14661_v12  ;;  %13400 = vmatprep.subr.bf16.mxu1 %v14662_v32 }
0x1131   :  { %12591 = vmatmul.mubr.msk.bf16.vlgmr.msra.gmra.mrb[84].mxu0 %vm45_vm1, %v16287_v6  ;;  %12592 = vmatmul.mubr.msk.bf16.vlgmr.msra.gmra.mrb[84].mxu1 %vm45_vm1, %v16287_v6  ;;  %v14692_v6 = vld [vmem:[%s18609_s2 + $0x4b8] sm:$0xff]  }
0x1132   :  { %13379 = vmatpush3.bf16.msra.mxu0 %v14663_v33  ;;  %13401 = vmatpush3.bf16.msra.mxu1 %v14664_v34 }
0x1133   :  { %13380 = vmatprep.subr.bf16.mxu0 %v14665_v35  ;;  %13402 = vmatprep.subr.bf16.mxu1 %v14666_v36  ;;  %v3445_v36 = vrot.slane %v16476_v11, %v15754_v2 }
0x1136   :  { %13381 = vmatpush3.bf16.msra.mxu0 %v14667_v22  ;;  %13403 = vmatpush3.bf16.msra.mxu1 %v14668_v23  ;;  %v3453_v22 = vrot.slane %v16476_v11, %v15757_v3  ;;  %v14695_v23 = vld [vmem:[%s18609_s2 + $0x500] sm:$0xff]  }
0x1137   :  { %13382 = vmatprep.subr.bf16.mxu0 %v14669_v14  ;;  %13404 = vmatprep.subr.bf16.mxu1 %v14670_v51  ;;  %v14696_v14 = vld [vmem:[%s18609_s2 + $0x580] sm:$0xff]  }
0x113a   :  { %13383 = vmatpush3.bf16.msra.mxu0 %v14671_v37  ;;  %13405 = vmatpush3.bf16.msra.mxu1 %v14672_v39  ;;  %v14697_v39 = vld [vmem:[%s18609_s2 + $0x548] sm:$0xff]  }
0x113b   :  { %13384 = vmatprep.subr.bf16.mxu0 %v14673_v46  ;;  %13406 = vmatprep.subr.bf16.mxu1 %v14674_v43  ;;  %v14698_v46 = vld [vmem:[%s18609_s2 + $0x5c8] sm:$0xff]  }
0x113e   :  { %13385 = vmatpush3.bf16.msra.mxu0 %v14675_v52  ;;  %13407 = vmatpush3.bf16.msra.mxu1 %v14676_v56 }
0x113f   :  { %13386 = vmatprep.subr.bf16.mxu0 %v14677_v7  ;;  %13408 = vmatprep.subr.bf16.mxu1 %v14678_v40 }
0x1142   :  { %13387 = vmatpush3.bf16.msra.mxu0 %v14679_v15  ;;  %13409 = vmatpush3.bf16.msra.mxu1 %v14680_v16 }
0x1143   :  { %13388 = vmatprep.subr.bf16.mxu0 %v14681_v41  ;;  %13410 = vmatprep.subr.bf16.mxu1 %v14682_v42  ;;  %v14699_v42 = vld [vmem:[%s18609_s2 + $0x508] sm:$0xff]  }
0x1146   :  { %13389 = vmatpush3.bf16.msra.mxu0 %v14683_v53  ;;  %13411 = vmatpush3.bf16.msra.mxu1 %v14684_v54  ;;  %v14700_v53 = vld [vmem:[%s18609_s2 + $0x588] sm:$0xff]  }
0x1147   :  { %13390 = vmatprep.subr.bf16.mxu0 %v14685_v55  ;;  %13412 = vmatprep.subr.bf16.mxu1 %v14686_v57  ;;  %v14701_v57 = vld [vmem:[%s18609_s2 + $0x550] sm:$0xff]  }
0x114a   :  { %13391 = vmatpush3.bf16.msra.mxu0 %v14687_v58  ;;  %13413 = vmatpush3.bf16.msra.mxu1 %v14688_v60  ;;  %v14702_v58 = vld [vmem:[%s18609_s2 + $0x5d0] sm:$0xff]  }
0x114b   :  { %13392 = vmatprep.subr.bf16.mxu0 %v14689_v61  ;;  %13414 = vmatprep.subr.bf16.mxu1 %v14690_v63 }
0x114e   :  { %13393 = vmatpush3.bf16.msra.mxu0 %v14691_v5  ;;  %13415 = vmatpush3.bf16.msra.mxu1 %v14692_v6  ;;  %v14703_v6 = vld [vmem:[%s18609_s2 + $0x510] sm:$0xff]  }
0x114f   :  { %13422 = vmatprep.subr.bf16.mxu0 %v14693_v8  ;;  %13444 = vmatprep.subr.bf16.mxu1 %v14694_v10  ;;  %v14704_v8 = vld [vmem:[%s18609_s2 + $0x590] sm:$0xff]   ;;  %v14705_v10 = vld [vmem:[%s18609_s2 + $0x558] sm:$0xff]  }
0x11ec   :  { %v3699_v19 = vpop.f32.mrb[72].mxu0  ;;  %v3740_v20 = vpop.f32.mrb[72].mxu1 }
0x11ed   :  { %v3700_v21 = vadd.f32 %v3699_v19, %v3425_v13  ;;  %v3741_v24 = vadd.f32 %v3740_v20, %v3433_v44  ;;  %v3701_v25 = vpop.f32.mrb[73].mxu0  ;;  %v3742_v26 = vpop.f32.mrb[73].mxu1  ;;  %v14706_v13 = vld [vmem:[%s18609_s2 + $0x5d8] sm:$0xff]  }
0x11ee   :  { %v3702_v27 = vadd.f32 %v3701_v25, %v3429_v17  ;;  %v3743_v28 = vadd.f32 %v3742_v26, %v3437_v18  ;;  %v3703_v1 = vpop.f32.mrb[74].mxu0  ;;  %v3744_v29 = vpop.f32.mrb[74].mxu1  ;;  %v14708_v25 = vld [vmem:[%s18609_s2 + $0x598] sm:$0xff]  }
0x11ef   :  { %v3993_v48 = vmax.f32 %v3700_v21, 0.0  ;;  %v3995_v30 = vmax.f32 %v3741_v24, 0.0  ;;  %v3704_v31 = vpop.f32.mrb[75].mxu0  ;;  %v3745_v12 = vpop.f32.mrb[75].mxu1  ;;  %v14707_v24 = vld [vmem:[%s18609_s2 + $0x518] sm:$0xff]   ;;  %v14710_v1 = vld [vmem:[%s18609_s2 + $0x5e0] sm:$0xff]  }
0x11f0   :  { %v3994_v32 = vmax.f32 %v3702_v27, 0.0  ;;  %v3996_v33 = vmax.f32 %v3743_v28, 0.0  ;;  %v14709_v28 = vld [vmem:[%s18609_s2 + $0x560] sm:$0xff]   ;;  %v14713_v12 = vld [vmem:[%s18609_s2 + $0x568] sm:$0xff]  }
0x11f1   :  { %v4009_v51 = vpack.c.bf16 %v3993_v48, %v3993_v48  ;;  %v4011_v37 = vpack.c.bf16 %v3995_v30, %v3995_v30  ;;  %v16549_v29 = vld [vmem:[%s18611_s4 + $0x21] ss:$4 sm:$0xff] }
0x11f2   :  { %v4010_v34 = vpack.c.bf16 %v3994_v32, %v3994_v32  ;;  %v4012_v35 = vpack.c.bf16 %v3996_v33, %v3996_v33  ;;  %v3481_v48 = vrot.slane %v16549_v29, %v15814_v59  ;;  %v14711_v30 = vld [vmem:[%s18609_s2 + $0x520] sm:$0xff]   ;;  %v14714_v32 = vld [vmem:[%s18609_s2 + $0x5e8] sm:$0xff]  }
0x11f3   :  { %v14712_v31 = vld [vmem:[%s18609_s2 + $0x5a0] sm:$0xff]  }
0x11f4   :  { %v16502_v43 = vpop.f32.mrb[76].mxu0  ;;  %v16504_v52 = vpop.f32.mrb[76].mxu1  ;;  %5086 = vmatprep.mubr.bf16.mxu0 %v4010_v34  ;;  %5126 = vmatprep.mubr.bf16.mxu1 %v4012_v35 }
0x11f5   :  { %v3783_v56 = vpop.f32.mrb[77].mxu0  ;;  %v3824_v7 = vpop.f32.mrb[77].mxu1  ;;  %5087 = vmatmul.mubr.bf16.vlgmr.msra.gmra.mrb[88].mxu0 %v4009_v51  ;;  %5127 = vmatmul.mubr.bf16.vlgmr.msra.gmra.mrb[88].mxu1 %v4011_v37  ;;  %v14715_v51 = vld [vmem:[%s18609_s2 + $0x528] sm:$0xff]  }
0x11f6   :  { %v3784_v40 = vadd.f32 %v3783_v56, %v3445_v36  ;;  %v3825_v15 = vadd.f32 %v3824_v7, %v3453_v22  ;;  %13423 = vmatpush3.bf16.msra.mxu0 %v14695_v23  ;;  %13445 = vmatpush3.bf16.msra.mxu1 %v14696_v14  ;;  %v3785_v16 = vpop.f32.mrb[78].mxu0  ;;  %v3826_v41 = vpop.f32.mrb[78].mxu1  ;;  %v14716_v37 = vld [vmem:[%s18609_s2 + $0x5a8] sm:$0xff]  }
0x11f7   :  { %v3786_v54 = vpop.f32.mrb[79].mxu0  ;;  %v3827_v55 = vpop.f32.mrb[79].mxu1  ;;  %13424 = vmatprep.subr.bf16.mxu0 %v14697_v39  ;;  %13446 = vmatprep.subr.bf16.mxu1 %v14698_v46  ;;  %v3441_v39 = vrot.slane %v16476_v11, %v15836_v9  ;;  %v3449_v46 = vrot.slane %v16476_v11, %v15814_v59  ;;  %v3461_v16 = vrot.slane %v16549_v29, %v15740_v49  ;;  %v14719_v11 = vld [vmem:[%s18609_s2 + $0x530] sm:$0xff]  }
0x11f8   :  { %v3998_v60 = vmax.f32 %v3784_v40, 0.0  ;;  %v4000_v61 = vmax.f32 %v3825_v15, 0.0  ;;  %v14717_v40 = vld [vmem:[%s18609_s2 + $0x570] sm:$0xff]   ;;  %v3469_v41 = vrot.slane %v16549_v29, %v15743_v50  ;;  %v14721_v55 = vld [vmem:[%s18609_s2 + $0x578] sm:$0xff]  }
0x11f9   :  { %v14718_v15 = vld [vmem:[%s18609_s2 + $0x5f0] sm:$0xff]   ;;  %v3823_v54 = vadd.f32 %v16504_v52, %v3449_v46  ;;  %v14724_v52 = vld [vmem:[%s18609_s2 + $0x5b8] sm:$0xff]   ;;  %v14745_v46 = vld [vmem:[%s18609_s2 + $0x668] sm:$0xff]  }
0x11fa   :  { %v4014_v63 = vpack.c.bf16 %v3998_v60, %v3998_v60  ;;  %v4016_v5 = vpack.c.bf16 %v4000_v61, %v4000_v61  ;;  %13425 = vmatpush3.bf16.msra.mxu0 %v14699_v42  ;;  %13447 = vmatpush3.bf16.msra.mxu1 %v14700_v53  ;;  %v14720_v42 = vld [vmem:[%s18609_s2 + $0x5b0] sm:$0xff]   ;;  %v3782_v53 = vadd.f32 %v16502_v43, %v3441_v39  ;;  %v14723_v43 = vld [vmem:[%s18609_s2 + $0x538] sm:$0xff]   ;;  %v14744_v39 = vld [vmem:[%s18609_s2 + $0x6a0] sm:$0xff]  }
0x11fb   :  { %13426 = vmatprep.subr.bf16.mxu0 %v14701_v57  ;;  %13448 = vmatprep.subr.bf16.mxu1 %v14702_v58  ;;  %v14722_v57 = vld [vmem:[%s18609_s2 + $0x5f8] sm:$0xff]  }
0x11fc   :  { %v16530_v44 = vpop.f32.mrb[80].mxu0  ;;  %v16532_v17 = vpop.f32.mrb[80].mxu1  ;;  %5166 = vmatprep.mubr.bf16.mxu0 %v4014_v63  ;;  %5206 = vmatprep.mubr.bf16.mxu1 %v4016_v5  ;;  %v3997_v61 = vmax.f32 %v3782_v53, 0.0  ;;  %v3999_v63 = vmax.f32 %v3823_v54, 0.0  ;;  %v14725_v5 = vld [vmem:[%s18609_s2 + $0x640] sm:$0xff]   ;;  %v3485_v53 = vrot.slane %v16549_v29, %v15757_v3  ;;  %v14751_v54 = vld [vmem:[%s18609_s2 + $0x630] sm:$0xff]  }
0x11fd   :  { %v3865_v18 = vpop.f32.mrb[81].mxu0  ;;  %v3906_v19 = vpop.f32.mrb[81].mxu1 }
0x11fe   :  { %13427 = vmatpush3.bf16.msra.mxu0 %v14703_v6  ;;  %13449 = vmatpush3.bf16.msra.mxu1 %v14704_v8  ;;  %v3867_v20 = vpop.f32.mrb[82].mxu0  ;;  %v3908_v21 = vpop.f32.mrb[82].mxu1  ;;  %v3866_v58 = vadd.f32 %v3865_v18, %v3461_v16  ;;  %v3907_v60 = vadd.f32 %v3906_v19, %v3469_v41  ;;  %v14726_v6 = vld [vmem:[%s18609_s2 + $0x6c0] sm:$0xff]   ;;  %v4013_v18 = vpack.c.bf16 %v3997_v61, %v3997_v61  ;;  %v14749_v16 = vld [vmem:[%s18609_s2 + $0x670] sm:$0xff]   ;;  %v14755_v61 = vld [vmem:[%s18609_s2 + $0x638] sm:$0xff]  }
0x11ff   :  { %v3868_v26 = vpop.f32.mrb[83].mxu0  ;;  %v3909_v27 = vpop.f32.mrb[83].mxu1  ;;  %13428 = vmatprep.subr.bf16.mxu0 %v14705_v10  ;;  %13450 = vmatprep.subr.bf16.mxu1 %v14706_v13  ;;  %v14727_v13 = vld [vmem:[%s18609_s2 + $0x600] sm:$0xff]   ;;  %v4015_v19 = vpack.c.bf16 %v3999_v63, %v3999_v63  ;;  %v3465_v41 = vrot.slane %v16549_v29, %v15732_v47 }
0x1200   :  { %v4002_v8 = vmax.f32 %v3866_v58, 0.0  ;;  %v4004_v10 = vmax.f32 %v3907_v60, 0.0  ;;  %v14728_v20 = vld [vmem:[%s18609_s2 + $0x680] sm:$0xff]   ;;  %v14731_v27 = vld [vmem:[%s18609_s2 + $0x608] sm:$0xff]   ;;  %v14753_v58 = vld [vmem:[%s18609_s2 + $0x678] sm:$0xff]  }
0x1201   :  { %v3905_v60 = vadd.f32 %v16532_v17, %v3465_v41  ;;  %v14756_v17 = vld [vmem:[%s18609_s2 + $0x6b8] sm:$0xff]  }
0x1202   :  { %13429 = vmatpush3.bf16.msra.mxu0 %v14707_v24  ;;  %13451 = vmatpush3.bf16.msra.mxu1 %v14708_v25  ;;  %v4018_v21 = vpack.c.bf16 %v4002_v8, %v4002_v8  ;;  %v14729_v24 = vld [vmem:[%s18609_s2 + $0x648] sm:$0xff]   ;;  %v4020_v26 = vpack.c.bf16 %v4004_v10, %v4004_v10  ;;  %v14759_v10 = vld [vmem:[%s18609_s2 + $0x700] sm:$0xff]  }
0x1203   :  { %13430 = vmatprep.subr.bf16.mxu0 %v14709_v28  ;;  %13452 = vmatprep.subr.bf16.mxu1 %v14710_v1  ;;  %v14730_v25 = vld [vmem:[%s18609_s2 + $0x6c8] sm:$0xff]   ;;  %v14733_v1 = vld [vmem:[%s18609_s2 + $0x650] sm:$0xff]  }
0x1204   :  { %v16565_v33 = vpop.f32.mrb[84].mxu0  ;;  %v3986_v34 = vpop.f32.mrb[84].mxu1  ;;  %v14732_v28 = vld [vmem:[%s18609_s2 + $0x688] sm:$0xff]  }
0x1205   :  { %v16567_v35 = vadd.f32 %v3986_v34, %v3481_v48  ;;  %v16569_v36 = vpop.f32.mrb[85].mxu0  ;;  %v16571_v22 = vpop.f32.mrb[85].mxu1  ;;  %v14734_v48 = vld [vmem:[%s18609_s2 + $0x6d0] sm:$0xff]   ;;  %v14739_v34 = vld [vmem:[%s18609_s2 + $0x618] sm:$0xff]  }
0x1206   :  { %13431 = vmatpush3.bf16.msra.mxu0 %v14711_v30  ;;  %13453 = vmatpush3.bf16.msra.mxu1 %v14712_v31  ;;  %v3949_v23 = vpop.f32.mrb[86].mxu0  ;;  %v3990_v14 = vpop.f32.mrb[86].mxu1  ;;  %v14735_v30 = vld [vmem:[%s18609_s2 + $0x610] sm:$0xff]  }
0x1207   :  { %v3950_v56 = vpop.f32.mrb[87].mxu0  ;;  %v3991_v7 = vpop.f32.mrb[87].mxu1  ;;  %13432 = vmatprep.subr.bf16.mxu0 %v14713_v12  ;;  %13454 = vmatprep.subr.bf16.mxu1 %v14714_v32  ;;  %v14736_v31 = vld [vmem:[%s18609_s2 + $0x690] sm:$0xff]   ;;  %v14737_v12 = vld [vmem:[%s18609_s2 + $0x658] sm:$0xff]   ;;  %v14741_v14 = vld [vmem:[%s18609_s2 + $0x660] sm:$0xff]  }
0x1208   :  { %v14738_v32 = vld [vmem:[%s18609_s2 + $0x6d8] sm:$0xff]   ;;  %v14746_v56 = vld [vmem:[%s18609_s2 + $0x6e8] sm:$0xff]  }
0x1209   :  { %v14740_v23 = vld [vmem:[%s18609_s2 + $0x698] sm:$0xff]   ;;  %v14747_v7 = vld [vmem:[%s18609_s2 + $0x628] sm:$0xff]  }
0x120a   :  { %13433 = vmatpush3.bf16.msra.mxu0 %v14715_v51  ;;  %13455 = vmatpush3.bf16.msra.mxu1 %v14716_v37  ;;  %v14742_v51 = vld [vmem:[%s18609_s2 + $0x6e0] sm:$0xff]  }
0x120b   :  { %13434 = vmatprep.subr.bf16.mxu0 %v14717_v40  ;;  %13456 = vmatprep.subr.bf16.mxu1 %v14718_v15  ;;  %v14743_v37 = vld [vmem:[%s18609_s2 + $0x620] sm:$0xff]   ;;  %v3457_v40 = vrot.slane %v16549_v29, %v15729_v45  ;;  %v14748_v15 = vld [vmem:[%s18609_s2 + $0x6a8] sm:$0xff]  }
0x120e   :  { %13435 = vmatpush3.bf16.msra.mxu0 %v14719_v11  ;;  %13457 = vmatpush3.bf16.msra.mxu1 %v14720_v42  ;;  %v14750_v11 = vld [vmem:[%s18609_s2 + $0x6f0] sm:$0xff]   ;;  %v3477_v42 = vrot.slane %v16549_v29, %v15754_v2 }
0x120f   :  { %13436 = vmatprep.subr.bf16.mxu0 %v14721_v55  ;;  %13458 = vmatprep.subr.bf16.mxu1 %v14722_v57  ;;  %v3864_v55 = vadd.f32 %v16530_v44, %v3457_v40  ;;  %v14752_v57 = vld [vmem:[%s18609_s2 + $0x6b0] sm:$0xff]   ;;  %v3989_v44 = vadd.f32 %v16571_v22, %v3485_v53  ;;  %v14780_v40 = vld [vmem:[%s18609_s2 + $0x7a8] sm:$0xff]   ;;  %v14786_v53 = vld [vmem:[%s18609_s2 + $0x7f8] sm:$0xff]  }
0x1211   :  { %v4001_v63 = vmax.f32 %v3864_v55, 0.0  ;;  %v4008_v8 = vmax.f32 %v3989_v44, 0.0  ;;  %v14788_v55 = vld [vmem:[%s18609_s2 + $0x7b8] sm:$0xff]  }
0x1212   :  { %13437 = vmatpush3.bf16.msra.mxu0 %v14723_v43  ;;  %13459 = vmatpush3.bf16.msra.mxu1 %v14724_v52  ;;  %v14754_v43 = vld [vmem:[%s18609_s2 + $0x6f8] sm:$0xff]   ;;  %v3948_v52 = vadd.f32 %v16569_v36, %v3477_v42  ;;  %v14758_v36 = vld [vmem:[%s18609_s2 + $0x7c0] sm:$0xff]  }
0x1213   :  { %13466 = vmatprep.subr.bf16.mxu0 %v14725_v5  ;;  %13488 = vmatprep.subr.bf16.mxu1 %v14726_v6  ;;  %v14757_v5 = vld [vmem:[%s18609_s2 + $0x740] sm:$0xff]   ;;  %v4003_v6 = vmax.f32 %v3905_v60, 0.0  ;;  %v14785_v42 = vld [vmem:[%s18609_s2 + $0x778] sm:$0xff]  }
0x1214   :  { %v4006_v22 = vmax.f32 %v3948_v52, 0.0 }
0x1215   :  { %5167 = vmatmul.mubr.bf16.vlgmr.msra.gmra.mrb[92].mxu0 %v4013_v18  ;;  %5207 = vmatmul.mubr.bf16.vlgmr.msra.gmra.mrb[92].mxu1 %v4015_v19  ;;  %v14760_v18 = vld [vmem:[%s18609_s2 + $0x780] sm:$0xff]   ;;  %v4019_v19 = vpack.c.bf16 %v4003_v6, %v4003_v6 }
0x1216   :  { %13467 = vmatpush3.bf16.msra.mxu0 %v14727_v13  ;;  %5246 = vmatprep.mubr.bf16.mxu0 %v4018_v21  ;;  %v4017_v13 = vpack.c.bf16 %v4001_v63, %v4001_v63  ;;  %v4022_v21 = vpack.c.bf16 %v4006_v22, %v4006_v22 }
0x1217   :  { %13489 = vmatpush3.bf16.msra.mxu1 %v14728_v20  ;;  %5286 = vmatprep.mubr.bf16.mxu1 %v4020_v26  ;;  %v14761_v20 = vld [vmem:[%s18609_s2 + $0x748] sm:$0xff]  }
0x1218   :  { %13468 = vmatprep.subr.bf16.mxu0 %v14729_v24  ;;  %13490 = vmatprep.subr.bf16.mxu1 %v14730_v25  ;;  %v14762_v24 = vld [vmem:[%s18609_s2 + $0x7c8] sm:$0xff]   ;;  %v4024_v25 = vpack.c.bf16 %v4008_v8, %v4008_v8 }
0x1219   :  { %v14763_v26 = vld [vmem:[%s18609_s2 + $0x708] sm:$0xff]  }
0x121a   :  { %13469 = vmatpush3.bf16.msra.mxu0 %v14731_v27  ;;  %v14764_v27 = vld [vmem:[%s18609_s2 + $0x788] sm:$0xff]  }
0x121b   :  { %13491 = vmatpush3.bf16.msra.mxu1 %v14732_v28  ;;  %13470 = vmatprep.subr.bf16.mxu0 %v14733_v1  ;;  %v14765_v28 = vld [vmem:[%s18609_s2 + $0x750] sm:$0xff]  }
0x121c   :  { %13492 = vmatprep.subr.bf16.mxu1 %v14734_v48  ;;  %v14766_v1 = vld [vmem:[%s18609_s2 + $0x7d0] sm:$0xff]  }
0x121d   :  { %v14767_v48 = vld [vmem:[%s18609_s2 + $0x710] sm:$0xff]  }
0x121e   :  { %13471 = vmatpush3.bf16.msra.mxu0 %v14735_v30  ;;  %v14768_v30 = vld [vmem:[%s18609_s2 + $0x790] sm:$0xff]  }
0x121f   :  { %13493 = vmatpush3.bf16.msra.mxu1 %v14736_v31  ;;  %13472 = vmatprep.subr.bf16.mxu0 %v14737_v12  ;;  %v14769_v31 = vld [vmem:[%s18609_s2 + $0x758] sm:$0xff]  }
0x1220   :  { %13494 = vmatprep.subr.bf16.mxu1 %v14738_v32  ;;  %v14770_v12 = vld [vmem:[%s18609_s2 + $0x7d8] sm:$0xff]  }
0x1221   :  { %v14771_v32 = vld [vmem:[%s18609_s2 + $0x718] sm:$0xff]  }
0x1222   :  { %13473 = vmatpush3.bf16.msra.mxu0 %v14739_v34  ;;  %v14772_v34 = vld [vmem:[%s18609_s2 + $0x798] sm:$0xff]  }
0x1223   :  { %13495 = vmatpush3.bf16.msra.mxu1 %v14740_v23  ;;  %13474 = vmatprep.subr.bf16.mxu0 %v14741_v14  ;;  %v14773_v23 = vld [vmem:[%s18609_s2 + $0x760] sm:$0xff]  }
0x1224   :  { %13496 = vmatprep.subr.bf16.mxu1 %v14742_v51  ;;  %v14774_v14 = vld [vmem:[%s18609_s2 + $0x7e0] sm:$0xff]  }
0x1225   :  { %v14775_v51 = vld [vmem:[%s18609_s2 + $0x720] sm:$0xff]  }
0x1226   :  { %13475 = vmatpush3.bf16.msra.mxu0 %v14743_v37  ;;  %v14776_v37 = vld [vmem:[%s18609_s2 + $0x7a0] sm:$0xff]  }
0x1227   :  { %13497 = vmatpush3.bf16.msra.mxu1 %v14744_v39  ;;  %13476 = vmatprep.subr.bf16.mxu0 %v14745_v46  ;;  %v14777_v39 = vld [vmem:[%s18609_s2 + $0x768] sm:$0xff]  }
0x1228   :  { %13498 = vmatprep.subr.bf16.mxu1 %v14746_v56  ;;  %v14778_v46 = vld [vmem:[%s18609_s2 + $0x7e8] sm:$0xff]  }
0x1229   :  { %v14779_v56 = vld [vmem:[%s18609_s2 + $0x728] sm:$0xff]  }
0x122a   :  { %13477 = vmatpush3.bf16.msra.mxu0 %v14747_v7  ;;  %v3473_v7 = vrot.slane %v16549_v29, %v15836_v9  ;;  %v14783_v29 = vld [vmem:[%s18609_s2 + $0x730] sm:$0xff]  }
0x122b   :  { %13499 = vmatpush3.bf16.msra.mxu1 %v14748_v15  ;;  %13478 = vmatprep.subr.bf16.mxu0 %v14749_v16  ;;  %v14781_v15 = vld [vmem:[%s18609_s2 + $0x770] sm:$0xff]  }
0x122c   :  { %13500 = vmatprep.subr.bf16.mxu1 %v14750_v11  ;;  %v14782_v16 = vld [vmem:[%s18609_s2 + $0x7f0] sm:$0xff]   ;;  %v3946_v41 = vadd.f32 %v16565_v33, %v3473_v7  ;;  %v14787_v33 = vld [vmem:[%s18609_s2 + $0x738] sm:$0xff]  }
0x122d   :  { %v14784_v11 = vld [vmem:[%s18609_s2 + $0x7b0] sm:$0xff]  }
0x122e   :  { %13479 = vmatpush3.bf16.msra.mxu0 %v14751_v54  ;;  %v4005_v54 = vmax.f32 %v3946_v41, 0.0 }
0x122f   :  { %13501 = vmatpush3.bf16.msra.mxu1 %v14752_v57  ;;  %13480 = vmatprep.subr.bf16.mxu0 %v14753_v58  ;;  %v4007_v57 = vmax.f32 %v16567_v35, 0.0  ;;  %v14789_v58 = vld [vmem:[%s18608_s1 + $0x90] ss:$316 sps:$4 sm:$0xff]   ;;  %v14790_v35 = vld [vmem:[%s18608_s1 + $0x308] ss:$316 sps:$4 sm:$0xff]  }
0x1230   :  { %13502 = vmatprep.subr.bf16.mxu1 %v14754_v43  ;;  %v4021_v60 = vpack.c.bf16 %v4005_v54, %v4005_v54 }
0x1231   :  { %v4023_v43 = vpack.c.bf16 %v4007_v57, %v4007_v57 }
0x1232   :  { %13481 = vmatpush3.bf16.msra.mxu0 %v14755_v61  ;;  %v12593_v61 = vld [vmem:[%s18610_s3 + $0x9] ss:$0 sm:$0xff] }
0x1233   :  { %13503 = vmatpush3.bf16.msra.mxu1 %v14756_v17  ;;  %13510 = vmatprep.subr.bf16.mxu0 %v14757_v5 }
0x1234   :  { %13532 = vmatprep.subr.bf16.mxu1 %v14758_v36 }
0x1235   :  { %5247 = vmatmul.mubr.bf16.vlgmr.msra.gmra.mrb[96].mxu0 %v4017_v13 }
0x1236   :  { %5287 = vmatmul.mubr.bf16.vlgmr.msra.gmra.mrb[96].mxu1 %v4019_v19  ;;  %13511 = vmatpush3.bf16.msra.mxu0 %v14759_v10 }
0x1237   :  { %5326 = vmatprep.mubr.bf16.mxu0 %v4022_v21  ;;  %13533 = vmatpush3.bf16.msra.mxu1 %v14760_v18 }
0x1238   :  { %5366 = vmatprep.mubr.bf16.mxu1 %v4024_v25  ;;  %13512 = vmatprep.subr.bf16.mxu0 %v14761_v20 }
0x1239   :  { %13534 = vmatprep.subr.bf16.mxu1 %v14762_v24 }
0x123a   :  { %13513 = vmatpush3.bf16.msra.mxu0 %v14763_v26 }
0x123b   :  { %13535 = vmatpush3.bf16.msra.mxu1 %v14764_v27  ;;  %13514 = vmatprep.subr.bf16.mxu0 %v14765_v28 }
0x123c   :  { %13536 = vmatprep.subr.bf16.mxu1 %v14766_v1 }
0x123e   :  { %13515 = vmatpush3.bf16.msra.mxu0 %v14767_v48 }
0x123f   :  { %13537 = vmatpush3.bf16.msra.mxu1 %v14768_v30  ;;  %13516 = vmatprep.subr.bf16.mxu0 %v14769_v31 }
0x1240   :  { %13538 = vmatprep.subr.bf16.mxu1 %v14770_v12 }
0x1242   :  { %13517 = vmatpush3.bf16.msra.mxu0 %v14771_v32 }
0x1243   :  { %13539 = vmatpush3.bf16.msra.mxu1 %v14772_v34  ;;  %13518 = vmatprep.subr.bf16.mxu0 %v14773_v23 }
0x1244   :  { %13540 = vmatprep.subr.bf16.mxu1 %v14774_v14 }
0x1246   :  { %13519 = vmatpush3.bf16.msra.mxu0 %v14775_v51 }
0x1247   :  { %13541 = vmatpush3.bf16.msra.mxu1 %v14776_v37  ;;  %13520 = vmatprep.subr.bf16.mxu0 %v14777_v39 }
0x1248   :  { %13542 = vmatprep.subr.bf16.mxu1 %v14778_v46 }
0x124a   :  { %13521 = vmatpush3.bf16.msra.mxu0 %v14779_v56 }
0x124b   :  { %13543 = vmatpush3.bf16.msra.mxu1 %v14780_v40  ;;  %13522 = vmatprep.subr.bf16.mxu0 %v14781_v15 }
0x124c   :  { %13544 = vmatprep.subr.bf16.mxu1 %v14782_v16 }
0x124e   :  { %13523 = vmatpush3.bf16.msra.mxu0 %v14783_v29 }
0x124f   :  { %13545 = vmatpush3.bf16.msra.mxu1 %v14784_v11  ;;  %13524 = vmatprep.subr.bf16.mxu0 %v14785_v42 }
0x1250   :  { %13546 = vmatprep.subr.bf16.mxu1 %v14786_v53 }
0x1252   :  { %13525 = vmatpush3.bf16.msra.mxu0 %v14787_v33 }
0x1253   :  { %13547 = vmatpush3.bf16.msra.mxu1 %v14788_v55  ;;  %14131 = vmatprep.subr.bf16.mxu0 %v15313_v0 }
0x1254   :  { %14139 = vmatprep.subr.bf16.mxu1 %v15313_v0 }
0x1255   :  { %5327 = vmatmul.mubr.bf16.vlgmr.msra.gmra.mrb[100].mxu0 %v4021_v60 }
0x1256   :  { %5367 = vmatmul.mubr.bf16.vlgmr.msra.gmra.mrb[100].mxu1 %v4023_v43  ;;  %14132 = vmatpush3.bf16.msra.mxu0 %v14789_v58  ;;  %v12726_v58 = vld [vmem:[%s18610_s3 + $0xe] ss:$0 sm:$0xff] }
0x1257   :  { %14133 = vmatprep.subr.bf16.mxu0 %v15313_v0  ;;  %14135 = vmatprep.mubr.msk.bf16.mxu0 %vm15314_vm0, %v15313_v0 }
0x1258   :  { %14141 = vmatprep.mubr.msk.bf16.mxu1 %vm15314_vm0, %v15313_v0 }
0x125a   :  { %14134 = vmatpush3.bf16.msra.mxu0 %v14790_v35 }
0x125b   :  { %14145 = vmatprep.subr.bf16.mxu0 %v15313_v0 }
0x125d   :  { %14136 = vmatmul.mubr.msk.bf16.vlgmr.msra.gmra.mrb[104].mxu0 %vm45_vm1, %v15377_v4 }
0x125e   :  { %14147 = vmatprep.mubr.msk.bf16.mxu0 %vm15314_vm0, %v15313_v0 }
0x12c8   :  { %v13394_v52 = vpop.f32.mrb[88].mxu0  ;;  %v13416_v44 = vpop.f32.mrb[88].mxu1 }
0x12c9   :  { %v13395_v63 = vpop.f32.mrb[89].mxu0  ;;  %v13417_v17 = vpop.f32.mrb[89].mxu1 }
0x12ca   :  { %v13396_v5 = vadd.f32 %v13395_v63, %v13394_v52  ;;  %v13418_v6 = vadd.f32 %v13417_v17, %v13416_v44  ;;  %v13397_v36 = vpop.f32.mrb[90].mxu0  ;;  %v13419_v22 = vpop.f32.mrb[90].mxu1 }
0x12cb   :  { %v13398_v8 = vpop.f32.mrb[91].mxu0  ;;  %v13420_v10 = vpop.f32.mrb[91].mxu1 }
0x12cc   :  { %v5089_v13 = vadd.f32 %v13396_v5, %v12593_v61 }
0x12ce   :  { %v5129_v18 = vadd.f32 %v13418_v6, %v5089_v13 }
0x12e8   :  { %v13438_v4 = vpop.f32.mrb[92].mxu0  ;;  %v13460_v19 = vpop.f32.mrb[92].mxu1 }
0x12e9   :  { %v13439_v20 = vpop.f32.mrb[93].mxu0  ;;  %v13461_v21 = vpop.f32.mrb[93].mxu1 }
0x12ea   :  { %v13440_v24 = vadd.f32 %v13439_v20, %v13438_v4  ;;  %v13462_v25 = vadd.f32 %v13461_v21, %v13460_v19  ;;  %v13441_v26 = vpop.f32.mrb[94].mxu0  ;;  %v13463_v27 = vpop.f32.mrb[94].mxu1 }
0x12eb   :  { %v13442_v28 = vpop.f32.mrb[95].mxu0  ;;  %v13464_v1 = vpop.f32.mrb[95].mxu1 }
0x12ec   :  { %v5169_v48 = vadd.f32 %v13440_v24, %v5129_v18 }
0x12ee   :  { %v5209_v30 = vadd.f32 %v13462_v25, %v5169_v48 }
0x1308   :  { %v13482_v31 = vpop.f32.mrb[96].mxu0 }
0x1309   :  { %v13504_v12 = vpop.f32.mrb[96].mxu1  ;;  %v13483_v32 = vpop.f32.mrb[97].mxu0 }
0x130a   :  { %v13484_v34 = vadd.f32 %v13483_v32, %v13482_v31  ;;  %v13505_v23 = vpop.f32.mrb[97].mxu1  ;;  %v13485_v14 = vpop.f32.mrb[98].mxu0 }
0x130b   :  { %v13506_v51 = vadd.f32 %v13505_v23, %v13504_v12  ;;  %v13507_v37 = vpop.f32.mrb[98].mxu1  ;;  %v13486_v39 = vpop.f32.mrb[99].mxu0 }
0x130c   :  { %v5249_v46 = vadd.f32 %v13484_v34, %v5209_v30  ;;  %v13508_v56 = vpop.f32.mrb[99].mxu1 }
0x130e   :  { %v5289_v7 = vadd.f32 %v13506_v51, %v5249_v46 }
0x1328   :  { %v13526_v40 = vpop.f32.mrb[100].mxu0 }
0x1329   :  { %v13548_v15 = vpop.f32.mrb[100].mxu1  ;;  %v13527_v16 = vpop.f32.mrb[101].mxu0 }
0x132a   :  { %v13528_v29 = vadd.f32 %v13527_v16, %v13526_v40  ;;  %v13549_v41 = vpop.f32.mrb[101].mxu1  ;;  %v13529_v11 = vpop.f32.mrb[102].mxu0 }
0x132b   :  { %v13550_v42 = vadd.f32 %v13549_v41, %v13548_v15  ;;  %v13551_v53 = vpop.f32.mrb[102].mxu1  ;;  %v13530_v33 = vpop.f32.mrb[103].mxu0 }
0x132c   :  { %v5329_v54 = vadd.f32 %v13528_v29, %v5289_v7  ;;  %v13552_v55 = vpop.f32.mrb[103].mxu1 }
0x132e   :  { %v16842_v57 = vadd.f32 %v13550_v42, %v5329_v54 }
0x1330   :  { %v5480_v60 = vpop.f32.mrb[104].mxu0 }
0x1331   :  { %v16847_v43 = vadd.f32 %v12726_v58, %v5480_v60  ;;  %v14137_v35 = vpop.f32.mrb[105].mxu0 }
0x1332   :  { %v5483_v52 = vpop.f32.mrb[106].mxu0 }
0x1333   :  { %5486 = vst.msk [vmem:[#allocation2] sm:$0xff] %vm89_vm2, %v16847_v43  ;;  %5500 = vrot.lane.b32.xlu1 %v16847_v43, %s15318_s29  ;;  %5488 = vrot.lane.b32.xlu0 %v16847_v43, %s15316_s27  ;;  %v14138_v44 = vpop.f32.mrb[107].mxu0 }
0x1337   :  { %5512 = vrot.lane.b32.xlu1 %v16847_v43, %s15317_s28  ;;  %5496 = vrot.lane.b32.xlu0 %v16847_v43, %s15315_s26 }
0x133a   :  { %v5532_v18 = vld [vmem:[#allocation2] sm:$0xff] }
0x133b   :  { %5508 = vrot.lane.b32.xlu1 %v16847_v43, %s15319_s30  ;;  %5524 = vrot.lane.b32.xlu0 %v16847_v43, %s15320_s6  ;;  %v5536_v25 = vmul.f32 0.35355338, %v5532_v18 }
0x133d   :  { %v5548_v1 = vpack.c.bf16 %v5536_v25, %v5536_v25 }
0x133f   :  { %5520 = vrot.lane.b32.xlu0 %v16847_v43, %s15321_s7 }
0x13a5   :  { %v5501_v61 = vpop.permute.xlu1 %5500  ;;  %v5489_v63 = vpop.permute.xlu0 %5488 }
0x13a6   :  { %5503 = vst.msk [vmem:[#allocation2 + $0x28] sm:$0xff] %vm89_vm2, %v5501_v61  ;;  %5491 = vst.msk [vmem:[#allocation2 + $0x20] sm:$0xff] %vm89_vm2, %v5489_v63 }
0x13a9   :  { %v5513_v17 = vpop.permute.xlu1 %5512  ;;  %v5497_v5 = vpop.permute.xlu0 %5496 }
0x13aa   :  { %5515 = vst.msk [vmem:[#allocation2 + $0x30] sm:$0xff] %vm89_vm2, %v5513_v17  ;;  %5499 = vst.msk [vmem:[#allocation2 + $0x8] sm:$0xff] %vm89_vm2, %v5497_v5 }
0x13ad   :  { %v5509_v6 = vpop.permute.xlu1 %5508  ;;  %v5525_v36 = vpop.permute.xlu0 %5524  ;;  %v5540_v22 = vld [vmem:[#allocation2 + $0x20] sm:$0xff]  ;;  %v5541_v8 = vld [vmem:[#allocation2 + $0x28] sm:$0xff] }
0x13ae   :  { %5511 = vst.msk [vmem:[#allocation2 + $0x10] sm:$0xff] %vm89_vm2, %v5509_v6  ;;  %5527 = vst.msk [vmem:[#allocation2 + $0x38] sm:$0xff] %vm89_vm2, %v5525_v36  ;;  %v5552_v10 = vpack.c.bf16 %v5540_v22, %v5540_v22  ;;  %v5553_v13 = vpack.c.bf16 %v5541_v8, %v5541_v8 }
0x13b0   :  { %v5560_v4 = vsel %vm89_vm2, %v5552_v10, 0  ;;  %v5606_v19 = vsel %vm89_vm2, %v5553_v13, 0 }
0x13b1   :  { %14140 = vmatpush3.bf16.xpose.msra.mxu1 %v5560_v4  ;;  %14146 = vmatpush3.bf16.xpose.msra.mxu0 %v5606_v19  ;;  %v5521_v20 = vpop.permute.xlu0 %5520  ;;  %v5533_v21 = vld [vmem:[#allocation2 + $0x8] sm:$0xff]  ;;  %v5542_v24 = vld [vmem:[#allocation2 + $0x30] sm:$0xff] }
0x13b2   :  { %5523 = vst.msk [vmem:[#allocation2 + $0x18] sm:$0xff] %vm89_vm2, %v5521_v20  ;;  %v5537_v26 = vmul.f32 0.35355338, %v5533_v21  ;;  %14151 = vmatprep.subr.bf16.mxu1 %v15313_v0  ;;  %14157 = vmatprep.subr.bf16.mxu0 %v15313_v0  ;;  %v5554_v27 = vpack.c.bf16 %v5542_v24, %v5542_v24 }
0x13b4   :  { %v5549_v48 = vpack.c.bf16 %v5537_v26, %v5537_v26  ;;  %v5652_v12 = vsel %vm89_vm2, %v5554_v27, 0 }
0x13b5   :  { %v5543_v28 = vld [vmem:[#allocation2 + $0x38] sm:$0xff]  ;;  %v5534_v31 = vld [vmem:[#allocation2 + $0x10] sm:$0xff] }
0x13b6   :  { %v5555_v30 = vpack.c.bf16 %v5543_v28, %v5543_v28  ;;  %v5538_v23 = vmul.f32 0.35355338, %v5534_v31 }
0x13b8   :  { %14142 = vmatmul.mubr.msk.bf16.vlgmr.msra.gmra.mrb[104].mxu1 %vm89_vm2, %v5548_v1  ;;  %14148 = vmatmul.mubr.msk.bf16.vlgmr.msra.gmra.mrb[108].mxu0 %vm89_vm2, %v5549_v48  ;;  %v5698_v32 = vsel %vm89_vm2, %v5555_v30, 0  ;;  %v5550_v51 = vpack.c.bf16 %v5538_v23, %v5538_v23 }
0x13b9   :  { %14152 = vmatpush3.bf16.xpose.msra.mxu1 %v5652_v12  ;;  %14158 = vmatpush3.bf16.xpose.msra.mxu0 %v5698_v32  ;;  %v5535_v34 = vld [vmem:[#allocation2 + $0x18] sm:$0xff] }
0x13ba   :  { %14153 = vmatprep.mubr.msk.bf16.mxu1 %vm15314_vm0, %v15313_v0  ;;  %14159 = vmatprep.mubr.msk.bf16.mxu0 %vm15314_vm0, %v15313_v0  ;;  %v5539_v14 = vmul.f32 0.35355338, %v5535_v34 }
0x13bb   :  { %14163 = vmatprep.subr.bf16.mxu1 %v15313_v0  ;;  %14169 = vmatprep.subr.bf16.mxu0 %v15313_v0 }
0x13bc   :  { %v5551_v37 = vpack.c.bf16 %v5539_v14, %v5539_v14 }
0x13c0   :  { %14154 = vmatmul.mubr.msk.bf16.vlgmr.msra.gmra.mrb[108].mxu1 %vm89_vm2, %v5550_v51  ;;  %14160 = vmatmul.mubr.msk.bf16.vlgmr.msra.gmra.mrb[112].mxu0 %vm89_vm2, %v5551_v37 }
0x13c1   :  { %14165 = vmatprep.mubr.msk.bf16.mxu1 %vm15314_vm0, %v15313_v0  ;;  %14171 = vmatprep.mubr.msk.bf16.mxu0 %vm15314_vm0, %v15313_v0 }
0x148b   :  { %v5596_v39 = vpop.f32.mrb[104].mxu1  ;;  %v5642_v46 = vpop.f32.mrb[108].mxu0 }
0x148c   :  { %v14143_v56 = vpop.f32.mrb[105].mxu1  ;;  %v14149_v7 = vpop.f32.mrb[109].mxu0  ;;  %v5740_v40 = vsel %vm89_vm2, %v5596_v39, -inf  ;;  %v5743_v15 = vsel %vm89_vm2, %v5642_v46, -inf }
0x148d   :  { %5741 = vmax.xlane.f32.xlu1 %v5740_v40  ;;  %v5599_v16 = vpop.f32.mrb[106].mxu1  ;;  %5744 = vmax.xlane.f32.xlu0 %v5743_v15  ;;  %v5645_v29 = vpop.f32.mrb[110].mxu0 }
0x148e   :  { %v14144_v41 = vpop.f32.mrb[107].mxu1  ;;  %v14150_v11 = vpop.f32.mrb[111].mxu0 }
0x1493   :  { %v5688_v42 = vpop.f32.mrb[108].mxu1  ;;  %v5734_v53 = vpop.f32.mrb[112].mxu0 }
0x1494   :  { %v14155_v33 = vpop.f32.mrb[109].mxu1  ;;  %v14161_v54 = vpop.f32.mrb[113].mxu0  ;;  %v5746_v55 = vsel %vm89_vm2, %v5688_v42, -inf  ;;  %v5749_v58 = vsel %vm89_vm2, %v5734_v53, -inf }
0x1495   :  { %v5691_v60 = vpop.f32.mrb[110].mxu1  ;;  %5747 = vmax.xlane.f32.xlu0 %v5746_v55  ;;  %5750 = vmax.xlane.f32.xlu1 %v5749_v58  ;;  %v5737_v35 = vpop.f32.mrb[114].mxu0 }
0x1496   :  { %v14156_v52 = vpop.f32.mrb[111].mxu1  ;;  %v14162_v44 = vpop.f32.mrb[115].mxu0 }
0x14a6   :  { %5504 = vrot.lane.b32.xlu1 %v16847_v43, %s15322_s8 }
0x14ab   :  { %5492 = vrot.lane.b32.xlu0 %v16847_v43, %s15323_s9 }
0x151a   :  { %v5742_v61 = vpop.xlane.xlu1 %5741  ;;  %v5745_v63 = vpop.xlane.xlu0 %5744 }
0x151b   :  { %v5752_v17 = vsub.f32 %v5596_v39, %v5742_v61  ;;  %v5753_v5 = vsub.f32 %v5642_v46, %v5745_v63 }
0x151d   :  { %v5756_v6 = vmul.f32 1.442695, %v5752_v17  ;;  %v5758_v36 = vmul.f32 1.442695, %v5753_v5  ;;  %v14791_v5 = vld [vmem:[%s18608_s1 + $0x94] ss:$316 sps:$4 sm:$0xff]  }
0x151f   :  { %15201 = vpow2.f32 %v5756_v6 }
0x1520   :  { %15203 = vpow2.f32 %v5758_v36 }
0x1522   :  { %v5748_v22 = vpop.xlane.xlu0 %5747  ;;  %v5751_v8 = vpop.xlane.xlu1 %5750 }
0x1523   :  { %v5754_v10 = vsub.f32 %v5688_v42, %v5748_v22  ;;  %v5755_v13 = vsub.f32 %v5734_v53, %v5751_v8 }
0x1525   :  { %v5760_v18 = vmul.f32 1.442695, %v5754_v10  ;;  %v5762_v4 = vmul.f32 1.442695, %v5755_v13  ;;  %v14792_v10 = vld [vmem:[%s18608_s1 + $0x30c] ss:$316 sps:$4 sm:$0xff]  }
0x1526   :  { %v5493_v19 = vpop.permute.xlu0 %5492  ;;  %v5505_v20 = vpop.permute.xlu1 %5504 }
0x1527   :  { %15205 = vpow2.f32 %v5760_v18  ;;  %5495 = vst.msk [vmem:[#allocation2 + $0x40] sm:$0xff] %vm89_vm2, %v5493_v19  ;;  %5507 = vst.msk [vmem:[#allocation2 + $0x48] sm:$0xff] %vm89_vm2, %v5505_v20 }
0x1528   :  { %15207 = vpow2.f32 %v5762_v4 }
0x1529   :  { %v15202_v21 = vpop.eup %15201 }
0x152a   :  { %v15204_v24 = vpop.eup %15203  ;;  %v5764_v25 = vsel %vm89_vm2, %v15202_v21, 0.0 }
0x152b   :  { %5765 = vadd.xlane.f32.xlu0 %v5764_v25  ;;  %v5767_v26 = vsel %vm89_vm2, %v15204_v24, 0.0 }
0x152c   :  { %5768 = vadd.xlane.f32.xlu1 %v5767_v26 }
0x152e   :  { %v5544_v27 = vld [vmem:[#allocation2 + $0x40] sm:$0xff]  ;;  %v5545_v28 = vld [vmem:[#allocation2 + $0x48] sm:$0xff] }
0x152f   :  { %v5788_v1 = vpack.c.bf16 %v5544_v27, %v5544_v27  ;;  %v5789_v48 = vpack.c.bf16 %v5545_v28, %v5545_v28  ;;  %v5374_v27 = vadd.f32 %v16842_v57, %v16277_v62 }
0x1531   :  { %v15206_v30 = vpop.eup %15205  ;;  %v5796_v31 = vsel %vm410_vm3, %v5788_v1, 0  ;;  %v5842_v12 = vsel %vm410_vm3, %v5789_v48, 0  ;;  %v5375_v28 = vsel %vm45_vm1, %v5374_v27, 0.0 }
0x1532   :  { %v15208_v32 = vpop.eup %15207  ;;  %14164 = vmatpush3.bf16.msra.mxu1 %v5796_v31  ;;  %14170 = vmatpush3.bf16.msra.mxu0 %v5842_v12  ;;  %v5770_v34 = vsel %vm89_vm2, %v15206_v30, 0.0 }
0x1533   :  { %5771 = vadd.xlane.f32.xlu0 %v5770_v34  ;;  %v5773_v23 = vsel %vm89_vm2, %v15208_v32, 0.0  ;;  %14175 = vmatprep.subr.bf16.mxu1 %v15313_v0 }
0x1534   :  { %5774 = vadd.xlane.f32.xlu1 %v5773_v23  ;;  %14181 = vmatprep.subr.bf16.mxu0 %v15313_v0 }
0x1545   :  { %5516 = vrot.lane.b32.xlu1 %v16847_v43, %s15324_s10 }
0x1549   :  { %5528 = vrot.lane.b32.xlu0 %v16847_v43, %s15325_s11 }
0x15b8   :  { %v5766_v14 = vpop.xlane.xlu0 %5765 }
0x15b9   :  { %15209 = vrcp.f32 %v5766_v14  ;;  %v5769_v51 = vpop.xlane.xlu1 %5768 }
0x15ba   :  { %15211 = vrcp.f32 %v5769_v51 }
0x15c0   :  { %v5772_v37 = vpop.xlane.xlu0 %5771 }
0x15c1   :  { %15213 = vrcp.f32 %v5772_v37  ;;  %v5775_v39 = vpop.xlane.xlu1 %5774 }
0x15c2   :  { %15215 = vrcp.f32 %v5775_v39 }
0x15c3   :  { %v15210_v46 = vpop.eup %15209 }
0x15c4   :  { %v15212_v56 = vpop.eup %15211  ;;  %v5780_v7 = vmul.f32 %v15210_v46, %v15202_v21  ;;  %v5529_v40 = vpop.permute.xlu0 %5528  ;;  %v12738_v46 = vld [vmem:[%s18610_s3 + $0xf] ss:$0 sm:$0xff] }
0x15c5   :  { %v5781_v15 = vmul.f32 %v15212_v56, %v15204_v24  ;;  %5531 = vst.msk [vmem:[#allocation2 + $0x58] sm:$0xff] %vm89_vm2, %v5529_v40  ;;  %v5517_v16 = vpop.permute.xlu1 %5516  ;;  %v12722_v56 = vld [vmem:[%s18610_s3 + $0xc] ss:$0 sm:$0xff] }
0x15c6   :  { %5519 = vst.msk [vmem:[#allocation2 + $0x50] sm:$0xff] %vm89_vm2, %v5517_v16  ;;  %v5784_v29 = vpack.c.bf16 %v5780_v7, %v5780_v7  ;;  %v12723_v16 = vld [vmem:[%s18610_s3 + $0xd] ss:$0 sm:$0xff] }
0x15c7   :  { %v5785_v43 = vpack.c.bf16 %v5781_v15, %v5781_v15 }
0x15c8   :  { %14166 = vmatmul.mubr.msk.bf16.vlgmr.msra.gmra.mrb[112].mxu1 %vm89_vm2, %v5784_v29 }
0x15c9   :  { %14172 = vmatmul.mubr.msk.bf16.vlgmr.msra.gmra.mrb[116].mxu0 %vm89_vm2, %v5785_v43  ;;  %14177 = vmatprep.mubr.msk.bf16.mxu1 %vm15314_vm0, %v15313_v0 }
0x15ca   :  { %14183 = vmatprep.mubr.msk.bf16.mxu0 %vm15314_vm0, %v15313_v0 }
0x15cb   :  { %v15214_v41 = vpop.eup %15213 }
0x15cc   :  { %v15216_v11 = vpop.eup %15215  ;;  %v5547_v42 = vld [vmem:[#allocation2 + $0x58] sm:$0xff]  ;;  %v5782_v55 = vmul.f32 %v15214_v41, %v15206_v30 }
0x15cd   :  { %v5783_v53 = vmul.f32 %v15216_v11, %v15208_v32  ;;  %v5546_v33 = vld [vmem:[#allocation2 + $0x50] sm:$0xff]  ;;  %v5791_v54 = vpack.c.bf16 %v5547_v42, %v5547_v42 }
0x15ce   :  { %v5790_v58 = vpack.c.bf16 %v5546_v33, %v5546_v33  ;;  %v5786_v44 = vpack.c.bf16 %v5782_v55, %v5782_v55  ;;  %v15288_v33 = vld [vmem:[%s18607_s0] sm:$0xff] }
0x15cf   :  { %v5934_v60 = vsel %vm410_vm3, %v5791_v54, 0  ;;  %v5787_v52 = vpack.c.bf16 %v5783_v53, %v5783_v53 }
0x15d0   :  { %v5888_v35 = vsel %vm410_vm3, %v5790_v58, 0  ;;  %14182 = vmatpush3.bf16.msra.mxu0 %v5934_v60 }
0x15d1   :  { %14176 = vmatpush3.bf16.msra.mxu1 %v5888_v35  ;;  %14195 = vmatprep.subr.bf16.mxu0 %v15313_v0 }
0x15d2   :  { %14187 = vmatprep.subr.bf16.mxu1 %v15313_v0 }
0x15d3   :  { %14184 = vmatmul.mubr.msk.bf16.vlgmr.msra.gmra.mrb[120].mxu0 %vm89_vm2, %v5787_v52 }
0x15d4   :  { %14178 = vmatmul.mubr.msk.bf16.vlgmr.msra.gmra.mrb[116].mxu1 %vm89_vm2, %v5786_v44  ;;  %14199 = vmatprep.mubr.msk.bf16.mxu0 %vm15314_vm0, %v15313_v0 }
0x15d5   :  { %14191 = vmatprep.mubr.msk.bf16.mxu1 %vm15314_vm0, %v15313_v0  ;;  %14188 = vmatpush3.bf16.msra.mxu1 %v14791_v5 }
0x15d6   :  { %14189 = vmatprep.subr.bf16.mxu1 %v15313_v0 }
0x15d9   :  { %14190 = vmatpush3.bf16.msra.mxu1 %v14792_v10  ;;  %v14796_v10 = vld [vmem:[%s18608_s1 + $0x310] ss:$316 sps:$4 sm:$0xff]  }
0x15da   :  { %14203 = vmatprep.subr.bf16.mxu1 %v15313_v0 }
0x169b   :  { %v5832_v61 = vpop.f32.mrb[112].mxu1 }
0x169c   :  { %5976 = vst.msk [vmem:[#allocation3] sm:$0xff] %vm89_vm2, %v5832_v61  ;;  %v5878_v63 = vpop.f32.mrb[116].mxu0  ;;  %v14167_v17 = vpop.f32.mrb[113].mxu1 }
0x169d   :  { %5978 = vrot.lane.b32.xlu1 %v5878_v63, %s15326_s14  ;;  %v14173_v6 = vpop.f32.mrb[117].mxu0  ;;  %v5835_v36 = vpop.f32.mrb[114].mxu1 }
0x169e   :  { %v5881_v22 = vpop.f32.mrb[118].mxu0  ;;  %v14168_v8 = vpop.f32.mrb[115].mxu1  ;;  %v14793_v36 = vld [vmem:[%s18608_s1 + $0x9c] ss:$316 sps:$4 sm:$0xff]  }
0x169f   :  { %v14174_v13 = vpop.f32.mrb[119].mxu0  ;;  %v14794_v22 = vld [vmem:[%s18608_s1 + $0x98] ss:$316 sps:$4 sm:$0xff]  }
0x16a0   :  { %v14795_v8 = vld [vmem:[%s18608_s1 + $0x314] ss:$316 sps:$4 sm:$0xff]   ;;  %14196 = vmatpush3.bf16.msra.mxu0 %v14794_v22 }
0x16a1   :  { %14197 = vmatprep.subr.bf16.mxu0 %v15313_v0 }
0x16a4   :  { %14198 = vmatpush3.bf16.msra.mxu0 %v14796_v10 }
0x16a5   :  { %14211 = vmatprep.subr.bf16.mxu0 %v15313_v0 }
0x16a6   :  { %v5970_v18 = vpop.f32.mrb[120].mxu0 }
0x16a7   :  { %v5924_v4 = vpop.f32.mrb[116].mxu1  ;;  %5988 = vrot.lane.b32.xlu1 %v5970_v18, %s15327_s17  ;;  %v14185_v19 = vpop.f32.mrb[121].mxu0 }
0x16a8   :  { %5983 = vrot.lane.b32.xlu0 %v5924_v4, %s15328_s18  ;;  %v14179_v20 = vpop.f32.mrb[117].mxu1  ;;  %v5973_v21 = vpop.f32.mrb[122].mxu0 }
0x16a9   :  { %v5927_v24 = vpop.f32.mrb[118].mxu1  ;;  %v14186_v25 = vpop.f32.mrb[123].mxu0 }
0x16aa   :  { %v14180_v26 = vpop.f32.mrb[119].mxu1  ;;  %v12724_v25 = vld [vmem:[%s18610_s3 + $0x26] ss:$0 sm:$0xff] }
0x16c7   :  { %5376 = vadd.xlane.f32.xlu0 %v5375_v28 }
0x170f   :  { %v5979_v1 = vpop.permute.xlu1 %5978 }
0x1710   :  { %5981 = vst.msk [vmem:[#allocation3] sm:$0xff] %vm597_vm4, %v5979_v1 }
0x1719   :  { %v5989_v48 = vpop.permute.xlu1 %5988 }
0x171a   :  { %v5984_v30 = vpop.permute.xlu0 %5983 }
0x171b   :  { %5986 = vst.msk [vmem:[#allocation3] sm:$0xff] %vm603_vm5, %v5984_v30 }
0x171c   :  { %5991 = vst.msk [vmem:[#allocation3] sm:$0xff] %vm609_vm6, %v5989_v48  ;;  %v12742_v48 = vld [vmem:[%s18610_s3 + $0x14] ss:$0 sm:$0xff] }
0x1723   :  { %v5992_v31 = vld [vmem:[#allocation3] sm:$0xff] }
0x1724   :  { %v5997_v12 = vpack.c.bf16 %v5992_v31, %v5992_v31 }
0x1726   :  { %14192 = vmatmul.mubr.msk.bf16.vlgmr.msra.gmra.mrb[120].mxu1 %vm45_vm1, %v5997_v12  ;;  %v12743_v12 = vld [vmem:[%s18610_s3 + $0x15] ss:$0 sm:$0xff] }
0x1727   :  { %14207 = vmatprep.mubr.msk.bf16.mxu1 %vm15314_vm0, %v15313_v0  ;;  %14204 = vmatpush3.bf16.msra.mxu1 %v14793_v36 }
0x1728   :  { %14205 = vmatprep.subr.bf16.mxu1 %v15313_v0 }
0x172b   :  { %14206 = vmatpush3.bf16.msra.mxu1 %v14795_v8 }
0x172c   :  { %14217 = vmatprep.subr.bf16.mxu1 %v15313_v0 }
0x1754   :  { %v5377_v62 = vpop.xlane.xlu0 %5376 }
0x1755   :  { %v5378_v57 = vmul.f32 0.03125, %v5377_v62 }
0x1757   :  { %v5379_v32 = vsub.f32 %v5374_v27, %v5378_v57  ;;  %v12725_v27 = vld [vmem:[%s18610_s3 + $0x27] ss:$0 sm:$0xff] }
0x1759   :  { %v5380_v34 = vmul.f32 %v5379_v32, %v5379_v32 }
0x175b   :  { %v5381_v23 = vsel %vm45_vm1, %v5380_v34, 0.0 }
0x175c   :  { %5382 = vadd.xlane.f32.xlu1 %v5381_v23  ;;  %v12748_v23 = vld [vmem:[%s18610_s3 + $0x11] ss:$0 sm:$0xff] }
0x17e9   :  { %v5383_v14 = vpop.xlane.xlu1 %5382 }
0x17ea   :  { %v5384_v51 = vmul.f32 0.03125, %v5383_v14 }
0x17ec   :  { %v5385_v37 = vadd.f32 1e-05, %v5384_v51 }
0x17ee   :  { %15217 = vrsqrt.f32 %v5385_v37 }
0x17f8   :  { %v15218_v39 = vpop.eup %15217 }
0x17f9   :  { %v6052_v7 = vpop.f32.mrb[120].mxu1  ;;  %v5387_v40 = vmul.f32 %v15218_v39, %v5379_v32 }
0x17fa   :  { %v14193_v15 = vpop.f32.mrb[121].mxu1  ;;  %v6053_v29 = vadd.f32 %v12738_v46, %v6052_v7  ;;  %v12744_v46 = vld [vmem:[%s18610_s3 + $0x10] ss:$0 sm:$0xff] }
0x17fb   :  { %v6055_v43 = vpop.f32.mrb[122].mxu1  ;;  %v5393_v41 = vmul.f32 %v12722_v56, %v5387_v40 }
0x17fc   :  { %v14194_v11 = vpop.f32.mrb[123].mxu1  ;;  %v6058_v54 = vadd.f32 %v15288_v33, %v6053_v29 }
0x17fd   :  { %v5399_v42 = vadd.f32 %v12723_v16, %v5393_v41 }
0x17fe   :  { %v6059_v55 = vsel %vm45_vm1, %v6058_v54, 0.0 }
0x17ff   :  { %v5400_v53 = vsel %vm45_vm1, %v5399_v42, 0.0 }
0x1800   :  { %5401 = vadd.xlane.f32.xlu0 %v5400_v53 }
0x1804   :  { %6060 = vadd.xlane.f32.xlu0 %v6059_v55 }
0x188d   :  { %v5402_v58 = vpop.xlane.xlu0 %5401 }
0x188e   :  { %v5403_v60 = vmul.f32 0.03125, %v5402_v58 }
0x1890   :  { %v5404_v35 = vsub.f32 %v5399_v42, %v5403_v60 }
0x1891   :  { %v6061_v52 = vpop.xlane.xlu0 %6060 }
0x1892   :  { %v6062_v44 = vmul.f32 0.03125, %v6061_v52  ;;  %v5405_v61 = vmul.f32 %v5404_v35, %v5404_v35 }
0x1894   :  { %v6063_v63 = vsub.f32 %v6058_v54, %v6062_v44  ;;  %v5406_v17 = vsel %vm45_vm1, %v5405_v61, 0.0 }
0x1895   :  { %5407 = vadd.xlane.f32.xlu1 %v5406_v17 }
0x1896   :  { %v6064_v5 = vmul.f32 %v6063_v63, %v6063_v63 }
0x1898   :  { %v6065_v6 = vsel %vm45_vm1, %v6064_v5, 0.0 }
0x1899   :  { %6066 = vadd.xlane.f32.xlu0 %v6065_v6 }
0x1922   :  { %v5408_v13 = vpop.xlane.xlu1 %5407 }
0x1923   :  { %v5409_v18 = vmul.f32 0.03125, %v5408_v13 }
0x1925   :  { %v5410_v4 = vadd.f32 1e-05, %v5409_v18 }
0x1926   :  { %v6067_v19 = vpop.xlane.xlu0 %6066 }
0x1927   :  { %15219 = vrsqrt.f32 %v5410_v4  ;;  %v6068_v20 = vmul.f32 0.03125, %v6067_v19 }
0x1929   :  { %v6069_v21 = vadd.f32 1e-05, %v6068_v20 }
0x192b   :  { %15221 = vrsqrt.f32 %v6069_v21 }
0x1931   :  { %v15220_v24 = vpop.eup %15219 }
0x1932   :  { %v5412_v26 = vmul.f32 %v15220_v24, %v5404_v35 }
0x1934   :  { %v5418_v28 = vmul.f32 %v12724_v25, %v5412_v26 }
0x1935   :  { %v15222_v1 = vpop.eup %15221 }
0x1936   :  { %v6071_v30 = vmul.f32 %v15222_v1, %v6063_v63  ;;  %v5424_v31 = vadd.f32 %v12725_v27, %v5418_v28 }
0x1938   :  { %v6077_v62 = vmul.f32 %v12742_v48, %v6071_v30  ;;  %v16998_v57 = vpack.c.bf16 %v5424_v31, %v5424_v31 }
0x193a   :  { %14208 = vmatmul.mubr.msk.bf16.vlgmr.msra.gmra.mrb[124].mxu1 %vm45_vm1, %v16998_v57  ;;  %v17002_v32 = vadd.f32 %v12743_v12, %v6077_v62 }
0x193b   :  { %14219 = vmatprep.mubr.msk.bf16.mxu1 %vm15314_vm0, %v15313_v0 }
0x193c   :  { %v6088_v34 = vpack.c.bf16 %v17002_v32, %v17002_v32 }
0x193e   :  { %14200 = vmatmul.mubr.msk.bf16.vlgmr.msra.gmra.mrb[124].mxu0 %vm45_vm1, %v6088_v34 }
0x193f   :  { %14213 = vmatprep.mubr.msk.bf16.mxu0 %vm15314_vm0, %v15313_v0 }
0x1a0d   :  { %v6208_v14 = vpop.f32.mrb[124].mxu1 }
0x1a0e   :  { %v17014_v51 = vadd.f32 %v12748_v23, %v6208_v14  ;;  %v14209_v37 = vpop.f32.mrb[125].mxu1 }
0x1a0f   :  { %v6211_v39 = vpop.f32.mrb[126].mxu1 }
0x1a10   :  { %6215 = vst.msk [vmem:[#allocation2 + $0x20] sm:$0xff] %vm89_vm2, %v17014_v51  ;;  %6226 = vrot.lane.b32.xlu1 %v17014_v51, %s15315_s26  ;;  %v14210_v56 = vpop.f32.mrb[127].mxu1 }
0x1a11   :  { %v6143_v7 = vpop.f32.mrb[124].mxu0 }
0x1a12   :  { %v6144_v40 = vadd.f32 %v12744_v46, %v6143_v7  ;;  %v14201_v15 = vpop.f32.mrb[125].mxu0 }
0x1a13   :  { %v6146_v16 = vpop.f32.mrb[126].mxu0 }
0x1a14   :  { %6214 = vst.msk [vmem:[#allocation2] sm:$0xff] %vm89_vm2, %v6144_v40  ;;  %6238 = vrot.lane.b32.xlu1 %v17014_v51, %s15319_s30  ;;  %6222 = vrot.lane.b32.xlu0 %v6144_v40, %s15315_s26  ;;  %v14202_v29 = vpop.f32.mrb[127].mxu0 }
0x1a17   :  { %v6266_v43 = vld [vmem:[#allocation2 + $0x20] sm:$0xff] }
0x1a18   :  { %6250 = vrot.lane.b32.xlu1 %v17014_v51, %s15321_s7  ;;  %6234 = vrot.lane.b32.xlu0 %v6144_v40, %s15319_s30  ;;  %v6278_v41 = vpack.c.bf16 %v6266_v43, %v6266_v43 }
0x1a1a   :  { %v6286_v11 = vsel %vm89_vm2, %v6278_v41, 0 }
0x1a1b   :  { %14212 = vmatpush3.bf16.xpose.msra.mxu0 %v6286_v11  ;;  %v6258_v42 = vld [vmem:[#allocation2] sm:$0xff] }
0x1a1c   :  { %6246 = vrot.lane.b32.xlu1 %v6144_v40, %s15321_s7  ;;  %v6262_v53 = vmul.f32 0.35355338, %v6258_v42  ;;  %14223 = vmatprep.subr.bf16.mxu0 %v15313_v0 }
0x1a1e   :  { %v6274_v33 = vpack.c.bf16 %v6262_v53, %v6262_v53 }
0x1a22   :  { %14214 = vmatmul.mubr.msk.bf16.vlgmr.msra.gmra.mrb[128].mxu0 %vm89_vm2, %v6274_v33 }
0x1a23   :  { %14225 = vmatprep.mubr.msk.bf16.mxu0 %vm15314_vm0, %v15313_v0 }
0x1a82   :  { %v6227_v54 = vpop.permute.xlu1 %6226 }
0x1a83   :  { %6229 = vst.msk [vmem:[#allocation2 + $0x28] sm:$0xff] %vm89_vm2, %v6227_v54 }
0x1a86   :  { %v6239_v55 = vpop.permute.xlu1 %6238  ;;  %v6223_v58 = vpop.permute.xlu0 %6222 }
0x1a87   :  { %6241 = vst.msk [vmem:[#allocation2 + $0x30] sm:$0xff] %vm89_vm2, %v6239_v55  ;;  %6225 = vst.msk [vmem:[#allocation2 + $0x8] sm:$0xff] %vm89_vm2, %v6223_v58 }
0x1a8a   :  { %v6251_v60 = vpop.permute.xlu1 %6250  ;;  %v6235_v35 = vpop.permute.xlu0 %6234  ;;  %v6267_v52 = vld [vmem:[#allocation2 + $0x28] sm:$0xff] }
0x1a8b   :  { %6253 = vst.msk [vmem:[#allocation2 + $0x38] sm:$0xff] %vm89_vm2, %v6251_v60  ;;  %6237 = vst.msk [vmem:[#allocation2 + $0x10] sm:$0xff] %vm89_vm2, %v6235_v35  ;;  %v6279_v44 = vpack.c.bf16 %v6267_v52, %v6267_v52 }
0x1a8d   :  { %v6332_v61 = vsel %vm89_vm2, %v6279_v44, 0 }
0x1a8e   :  { %14218 = vmatpush3.bf16.xpose.msra.mxu1 %v6332_v61  ;;  %v6247_v63 = vpop.permute.xlu1 %6246  ;;  %v6268_v17 = vld [vmem:[#allocation2 + $0x30] sm:$0xff]  ;;  %v6259_v5 = vld [vmem:[#allocation2 + $0x8] sm:$0xff] }
0x1a8f   :  { %6249 = vst.msk [vmem:[#allocation2 + $0x18] sm:$0xff] %vm89_vm2, %v6247_v63  ;;  %v6280_v6 = vpack.c.bf16 %v6268_v17, %v6268_v17  ;;  %v6263_v36 = vmul.f32 0.35355338, %v6259_v5  ;;  %14229 = vmatprep.subr.bf16.mxu1 %v15313_v0 }
0x1a91   :  { %v6378_v22 = vsel %vm89_vm2, %v6280_v6, 0  ;;  %v6275_v13 = vpack.c.bf16 %v6263_v36, %v6263_v36 }
0x1a92   :  { %14224 = vmatpush3.bf16.xpose.msra.mxu0 %v6378_v22  ;;  %v6269_v8 = vld [vmem:[#allocation2 + $0x38] sm:$0xff]  ;;  %v6260_v10 = vld [vmem:[#allocation2 + $0x10] sm:$0xff] }
0x1a93   :  { %v6281_v18 = vpack.c.bf16 %v6269_v8, %v6269_v8  ;;  %v6264_v4 = vmul.f32 0.35355338, %v6260_v10  ;;  %14235 = vmatprep.subr.bf16.mxu0 %v15313_v0 }
0x1a95   :  { %14220 = vmatmul.mubr.msk.bf16.vlgmr.msra.gmra.mrb[128].mxu1 %vm89_vm2, %v6275_v13  ;;  %v6424_v19 = vsel %vm89_vm2, %v6281_v18, 0  ;;  %v6276_v21 = vpack.c.bf16 %v6264_v4, %v6264_v4 }
0x1a96   :  { %14230 = vmatpush3.bf16.xpose.msra.mxu1 %v6424_v19  ;;  %14231 = vmatprep.mubr.msk.bf16.mxu1 %vm15314_vm0, %v15313_v0  ;;  %v6261_v20 = vld [vmem:[#allocation2 + $0x18] sm:$0xff] }
0x1a97   :  { %v6265_v24 = vmul.f32 0.35355338, %v6261_v20  ;;  %14241 = vmatprep.subr.bf16.mxu1 %v15313_v0 }
0x1a99   :  { %14226 = vmatmul.mubr.msk.bf16.vlgmr.msra.gmra.mrb[132].mxu0 %vm89_vm2, %v6276_v21  ;;  %v6277_v25 = vpack.c.bf16 %v6265_v24, %v6265_v24 }
0x1a9a   :  { %14237 = vmatprep.mubr.msk.bf16.mxu0 %vm15314_vm0, %v15313_v0 }
0x1a9d   :  { %14232 = vmatmul.mubr.msk.bf16.vlgmr.msra.gmra.mrb[132].mxu1 %vm89_vm2, %v6277_v25 }
0x1a9e   :  { %14243 = vmatprep.mubr.msk.bf16.mxu1 %vm15314_vm0, %v15313_v0 }
0x1af5   :  { %v6322_v26 = vpop.f32.mrb[128].mxu0 }
0x1af6   :  { %v14215_v27 = vpop.f32.mrb[129].mxu0  ;;  %v6466_v28 = vsel %vm89_vm2, %v6322_v26, -inf }
0x1af7   :  { %6467 = vmax.xlane.f32.xlu0 %v6466_v28  ;;  %v6325_v1 = vpop.f32.mrb[130].mxu0 }
0x1af8   :  { %v14216_v48 = vpop.f32.mrb[131].mxu0 }
0x1b68   :  { %v6368_v30 = vpop.f32.mrb[128].mxu1 }
0x1b69   :  { %v14221_v31 = vpop.f32.mrb[129].mxu1  ;;  %v6469_v12 = vsel %vm89_vm2, %v6368_v30, -inf }
0x1b6a   :  { %6470 = vmax.xlane.f32.xlu1 %v6469_v12  ;;  %v6371_v62 = vpop.f32.mrb[130].mxu1 }
0x1b6b   :  { %v14222_v34 = vpop.f32.mrb[131].mxu1 }
0x1b6c   :  { %v6414_v23 = vpop.f32.mrb[132].mxu0 }
0x1b6d   :  { %v14227_v14 = vpop.f32.mrb[133].mxu0  ;;  %v6472_v37 = vsel %vm89_vm2, %v6414_v23, -inf }
0x1b6e   :  { %6473 = vmax.xlane.f32.xlu0 %v6472_v37  ;;  %v6417_v39 = vpop.f32.mrb[134].mxu0 }
0x1b6f   :  { %v14228_v46 = vpop.f32.mrb[135].mxu0 }
0x1b70   :  { %v6460_v56 = vpop.f32.mrb[132].mxu1 }
0x1b71   :  { %v14233_v7 = vpop.f32.mrb[133].mxu1  ;;  %v6475_v40 = vsel %vm89_vm2, %v6460_v56, -inf }
0x1b72   :  { %v6463_v15 = vpop.f32.mrb[134].mxu1  ;;  %6476 = vmax.xlane.f32.xlu0 %v6475_v40 }
0x1b73   :  { %v14234_v16 = vpop.f32.mrb[135].mxu1 }
0x1b7b   :  { %6217 = vrot.lane.b32.xlu1 %v17014_v51, %s15316_s27 }
0x1b84   :  { %v6468_v29 = vpop.xlane.xlu0 %6467 }
0x1b85   :  { %v6478_v43 = vsub.f32 %v6322_v26, %v6468_v29 }
0x1b87   :  { %v6482_v41 = vmul.f32 1.442695, %v6478_v43 }
0x1b89   :  { %15223 = vpow2.f32 %v6482_v41 }
0x1b93   :  { %v15224_v11 = vpop.eup %15223 }
0x1b94   :  { %v6490_v42 = vsel %vm89_vm2, %v15224_v11, 0.0 }
0x1b9f   :  { %6491 = vadd.xlane.f32.xlu1 %v6490_v42 }
0x1bf7   :  { %v6471_v53 = vpop.xlane.xlu1 %6470 }
0x1bf8   :  { %v6479_v33 = vsub.f32 %v6368_v30, %v6471_v53  ;;  %v14797_v53 = vld [vmem:[%s18608_s1 + $0xa0] ss:$316 sps:$4 sm:$0xff]  }
0x1bfa   :  { %v6484_v54 = vmul.f32 1.442695, %v6479_v33 }
0x1bfb   :  { %v6218_v55 = vpop.permute.xlu1 %6217  ;;  %v6474_v58 = vpop.xlane.xlu0 %6473 }
0x1bfc   :  { %15225 = vpow2.f32 %v6484_v54  ;;  %6220 = vst.msk [vmem:[#allocation2 + $0x40] sm:$0xff] %vm89_vm2, %v6218_v55  ;;  %v6480_v60 = vsub.f32 %v6414_v23, %v6474_v58  ;;  %v14798_v55 = vld [vmem:[%s18608_s1 + $0x318] ss:$316 sps:$4 sm:$0xff]  }
0x1bfe   :  { %v6486_v35 = vmul.f32 1.442695, %v6480_v60 }
0x1bff   :  { %v6477_v52 = vpop.xlane.xlu0 %6476 }
0x1c00   :  { %15227 = vpow2.f32 %v6486_v35  ;;  %v6481_v44 = vsub.f32 %v6460_v56, %v6477_v52 }
0x1c02   :  { %v6488_v61 = vmul.f32 1.442695, %v6481_v44 }
0x1c03   :  { %v6270_v63 = vld [vmem:[#allocation2 + $0x40] sm:$0xff] }
0x1c04   :  { %15229 = vpow2.f32 %v6488_v61  ;;  %v6514_v17 = vpack.c.bf16 %v6270_v63, %v6270_v63 }
0x1c06   :  { %v15226_v5 = vpop.eup %15225  ;;  %v6522_v6 = vsel %vm410_vm3, %v6514_v17, 0 }
0x1c07   :  { %14236 = vmatpush3.bf16.msra.mxu0 %v6522_v6  ;;  %v6493_v36 = vsel %vm89_vm2, %v15226_v5, 0.0 }
0x1c08   :  { %6494 = vadd.xlane.f32.xlu0 %v6493_v36  ;;  %14247 = vmatprep.subr.bf16.mxu0 %v15313_v0 }
0x1c0a   :  { %v15228_v22 = vpop.eup %15227 }
0x1c0b   :  { %v6496_v8 = vsel %vm89_vm2, %v15228_v22, 0.0 }
0x1c0c   :  { %6497 = vadd.xlane.f32.xlu1 %v6496_v8 }
0x1c0e   :  { %v15230_v10 = vpop.eup %15229 }
0x1c0f   :  { %v6499_v13 = vsel %vm89_vm2, %v15230_v10, 0.0 }
0x1c10   :  { %6500 = vadd.xlane.f32.xlu0 %v6499_v13  ;;  %v12760_v13 = vld [vmem:[%s18610_s3 + $0x12] ss:$0 sm:$0xff] }
0x1c1d   :  { %6242 = vrot.lane.b32.xlu1 %v17014_v51, %s15317_s28 }
0x1c21   :  { %6254 = vrot.lane.b32.xlu1 %v17014_v51, %s15320_s6 }
0x1c26   :  { %6230 = vrot.lane.b32.xlu0 %v17014_v51, %s15318_s29 }
0x1c2c   :  { %v6492_v18 = vpop.xlane.xlu1 %6491 }
0x1c2d   :  { %15231 = vrcp.f32 %v6492_v18 }
0x1c37   :  { %v15232_v4 = vpop.eup %15231 }
0x1c38   :  { %v6506_v19 = vmul.f32 %v15232_v4, %v15224_v11 }
0x1c3a   :  { %v6510_v20 = vpack.c.bf16 %v6506_v19, %v6506_v19 }
0x1c3c   :  { %14238 = vmatmul.mubr.msk.bf16.vlgmr.msra.gmra.mrb[136].mxu0 %vm89_vm2, %v6510_v20 }
0x1c3d   :  { %14249 = vmatprep.mubr.msk.bf16.mxu0 %vm15314_vm0, %v15313_v0 }
0x1c95   :  { %v6495_v21 = vpop.xlane.xlu0 %6494 }
0x1c99   :  { %v6498_v24 = vpop.xlane.xlu1 %6497 }
0x1c9a   :  { %15233 = vrcp.f32 %v6498_v24 }
0x1c9b   :  { %15235 = vrcp.f32 %v6495_v21 }
0x1c9d   :  { %v6243_v25 = vpop.permute.xlu1 %6242  ;;  %v6501_v26 = vpop.xlane.xlu0 %6500 }
0x1c9e   :  { %6245 = vst.msk [vmem:[#allocation2 + $0x50] sm:$0xff] %vm89_vm2, %v6243_v25  ;;  %15237 = vrcp.f32 %v6501_v26 }
0x1ca1   :  { %v6255_v27 = vpop.permute.xlu1 %6254  ;;  %v6231_v51 = vpop.permute.xlu0 %6230 }
0x1ca2   :  { %6257 = vst.msk [vmem:[#allocation2 + $0x58] sm:$0xff] %vm89_vm2, %v6255_v27  ;;  %6233 = vst.msk [vmem:[#allocation2 + $0x48] sm:$0xff] %vm89_vm2, %v6231_v51 }
0x1ca4   :  { %v15234_v28 = vpop.eup %15233 }
0x1ca5   :  { %v6272_v1 = vld [vmem:[#allocation2 + $0x50] sm:$0xff]  ;;  %v6508_v48 = vmul.f32 %v15234_v28, %v15228_v22  ;;  %v15236_v31 = vpop.eup %15235 }
0x1ca6   :  { %v6516_v30 = vpack.c.bf16 %v6272_v1, %v6272_v1  ;;  %v6507_v23 = vmul.f32 %v15236_v31, %v15226_v5  ;;  %v14802_v31 = vld [vmem:[%s18608_s1 + $0xac] ss:$316 sps:$4 sm:$0xff]  }
0x1ca7   :  { %v6512_v14 = vpack.c.bf16 %v6508_v48, %v6508_v48  ;;  %v14801_v48 = vld [vmem:[%s18608_s1 + $0xa8] ss:$316 sps:$4 sm:$0xff]  }
0x1ca8   :  { %v6614_v12 = vsel %vm410_vm3, %v6516_v30, 0  ;;  %v6511_v56 = vpack.c.bf16 %v6507_v23, %v6507_v23  ;;  %v15238_v7 = vpop.eup %15237  ;;  %v14804_v30 = vld [vmem:[%s18608_s1 + $0xb0] ss:$316 sps:$4 sm:$0xff]   ;;  %v14808_v23 = vld [vmem:[%s18608_s1 + $0x324] ss:$316 sps:$4 sm:$0xff]  }
0x1ca9   :  { %14248 = vmatpush3.bf16.msra.mxu0 %v6614_v12  ;;  %v6271_v62 = vld [vmem:[#allocation2 + $0x48] sm:$0xff]  ;;  %v6273_v34 = vld [vmem:[#allocation2 + $0x58] sm:$0xff]  ;;  %v6509_v15 = vmul.f32 %v15238_v7, %v15230_v10 }
0x1caa   :  { %v6515_v37 = vpack.c.bf16 %v6271_v62, %v6271_v62  ;;  %14259 = vmatprep.subr.bf16.mxu0 %v15313_v0  ;;  %v6517_v46 = vpack.c.bf16 %v6273_v34, %v6273_v34  ;;  %v14807_v12 = vld [vmem:[%s18608_s1 + $0x320] ss:$316 sps:$4 sm:$0xff]   ;;  %v14810_v62 = vld [vmem:[%s18608_s1 + $0x328] ss:$316 sps:$4 sm:$0xff]  }
0x1cab   :  { %v6513_v16 = vpack.c.bf16 %v6509_v15, %v6509_v15  ;;  %v14805_v34 = vld [vmem:[%s18608_s1 + $0x31c] ss:$316 sps:$4 sm:$0xff]  }
0x1cac   :  { %14250 = vmatmul.mubr.msk.bf16.vlgmr.msra.gmra.mrb[140].mxu0 %vm89_vm2, %v6512_v14  ;;  %v6568_v39 = vsel %vm410_vm3, %v6515_v37, 0  ;;  %v6660_v40 = vsel %vm410_vm3, %v6517_v46, 0  ;;  %v14813_v14 = vld [vmem:[%s18608_s1 + $0xb8] ss:$316 sps:$4 sm:$0xff]   ;;  %v14816_v37 = vld [vmem:[%s18608_s1 + $0xc0] ss:$316 sps:$4 sm:$0xff]  }
0x1cad   :  { %14242 = vmatpush3.bf16.msra.mxu1 %v6568_v39  ;;  %14263 = vmatprep.mubr.msk.bf16.mxu0 %vm15314_vm0, %v15313_v0 }
0x1cae   :  { %14253 = vmatprep.subr.bf16.mxu1 %v15313_v0  ;;  %14260 = vmatpush3.bf16.msra.mxu0 %v14797_v53  ;;  %v14819_v53 = vld [vmem:[%s18608_s1 + $0x330] ss:$316 sps:$4 sm:$0xff]  }
0x1caf   :  { %14261 = vmatprep.subr.bf16.mxu0 %v15313_v0 }
0x1cb0   :  { %14244 = vmatmul.mubr.msk.bf16.vlgmr.msra.gmra.mrb[136].mxu1 %vm89_vm2, %v6511_v56 }
0x1cb1   :  { %14254 = vmatpush3.bf16.msra.mxu1 %v6660_v40  ;;  %14255 = vmatprep.mubr.msk.bf16.mxu1 %vm15314_vm0, %v15313_v0  ;;  %v12764_v40 = vld [vmem:[%s18610_s3 + $0x16] ss:$0 sm:$0xff] }
0x1cb2   :  { %14262 = vmatpush3.bf16.msra.mxu0 %v14798_v55  ;;  %7092 = vmatprep.subr.bf16.mxu1 %v14801_v48  ;;  %v14820_v55 = vld [vmem:[%s18608_s1 + $0x334] ss:$316 sps:$4 sm:$0xff]  }
0x1cb3   :  { %7133 = vmatprep.subr.bf16.mxu0 %v14804_v30  ;;  %v14858_v48 = vld [vmem:[%s18609_s2 + $0x890] sm:$0xff]   ;;  %v14859_v30 = vld [vmem:[%s18609_s2 + $0x858] sm:$0xff]  }
0x1cb8   :  { %14256 = vmatmul.mubr.msk.bf16.vlgmr.msra.gmra.mrb[140].mxu1 %vm89_vm2, %v6513_v16  ;;  %v12765_v16 = vld [vmem:[%s18610_s3 + $0x17] ss:$0 sm:$0xff] }
0x1cb9   :  { %7124 = vmatprep.mubr.bf16.mxu1 %v15329_v38 }
0x1d0f   :  { %v6558_v29 = vpop.f32.mrb[136].mxu0 }
0x1d10   :  { %6702 = vst.msk [vmem:[#allocation3] sm:$0xff] %vm89_vm2, %v6558_v29  ;;  %v14239_v43 = vpop.f32.mrb[137].mxu0 }
0x1d11   :  { %v6561_v41 = vpop.f32.mrb[138].mxu0 }
0x1d12   :  { %v14240_v11 = vpop.f32.mrb[139].mxu0  ;;  %v14811_v41 = vld [vmem:[%s18608_s1 + $0xb4] ss:$316 sps:$4 sm:$0xff]  }
0x1d13   :  { %v14814_v11 = vld [vmem:[%s18608_s1 + $0xbc] ss:$316 sps:$4 sm:$0xff]  }
0x1d7f   :  { %v6650_v42 = vpop.f32.mrb[140].mxu0 }
0x1d80   :  { %6709 = vrot.lane.b32.xlu1 %v6650_v42, %s15328_s18  ;;  %v14251_v33 = vpop.f32.mrb[141].mxu0 }
0x1d81   :  { %v6653_v54 = vpop.f32.mrb[142].mxu0  ;;  %v14822_v33 = vld [vmem:[%s18608_s1 + $0x338] ss:$316 sps:$4 sm:$0xff]  }
0x1d82   :  { %v14252_v58 = vpop.f32.mrb[143].mxu0  ;;  %v14817_v54 = vld [vmem:[%s18608_s1 + $0x32c] ss:$316 sps:$4 sm:$0xff]  }
0x1d83   :  { %v6604_v60 = vpop.f32.mrb[136].mxu1  ;;  %v14825_v58 = vld [vmem:[%s18608_s1 + $0xc8] ss:$316 sps:$4 sm:$0xff]  }
0x1d84   :  { %6704 = vrot.lane.b32.xlu0 %v6604_v60, %s15326_s14  ;;  %v14245_v35 = vpop.f32.mrb[137].mxu1  ;;  %v14828_v60 = vld [vmem:[%s18608_s1 + $0xd0] ss:$316 sps:$4 sm:$0xff]  }
0x1d85   :  { %v6607_v52 = vpop.f32.mrb[138].mxu1  ;;  %v14823_v35 = vld [vmem:[%s18608_s1 + $0xc4] ss:$316 sps:$4 sm:$0xff]  }
0x1d86   :  { %v14246_v44 = vpop.f32.mrb[139].mxu1  ;;  %v14826_v52 = vld [vmem:[%s18608_s1 + $0xcc] ss:$316 sps:$4 sm:$0xff]  }
0x1d87   :  { %v14831_v44 = vld [vmem:[%s18608_s1 + $0x340] ss:$316 sps:$4 sm:$0xff]  }
0x1d8b   :  { %v6696_v61 = vpop.f32.mrb[140].mxu1 }
0x1d8c   :  { %6714 = vrot.lane.b32.xlu0 %v6696_v61, %s15327_s17  ;;  %v14257_v63 = vpop.f32.mrb[141].mxu1  ;;  %v14834_v61 = vld [vmem:[%s18608_s1 + $0x348] ss:$316 sps:$4 sm:$0xff]  }
0x1d8d   :  { %v6699_v17 = vpop.f32.mrb[142].mxu1  ;;  %v14829_v63 = vld [vmem:[%s18608_s1 + $0x33c] ss:$316 sps:$4 sm:$0xff]  }
0x1d8e   :  { %v14258_v5 = vpop.f32.mrb[143].mxu1  ;;  %v14832_v17 = vld [vmem:[%s18608_s1 + $0x344] ss:$316 sps:$4 sm:$0xff]  }
0x1d8f   :  { %v14837_v5 = vld [vmem:[%s18608_s1 + $0xd8] ss:$316 sps:$4 sm:$0xff]  }
0x1df2   :  { %v6710_v36 = vpop.permute.xlu1 %6709 }
0x1df6   :  { %v6705_v6 = vpop.permute.xlu0 %6704 }
0x1df7   :  { %6707 = vst.msk [vmem:[#allocation3] sm:$0xff] %vm597_vm4, %v6705_v6  ;;  %v14840_v6 = vld [vmem:[%s18608_s1 + $0xe0] ss:$316 sps:$4 sm:$0xff]  }
0x1df8   :  { %6712 = vst.msk [vmem:[#allocation3] sm:$0xff] %vm603_vm5, %v6710_v36  ;;  %v14835_v36 = vld [vmem:[%s18608_s1 + $0xd4] ss:$316 sps:$4 sm:$0xff]  }
0x1dfe   :  { %v6715_v22 = vpop.permute.xlu0 %6714 }
0x1dff   :  { %6717 = vst.msk [vmem:[#allocation3] sm:$0xff] %vm609_vm6, %v6715_v22  ;;  %v14838_v22 = vld [vmem:[%s18608_s1 + $0xdc] ss:$316 sps:$4 sm:$0xff]  }
0x1e06   :  { %v6718_v8 = vld [vmem:[#allocation3] sm:$0xff] }
0x1e07   :  { %v6723_v10 = vpack.c.bf16 %v6718_v8, %v6718_v8  ;;  %v14843_v8 = vld [vmem:[%s18608_s1 + $0x350] ss:$316 sps:$4 sm:$0xff]  }
0x1e09   :  { %14264 = vmatmul.mubr.msk.bf16.vlgmr.msra.gmra.mrb[144].mxu0 %vm45_vm1, %v6723_v10  ;;  %v14846_v10 = vld [vmem:[%s18608_s1 + $0x358] ss:$316 sps:$4 sm:$0xff]  }
0x1e0a   :  { %7165 = vmatprep.mubr.bf16.mxu0 %v15329_v38  ;;  %7134 = vmatpush1.bf16.msra.mxu0 %v14802_v31  ;;  %v14861_v31 = vld [vmem:[%s18609_s2 + $0x818] sm:$0xff]  }
0x1e0b   :  { %7135 = vmatprep.subr.bf16.mxu0 %v14810_v62  ;;  %v14863_v62 = vld [vmem:[%s18609_s2 + $0x860] sm:$0xff]  }
0x1e0e   :  { %7136 = vmatpush1.bf16.msra.mxu0 %v14808_v23  ;;  %v14865_v23 = vld [vmem:[%s18609_s2 + $0x820] sm:$0xff]  }
0x1e0f   :  { %7215 = vmatprep.subr.bf16.mxu0 %v14816_v37  ;;  %v14867_v37 = vld [vmem:[%s18609_s2 + $0x868] sm:$0xff]  }
0x1edc   :  { %v6778_v18 = vpop.f32.mrb[144].mxu0 }
0x1edd   :  { %v6779_v4 = vadd.f32 %v12760_v13, %v6778_v18  ;;  %v14265_v19 = vpop.f32.mrb[145].mxu0  ;;  %v14841_v13 = vld [vmem:[%s18608_s1 + $0x34c] ss:$316 sps:$4 sm:$0xff]   ;;  %v14844_v18 = vld [vmem:[%s18608_s1 + $0x354] ss:$316 sps:$4 sm:$0xff]  }
0x1ede   :  { %v6781_v20 = vpop.f32.mrb[146].mxu0  ;;  %v14848_v19 = vld [vmem:[%s18609_s2 + $0x8c0] sm:$0xff]  }
0x1edf   :  { %v6784_v21 = vadd.f32 %v6779_v4, %v17002_v32  ;;  %v14266_v24 = vpop.f32.mrb[147].mxu0  ;;  %v14799_v32 = vld [vmem:[%s18608_s1 + $0xa4] ss:$316 sps:$4 sm:$0xff]  }
0x1ee0   :  { %7093 = vmatpush1.bf16.msra.mxu1 %v14799_v32  ;;  %v14847_v4 = vld [vmem:[%s18609_s2 + $0x840] sm:$0xff]   ;;  %v14851_v24 = vld [vmem:[%s18609_s2 + $0x848] sm:$0xff]   ;;  %v14860_v32 = vld [vmem:[%s18609_s2 + $0x8d8] sm:$0xff]  }
0x1ee1   :  { %v6785_v25 = vsel %vm45_vm1, %v6784_v21, 0.0  ;;  %7094 = vmatprep.subr.bf16.mxu1 %v14807_v12  ;;  %v14849_v20 = vld [vmem:[%s18609_s2 + $0x800] sm:$0xff]   ;;  %v14862_v12 = vld [vmem:[%s18609_s2 + $0x898] sm:$0xff]  }
0x1ee2   :  { %6786 = vadd.xlane.f32.xlu1 %v6785_v25  ;;  %v14852_v25 = vld [vmem:[%s18609_s2 + $0x8c8] sm:$0xff]  }
0x1ee4   :  { %7095 = vmatpush1.bf16.msra.mxu1 %v14805_v34  ;;  %v14864_v34 = vld [vmem:[%s18609_s2 + $0x8e0] sm:$0xff]  }
0x1ee5   :  { %7174 = vmatprep.subr.bf16.mxu1 %v14813_v14  ;;  %v14866_v14 = vld [vmem:[%s18609_s2 + $0x8a0] sm:$0xff]  }
0x1f6f   :  { %v6787_v26 = vpop.xlane.xlu1 %6786 }
0x1f70   :  { %v6788_v27 = vmul.f32 0.03125, %v6787_v26  ;;  %v14853_v26 = vld [vmem:[%s18609_s2 + $0x808] sm:$0xff]  }
0x1f72   :  { %v6789_v51 = vsub.f32 %v6784_v21, %v6788_v27  ;;  %v14850_v21 = vld [vmem:[%s18609_s2 + $0x880] sm:$0xff]   ;;  %v14854_v27 = vld [vmem:[%s18609_s2 + $0x888] sm:$0xff]  }
0x1f74   :  { %v6790_v28 = vmul.f32 %v6789_v51, %v6789_v51 }
0x1f76   :  { %v6791_v1 = vsel %vm45_vm1, %v6790_v28, 0.0  ;;  %v14856_v28 = vld [vmem:[%s18609_s2 + $0x8d0] sm:$0xff]  }
0x1f77   :  { %6792 = vadd.xlane.f32.xlu0 %v6791_v1  ;;  %v14857_v1 = vld [vmem:[%s18609_s2 + $0x810] sm:$0xff]  }
0x2004   :  { %v6793_v39 = vpop.xlane.xlu0 %6792 }
0x2005   :  { %v6794_v46 = vmul.f32 0.03125, %v6793_v39  ;;  %v14868_v39 = vld [vmem:[%s18609_s2 + $0x8e8] sm:$0xff]  }
0x2007   :  { %v6795_v56 = vadd.f32 1e-05, %v6794_v46  ;;  %v14869_v46 = vld [vmem:[%s18609_s2 + $0x828] sm:$0xff]  }
0x2009   :  { %15239 = vrsqrt.f32 %v6795_v56  ;;  %v14870_v56 = vld [vmem:[%s18609_s2 + $0x8a8] sm:$0xff]  }
0x2013   :  { %v15240_v7 = vpop.eup %15239 }
0x2014   :  { %v6797_v15 = vmul.f32 %v15240_v7, %v6789_v51  ;;  %v14855_v51 = vld [vmem:[%s18609_s2 + $0x850] sm:$0xff]  }
0x2015   :  { %v14871_v7 = vld [vmem:[%s18609_s2 + $0x870] sm:$0xff]  }
0x2016   :  { %v6803_v29 = vmul.f32 %v12764_v40, %v6797_v15  ;;  %v14872_v40 = vld [vmem:[%s18609_s2 + $0x8f0] sm:$0xff]  }
0x2017   :  { %v14873_v15 = vld [vmem:[%s18609_s2 + $0x830] sm:$0xff]  }
0x2018   :  { %v17153_v43 = vadd.f32 %v12765_v16, %v6803_v29  ;;  %v14874_v16 = vld [vmem:[%s18609_s2 + $0x8b0] sm:$0xff]   ;;  %v14875_v29 = vld [vmem:[%s18609_s2 + $0x878] sm:$0xff]  }
0x201a   :  { %v17163_v42 = vpack.c.bf16 %v17153_v43, %v17153_v43 }
0x201c   :  { %12800 = vmatmul.mubr.msk.bf16.vlgmr.msra.gmra.mrb[144].mxu1 %vm45_vm1, %v17163_v42  ;;  %12801 = vmatmul.mubr.msk.bf16.vlgmr.msra.gmra.mrb[148].mxu0 %vm45_vm1, %v17163_v42 }
0x201d   :  { %7175 = vmatpush1.bf16.msra.mxu1 %v14811_v41  ;;  %7216 = vmatpush1.bf16.msra.mxu0 %v14814_v11  ;;  %v14876_v41 = vld [vmem:[%s18609_s2 + $0x8f8] sm:$0xff]  }
0x201e   :  { %7176 = vmatprep.subr.bf16.mxu1 %v14819_v53  ;;  %7217 = vmatprep.subr.bf16.mxu0 %v14822_v33  ;;  %v14877_v11 = vld [vmem:[%s18609_s2 + $0x838] sm:$0xff]   ;;  %v14879_v53 = vld [vmem:[%s18609_s2 + $0x940] sm:$0xff]  }
0x201f   :  { %7206 = vmatprep.mubr.bf16.mxu1 %v15329_v38  ;;  %7247 = vmatprep.mubr.bf16.mxu0 %v15329_v38  ;;  %v14880_v33 = vld [vmem:[%s18609_s2 + $0x9c0] sm:$0xff]  }
0x2021   :  { %7177 = vmatpush1.bf16.msra.mxu1 %v14817_v54  ;;  %7218 = vmatpush1.bf16.msra.mxu0 %v14820_v55  ;;  %v17352_v54 = vld [vmem:[%s18611_s4 + $0x2] ss:$4 sm:$0xff] }
0x2022   :  { %7256 = vmatprep.subr.bf16.mxu1 %v14825_v58  ;;  %7297 = vmatprep.subr.bf16.mxu0 %v14828_v60  ;;  %v6852_v55 = vrot.slane %v17352_v54, %v15729_v45  ;;  %v6860_v58 = vrot.slane %v17352_v54, %v15732_v47  ;;  %v6856_v60 = vrot.slane %v17352_v54, %v15740_v49 }
0x2024   :  { %12802 = vmatmul.mubr.msk.bf16.vlgmr.msra.gmra.mrb[148].mxu1 %vm45_vm1, %v17163_v42  ;;  %12803 = vmatmul.mubr.msk.bf16.vlgmr.msra.gmra.mrb[152].mxu0 %vm45_vm1, %v17163_v42 }
0x2025   :  { %7257 = vmatpush1.bf16.msra.mxu1 %v14823_v35  ;;  %7298 = vmatpush1.bf16.msra.mxu0 %v14826_v52  ;;  %v6864_v35 = vrot.slane %v17352_v54, %v15743_v50 }
0x2026   :  { %7258 = vmatprep.subr.bf16.mxu1 %v14831_v44  ;;  %7299 = vmatprep.subr.bf16.mxu0 %v14834_v61 }
0x2027   :  { %7288 = vmatprep.mubr.bf16.mxu1 %v15329_v38  ;;  %7329 = vmatprep.mubr.bf16.mxu0 %v15329_v38 }
0x2029   :  { %7259 = vmatpush1.bf16.msra.mxu1 %v14829_v63  ;;  %7300 = vmatpush1.bf16.msra.mxu0 %v14832_v17 }
0x202a   :  { %7338 = vmatprep.subr.bf16.mxu1 %v14837_v5  ;;  %7379 = vmatprep.subr.bf16.mxu0 %v14840_v6 }
0x202c   :  { %12804 = vmatmul.mubr.msk.bf16.vlgmr.msra.gmra.mrb[152].mxu1 %vm45_vm1, %v17163_v42  ;;  %12805 = vmatmul.mubr.msk.bf16.vlgmr.msra.gmra.mrb[156].mxu0 %vm45_vm1, %v17163_v42 }
0x202d   :  { %7339 = vmatpush1.bf16.msra.mxu1 %v14835_v36  ;;  %7380 = vmatpush1.bf16.msra.mxu0 %v14838_v22 }
0x202e   :  { %7340 = vmatprep.subr.bf16.mxu1 %v14843_v8  ;;  %7381 = vmatprep.subr.bf16.mxu0 %v14846_v10 }
0x202f   :  { %7370 = vmatprep.mubr.bf16.mxu1 %v15329_v38  ;;  %7411 = vmatprep.mubr.bf16.mxu0 %v15329_v38 }
0x2031   :  { %7341 = vmatpush1.bf16.msra.mxu1 %v14841_v13  ;;  %7382 = vmatpush1.bf16.msra.mxu0 %v14844_v18 }
0x2032   :  { %13601 = vmatprep.subr.bf16.mxu1 %v14847_v4  ;;  %13623 = vmatprep.subr.bf16.mxu0 %v14848_v19 }
0x2034   :  { %12806 = vmatmul.mubr.msk.bf16.vlgmr.msra.gmra.mrb[156].mxu1 %vm45_vm1, %v17163_v42  ;;  %12807 = vmatmul.mubr.msk.bf16.vlgmr.msra.gmra.mrb[160].mxu0 %vm45_vm1, %v17163_v42  ;;  %v14878_v42 = vld [vmem:[%s18609_s2 + $0x8b8] sm:$0xff]  }
0x2035   :  { %13602 = vmatpush3.bf16.msra.mxu1 %v14849_v20  ;;  %13624 = vmatpush3.bf16.msra.mxu0 %v14850_v21 }
0x2036   :  { %13603 = vmatprep.subr.bf16.mxu1 %v14851_v24  ;;  %13625 = vmatprep.subr.bf16.mxu0 %v14852_v25  ;;  %v6872_v25 = vrot.slane %v17352_v54, %v15754_v2 }
0x2039   :  { %13604 = vmatpush3.bf16.msra.mxu1 %v14853_v26  ;;  %13626 = vmatpush3.bf16.msra.mxu0 %v14854_v27  ;;  %v6880_v26 = vrot.slane %v17352_v54, %v15757_v3  ;;  %v14881_v27 = vld [vmem:[%s18609_s2 + $0x900] sm:$0xff]  }
0x203a   :  { %13605 = vmatprep.subr.bf16.mxu1 %v14855_v51  ;;  %13627 = vmatprep.subr.bf16.mxu0 %v14856_v28  ;;  %v14882_v51 = vld [vmem:[%s18609_s2 + $0x980] sm:$0xff]  }
0x203d   :  { %13606 = vmatpush3.bf16.msra.mxu1 %v14857_v1  ;;  %13628 = vmatpush3.bf16.msra.mxu0 %v14858_v48  ;;  %v14883_v48 = vld [vmem:[%s18609_s2 + $0x948] sm:$0xff]  }
0x203e   :  { %13607 = vmatprep.subr.bf16.mxu1 %v14859_v30  ;;  %13629 = vmatprep.subr.bf16.mxu0 %v14860_v32  ;;  %v14884_v30 = vld [vmem:[%s18609_s2 + $0x9c8] sm:$0xff]  }
0x2041   :  { %13608 = vmatpush3.bf16.msra.mxu1 %v14861_v31  ;;  %13630 = vmatpush3.bf16.msra.mxu0 %v14862_v12 }
0x2042   :  { %13609 = vmatprep.subr.bf16.mxu1 %v14863_v62  ;;  %13631 = vmatprep.subr.bf16.mxu0 %v14864_v34 }
0x2045   :  { %13610 = vmatpush3.bf16.msra.mxu1 %v14865_v23  ;;  %13632 = vmatpush3.bf16.msra.mxu0 %v14866_v14 }
0x2046   :  { %13611 = vmatprep.subr.bf16.mxu1 %v14867_v37  ;;  %13633 = vmatprep.subr.bf16.mxu0 %v14868_v39  ;;  %v14885_v39 = vld [vmem:[%s18609_s2 + $0x908] sm:$0xff]  }
0x2049   :  { %13612 = vmatpush3.bf16.msra.mxu1 %v14869_v46  ;;  %13634 = vmatpush3.bf16.msra.mxu0 %v14870_v56  ;;  %v14886_v46 = vld [vmem:[%s18609_s2 + $0x988] sm:$0xff]  }
0x204a   :  { %13613 = vmatprep.subr.bf16.mxu1 %v14871_v7  ;;  %13635 = vmatprep.subr.bf16.mxu0 %v14872_v40  ;;  %v14887_v40 = vld [vmem:[%s18609_s2 + $0x950] sm:$0xff]  }
0x204d   :  { %13614 = vmatpush3.bf16.msra.mxu1 %v14873_v15  ;;  %13636 = vmatpush3.bf16.msra.mxu0 %v14874_v16  ;;  %v14888_v15 = vld [vmem:[%s18609_s2 + $0x9d0] sm:$0xff]  }
0x204e   :  { %13615 = vmatprep.subr.bf16.mxu1 %v14875_v29  ;;  %13637 = vmatprep.subr.bf16.mxu0 %v14876_v41 }
0x2051   :  { %13616 = vmatpush3.bf16.msra.mxu1 %v14877_v11  ;;  %13638 = vmatpush3.bf16.msra.mxu0 %v14878_v42  ;;  %v14889_v42 = vld [vmem:[%s18609_s2 + $0x910] sm:$0xff]  }
0x2052   :  { %13645 = vmatprep.subr.bf16.mxu1 %v14879_v53  ;;  %13667 = vmatprep.subr.bf16.mxu0 %v14880_v33  ;;  %v14890_v53 = vld [vmem:[%s18609_s2 + $0x990] sm:$0xff]   ;;  %v14891_v33 = vld [vmem:[%s18609_s2 + $0x958] sm:$0xff]  }
0x20ef   :  { %v7126_v52 = vpop.f32.mrb[144].mxu1  ;;  %v7167_v44 = vpop.f32.mrb[148].mxu0 }
0x20f0   :  { %v7127_v61 = vadd.f32 %v7126_v52, %v6852_v55  ;;  %v7168_v63 = vadd.f32 %v7167_v44, %v6860_v58  ;;  %v7128_v17 = vpop.f32.mrb[145].mxu1  ;;  %v7169_v5 = vpop.f32.mrb[149].mxu0  ;;  %v14892_v55 = vld [vmem:[%s18609_s2 + $0x9d8] sm:$0xff]  }
0x20f1   :  { %v7129_v6 = vadd.f32 %v7128_v17, %v6856_v60  ;;  %v7170_v36 = vadd.f32 %v7169_v5, %v6864_v35  ;;  %v7130_v22 = vpop.f32.mrb[146].mxu1  ;;  %v7171_v8 = vpop.f32.mrb[150].mxu0  ;;  %v14894_v17 = vld [vmem:[%s18609_s2 + $0x998] sm:$0xff]  }
0x20f2   :  { %v7420_v10 = vmax.f32 %v7127_v61, 0.0  ;;  %v7422_v13 = vmax.f32 %v7168_v63, 0.0  ;;  %v7131_v18 = vpop.f32.mrb[147].mxu1  ;;  %v7172_v4 = vpop.f32.mrb[151].mxu0  ;;  %v14893_v63 = vld [vmem:[%s18609_s2 + $0x918] sm:$0xff]   ;;  %v14896_v22 = vld [vmem:[%s18609_s2 + $0x9e0] sm:$0xff]  }
0x20f3   :  { %v7421_v19 = vmax.f32 %v7129_v6, 0.0  ;;  %v7423_v20 = vmax.f32 %v7170_v36, 0.0  ;;  %v14895_v36 = vld [vmem:[%s18609_s2 + $0x960] sm:$0xff]   ;;  %v14899_v4 = vld [vmem:[%s18609_s2 + $0x968] sm:$0xff]  }
0x20f4   :  { %v7436_v28 = vpack.c.bf16 %v7420_v10, %v7420_v10  ;;  %v7438_v1 = vpack.c.bf16 %v7422_v13, %v7422_v13  ;;  %v17425_v8 = vld [vmem:[%s18611_s4 + $0x22] ss:$4 sm:$0xff] }
0x20f5   :  { %v7437_v21 = vpack.c.bf16 %v7421_v19, %v7421_v19  ;;  %v7439_v24 = vpack.c.bf16 %v7423_v20, %v7423_v20  ;;  %v6908_v10 = vrot.slane %v17425_v8, %v15814_v59  ;;  %v14897_v13 = vld [vmem:[%s18609_s2 + $0x920] sm:$0xff]   ;;  %v14900_v19 = vld [vmem:[%s18609_s2 + $0x9e8] sm:$0xff]  }
0x20f6   :  { %v14898_v18 = vld [vmem:[%s18609_s2 + $0x9a0] sm:$0xff]  }
0x20f7   :  { %v17378_v32 = vpop.f32.mrb[148].mxu1  ;;  %v17380_v31 = vpop.f32.mrb[152].mxu0  ;;  %8513 = vmatprep.mubr.bf16.mxu1 %v7437_v21  ;;  %8553 = vmatprep.mubr.bf16.mxu0 %v7439_v24 }
0x20f8   :  { %v7210_v12 = vpop.f32.mrb[149].mxu1  ;;  %v7251_v62 = vpop.f32.mrb[153].mxu0  ;;  %8514 = vmatmul.mubr.bf16.vlgmr.msra.gmra.mrb[160].mxu1 %v7436_v28  ;;  %8554 = vmatmul.mubr.bf16.vlgmr.msra.gmra.mrb[164].mxu0 %v7438_v1  ;;  %v14901_v28 = vld [vmem:[%s18609_s2 + $0x928] sm:$0xff]  }
0x20f9   :  { %v7211_v34 = vadd.f32 %v7210_v12, %v6872_v25  ;;  %v7252_v23 = vadd.f32 %v7251_v62, %v6880_v26  ;;  %13646 = vmatpush3.bf16.msra.mxu1 %v14881_v27  ;;  %13668 = vmatpush3.bf16.msra.mxu0 %v14882_v51  ;;  %v7212_v14 = vpop.f32.mrb[150].mxu1  ;;  %v7253_v37 = vpop.f32.mrb[154].mxu0  ;;  %v14902_v1 = vld [vmem:[%s18609_s2 + $0x9a8] sm:$0xff]  }
0x20fa   :  { %v7213_v56 = vpop.f32.mrb[151].mxu1  ;;  %v7254_v7 = vpop.f32.mrb[155].mxu0  ;;  %13647 = vmatprep.subr.bf16.mxu1 %v14883_v48  ;;  %13669 = vmatprep.subr.bf16.mxu0 %v14884_v30  ;;  %v6868_v48 = vrot.slane %v17352_v54, %v15836_v9  ;;  %v6876_v30 = vrot.slane %v17352_v54, %v15814_v59  ;;  %v6888_v14 = vrot.slane %v17425_v8, %v15740_v49  ;;  %v14905_v54 = vld [vmem:[%s18609_s2 + $0x930] sm:$0xff]  }
0x20fb   :  { %v7425_v16 = vmax.f32 %v7211_v34, 0.0  ;;  %v7427_v29 = vmax.f32 %v7252_v23, 0.0  ;;  %v14903_v34 = vld [vmem:[%s18609_s2 + $0x970] sm:$0xff]   ;;  %v6896_v37 = vrot.slane %v17425_v8, %v15743_v50  ;;  %v14907_v7 = vld [vmem:[%s18609_s2 + $0x978] sm:$0xff]  }
0x20fc   :  { %v14904_v23 = vld [vmem:[%s18609_s2 + $0x9f0] sm:$0xff]   ;;  %v7250_v56 = vadd.f32 %v17380_v31, %v6876_v30  ;;  %v14910_v31 = vld [vmem:[%s18609_s2 + $0x9b8] sm:$0xff]   ;;  %v14931_v30 = vld [vmem:[%s18609_s2 + $0xa68] sm:$0xff]  }
0x20fd   :  { %v7441_v41 = vpack.c.bf16 %v7425_v16, %v7425_v16  ;;  %v7443_v11 = vpack.c.bf16 %v7427_v29, %v7427_v29  ;;  %13648 = vmatpush3.bf16.msra.mxu1 %v14885_v39  ;;  %13670 = vmatpush3.bf16.msra.mxu0 %v14886_v46  ;;  %v14906_v39 = vld [vmem:[%s18609_s2 + $0x9b0] sm:$0xff]   ;;  %v7209_v46 = vadd.f32 %v17378_v32, %v6868_v48  ;;  %v14909_v32 = vld [vmem:[%s18609_s2 + $0x938] sm:$0xff]   ;;  %v14930_v48 = vld [vmem:[%s18609_s2 + $0xaa0] sm:$0xff]  }
0x20fe   :  { %13649 = vmatprep.subr.bf16.mxu1 %v14887_v40  ;;  %13671 = vmatprep.subr.bf16.mxu0 %v14888_v15  ;;  %v14908_v40 = vld [vmem:[%s18609_s2 + $0x9f8] sm:$0xff]  }
0x20ff   :  { %v17406_v58 = vpop.f32.mrb[152].mxu1  ;;  %v17408_v60 = vpop.f32.mrb[156].mxu0  ;;  %8593 = vmatprep.mubr.bf16.mxu1 %v7441_v41  ;;  %8633 = vmatprep.mubr.bf16.mxu0 %v7443_v11  ;;  %v7424_v29 = vmax.f32 %v7209_v46, 0.0  ;;  %v7426_v41 = vmax.f32 %v7250_v56, 0.0  ;;  %v14911_v11 = vld [vmem:[%s18609_s2 + $0xa40] sm:$0xff]   ;;  %v6912_v46 = vrot.slane %v17425_v8, %v15757_v3  ;;  %v14937_v56 = vld [vmem:[%s18609_s2 + $0xa30] sm:$0xff]  }
0x2100   :  { %v7292_v35 = vpop.f32.mrb[153].mxu1  ;;  %v7333_v52 = vpop.f32.mrb[157].mxu0 }
0x2101   :  { %13650 = vmatpush3.bf16.msra.mxu1 %v14889_v42  ;;  %13672 = vmatpush3.bf16.msra.mxu0 %v14890_v53  ;;  %v7294_v44 = vpop.f32.mrb[154].mxu1  ;;  %v7335_v61 = vpop.f32.mrb[158].mxu0  ;;  %v7293_v15 = vadd.f32 %v7292_v35, %v6888_v14  ;;  %v7334_v16 = vadd.f32 %v7333_v52, %v6896_v37  ;;  %v14912_v42 = vld [vmem:[%s18609_s2 + $0xac0] sm:$0xff]   ;;  %v7440_v35 = vpack.c.bf16 %v7424_v29, %v7424_v29  ;;  %v14935_v14 = vld [vmem:[%s18609_s2 + $0xa70] sm:$0xff]   ;;  %v14941_v29 = vld [vmem:[%s18609_s2 + $0xa38] sm:$0xff]  }
0x2102   :  { %v7295_v5 = vpop.f32.mrb[155].mxu1  ;;  %v7336_v6 = vpop.f32.mrb[159].mxu0  ;;  %13651 = vmatprep.subr.bf16.mxu1 %v14891_v33  ;;  %13673 = vmatprep.subr.bf16.mxu0 %v14892_v55  ;;  %v14913_v55 = vld [vmem:[%s18609_s2 + $0xa00] sm:$0xff]   ;;  %v7442_v52 = vpack.c.bf16 %v7426_v41, %v7426_v41  ;;  %v6892_v37 = vrot.slane %v17425_v8, %v15732_v47 }
0x2103   :  { %v7429_v53 = vmax.f32 %v7293_v15, 0.0  ;;  %v7431_v33 = vmax.f32 %v7334_v16, 0.0  ;;  %v14914_v44 = vld [vmem:[%s18609_s2 + $0xa80] sm:$0xff]   ;;  %v14917_v6 = vld [vmem:[%s18609_s2 + $0xa08] sm:$0xff]   ;;  %v14939_v15 = vld [vmem:[%s18609_s2 + $0xa78] sm:$0xff]  }
0x2104   :  { %v7332_v16 = vadd.f32 %v17408_v60, %v6892_v37  ;;  %v14942_v60 = vld [vmem:[%s18609_s2 + $0xab8] sm:$0xff]  }
0x2105   :  { %13652 = vmatpush3.bf16.msra.mxu1 %v14893_v63  ;;  %13674 = vmatpush3.bf16.msra.mxu0 %v14894_v17  ;;  %v7445_v61 = vpack.c.bf16 %v7429_v53, %v7429_v53  ;;  %v14915_v63 = vld [vmem:[%s18609_s2 + $0xa48] sm:$0xff]   ;;  %v7447_v5 = vpack.c.bf16 %v7431_v33, %v7431_v33  ;;  %v14945_v33 = vld [vmem:[%s18609_s2 + $0xb00] sm:$0xff]  }
0x2106   :  { %13653 = vmatprep.subr.bf16.mxu1 %v14895_v36  ;;  %13675 = vmatprep.subr.bf16.mxu0 %v14896_v22  ;;  %v14916_v17 = vld [vmem:[%s18609_s2 + $0xac8] sm:$0xff]   ;;  %v14919_v22 = vld [vmem:[%s18609_s2 + $0xa50] sm:$0xff]  }
0x2107   :  { %v17441_v20 = vpop.f32.mrb[156].mxu1  ;;  %v7413_v21 = vpop.f32.mrb[160].mxu0  ;;  %v14918_v36 = vld [vmem:[%s18609_s2 + $0xa88] sm:$0xff]  }
0x2108   :  { %v17443_v24 = vadd.f32 %v7413_v21, %v6908_v10  ;;  %v17445_v25 = vpop.f32.mrb[157].mxu1  ;;  %v17447_v26 = vpop.f32.mrb[161].mxu0  ;;  %v14920_v10 = vld [vmem:[%s18609_s2 + $0xad0] sm:$0xff]   ;;  %v14925_v21 = vld [vmem:[%s18609_s2 + $0xa18] sm:$0xff]  }
0x2109   :  { %13654 = vmatpush3.bf16.msra.mxu1 %v14897_v13  ;;  %13676 = vmatpush3.bf16.msra.mxu0 %v14898_v18  ;;  %v7376_v27 = vpop.f32.mrb[158].mxu1  ;;  %v7417_v51 = vpop.f32.mrb[162].mxu0  ;;  %v14921_v13 = vld [vmem:[%s18609_s2 + $0xa10] sm:$0xff]  }
0x210a   :  { %v7377_v12 = vpop.f32.mrb[159].mxu1  ;;  %v7418_v62 = vpop.f32.mrb[163].mxu0  ;;  %13655 = vmatprep.subr.bf16.mxu1 %v14899_v4  ;;  %13677 = vmatprep.subr.bf16.mxu0 %v14900_v19  ;;  %v14922_v18 = vld [vmem:[%s18609_s2 + $0xa90] sm:$0xff]   ;;  %v14923_v4 = vld [vmem:[%s18609_s2 + $0xa58] sm:$0xff]   ;;  %v14927_v51 = vld [vmem:[%s18609_s2 + $0xa60] sm:$0xff]  }
0x210b   :  { %v14924_v19 = vld [vmem:[%s18609_s2 + $0xad8] sm:$0xff]   ;;  %v14932_v12 = vld [vmem:[%s18609_s2 + $0xae8] sm:$0xff]  }
0x210c   :  { %v14926_v27 = vld [vmem:[%s18609_s2 + $0xa98] sm:$0xff]   ;;  %v14933_v62 = vld [vmem:[%s18609_s2 + $0xa28] sm:$0xff]  }
0x210d   :  { %13656 = vmatpush3.bf16.msra.mxu1 %v14901_v28  ;;  %13678 = vmatpush3.bf16.msra.mxu0 %v14902_v1  ;;  %v14928_v28 = vld [vmem:[%s18609_s2 + $0xae0] sm:$0xff]  }
0x210e   :  { %13657 = vmatprep.subr.bf16.mxu1 %v14903_v34  ;;  %13679 = vmatprep.subr.bf16.mxu0 %v14904_v23  ;;  %v14929_v1 = vld [vmem:[%s18609_s2 + $0xa20] sm:$0xff]   ;;  %v6884_v34 = vrot.slane %v17425_v8, %v15729_v45  ;;  %v14934_v23 = vld [vmem:[%s18609_s2 + $0xaa8] sm:$0xff]  }
0x2111   :  { %13658 = vmatpush3.bf16.msra.mxu1 %v14905_v54  ;;  %13680 = vmatpush3.bf16.msra.mxu0 %v14906_v39  ;;  %v14936_v54 = vld [vmem:[%s18609_s2 + $0xaf0] sm:$0xff]   ;;  %v6904_v39 = vrot.slane %v17425_v8, %v15754_v2 }
0x2112   :  { %13659 = vmatprep.subr.bf16.mxu1 %v14907_v7  ;;  %13681 = vmatprep.subr.bf16.mxu0 %v14908_v40  ;;  %v7291_v7 = vadd.f32 %v17406_v58, %v6884_v34  ;;  %v14938_v40 = vld [vmem:[%s18609_s2 + $0xab0] sm:$0xff]   ;;  %v7416_v58 = vadd.f32 %v17447_v26, %v6912_v46  ;;  %v14966_v34 = vld [vmem:[%s18609_s2 + $0xba8] sm:$0xff]   ;;  %v14972_v46 = vld [vmem:[%s18609_s2 + $0xbf8] sm:$0xff]  }
0x2114   :  { %v7428_v41 = vmax.f32 %v7291_v7, 0.0  ;;  %v7435_v53 = vmax.f32 %v7416_v58, 0.0  ;;  %v14974_v7 = vld [vmem:[%s18609_s2 + $0xbb8] sm:$0xff]  }
0x2115   :  { %13660 = vmatpush3.bf16.msra.mxu1 %v14909_v32  ;;  %13682 = vmatpush3.bf16.msra.mxu0 %v14910_v31  ;;  %v14940_v32 = vld [vmem:[%s18609_s2 + $0xaf8] sm:$0xff]   ;;  %v7375_v31 = vadd.f32 %v17445_v25, %v6904_v39  ;;  %v14944_v25 = vld [vmem:[%s18609_s2 + $0xbc0] sm:$0xff]  }
0x2116   :  { %13689 = vmatprep.subr.bf16.mxu1 %v14911_v11  ;;  %13711 = vmatprep.subr.bf16.mxu0 %v14912_v42  ;;  %v14943_v11 = vld [vmem:[%s18609_s2 + $0xb40] sm:$0xff]   ;;  %v7430_v42 = vmax.f32 %v7332_v16, 0.0  ;;  %v14971_v39 = vld [vmem:[%s18609_s2 + $0xb78] sm:$0xff]  }
0x2117   :  { %v7433_v26 = vmax.f32 %v7375_v31, 0.0 }
0x2118   :  { %8594 = vmatmul.mubr.bf16.vlgmr.msra.gmra.mrb[164].mxu1 %v7440_v35  ;;  %8634 = vmatmul.mubr.bf16.vlgmr.msra.gmra.mrb[168].mxu0 %v7442_v52  ;;  %v14946_v35 = vld [vmem:[%s18609_s2 + $0xb80] sm:$0xff]   ;;  %v7446_v52 = vpack.c.bf16 %v7430_v42, %v7430_v42 }
0x2119   :  { %13690 = vmatpush3.bf16.msra.mxu1 %v14913_v55  ;;  %8673 = vmatprep.mubr.bf16.mxu1 %v7445_v61  ;;  %v7444_v55 = vpack.c.bf16 %v7428_v41, %v7428_v41  ;;  %v7449_v61 = vpack.c.bf16 %v7433_v26, %v7433_v26 }
0x211a   :  { %13712 = vmatpush3.bf16.msra.mxu0 %v14914_v44  ;;  %8713 = vmatprep.mubr.bf16.mxu0 %v7447_v5  ;;  %v14947_v44 = vld [vmem:[%s18609_s2 + $0xb48] sm:$0xff]  }
0x211b   :  { %13691 = vmatprep.subr.bf16.mxu1 %v14915_v63  ;;  %13713 = vmatprep.subr.bf16.mxu0 %v14916_v17  ;;  %v14948_v63 = vld [vmem:[%s18609_s2 + $0xbc8] sm:$0xff]   ;;  %v7451_v17 = vpack.c.bf16 %v7435_v53, %v7435_v53 }
0x211c   :  { %v14949_v5 = vld [vmem:[%s18609_s2 + $0xb08] sm:$0xff]  }
0x211d   :  { %13692 = vmatpush3.bf16.msra.mxu1 %v14917_v6  ;;  %v14950_v6 = vld [vmem:[%s18609_s2 + $0xb88] sm:$0xff]  }
0x211e   :  { %13714 = vmatpush3.bf16.msra.mxu0 %v14918_v36  ;;  %13693 = vmatprep.subr.bf16.mxu1 %v14919_v22  ;;  %v14951_v36 = vld [vmem:[%s18609_s2 + $0xb50] sm:$0xff]  }
0x211f   :  { %13715 = vmatprep.subr.bf16.mxu0 %v14920_v10  ;;  %v14952_v22 = vld [vmem:[%s18609_s2 + $0xbd0] sm:$0xff]  }
0x2120   :  { %v14953_v10 = vld [vmem:[%s18609_s2 + $0xb10] sm:$0xff]  }
0x2121   :  { %13694 = vmatpush3.bf16.msra.mxu1 %v14921_v13  ;;  %v14954_v13 = vld [vmem:[%s18609_s2 + $0xb90] sm:$0xff]  }
0x2122   :  { %13716 = vmatpush3.bf16.msra.mxu0 %v14922_v18  ;;  %13695 = vmatprep.subr.bf16.mxu1 %v14923_v4  ;;  %v14955_v18 = vld [vmem:[%s18609_s2 + $0xb58] sm:$0xff]  }
0x2123   :  { %13717 = vmatprep.subr.bf16.mxu0 %v14924_v19  ;;  %v14956_v4 = vld [vmem:[%s18609_s2 + $0xbd8] sm:$0xff]  }
0x2124   :  { %v14957_v19 = vld [vmem:[%s18609_s2 + $0xb18] sm:$0xff]  }
0x2125   :  { %13696 = vmatpush3.bf16.msra.mxu1 %v14925_v21  ;;  %v14958_v21 = vld [vmem:[%s18609_s2 + $0xb98] sm:$0xff]  }
0x2126   :  { %13718 = vmatpush3.bf16.msra.mxu0 %v14926_v27  ;;  %13697 = vmatprep.subr.bf16.mxu1 %v14927_v51  ;;  %v14959_v27 = vld [vmem:[%s18609_s2 + $0xb60] sm:$0xff]  }
0x2127   :  { %13719 = vmatprep.subr.bf16.mxu0 %v14928_v28  ;;  %v14960_v51 = vld [vmem:[%s18609_s2 + $0xbe0] sm:$0xff]  }
0x2128   :  { %v14961_v28 = vld [vmem:[%s18609_s2 + $0xb20] sm:$0xff]  }
0x2129   :  { %13698 = vmatpush3.bf16.msra.mxu1 %v14929_v1  ;;  %v14962_v1 = vld [vmem:[%s18609_s2 + $0xba0] sm:$0xff]  }
0x212a   :  { %13720 = vmatpush3.bf16.msra.mxu0 %v14930_v48  ;;  %13699 = vmatprep.subr.bf16.mxu1 %v14931_v30  ;;  %v14963_v48 = vld [vmem:[%s18609_s2 + $0xb68] sm:$0xff]  }
0x212b   :  { %13721 = vmatprep.subr.bf16.mxu0 %v14932_v12  ;;  %v14964_v30 = vld [vmem:[%s18609_s2 + $0xbe8] sm:$0xff]  }
0x212c   :  { %v14965_v12 = vld [vmem:[%s18609_s2 + $0xb28] sm:$0xff]  }
0x212d   :  { %13700 = vmatpush3.bf16.msra.mxu1 %v14933_v62  ;;  %v6900_v62 = vrot.slane %v17425_v8, %v15836_v9  ;;  %v14969_v8 = vld [vmem:[%s18609_s2 + $0xb30] sm:$0xff]  }
0x212e   :  { %13722 = vmatpush3.bf16.msra.mxu0 %v14934_v23  ;;  %13701 = vmatprep.subr.bf16.mxu1 %v14935_v14  ;;  %v14967_v23 = vld [vmem:[%s18609_s2 + $0xb70] sm:$0xff]  }
0x212f   :  { %13723 = vmatprep.subr.bf16.mxu0 %v14936_v54  ;;  %v14968_v14 = vld [vmem:[%s18609_s2 + $0xbf0] sm:$0xff]   ;;  %v7373_v37 = vadd.f32 %v17441_v20, %v6900_v62  ;;  %v14973_v20 = vld [vmem:[%s18609_s2 + $0xb38] sm:$0xff]  }
0x2130   :  { %v14970_v54 = vld [vmem:[%s18609_s2 + $0xbb0] sm:$0xff]  }
0x2131   :  { %13702 = vmatpush3.bf16.msra.mxu1 %v14937_v56  ;;  %v7432_v56 = vmax.f32 %v7373_v37, 0.0 }
0x2132   :  { %13724 = vmatpush3.bf16.msra.mxu0 %v14938_v40  ;;  %13703 = vmatprep.subr.bf16.mxu1 %v14939_v15  ;;  %v7434_v40 = vmax.f32 %v17443_v24, 0.0  ;;  %v12808_v24 = vld [vmem:[%s18610_s3 + $0x13] ss:$0 sm:$0xff] }
0x2133   :  { %13725 = vmatprep.subr.bf16.mxu0 %v14940_v32  ;;  %v7448_v15 = vpack.c.bf16 %v7432_v56, %v7432_v56 }
0x2134   :  { %v7450_v16 = vpack.c.bf16 %v7434_v40, %v7434_v40 }
0x2135   :  { %13704 = vmatpush3.bf16.msra.mxu1 %v14941_v29 }
0x2136   :  { %13726 = vmatpush3.bf16.msra.mxu0 %v14942_v60  ;;  %13733 = vmatprep.subr.bf16.mxu1 %v14943_v11 }
0x2137   :  { %13755 = vmatprep.subr.bf16.mxu0 %v14944_v25 }
0x2138   :  { %8674 = vmatmul.mubr.bf16.vlgmr.msra.gmra.mrb[168].mxu1 %v7444_v55 }
0x2139   :  { %8714 = vmatmul.mubr.bf16.vlgmr.msra.gmra.mrb[172].mxu0 %v7446_v52  ;;  %13734 = vmatpush3.bf16.msra.mxu1 %v14945_v33 }
0x213a   :  { %8753 = vmatprep.mubr.bf16.mxu1 %v7449_v61  ;;  %13756 = vmatpush3.bf16.msra.mxu0 %v14946_v35 }
0x213b   :  { %8793 = vmatprep.mubr.bf16.mxu0 %v7451_v17  ;;  %13735 = vmatprep.subr.bf16.mxu1 %v14947_v44 }
0x213c   :  { %13757 = vmatprep.subr.bf16.mxu0 %v14948_v63 }
0x213d   :  { %13736 = vmatpush3.bf16.msra.mxu1 %v14949_v5 }
0x213e   :  { %13758 = vmatpush3.bf16.msra.mxu0 %v14950_v6  ;;  %13737 = vmatprep.subr.bf16.mxu1 %v14951_v36 }
0x213f   :  { %13759 = vmatprep.subr.bf16.mxu0 %v14952_v22 }
0x2141   :  { %13738 = vmatpush3.bf16.msra.mxu1 %v14953_v10 }
0x2142   :  { %13760 = vmatpush3.bf16.msra.mxu0 %v14954_v13  ;;  %13739 = vmatprep.subr.bf16.mxu1 %v14955_v18 }
0x2143   :  { %13761 = vmatprep.subr.bf16.mxu0 %v14956_v4 }
0x2145   :  { %13740 = vmatpush3.bf16.msra.mxu1 %v14957_v19 }
0x2146   :  { %13762 = vmatpush3.bf16.msra.mxu0 %v14958_v21  ;;  %13741 = vmatprep.subr.bf16.mxu1 %v14959_v27 }
0x2147   :  { %13763 = vmatprep.subr.bf16.mxu0 %v14960_v51 }
0x2149   :  { %13742 = vmatpush3.bf16.msra.mxu1 %v14961_v28 }
0x214a   :  { %13764 = vmatpush3.bf16.msra.mxu0 %v14962_v1  ;;  %13743 = vmatprep.subr.bf16.mxu1 %v14963_v48 }
0x214b   :  { %13765 = vmatprep.subr.bf16.mxu0 %v14964_v30 }
0x214d   :  { %13744 = vmatpush3.bf16.msra.mxu1 %v14965_v12 }
0x214e   :  { %13766 = vmatpush3.bf16.msra.mxu0 %v14966_v34  ;;  %13745 = vmatprep.subr.bf16.mxu1 %v14967_v23 }
0x214f   :  { %13767 = vmatprep.subr.bf16.mxu0 %v14968_v14 }
0x2151   :  { %13746 = vmatpush3.bf16.msra.mxu1 %v14969_v8 }
0x2152   :  { %13768 = vmatpush3.bf16.msra.mxu0 %v14970_v54  ;;  %13747 = vmatprep.subr.bf16.mxu1 %v14971_v39 }
0x2153   :  { %13769 = vmatprep.subr.bf16.mxu0 %v14972_v46 }
0x2155   :  { %13748 = vmatpush3.bf16.msra.mxu1 %v14973_v20 }
0x2156   :  { %13770 = vmatpush3.bf16.msra.mxu0 %v14974_v7  ;;  %14267 = vmatprep.subr.bf16.mxu1 %v15313_v0 }
0x2157   :  { %14275 = vmatprep.subr.bf16.mxu0 %v15313_v0 }
0x2158   :  { %8754 = vmatmul.mubr.bf16.vlgmr.msra.gmra.mrb[172].mxu1 %v7448_v15 }
0x2159   :  { %8794 = vmatmul.mubr.bf16.vlgmr.msra.gmra.mrb[176].mxu0 %v7450_v16  ;;  %14271 = vmatprep.mubr.msk.bf16.mxu1 %vm15314_vm0, %v15313_v0 }
0x215a   :  { %14277 = vmatprep.mubr.msk.bf16.mxu0 %vm15314_vm0, %v15313_v0 }
0x21cb   :  { %v13617_v32 = vpop.f32.mrb[160].mxu1  ;;  %v13639_v31 = vpop.f32.mrb[164].mxu0 }
0x21cc   :  { %v13618_v58 = vpop.f32.mrb[161].mxu1  ;;  %v13640_v29 = vpop.f32.mrb[165].mxu0 }
0x21cd   :  { %v13619_v41 = vadd.f32 %v13618_v58, %v13617_v32  ;;  %v13641_v60 = vadd.f32 %v13640_v29, %v13639_v31  ;;  %v13620_v11 = vpop.f32.mrb[162].mxu1  ;;  %v13642_v42 = vpop.f32.mrb[166].mxu0  ;;  %v14975_v29 = vld [vmem:[%s18608_s1 + $0xe4] ss:$316 sps:$4 sm:$0xff]  }
0x21ce   :  { %v13621_v25 = vpop.f32.mrb[163].mxu1  ;;  %v13643_v26 = vpop.f32.mrb[167].mxu0  ;;  %14268 = vmatpush3.bf16.msra.mxu1 %v14975_v29 }
0x21cf   :  { %v8516_v53 = vadd.f32 %v13619_v41, %v12808_v24  ;;  %v14976_v41 = vld [vmem:[%s18608_s1 + $0x35c] ss:$316 sps:$4 sm:$0xff]   ;;  %14269 = vmatprep.subr.bf16.mxu1 %v15313_v0 }
0x21d0   :  { %v12937_v25 = vld [vmem:[%s18610_s3 + $0x18] ss:$0 sm:$0xff] }
0x21d1   :  { %v8556_v33 = vadd.f32 %v13641_v60, %v8516_v53  ;;  %v12938_v53 = vld [vmem:[%s18610_s3 + $0x19] ss:$0 sm:$0xff] }
0x21d2   :  { %14270 = vmatpush3.bf16.msra.mxu1 %v14976_v41 }
0x21d3   :  { %14281 = vmatprep.subr.bf16.mxu1 %v15313_v0 }
0x21eb   :  { %v13661_v55 = vpop.f32.mrb[164].mxu1  ;;  %v13683_v35 = vpop.f32.mrb[168].mxu0 }
0x21ec   :  { %v13662_v52 = vpop.f32.mrb[165].mxu1  ;;  %v13684_v44 = vpop.f32.mrb[169].mxu0 }
0x21ed   :  { %v13663_v61 = vadd.f32 %v13662_v52, %v13661_v55  ;;  %v13685_v63 = vadd.f32 %v13684_v44, %v13683_v35  ;;  %v13664_v17 = vpop.f32.mrb[166].mxu1  ;;  %v13686_v5 = vpop.f32.mrb[170].mxu0  ;;  %v12939_v52 = vld [vmem:[%s18610_s3 + $0x1a] ss:$0 sm:$0xff] }
0x21ee   :  { %v13665_v6 = vpop.f32.mrb[167].mxu1  ;;  %v13687_v36 = vpop.f32.mrb[171].mxu0 }
0x21ef   :  { %v8596_v22 = vadd.f32 %v13663_v61, %v8556_v33 }
0x21f1   :  { %v8636_v10 = vadd.f32 %v13685_v63, %v8596_v22 }
0x220b   :  { %v13705_v13 = vpop.f32.mrb[168].mxu1 }
0x220c   :  { %v13727_v18 = vpop.f32.mrb[172].mxu0  ;;  %v13706_v4 = vpop.f32.mrb[169].mxu1 }
0x220d   :  { %v13707_v19 = vadd.f32 %v13706_v4, %v13705_v13  ;;  %v13728_v21 = vpop.f32.mrb[173].mxu0  ;;  %v13708_v27 = vpop.f32.mrb[170].mxu1 }
0x220e   :  { %v13729_v51 = vadd.f32 %v13728_v21, %v13727_v18  ;;  %v13730_v28 = vpop.f32.mrb[174].mxu0  ;;  %v13709_v1 = vpop.f32.mrb[171].mxu1 }
0x220f   :  { %v8676_v48 = vadd.f32 %v13707_v19, %v8636_v10  ;;  %v13731_v30 = vpop.f32.mrb[175].mxu0 }
0x2211   :  { %v8716_v12 = vadd.f32 %v13729_v51, %v8676_v48 }
0x222b   :  { %v13749_v62 = vpop.f32.mrb[172].mxu1 }
0x222c   :  { %v13771_v34 = vpop.f32.mrb[176].mxu0  ;;  %v13750_v23 = vpop.f32.mrb[173].mxu1 }
0x222d   :  { %v13751_v14 = vadd.f32 %v13750_v23, %v13749_v62  ;;  %v13772_v8 = vpop.f32.mrb[177].mxu0  ;;  %v13752_v37 = vpop.f32.mrb[174].mxu1 }
0x222e   :  { %v13773_v54 = vadd.f32 %v13772_v8, %v13771_v34  ;;  %v13774_v39 = vpop.f32.mrb[178].mxu0  ;;  %v13753_v46 = vpop.f32.mrb[175].mxu1 }
0x222f   :  { %v8756_v20 = vadd.f32 %v13751_v14, %v8716_v12  ;;  %v13775_v56 = vpop.f32.mrb[179].mxu0 }
0x2231   :  { %v8796_v7 = vadd.f32 %v13773_v54, %v8756_v20 }
0x2233   :  { %v8801_v40 = vadd.f32 %v8796_v7, %v17153_v43 }
0x2235   :  { %v8802_v15 = vsel %vm45_vm1, %v8801_v40, 0.0 }
0x2236   :  { %8803 = vadd.xlane.f32.xlu0 %v8802_v15 }
0x22c3   :  { %v8804_v16 = vpop.xlane.xlu0 %8803 }
0x22c4   :  { %v8805_v32 = vmul.f32 0.03125, %v8804_v16 }
0x22c6   :  { %v8806_v31 = vsub.f32 %v8801_v40, %v8805_v32 }
0x22c8   :  { %v8807_v24 = vmul.f32 %v8806_v31, %v8806_v31 }
0x22ca   :  { %v8808_v58 = vsel %vm45_vm1, %v8807_v24, 0.0 }
0x22cb   :  { %8809 = vadd.xlane.f32.xlu1 %v8808_v58 }
0x2358   :  { %v8810_v43 = vpop.xlane.xlu1 %8809 }
0x2359   :  { %v8811_v60 = vmul.f32 0.03125, %v8810_v43 }
0x235b   :  { %v8812_v11 = vadd.f32 1e-05, %v8811_v60 }
0x235d   :  { %15241 = vrsqrt.f32 %v8812_v11 }
0x2367   :  { %v15242_v42 = vpop.eup %15241 }
0x2368   :  { %v8814_v26 = vmul.f32 %v15242_v42, %v8806_v31 }
0x236a   :  { %v8820_v33 = vmul.f32 %v12937_v25, %v8814_v26 }
0x236c   :  { %v17723_v55 = vadd.f32 %v12938_v53, %v8820_v33 }
0x236e   :  { %v8831_v35 = vpack.c.bf16 %v17723_v55, %v17723_v55 }
0x2370   :  { %14272 = vmatmul.mubr.msk.bf16.vlgmr.msra.gmra.mrb[176].mxu1 %vm45_vm1, %v8831_v35 }
0x2371   :  { %14283 = vmatprep.mubr.msk.bf16.mxu1 %vm15314_vm0, %v15313_v0 }
0x2443   :  { %v8886_v44 = vpop.f32.mrb[176].mxu1 }
0x2444   :  { %v17733_v61 = vadd.f32 %v12939_v52, %v8886_v44  ;;  %v14273_v63 = vpop.f32.mrb[177].mxu1 }
0x2445   :  { %v8889_v17 = vpop.f32.mrb[178].mxu1 }
0x2446   :  { %8892 = vst.msk [vmem:[#allocation2] sm:$0xff] %vm89_vm2, %v17733_v61  ;;  %8906 = vrot.lane.b32.xlu1 %v17733_v61, %s15318_s29  ;;  %8894 = vrot.lane.b32.xlu0 %v17733_v61, %s15316_s27  ;;  %v14274_v5 = vpop.f32.mrb[179].mxu1 }
0x244a   :  { %8902 = vrot.lane.b32.xlu1 %v17733_v61, %s15315_s26  ;;  %8918 = vrot.lane.b32.xlu0 %v17733_v61, %s15317_s28 }
0x244d   :  { %v8938_v51 = vld [vmem:[#allocation2] sm:$0xff] }
0x244e   :  { %8930 = vrot.lane.b32.xlu1 %v17733_v61, %s15320_s6  ;;  %8914 = vrot.lane.b32.xlu0 %v17733_v61, %s15319_s30  ;;  %v8942_v62 = vmul.f32 0.35355338, %v8938_v51 }
0x2450   :  { %v8954_v8 = vpack.c.bf16 %v8942_v62, %v8942_v62 }
0x2452   :  { %8926 = vrot.lane.b32.xlu1 %v17733_v61, %s15321_s7 }
0x24b8   :  { %v8907_v6 = vpop.permute.xlu1 %8906  ;;  %v8895_v36 = vpop.permute.xlu0 %8894 }
0x24b9   :  { %8909 = vst.msk [vmem:[#allocation2 + $0x28] sm:$0xff] %vm89_vm2, %v8907_v6  ;;  %8897 = vst.msk [vmem:[#allocation2 + $0x20] sm:$0xff] %vm89_vm2, %v8895_v36 }
0x24bc   :  { %v8903_v22 = vpop.permute.xlu1 %8902  ;;  %v8919_v10 = vpop.permute.xlu0 %8918 }
0x24bd   :  { %8905 = vst.msk [vmem:[#allocation2 + $0x8] sm:$0xff] %vm89_vm2, %v8903_v22  ;;  %8921 = vst.msk [vmem:[#allocation2 + $0x30] sm:$0xff] %vm89_vm2, %v8919_v10 }
0x24c0   :  { %v8931_v13 = vpop.permute.xlu1 %8930  ;;  %v8915_v18 = vpop.permute.xlu0 %8914  ;;  %v8947_v4 = vld [vmem:[#allocation2 + $0x28] sm:$0xff]  ;;  %v8946_v19 = vld [vmem:[#allocation2 + $0x20] sm:$0xff] }
0x24c1   :  { %8933 = vst.msk [vmem:[#allocation2 + $0x38] sm:$0xff] %vm89_vm2, %v8931_v13  ;;  %8917 = vst.msk [vmem:[#allocation2 + $0x10] sm:$0xff] %vm89_vm2, %v8915_v18  ;;  %v8959_v21 = vpack.c.bf16 %v8947_v4, %v8947_v4  ;;  %v8958_v27 = vpack.c.bf16 %v8946_v19, %v8946_v19 }
0x24c3   :  { %v9012_v28 = vsel %vm89_vm2, %v8959_v21, 0  ;;  %v8966_v1 = vsel %vm89_vm2, %v8958_v27, 0 }
0x24c4   :  { %14282 = vmatpush3.bf16.xpose.msra.mxu1 %v9012_v28  ;;  %v8927_v48 = vpop.permute.xlu1 %8926  ;;  %14276 = vmatpush3.bf16.xpose.msra.mxu0 %v8966_v1  ;;  %v8939_v30 = vld [vmem:[#allocation2 + $0x8] sm:$0xff]  ;;  %v8948_v12 = vld [vmem:[#allocation2 + $0x30] sm:$0xff] }
0x24c5   :  { %8929 = vst.msk [vmem:[#allocation2 + $0x18] sm:$0xff] %vm89_vm2, %v8927_v48  ;;  %v8943_v34 = vmul.f32 0.35355338, %v8939_v30  ;;  %14287 = vmatprep.subr.bf16.mxu0 %v15313_v0  ;;  %14293 = vmatprep.subr.bf16.mxu1 %v15313_v0  ;;  %v8960_v23 = vpack.c.bf16 %v8948_v12, %v8948_v12 }
0x24c7   :  { %v8955_v37 = vpack.c.bf16 %v8943_v34, %v8943_v34  ;;  %v9058_v46 = vsel %vm89_vm2, %v8960_v23, 0 }
0x24c8   :  { %v8949_v14 = vld [vmem:[#allocation2 + $0x38] sm:$0xff]  ;;  %v8940_v39 = vld [vmem:[#allocation2 + $0x10] sm:$0xff] }
0x24c9   :  { %v8961_v54 = vpack.c.bf16 %v8949_v14, %v8949_v14  ;;  %v8944_v7 = vmul.f32 0.35355338, %v8940_v39 }
0x24cb   :  { %14278 = vmatmul.mubr.msk.bf16.vlgmr.msra.gmra.mrb[180].mxu0 %vm89_vm2, %v8954_v8  ;;  %14284 = vmatmul.mubr.msk.bf16.vlgmr.msra.gmra.mrb[180].mxu1 %vm89_vm2, %v8955_v37  ;;  %v9104_v20 = vsel %vm89_vm2, %v8961_v54, 0  ;;  %v8956_v15 = vpack.c.bf16 %v8944_v7, %v8944_v7 }
0x24cc   :  { %14288 = vmatpush3.bf16.xpose.msra.mxu0 %v9058_v46  ;;  %14294 = vmatpush3.bf16.xpose.msra.mxu1 %v9104_v20  ;;  %v8941_v56 = vld [vmem:[#allocation2 + $0x18] sm:$0xff] }
0x24cd   :  { %14289 = vmatprep.mubr.msk.bf16.mxu0 %vm15314_vm0, %v15313_v0  ;;  %14295 = vmatprep.mubr.msk.bf16.mxu1 %vm15314_vm0, %v15313_v0  ;;  %v8945_v40 = vmul.f32 0.35355338, %v8941_v56 }
0x24ce   :  { %14299 = vmatprep.subr.bf16.mxu0 %v15313_v0  ;;  %14305 = vmatprep.subr.bf16.mxu1 %v15313_v0 }
0x24cf   :  { %v8957_v16 = vpack.c.bf16 %v8945_v40, %v8945_v40 }
0x24d3   :  { %14290 = vmatmul.mubr.msk.bf16.vlgmr.msra.gmra.mrb[184].mxu0 %vm89_vm2, %v8956_v15  ;;  %14296 = vmatmul.mubr.msk.bf16.vlgmr.msra.gmra.mrb[184].mxu1 %vm89_vm2, %v8957_v16 }
0x24d4   :  { %14301 = vmatprep.mubr.msk.bf16.mxu0 %vm15314_vm0, %v15313_v0  ;;  %14307 = vmatprep.mubr.msk.bf16.mxu1 %vm15314_vm0, %v15313_v0 }
0x259e   :  { %v9002_v32 = vpop.f32.mrb[180].mxu0  ;;  %v9048_v31 = vpop.f32.mrb[180].mxu1 }
0x259f   :  { %v14279_v24 = vpop.f32.mrb[181].mxu0  ;;  %v14285_v58 = vpop.f32.mrb[181].mxu1  ;;  %v9146_v29 = vsel %vm89_vm2, %v9002_v32, -inf  ;;  %v9149_v41 = vsel %vm89_vm2, %v9048_v31, -inf }
0x25a0   :  { %9147 = vmax.xlane.f32.xlu0 %v9146_v29  ;;  %v9005_v43 = vpop.f32.mrb[182].mxu0  ;;  %9150 = vmax.xlane.f32.xlu1 %v9149_v41  ;;  %v9051_v60 = vpop.f32.mrb[182].mxu1 }
0x25a1   :  { %v14280_v11 = vpop.f32.mrb[183].mxu0  ;;  %v14286_v42 = vpop.f32.mrb[183].mxu1 }
0x25a6   :  { %v9094_v25 = vpop.f32.mrb[184].mxu0  ;;  %v9140_v26 = vpop.f32.mrb[184].mxu1 }
0x25a7   :  { %v14291_v53 = vpop.f32.mrb[185].mxu0  ;;  %v14297_v33 = vpop.f32.mrb[185].mxu1  ;;  %v9152_v35 = vsel %vm89_vm2, %v9094_v25, -inf  ;;  %v9155_v5 = vsel %vm89_vm2, %v9140_v26, -inf }
0x25a8   :  { %9153 = vmax.xlane.f32.xlu0 %v9152_v35  ;;  %v9097_v52 = vpop.f32.mrb[186].mxu0  ;;  %v9143_v44 = vpop.f32.mrb[186].mxu1 }
0x25a9   :  { %v14292_v63 = vpop.f32.mrb[187].mxu0  ;;  %v14298_v17 = vpop.f32.mrb[187].mxu1 }
0x25ac   :  { %9156 = vmax.xlane.f32.xlu0 %v9155_v5 }
0x25b1   :  { %8898 = vrot.lane.b32.xlu1 %v17733_v61, %s15323_s9 }
0x262d   :  { %v9148_v6 = vpop.xlane.xlu0 %9147  ;;  %v9151_v36 = vpop.xlane.xlu1 %9150 }
0x262e   :  { %v9158_v22 = vsub.f32 %v9002_v32, %v9148_v6  ;;  %v9159_v10 = vsub.f32 %v9048_v31, %v9151_v36 }
0x2630   :  { %v9162_v13 = vmul.f32 1.442695, %v9158_v22  ;;  %v9164_v18 = vmul.f32 1.442695, %v9159_v10 }
0x2631   :  { %v8899_v4 = vpop.permute.xlu1 %8898 }
0x2632   :  { %15243 = vpow2.f32 %v9162_v13  ;;  %8901 = vst.msk [vmem:[#allocation2 + $0x40] sm:$0xff] %vm89_vm2, %v8899_v4 }
0x2633   :  { %15245 = vpow2.f32 %v9164_v18  ;;  %v14977_v18 = vld [vmem:[%s18608_s1 + $0xe8] ss:$316 sps:$4 sm:$0xff]  }
0x2635   :  { %v9154_v19 = vpop.xlane.xlu0 %9153 }
0x2636   :  { %v9160_v21 = vsub.f32 %v9094_v25, %v9154_v19 }
0x2638   :  { %v9166_v27 = vmul.f32 1.442695, %v9160_v21  ;;  %v14978_v21 = vld [vmem:[%s18608_s1 + $0x360] ss:$316 sps:$4 sm:$0xff]  }
0x2639   :  { %v9157_v51 = vpop.xlane.xlu0 %9156  ;;  %v8950_v28 = vld [vmem:[#allocation2 + $0x40] sm:$0xff] }
0x263a   :  { %15247 = vpow2.f32 %v9166_v27  ;;  %v9161_v1 = vsub.f32 %v9140_v26, %v9157_v51  ;;  %v9194_v48 = vpack.c.bf16 %v8950_v28, %v8950_v28 }
0x263c   :  { %v15244_v30 = vpop.eup %15243  ;;  %v9168_v12 = vmul.f32 1.442695, %v9161_v1  ;;  %v9202_v62 = vsel %vm410_vm3, %v9194_v48, 0 }
0x263d   :  { %v15246_v34 = vpop.eup %15245  ;;  %14300 = vmatpush3.bf16.msra.mxu0 %v9202_v62  ;;  %v9170_v23 = vsel %vm89_vm2, %v15244_v30, 0.0 }
0x263e   :  { %15249 = vpow2.f32 %v9168_v12  ;;  %9171 = vadd.xlane.f32.xlu1 %v9170_v23  ;;  %v9173_v14 = vsel %vm89_vm2, %v15246_v34, 0.0  ;;  %14311 = vmatprep.subr.bf16.mxu0 %v15313_v0 }
0x263f   :  { %9174 = vadd.xlane.f32.xlu0 %v9173_v14 }
0x2644   :  { %v15248_v8 = vpop.eup %15247 }
0x2645   :  { %v9176_v37 = vsel %vm89_vm2, %v15248_v8, 0.0 }
0x2646   :  { %9177 = vadd.xlane.f32.xlu1 %v9176_v37 }
0x2648   :  { %v15250_v54 = vpop.eup %15249 }
0x2649   :  { %v9179_v39 = vsel %vm89_vm2, %v15250_v54, 0.0 }
0x264a   :  { %9180 = vadd.xlane.f32.xlu0 %v9179_v39 }
0x2657   :  { %8922 = vrot.lane.b32.xlu1 %v17733_v61, %s15324_s10 }
0x265b   :  { %8934 = vrot.lane.b32.xlu1 %v17733_v61, %s15325_s11 }
0x2660   :  { %8910 = vrot.lane.b32.xlu0 %v17733_v61, %s15322_s8 }
0x26cb   :  { %v9172_v46 = vpop.xlane.xlu1 %9171 }
0x26cc   :  { %15251 = vrcp.f32 %v9172_v46  ;;  %v9175_v20 = vpop.xlane.xlu0 %9174  ;;  %v14980_v46 = vld [vmem:[%s18608_s1 + $0x368] ss:$316 sps:$4 sm:$0xff]  }
0x26d3   :  { %v9178_v56 = vpop.xlane.xlu1 %9177 }
0x26d4   :  { %15253 = vrcp.f32 %v9178_v56 }
0x26d5   :  { %15255 = vrcp.f32 %v9175_v20  ;;  %v12951_v20 = vld [vmem:[%s18610_s3 + $0x1b] ss:$0 sm:$0xff] }
0x26d6   :  { %v15252_v7 = vpop.eup %15251 }
0x26d7   :  { %v9186_v40 = vmul.f32 %v15252_v7, %v15244_v30  ;;  %v8923_v15 = vpop.permute.xlu1 %8922  ;;  %v9181_v16 = vpop.xlane.xlu0 %9180 }
0x26d8   :  { %8925 = vst.msk [vmem:[#allocation2 + $0x50] sm:$0xff] %vm89_vm2, %v8923_v15  ;;  %15257 = vrcp.f32 %v9181_v16 }
0x26d9   :  { %v9190_v32 = vpack.c.bf16 %v9186_v40, %v9186_v40 }
0x26db   :  { %14302 = vmatmul.mubr.msk.bf16.vlgmr.msra.gmra.mrb[188].mxu0 %vm89_vm2, %v9190_v32  ;;  %v8935_v31 = vpop.permute.xlu1 %8934  ;;  %v8911_v24 = vpop.permute.xlu0 %8910 }
0x26dc   :  { %8937 = vst.msk [vmem:[#allocation2 + $0x58] sm:$0xff] %vm89_vm2, %v8935_v31  ;;  %8913 = vst.msk [vmem:[#allocation2 + $0x48] sm:$0xff] %vm89_vm2, %v8911_v24  ;;  %14313 = vmatprep.mubr.msk.bf16.mxu0 %vm15314_vm0, %v15313_v0 }
0x26de   :  { %v15254_v61 = vpop.eup %15253 }
0x26df   :  { %v8952_v58 = vld [vmem:[#allocation2 + $0x50] sm:$0xff]  ;;  %v9188_v29 = vmul.f32 %v15254_v61, %v15248_v8  ;;  %v15256_v43 = vpop.eup %15255 }
0x26e0   :  { %v9196_v41 = vpack.c.bf16 %v8952_v58, %v8952_v58  ;;  %v9187_v25 = vmul.f32 %v15256_v43, %v15246_v34 }
0x26e1   :  { %v9192_v26 = vpack.c.bf16 %v9188_v29, %v9188_v29 }
0x26e2   :  { %v9294_v60 = vsel %vm410_vm3, %v9196_v41, 0  ;;  %v9191_v52 = vpack.c.bf16 %v9187_v25, %v9187_v25  ;;  %v15258_v44 = vpop.eup %15257  ;;  %v14981_v25 = vld [vmem:[%s18608_s1 + $0xec] ss:$316 sps:$4 sm:$0xff]  }
0x26e3   :  { %14312 = vmatpush3.bf16.msra.mxu0 %v9294_v60  ;;  %v8951_v11 = vld [vmem:[#allocation2 + $0x48] sm:$0xff]  ;;  %v8953_v42 = vld [vmem:[#allocation2 + $0x58] sm:$0xff]  ;;  %v9189_v17 = vmul.f32 %v15258_v44, %v15250_v54 }
0x26e4   :  { %v9195_v53 = vpack.c.bf16 %v8951_v11, %v8951_v11  ;;  %14323 = vmatprep.subr.bf16.mxu0 %v15313_v0  ;;  %v9197_v35 = vpack.c.bf16 %v8953_v42, %v8953_v42  ;;  %v14979_v54 = vld [vmem:[%s18608_s1 + $0xf0] ss:$316 sps:$4 sm:$0xff]  }
0x26e5   :  { %v9193_v5 = vpack.c.bf16 %v9189_v17, %v9189_v17 }
0x26e6   :  { %14314 = vmatmul.mubr.msk.bf16.vlgmr.msra.gmra.mrb[192].mxu0 %vm89_vm2, %v9192_v26  ;;  %v9248_v33 = vsel %vm410_vm3, %v9195_v53, 0  ;;  %v9340_v63 = vsel %vm410_vm3, %v9197_v35, 0  ;;  %v14982_v26 = vld [vmem:[%s18608_s1 + $0x364] ss:$316 sps:$4 sm:$0xff]  }
0x26e7   :  { %14306 = vmatpush3.bf16.msra.mxu1 %v9248_v33  ;;  %14327 = vmatprep.mubr.msk.bf16.mxu0 %vm15314_vm0, %v15313_v0 }
0x26e8   :  { %14317 = vmatprep.subr.bf16.mxu1 %v15313_v0  ;;  %14324 = vmatpush3.bf16.msra.mxu0 %v14977_v18 }
0x26e9   :  { %14325 = vmatprep.subr.bf16.mxu0 %v15313_v0 }
0x26ea   :  { %14308 = vmatmul.mubr.msk.bf16.vlgmr.msra.gmra.mrb[188].mxu1 %vm89_vm2, %v9191_v52 }
0x26eb   :  { %14318 = vmatpush3.bf16.msra.mxu1 %v9340_v63  ;;  %14319 = vmatprep.mubr.msk.bf16.mxu1 %vm15314_vm0, %v15313_v0 }
0x26ec   :  { %14331 = vmatprep.subr.bf16.mxu1 %v15313_v0  ;;  %14326 = vmatpush3.bf16.msra.mxu0 %v14978_v21 }
0x26ed   :  { %14339 = vmatprep.subr.bf16.mxu0 %v15313_v0 }
0x26f2   :  { %14320 = vmatmul.mubr.msk.bf16.vlgmr.msra.gmra.mrb[192].mxu1 %vm89_vm2, %v9193_v5 }
0x26f3   :  { %14335 = vmatprep.mubr.msk.bf16.mxu1 %vm15314_vm0, %v15313_v0  ;;  %14332 = vmatpush3.bf16.msra.mxu1 %v14981_v25 }
0x26f4   :  { %14333 = vmatprep.subr.bf16.mxu1 %v15313_v0 }
0x26f7   :  { %14334 = vmatpush3.bf16.msra.mxu1 %v14982_v26 }
0x26f8   :  { %14347 = vmatprep.subr.bf16.mxu1 %v15313_v0 }
0x27ae   :  { %v9238_v6 = vpop.f32.mrb[188].mxu0 }
0x27af   :  { %9382 = vst.msk [vmem:[#allocation3] sm:$0xff] %vm89_vm2, %v9238_v6  ;;  %v14303_v36 = vpop.f32.mrb[189].mxu0  ;;  %v12955_v6 = vld [vmem:[%s18610_s3 + $0x20] ss:$0 sm:$0xff] }
0x27b0   :  { %v9241_v22 = vpop.f32.mrb[190].mxu0 }
0x27b1   :  { %v14304_v10 = vpop.f32.mrb[191].mxu0 }
0x27b2   :  { %v12956_v10 = vld [vmem:[%s18610_s3 + $0x21] ss:$0 sm:$0xff] }
0x27b9   :  { %v9330_v13 = vpop.f32.mrb[192].mxu0 }
0x27ba   :  { %9389 = vrot.lane.b32.xlu1 %v9330_v13, %s15328_s18  ;;  %v14315_v4 = vpop.f32.mrb[193].mxu0 }
0x27bb   :  { %v9333_v19 = vpop.f32.mrb[194].mxu0 }
0x27bc   :  { %v14316_v27 = vpop.f32.mrb[195].mxu0 }
0x27bd   :  { %v9284_v51 = vpop.f32.mrb[188].mxu1 }
0x27be   :  { %9384 = vrot.lane.b32.xlu0 %v9284_v51, %s15326_s14  ;;  %v14309_v28 = vpop.f32.mrb[189].mxu1  ;;  %v12957_v51 = vld [vmem:[%s18610_s3 + $0x1c] ss:$0 sm:$0xff] }
0x27bf   :  { %v9287_v1 = vpop.f32.mrb[190].mxu1 }
0x27c0   :  { %v14310_v48 = vpop.f32.mrb[191].mxu1 }
0x27c5   :  { %v9376_v30 = vpop.f32.mrb[192].mxu1 }
0x27c6   :  { %9394 = vrot.lane.b32.xlu0 %v9376_v30, %s15327_s17  ;;  %v14321_v12 = vpop.f32.mrb[193].mxu1 }
0x27c7   :  { %v9379_v62 = vpop.f32.mrb[194].mxu1 }
0x27c8   :  { %v14322_v34 = vpop.f32.mrb[195].mxu1 }
0x282c   :  { %v9390_v14 = vpop.permute.xlu1 %9389 }
0x2830   :  { %v9385_v23 = vpop.permute.xlu0 %9384 }
0x2831   :  { %9387 = vst.msk [vmem:[#allocation3] sm:$0xff] %vm597_vm4, %v9385_v23 }
0x2832   :  { %9392 = vst.msk [vmem:[#allocation3] sm:$0xff] %vm603_vm5, %v9390_v14 }
0x2838   :  { %v9395_v8 = vpop.permute.xlu0 %9394 }
0x2839   :  { %9397 = vst.msk [vmem:[#allocation3] sm:$0xff] %vm609_vm6, %v9395_v8 }
0x2840   :  { %v9398_v37 = vld [vmem:[#allocation3] sm:$0xff] }
0x2841   :  { %v9403_v39 = vpack.c.bf16 %v9398_v37, %v9398_v37 }
0x2843   :  { %14328 = vmatmul.mubr.msk.bf16.vlgmr.msra.gmra.mrb[196].mxu0 %vm45_vm1, %v9403_v39 }
0x2844   :  { %14340 = vmatpush3.bf16.msra.mxu0 %v14979_v54  ;;  %14343 = vmatprep.mubr.msk.bf16.mxu0 %vm15314_vm0, %v15313_v0 }
0x2845   :  { %14341 = vmatprep.subr.bf16.mxu0 %v15313_v0 }
0x2848   :  { %14342 = vmatpush3.bf16.msra.mxu0 %v14980_v46 }
0x2849   :  { %14353 = vmatprep.subr.bf16.mxu0 %v15313_v0 }
0x284b   :  { %14344 = vmatmul.mubr.msk.bf16.vlgmr.msra.gmra.mrb[200].mxu0 %vm45_vm1, %v16998_v57  ;;  %v12961_v57 = vld [vmem:[%s18610_s3 + $0x1d] ss:$0 sm:$0xff] }
0x284c   :  { %14355 = vmatprep.mubr.msk.bf16.mxu0 %vm15314_vm0, %v15313_v0 }
0x2916   :  { %v9458_v56 = vpop.f32.mrb[196].mxu0 }
0x2917   :  { %v9459_v7 = vadd.f32 %v12951_v20, %v9458_v56  ;;  %v14329_v40 = vpop.f32.mrb[197].mxu0 }
0x2918   :  { %v9461_v15 = vpop.f32.mrb[198].mxu0 }
0x2919   :  { %v9464_v16 = vadd.f32 %v9459_v7, %v17723_v55  ;;  %v14330_v32 = vpop.f32.mrb[199].mxu0 }
0x291b   :  { %v9465_v31 = vsel %vm45_vm1, %v9464_v16, 0.0 }
0x291c   :  { %9466 = vadd.xlane.f32.xlu1 %v9465_v31 }
0x291e   :  { %v9610_v24 = vpop.f32.mrb[200].mxu0 }
0x291f   :  { %v17856_v61 = vadd.f32 %v12961_v57, %v9610_v24  ;;  %v14345_v58 = vpop.f32.mrb[201].mxu0 }
0x2920   :  { %v9613_v29 = vpop.f32.mrb[202].mxu0 }
0x2921   :  { %9617 = vst.msk [vmem:[#allocation2 + $0x20] sm:$0xff] %vm89_vm2, %v17856_v61  ;;  %v14346_v41 = vpop.f32.mrb[203].mxu0 }
0x2928   :  { %v9668_v13 = vld [vmem:[#allocation2 + $0x20] sm:$0xff] }
0x2929   :  { %v9680_v19 = vpack.c.bf16 %v9668_v13, %v9668_v13 }
0x292b   :  { %v9688_v27 = vsel %vm89_vm2, %v9680_v19, 0 }
0x29a9   :  { %v9467_v43 = vpop.xlane.xlu1 %9466 }
0x29aa   :  { %v9468_v60 = vmul.f32 0.03125, %v9467_v43 }
0x29ac   :  { %v9469_v55 = vsub.f32 %v9464_v16, %v9468_v60 }
0x29ae   :  { %v9470_v11 = vmul.f32 %v9469_v55, %v9469_v55 }
0x29b0   :  { %v9471_v42 = vsel %vm45_vm1, %v9470_v11, 0.0 }
0x29b1   :  { %9472 = vadd.xlane.f32.xlu0 %v9471_v42 }
0x29c7   :  { %9628 = vrot.lane.b32.xlu0 %v17856_v61, %s15315_s26 }
0x29cb   :  { %9652 = vrot.lane.b32.xlu0 %v17856_v61, %s15321_s7 }
0x2a3e   :  { %v9473_v53 = vpop.xlane.xlu0 %9472 }
0x2a3f   :  { %v9474_v33 = vmul.f32 0.03125, %v9473_v53 }
0x2a41   :  { %v9475_v35 = vadd.f32 1e-05, %v9474_v33 }
0x2a42   :  { %v9629_v52 = vpop.permute.xlu0 %9628 }
0x2a43   :  { %15259 = vrsqrt.f32 %v9475_v35  ;;  %9631 = vst.msk [vmem:[#allocation2 + $0x28] sm:$0xff] %vm89_vm2, %v9629_v52 }
0x2a46   :  { %v9653_v44 = vpop.permute.xlu0 %9652 }
0x2a47   :  { %9655 = vst.msk [vmem:[#allocation2 + $0x38] sm:$0xff] %vm89_vm2, %v9653_v44 }
0x2a4a   :  { %v9669_v63 = vld [vmem:[#allocation2 + $0x28] sm:$0xff] }
0x2a4b   :  { %v9681_v17 = vpack.c.bf16 %v9669_v63, %v9669_v63 }
0x2a4d   :  { %v15260_v5 = vpop.eup %15259  ;;  %v9734_v36 = vsel %vm89_vm2, %v9681_v17, 0 }
0x2a4e   :  { %v9477_v22 = vmul.f32 %v15260_v5, %v9469_v55  ;;  %14354 = vmatpush3.bf16.xpose.msra.mxu0 %v9734_v36  ;;  %v9671_v54 = vld [vmem:[#allocation2 + $0x38] sm:$0xff] }
0x2a4f   :  { %14365 = vmatprep.subr.bf16.mxu0 %v15313_v0  ;;  %v9683_v56 = vpack.c.bf16 %v9671_v54, %v9671_v54 }
0x2a50   :  { %v9483_v18 = vmul.f32 %v12955_v6, %v9477_v22 }
0x2a51   :  { %v9826_v16 = vsel %vm89_vm2, %v9683_v56, 0 }
0x2a52   :  { %v17883_v4 = vadd.f32 %v12956_v10, %v9483_v18 }
0x2a54   :  { %v9494_v21 = vpack.c.bf16 %v17883_v4, %v17883_v4 }
0x2a56   :  { %14336 = vmatmul.mubr.msk.bf16.vlgmr.msra.gmra.mrb[196].mxu1 %vm45_vm1, %v9494_v21 }
0x2a57   :  { %14348 = vmatpush3.bf16.xpose.msra.mxu1 %v9688_v27  ;;  %14349 = vmatprep.mubr.msk.bf16.mxu1 %vm15314_vm0, %v15313_v0 }
0x2a58   :  { %14359 = vmatprep.subr.bf16.mxu1 %v15313_v0 }
0x2b29   :  { %v9549_v28 = vpop.f32.mrb[196].mxu1 }
0x2b2a   :  { %v9550_v1 = vadd.f32 %v12957_v51, %v9549_v28  ;;  %v14337_v48 = vpop.f32.mrb[197].mxu1 }
0x2b2b   :  { %v9552_v30 = vpop.f32.mrb[198].mxu1 }
0x2b2c   :  { %9616 = vst.msk [vmem:[#allocation2] sm:$0xff] %vm89_vm2, %v9550_v1  ;;  %9648 = vrot.lane.b32.xlu0 %v9550_v1, %s15321_s7  ;;  %9624 = vrot.lane.b32.xlu1 %v9550_v1, %s15315_s26  ;;  %v14338_v12 = vpop.f32.mrb[199].mxu1 }
0x2b30   :  { %9640 = vrot.lane.b32.xlu1 %v17856_v61, %s15319_s30 }
0x2b33   :  { %v9660_v62 = vld [vmem:[#allocation2] sm:$0xff] }
0x2b34   :  { %9636 = vrot.lane.b32.xlu1 %v9550_v1, %s15319_s30  ;;  %v9664_v34 = vmul.f32 0.35355338, %v9660_v62 }
0x2b36   :  { %v9676_v23 = vpack.c.bf16 %v9664_v34, %v9664_v34 }
0x2b38   :  { %14350 = vmatmul.mubr.msk.bf16.vlgmr.msra.gmra.mrb[200].mxu1 %vm89_vm2, %v9676_v23 }
0x2b39   :  { %14361 = vmatprep.mubr.msk.bf16.mxu1 %vm15314_vm0, %v15313_v0 }
0x2b9e   :  { %v9649_v14 = vpop.permute.xlu0 %9648  ;;  %v9625_v8 = vpop.permute.xlu1 %9624 }
0x2b9f   :  { %9651 = vst.msk [vmem:[#allocation2 + $0x18] sm:$0xff] %vm89_vm2, %v9649_v14  ;;  %9627 = vst.msk [vmem:[#allocation2 + $0x8] sm:$0xff] %vm89_vm2, %v9625_v8 }
0x2ba2   :  { %v9641_v37 = vpop.permute.xlu1 %9640 }
0x2ba3   :  { %9643 = vst.msk [vmem:[#allocation2 + $0x30] sm:$0xff] %vm89_vm2, %v9641_v37 }
0x2ba6   :  { %v9637_v39 = vpop.permute.xlu1 %9636  ;;  %v9661_v46 = vld [vmem:[#allocation2 + $0x8] sm:$0xff]  ;;  %v9663_v15 = vld [vmem:[#allocation2 + $0x18] sm:$0xff] }
0x2ba7   :  { %9639 = vst.msk [vmem:[#allocation2 + $0x10] sm:$0xff] %vm89_vm2, %v9637_v39  ;;  %v9665_v20 = vmul.f32 0.35355338, %v9661_v46  ;;  %v9667_v57 = vmul.f32 0.35355338, %v9663_v15 }
0x2ba9   :  { %v9677_v7 = vpack.c.bf16 %v9665_v20, %v9665_v20  ;;  %v9679_v29 = vpack.c.bf16 %v9667_v57, %v9667_v57 }
0x2baa   :  { %v9670_v40 = vld [vmem:[#allocation2 + $0x30] sm:$0xff] }
0x2bab   :  { %14356 = vmatmul.mubr.msk.bf16.vlgmr.msra.gmra.mrb[204].mxu0 %vm89_vm2, %v9677_v7  ;;  %v9682_v32 = vpack.c.bf16 %v9670_v40, %v9670_v40 }
0x2bac   :  { %14366 = vmatpush3.bf16.xpose.msra.mxu0 %v9826_v16  ;;  %14367 = vmatprep.mubr.msk.bf16.mxu0 %vm15314_vm0, %v15313_v0 }
0x2bad   :  { %v9780_v31 = vsel %vm89_vm2, %v9682_v32, 0  ;;  %14377 = vmatprep.subr.bf16.mxu0 %v15313_v0 }
0x2bae   :  { %14360 = vmatpush3.bf16.xpose.msra.mxu1 %v9780_v31  ;;  %v9662_v24 = vld [vmem:[#allocation2 + $0x10] sm:$0xff] }
0x2baf   :  { %v9666_v58 = vmul.f32 0.35355338, %v9662_v24  ;;  %14371 = vmatprep.subr.bf16.mxu1 %v15313_v0 }
0x2bb1   :  { %v9678_v41 = vpack.c.bf16 %v9666_v58, %v9666_v58 }
0x2bb3   :  { %14368 = vmatmul.mubr.msk.bf16.vlgmr.msra.gmra.mrb[208].mxu0 %vm89_vm2, %v9679_v29 }
0x2bb4   :  { %14379 = vmatprep.mubr.msk.bf16.mxu0 %vm15314_vm0, %v15313_v0 }
0x2bb5   :  { %14362 = vmatmul.mubr.msk.bf16.vlgmr.msra.gmra.mrb[204].mxu1 %vm89_vm2, %v9678_v41 }
0x2bb6   :  { %14373 = vmatprep.mubr.msk.bf16.mxu1 %vm15314_vm0, %v15313_v0 }
0x2c0b   :  { %v9724_v43 = vpop.f32.mrb[200].mxu1 }
0x2c0c   :  { %v14351_v60 = vpop.f32.mrb[201].mxu1  ;;  %v9868_v55 = vsel %vm89_vm2, %v9724_v43, -inf }
0x2c0d   :  { %9869 = vmax.xlane.f32.xlu1 %v9868_v55  ;;  %v9727_v11 = vpop.f32.mrb[202].mxu1 }
0x2c0e   :  { %v14352_v42 = vpop.f32.mrb[203].mxu1 }
0x2c7e   :  { %v9770_v25 = vpop.f32.mrb[204].mxu0 }
0x2c7f   :  { %v14357_v26 = vpop.f32.mrb[205].mxu0  ;;  %v9871_v53 = vsel %vm89_vm2, %v9770_v25, -inf }
0x2c80   :  { %9872 = vmax.xlane.f32.xlu0 %v9871_v53  ;;  %v9773_v33 = vpop.f32.mrb[206].mxu0 }
0x2c81   :  { %v14358_v35 = vpop.f32.mrb[207].mxu0 }
0x2c86   :  { %v9862_v52 = vpop.f32.mrb[208].mxu0 }
0x2c87   :  { %v14369_v44 = vpop.f32.mrb[209].mxu0  ;;  %v9877_v63 = vsel %vm89_vm2, %v9862_v52, -inf }
0x2c88   :  { %v9865_v17 = vpop.f32.mrb[210].mxu0  ;;  %9878 = vmax.xlane.f32.xlu1 %v9877_v63  ;;  %v9816_v5 = vpop.f32.mrb[204].mxu1 }
0x2c89   :  { %v14363_v6 = vpop.f32.mrb[205].mxu1  ;;  %v14370_v36 = vpop.f32.mrb[211].mxu0  ;;  %v9874_v22 = vsel %vm89_vm2, %v9816_v5, -inf }
0x2c8a   :  { %9875 = vmax.xlane.f32.xlu0 %v9874_v22  ;;  %v9819_v10 = vpop.f32.mrb[206].mxu1 }
0x2c8b   :  { %v14364_v13 = vpop.f32.mrb[207].mxu1 }
0x2c99   :  { %9632 = vrot.lane.b32.xlu1 %v17856_v61, %s15318_s29  ;;  %s15330_s29 = smov [#allocation4]  }
0x2c9a   :  { %v9870_v18 = vpop.xlane.xlu1 %9869  ;;  %s12335_s30 = sshll.u32 %s15330_s29, 4  ;;  %s12336_s30 = int_to_ptr.vmem [resolvable:$true] %s12335_s30 }
0x2c9b   :  { %v9880_v19 = vsub.f32 %v9724_v43, %v9870_v18  ;;  %p15294_p1 = scmp.lt.s32.totalorder %s12336_s30, %s12336_s30 }
0x2c9d   :  { %v9884_v21 = vmul.f32 1.442695, %v9880_v19 }
0x2c9f   :  { %15261 = vpow2.f32 %v9884_v21 }
0x2ca0   :  { %9619 = vrot.lane.b32.xlu0 %v17856_v61, %s15316_s27 }
0x2ca9   :  { %v15262_v27 = vpop.eup %15261 }
0x2caa   :  { %v9892_v51 = vsel %vm89_vm2, %v15262_v27, 0.0 }
0x2cbf   :  { %9893 = vadd.xlane.f32.xlu0 %v9892_v51 }
0x2d0d   :  { %v9873_v28 = vpop.xlane.xlu0 %9872 }
0x2d0e   :  { %v9881_v1 = vsub.f32 %v9770_v25, %v9873_v28  ;;  %v14983_v28 = vld [vmem:[%s18608_s1 + $0xf4] ss:$316 sps:$4 sm:$0xff]  }
0x2d10   :  { %v9886_v48 = vmul.f32 1.442695, %v9881_v1 }
0x2d12   :  { %15263 = vpow2.f32 %v9886_v48 }
0x2d15   :  { %v9879_v30 = vpop.xlane.xlu1 %9878 }
0x2d16   :  { %v9883_v12 = vsub.f32 %v9862_v52, %v9879_v30  ;;  %v14984_v30 = vld [vmem:[%s18608_s1 + $0x36c] ss:$316 sps:$4 sm:$0xff]  }
0x2d17   :  { %v9876_v62 = vpop.xlane.xlu0 %9875 }
0x2d18   :  { %v9890_v34 = vmul.f32 1.442695, %v9883_v12  ;;  %v9882_v23 = vsub.f32 %v9816_v5, %v9876_v62 }
0x2d19   :  { %v9633_v14 = vpop.permute.xlu1 %9632 }
0x2d1a   :  { %15265 = vpow2.f32 %v9890_v34  ;;  %v9888_v8 = vmul.f32 1.442695, %v9882_v23  ;;  %9635 = vst.msk [vmem:[#allocation2 + $0x48] sm:$0xff] %vm89_vm2, %v9633_v14 }
0x2d1b   :  { %v9620_v37 = vpop.permute.xlu0 %9619 }
0x2d1c   :  { %v15264_v54 = vpop.eup %15263  ;;  %15267 = vpow2.f32 %v9888_v8  ;;  %9622 = vst.msk [vmem:[#allocation2 + $0x40] sm:$0xff] %vm89_vm2, %v9620_v37 }
0x2d1d   :  { %v9895_v39 = vsel %vm89_vm2, %v15264_v54, 0.0 }
0x2d1e   :  { %9896 = vadd.xlane.f32.xlu1 %v9895_v39 }
0x2d21   :  { %v9673_v46 = vld [vmem:[#allocation2 + $0x48] sm:$0xff] }
0x2d22   :  { %v9917_v20 = vpack.c.bf16 %v9673_v46, %v9673_v46 }
0x2d23   :  { %v9672_v56 = vld [vmem:[#allocation2 + $0x40] sm:$0xff] }
0x2d24   :  { %v15266_v7 = vpop.eup %15265  ;;  %v9970_v40 = vsel %vm410_vm3, %v9917_v20, 0  ;;  %v9916_v15 = vpack.c.bf16 %v9672_v56, %v9672_v56 }
0x2d25   :  { %14378 = vmatpush3.bf16.msra.mxu0 %v9970_v40  ;;  %v9901_v16 = vsel %vm89_vm2, %v15266_v7, 0.0  ;;  %v12973_v40 = vld [vmem:[%s18610_s3 + $0x1e] ss:$0 sm:$0xff] }
0x2d26   :  { %v15268_v32 = vpop.eup %15267  ;;  %9902 = vadd.xlane.f32.xlu1 %v9901_v16  ;;  %v9924_v31 = vsel %vm410_vm3, %v9916_v15, 0  ;;  %14389 = vmatprep.subr.bf16.mxu0 %v15313_v0 }
0x2d27   :  { %14372 = vmatpush3.bf16.msra.mxu1 %v9924_v31  ;;  %v9898_v57 = vsel %vm89_vm2, %v15268_v32, 0.0 }
0x2d28   :  { %9899 = vadd.xlane.f32.xlu0 %v9898_v57  ;;  %14383 = vmatprep.subr.bf16.mxu1 %v15313_v0 }
0x2d37   :  { %9644 = vrot.lane.b32.xlu1 %v17856_v61, %s15317_s28 }
0x2d3e   :  { %9656 = vrot.lane.b32.xlu0 %v17856_v61, %s15320_s6 }
0x2d4c   :  { %v9894_v24 = vpop.xlane.xlu0 %9893 }
0x2d4d   :  { %15269 = vrcp.f32 %v9894_v24 }
0x2d57   :  { %v15270_v58 = vpop.eup %15269 }
0x2d58   :  { %v9908_v29 = vmul.f32 %v15270_v58, %v15262_v27 }
0x2d5a   :  { %v9912_v41 = vpack.c.bf16 %v9908_v29, %v9908_v29 }
0x2d5c   :  { %14374 = vmatmul.mubr.msk.bf16.vlgmr.msra.gmra.mrb[208].mxu1 %vm89_vm2, %v9912_v41 }
0x2d5d   :  { %14385 = vmatprep.mubr.msk.bf16.mxu1 %vm15314_vm0, %v15313_v0 }
0x2dab   :  { %v9897_v43 = vpop.xlane.xlu1 %9896 }
0x2dac   :  { %15271 = vrcp.f32 %v9897_v43 }
0x2db3   :  { %v9903_v60 = vpop.xlane.xlu1 %9902 }
0x2db4   :  { %15273 = vrcp.f32 %v9903_v60 }
0x2db5   :  { %v9900_v55 = vpop.xlane.xlu0 %9899 }
0x2db6   :  { %v15272_v11 = vpop.eup %15271  ;;  %15275 = vrcp.f32 %v9900_v55 }
0x2db7   :  { %v9909_v42 = vmul.f32 %v15272_v11, %v15264_v54  ;;  %v9645_v25 = vpop.permute.xlu1 %9644  ;;  %v14987_v11 = vld [vmem:[%s18608_s1 + $0xfc] ss:$316 sps:$4 sm:$0xff]  }
0x2db8   :  { %9647 = vst.msk [vmem:[#allocation2 + $0x50] sm:$0xff] %vm89_vm2, %v9645_v25  ;;  %v14988_v25 = vld [vmem:[%s18608_s1 + $0x100] ss:$316 sps:$4 sm:$0xff]  }
0x2db9   :  { %v9657_v61 = vpop.permute.xlu0 %9656  ;;  %v9913_v26 = vpack.c.bf16 %v9909_v42, %v9909_v42  ;;  %v14990_v42 = vld [vmem:[%s18608_s1 + $0x104] ss:$316 sps:$4 sm:$0xff]  }
0x2dba   :  { %9659 = vst.msk [vmem:[#allocation2 + $0x58] sm:$0xff] %vm89_vm2, %v9657_v61  ;;  %v14993_v61 = vld [vmem:[%s18608_s1 + $0x374] ss:$316 sps:$4 sm:$0xff]  }
0x2dbb   :  { %14380 = vmatmul.mubr.msk.bf16.vlgmr.msra.gmra.mrb[212].mxu0 %vm89_vm2, %v9913_v26  ;;  %v14996_v26 = vld [vmem:[%s18608_s1 + $0x37c] ss:$316 sps:$4 sm:$0xff]  }
0x2dbc   :  { %14391 = vmatprep.mubr.msk.bf16.mxu0 %vm15314_vm0, %v15313_v0 }
0x2dbe   :  { %v15274_v53 = vpop.eup %15273 }
0x2dbf   :  { %v9674_v33 = vld [vmem:[#allocation2 + $0x50] sm:$0xff]  ;;  %v9911_v17 = vmul.f32 %v15274_v53, %v15266_v7 }
0x2dc0   :  { %v15276_v35 = vpop.eup %15275  ;;  %v9918_v52 = vpack.c.bf16 %v9674_v33, %v9674_v33  ;;  %v14991_v53 = vld [vmem:[%s18608_s1 + $0x370] ss:$316 sps:$4 sm:$0xff]   ;;  %v14994_v33 = vld [vmem:[%s18608_s1 + $0x378] ss:$316 sps:$4 sm:$0xff]  }
0x2dc1   :  { %v9910_v44 = vmul.f32 %v15276_v35, %v15268_v32  ;;  %v9675_v63 = vld [vmem:[#allocation2 + $0x58] sm:$0xff]  ;;  %v9915_v10 = vpack.c.bf16 %v9911_v17, %v9911_v17  ;;  %v14999_v35 = vld [vmem:[%s18608_s1 + $0x10c] ss:$316 sps:$4 sm:$0xff]  }
0x2dc2   :  { %v10016_v5 = vsel %vm410_vm3, %v9918_v52, 0  ;;  %v9919_v6 = vpack.c.bf16 %v9675_v63, %v9675_v63  ;;  %v15002_v52 = vld [vmem:[%s18608_s1 + $0x114] ss:$316 sps:$4 sm:$0xff]  }
0x2dc3   :  { %14384 = vmatpush3.bf16.msra.mxu1 %v10016_v5  ;;  %v9914_v36 = vpack.c.bf16 %v9910_v44, %v9910_v44 }
0x2dc4   :  { %v10062_v22 = vsel %vm410_vm3, %v9919_v6, 0  ;;  %14395 = vmatprep.subr.bf16.mxu1 %v15313_v0  ;;  %v12977_v6 = vld [vmem:[%s18610_s3 + $0x22] ss:$0 sm:$0xff] }
0x2dc5   :  { %14390 = vmatpush3.bf16.msra.mxu0 %v10062_v22  ;;  %v12978_v22 = vld [vmem:[%s18610_s3 + $0x23] ss:$0 sm:$0xff] }
0x2dc6   :  { %14386 = vmatmul.mubr.msk.bf16.vlgmr.msra.gmra.mrb[212].mxu1 %vm89_vm2, %v9914_v36  ;;  %10494 = vmatprep.subr.bf16.mxu0 %v14987_v11  ;;  %v15046_v11 = vld [vmem:[%s18609_s2 + $0xcd8] sm:$0xff]  }
0x2dc7   :  { %14399 = vmatprep.mubr.msk.bf16.mxu1 %vm15314_vm0, %v15313_v0  ;;  %14396 = vmatpush3.bf16.msra.mxu1 %v14983_v28  ;;  %v15003_v28 = vld [vmem:[%s18608_s1 + $0x380] ss:$316 sps:$4 sm:$0xff]  }
0x2dc8   :  { %14392 = vmatmul.mubr.msk.bf16.vlgmr.msra.gmra.mrb[216].mxu0 %vm89_vm2, %v9915_v10  ;;  %14397 = vmatprep.subr.bf16.mxu1 %v15313_v0 }
0x2dc9   :  { %10526 = vmatprep.mubr.bf16.mxu0 %v15329_v38 }
0x2dcb   :  { %14398 = vmatpush3.bf16.msra.mxu1 %v14984_v30  ;;  %v15014_v30 = vld [vmem:[%s18608_s1 + $0x124] ss:$316 sps:$4 sm:$0xff]  }
0x2dcc   :  { %10535 = vmatprep.subr.bf16.mxu1 %v14990_v42  ;;  %v15047_v42 = vld [vmem:[%s18609_s2 + $0xc18] sm:$0xff]  }
0x2e2f   :  { %v9960_v13 = vpop.f32.mrb[208].mxu1 }
0x2e30   :  { %10104 = vst.msk [vmem:[#allocation3] sm:$0xff] %vm89_vm2, %v9960_v13  ;;  %v14375_v18 = vpop.f32.mrb[209].mxu1 }
0x2e31   :  { %v9963_v19 = vpop.f32.mrb[210].mxu1  ;;  %v14997_v18 = vld [vmem:[%s18608_s1 + $0x108] ss:$316 sps:$4 sm:$0xff]  }
0x2e32   :  { %v14376_v21 = vpop.f32.mrb[211].mxu1  ;;  %v15000_v19 = vld [vmem:[%s18608_s1 + $0x110] ss:$316 sps:$4 sm:$0xff]  }
0x2e8e   :  { %v10006_v27 = vpop.f32.mrb[212].mxu0 }
0x2e8f   :  { %10106 = vrot.lane.b32.xlu1 %v10006_v27, %s15326_s14  ;;  %v14381_v51 = vpop.f32.mrb[213].mxu0  ;;  %v15005_v27 = vld [vmem:[%s18608_s1 + $0x384] ss:$316 sps:$4 sm:$0xff]  }
0x2e90   :  { %v10009_v1 = vpop.f32.mrb[214].mxu0  ;;  %v15008_v51 = vld [vmem:[%s18608_s1 + $0x38c] ss:$316 sps:$4 sm:$0xff]  }
0x2e91   :  { %v14382_v48 = vpop.f32.mrb[215].mxu0  ;;  %v15006_v1 = vld [vmem:[%s18608_s1 + $0x388] ss:$316 sps:$4 sm:$0xff]  }
0x2e92   :  { %v15011_v48 = vld [vmem:[%s18608_s1 + $0x11c] ss:$316 sps:$4 sm:$0xff]  }
0x2e99   :  { %v10052_v12 = vpop.f32.mrb[212].mxu1 }
0x2e9a   :  { %10111 = vrot.lane.b32.xlu0 %v10052_v12, %s15328_s18  ;;  %v14387_v62 = vpop.f32.mrb[213].mxu1  ;;  %v15009_v12 = vld [vmem:[%s18608_s1 + $0x118] ss:$316 sps:$4 sm:$0xff]  }
0x2e9b   :  { %v10055_v34 = vpop.f32.mrb[214].mxu1  ;;  %v10098_v23 = vpop.f32.mrb[216].mxu0  ;;  %v15012_v62 = vld [vmem:[%s18608_s1 + $0x120] ss:$316 sps:$4 sm:$0xff]  }
0x2e9c   :  { %10116 = vrot.lane.b32.xlu1 %v10098_v23, %s15327_s17  ;;  %v14388_v14 = vpop.f32.mrb[215].mxu1  ;;  %v14393_v8 = vpop.f32.mrb[217].mxu0  ;;  %v15017_v34 = vld [vmem:[%s18608_s1 + $0x394] ss:$316 sps:$4 sm:$0xff]   ;;  %v15020_v23 = vld [vmem:[%s18608_s1 + $0x39c] ss:$316 sps:$4 sm:$0xff]  }
0x2e9d   :  { %v10101_v37 = vpop.f32.mrb[218].mxu0  ;;  %v15015_v14 = vld [vmem:[%s18608_s1 + $0x390] ss:$316 sps:$4 sm:$0xff]   ;;  %v15018_v8 = vld [vmem:[%s18608_s1 + $0x398] ss:$316 sps:$4 sm:$0xff]  }
0x2e9e   :  { %v14394_v54 = vpop.f32.mrb[219].mxu0  ;;  %v15023_v37 = vld [vmem:[%s18608_s1 + $0x12c] ss:$316 sps:$4 sm:$0xff]  }
0x2e9f   :  { %v15026_v54 = vld [vmem:[%s18608_s1 + $0x134] ss:$316 sps:$4 sm:$0xff]  }
0x2f01   :  { %v10107_v39 = vpop.permute.xlu1 %10106 }
0x2f02   :  { %10109 = vst.msk [vmem:[#allocation3] sm:$0xff] %vm597_vm4, %v10107_v39  ;;  %v15021_v39 = vld [vmem:[%s18608_s1 + $0x128] ss:$316 sps:$4 sm:$0xff]  }
0x2f0c   :  { %v10112_v46 = vpop.permute.xlu0 %10111 }
0x2f0d   :  { %10114 = vst.msk [vmem:[#allocation3] sm:$0xff] %vm603_vm5, %v10112_v46  ;;  %v15024_v46 = vld [vmem:[%s18608_s1 + $0x130] ss:$316 sps:$4 sm:$0xff]  }
0x2f0e   :  { %v10117_v20 = vpop.permute.xlu1 %10116 }
0x2f0f   :  { %10119 = vst.msk [vmem:[#allocation3] sm:$0xff] %vm609_vm6, %v10117_v20  ;;  %v15029_v20 = vld [vmem:[%s18608_s1 + $0x3a4] ss:$316 sps:$4 sm:$0xff]  }
0x2f16   :  { %v10120_v56 = vld [vmem:[#allocation3] sm:$0xff] }
0x2f17   :  { %v10125_v7 = vpack.c.bf16 %v10120_v56, %v10120_v56  ;;  %v15032_v56 = vld [vmem:[%s18608_s1 + $0x3ac] ss:$316 sps:$4 sm:$0xff]  }
0x2f19   :  { %14400 = vmatmul.mubr.msk.bf16.vlgmr.msra.gmra.mrb[216].mxu1 %vm45_vm1, %v10125_v7  ;;  %v15027_v7 = vld [vmem:[%s18608_s1 + $0x3a0] ss:$316 sps:$4 sm:$0xff]  }
0x2f1a   :  { %10567 = vmatprep.mubr.bf16.mxu1 %v15329_v38  ;;  %10536 = vmatpush1.bf16.msra.mxu1 %v14988_v25  ;;  %v15049_v25 = vld [vmem:[%s18609_s2 + $0xc60] sm:$0xff]  }
0x2f1b   :  { %10537 = vmatprep.subr.bf16.mxu1 %v14996_v26  ;;  %v15051_v26 = vld [vmem:[%s18609_s2 + $0xc20] sm:$0xff]  }
0x2f1e   :  { %10538 = vmatpush1.bf16.msra.mxu1 %v14994_v33  ;;  %v15053_v33 = vld [vmem:[%s18609_s2 + $0xc68] sm:$0xff]  }
0x2f1f   :  { %10617 = vmatprep.subr.bf16.mxu1 %v15002_v52  ;;  %v15055_v52 = vld [vmem:[%s18609_s2 + $0xc28] sm:$0xff]  }
0x2fec   :  { %v10180_v15 = vpop.f32.mrb[216].mxu1 }
0x2fed   :  { %v10181_v16 = vadd.f32 %v12973_v40, %v10180_v15  ;;  %v14401_v32 = vpop.f32.mrb[217].mxu1  ;;  %v15030_v40 = vld [vmem:[%s18608_s1 + $0x3a8] ss:$316 sps:$4 sm:$0xff]  }
0x2fee   :  { %v10183_v31 = vpop.f32.mrb[218].mxu1  ;;  %v15033_v15 = vld [vmem:[%s18609_s2 + $0xc40] sm:$0xff]  }
0x2fef   :  { %v10186_v57 = vadd.f32 %v10181_v16, %v17883_v4  ;;  %v14402_v24 = vpop.f32.mrb[219].mxu1  ;;  %v14985_v4 = vld [vmem:[%s18608_s1 + $0xf8] ss:$316 sps:$4 sm:$0xff]   ;;  %v15034_v16 = vld [vmem:[%s18609_s2 + $0xcc0] sm:$0xff]  }
0x2ff0   :  { %10495 = vmatpush1.bf16.msra.mxu0 %v14985_v4  ;;  %v15035_v32 = vld [vmem:[%s18609_s2 + $0xc00] sm:$0xff]   ;;  %v15039_v24 = vld [vmem:[%s18609_s2 + $0xc08] sm:$0xff]   ;;  %v15048_v4 = vld [vmem:[%s18609_s2 + $0xc98] sm:$0xff]  }
0x2ff1   :  { %v10187_v58 = vsel %vm45_vm1, %v10186_v57, 0.0  ;;  %10496 = vmatprep.subr.bf16.mxu0 %v14993_v61  ;;  %v15036_v31 = vld [vmem:[%s18609_s2 + $0xc80] sm:$0xff]  }
0x2ff2   :  { %10188 = vadd.xlane.f32.xlu0 %v10187_v58  ;;  %v15040_v58 = vld [vmem:[%s18609_s2 + $0xc88] sm:$0xff]   ;;  %v15050_v61 = vld [vmem:[%s18609_s2 + $0xce0] sm:$0xff]  }
0x2ff4   :  { %10497 = vmatpush1.bf16.msra.mxu0 %v14991_v53  ;;  %v15052_v53 = vld [vmem:[%s18609_s2 + $0xca0] sm:$0xff]  }
0x2ff5   :  { %10576 = vmatprep.subr.bf16.mxu0 %v14999_v35  ;;  %v15054_v35 = vld [vmem:[%s18609_s2 + $0xce8] sm:$0xff]  }
0x307f   :  { %v10189_v29 = vpop.xlane.xlu0 %10188 }
0x3080   :  { %v10190_v41 = vmul.f32 0.03125, %v10189_v29  ;;  %v15041_v29 = vld [vmem:[%s18609_s2 + $0xc50] sm:$0xff]  }
0x3082   :  { %v10191_v43 = vsub.f32 %v10186_v57, %v10190_v41  ;;  %v15037_v57 = vld [vmem:[%s18609_s2 + $0xc48] sm:$0xff]   ;;  %v15042_v41 = vld [vmem:[%s18609_s2 + $0xcd0] sm:$0xff]  }
0x3084   :  { %v10192_v60 = vmul.f32 %v10191_v43, %v10191_v43 }
0x3086   :  { %v10193_v55 = vsel %vm45_vm1, %v10192_v60, 0.0  ;;  %v15044_v60 = vld [vmem:[%s18609_s2 + $0xc90] sm:$0xff]  }
0x3087   :  { %10194 = vadd.xlane.f32.xlu1 %v10193_v55  ;;  %v15045_v55 = vld [vmem:[%s18609_s2 + $0xc58] sm:$0xff]  }
0x3114   :  { %v10195_v44 = vpop.xlane.xlu1 %10194 }
0x3115   :  { %v10196_v63 = vmul.f32 0.03125, %v10195_v44  ;;  %v15056_v44 = vld [vmem:[%s18609_s2 + $0xca8] sm:$0xff]  }
0x3117   :  { %v10197_v17 = vadd.f32 1e-05, %v10196_v63  ;;  %v15057_v63 = vld [vmem:[%s18609_s2 + $0xc70] sm:$0xff]  }
0x3119   :  { %15277 = vrsqrt.f32 %v10197_v17  ;;  %v15058_v17 = vld [vmem:[%s18609_s2 + $0xcf0] sm:$0xff]  }
0x3123   :  { %v15278_v5 = vpop.eup %15277 }
0x3124   :  { %v10199_v36 = vmul.f32 %v15278_v5, %v10191_v43  ;;  %v15043_v43 = vld [vmem:[%s18609_s2 + $0xc10] sm:$0xff]  }
0x3125   :  { %v15059_v5 = vld [vmem:[%s18609_s2 + $0xc30] sm:$0xff]  }
0x3126   :  { %v10205_v10 = vmul.f32 %v12977_v6, %v10199_v36  ;;  %v15060_v6 = vld [vmem:[%s18609_s2 + $0xcb0] sm:$0xff]   ;;  %v15061_v36 = vld [vmem:[%s18609_s2 + $0xc78] sm:$0xff]  }
0x3128   :  { %v18017_v13 = vadd.f32 %v12978_v22, %v10205_v10  ;;  %v15062_v22 = vld [vmem:[%s18609_s2 + $0xcf8] sm:$0xff]  }
0x3129   :  { %v15063_v10 = vld [vmem:[%s18609_s2 + $0xc38] sm:$0xff]  }
0x312a   :  { %v18027_v21 = vpack.c.bf16 %v18017_v13, %v18017_v13 }
0x312c   :  { %13013 = vmatmul.mubr.msk.bf16.vlgmr.msra.gmra.mrb[220].mxu0 %vm45_vm1, %v18027_v21  ;;  %13014 = vmatmul.mubr.msk.bf16.vlgmr.msra.gmra.mrb[220].mxu1 %vm45_vm1, %v18027_v21 }
0x312d   :  { %10577 = vmatpush1.bf16.msra.mxu0 %v14997_v18  ;;  %10618 = vmatpush1.bf16.msra.mxu1 %v15000_v19  ;;  %v15064_v18 = vld [vmem:[%s18609_s2 + $0xcb8] sm:$0xff]   ;;  %v15065_v19 = vld [vmem:[%s18609_s2 + $0xd40] sm:$0xff]  }
0x312e   :  { %10578 = vmatprep.subr.bf16.mxu0 %v15005_v27  ;;  %10619 = vmatprep.subr.bf16.mxu1 %v15008_v51  ;;  %v18216_v27 = vld [vmem:[%s18611_s4 + $0x3] ss:$4 sm:$0xff] }
0x312f   :  { %10608 = vmatprep.mubr.bf16.mxu0 %v15329_v38  ;;  %10649 = vmatprep.mubr.bf16.mxu1 %v15329_v38  ;;  %v10254_v51 = vrot.slane %v18216_v27, %v15729_v45 }
0x3131   :  { %10579 = vmatpush1.bf16.msra.mxu0 %v15003_v28  ;;  %10620 = vmatpush1.bf16.msra.mxu1 %v15006_v1  ;;  %v10262_v28 = vrot.slane %v18216_v27, %v15732_v47  ;;  %v10258_v1 = vrot.slane %v18216_v27, %v15740_v49 }
0x3132   :  { %10658 = vmatprep.subr.bf16.mxu0 %v15011_v48  ;;  %10699 = vmatprep.subr.bf16.mxu1 %v15014_v30  ;;  %v10266_v48 = vrot.slane %v18216_v27, %v15743_v50 }
0x3134   :  { %13015 = vmatmul.mubr.msk.bf16.vlgmr.msra.gmra.mrb[224].mxu0 %vm45_vm1, %v18027_v21  ;;  %13016 = vmatmul.mubr.msk.bf16.vlgmr.msra.gmra.mrb[224].mxu1 %vm45_vm1, %v18027_v21 }
0x3135   :  { %10659 = vmatpush1.bf16.msra.mxu0 %v15009_v12  ;;  %10700 = vmatpush1.bf16.msra.mxu1 %v15012_v62 }
0x3136   :  { %10660 = vmatprep.subr.bf16.mxu0 %v15017_v34  ;;  %10701 = vmatprep.subr.bf16.mxu1 %v15020_v23 }
0x3137   :  { %10690 = vmatprep.mubr.bf16.mxu0 %v15329_v38  ;;  %10731 = vmatprep.mubr.bf16.mxu1 %v15329_v38 }
0x3139   :  { %10661 = vmatpush1.bf16.msra.mxu0 %v15015_v14  ;;  %10702 = vmatpush1.bf16.msra.mxu1 %v15018_v8 }
0x313a   :  { %10740 = vmatprep.subr.bf16.mxu0 %v15023_v37  ;;  %10781 = vmatprep.subr.bf16.mxu1 %v15026_v54 }
0x313c   :  { %13017 = vmatmul.mubr.msk.bf16.vlgmr.msra.gmra.mrb[228].mxu0 %vm45_vm1, %v18027_v21  ;;  %13018 = vmatmul.mubr.msk.bf16.vlgmr.msra.gmra.mrb[228].mxu1 %vm45_vm1, %v18027_v21 }
0x313d   :  { %10741 = vmatpush1.bf16.msra.mxu0 %v15021_v39  ;;  %10782 = vmatpush1.bf16.msra.mxu1 %v15024_v46 }
0x313e   :  { %10742 = vmatprep.subr.bf16.mxu0 %v15029_v20  ;;  %10783 = vmatprep.subr.bf16.mxu1 %v15032_v56 }
0x313f   :  { %10772 = vmatprep.mubr.bf16.mxu0 %v15329_v38  ;;  %10813 = vmatprep.mubr.bf16.mxu1 %v15329_v38  ;;  %v15038_v38 = vld [vmem:[%s18609_s2 + $0xcc8] sm:$0xff]  }
0x3141   :  { %10743 = vmatpush1.bf16.msra.mxu0 %v15027_v7  ;;  %10784 = vmatpush1.bf16.msra.mxu1 %v15030_v40 }
0x3142   :  { %13824 = vmatprep.subr.bf16.mxu0 %v15033_v15  ;;  %13846 = vmatprep.subr.bf16.mxu1 %v15034_v16 }
0x3144   :  { %13019 = vmatmul.mubr.msk.bf16.vlgmr.msra.gmra.mrb[232].mxu0 %vm45_vm1, %v18027_v21  ;;  %13020 = vmatmul.mubr.msk.bf16.vlgmr.msra.gmra.mrb[232].mxu1 %vm45_vm1, %v18027_v21  ;;  %v15066_v21 = vld [vmem:[%s18609_s2 + $0xdc0] sm:$0xff]  }
0x3145   :  { %13825 = vmatpush3.bf16.msra.mxu0 %v15035_v32  ;;  %13847 = vmatpush3.bf16.msra.mxu1 %v15036_v31  ;;  %v10274_v31 = vrot.slane %v18216_v27, %v15754_v2 }
0x3146   :  { %13826 = vmatprep.subr.bf16.mxu0 %v15037_v57  ;;  %13848 = vmatprep.subr.bf16.mxu1 %v15038_v38  ;;  %v10282_v57 = vrot.slane %v18216_v27, %v15757_v3  ;;  %v15067_v38 = vld [vmem:[%s18609_s2 + $0xd00] sm:$0xff]  }
0x3149   :  { %13827 = vmatpush3.bf16.msra.mxu0 %v15039_v24  ;;  %13849 = vmatpush3.bf16.msra.mxu1 %v15040_v58  ;;  %v15068_v24 = vld [vmem:[%s18609_s2 + $0xd80] sm:$0xff]  }
0x314a   :  { %13828 = vmatprep.subr.bf16.mxu0 %v15041_v29  ;;  %13850 = vmatprep.subr.bf16.mxu1 %v15042_v41  ;;  %v15069_v41 = vld [vmem:[%s18609_s2 + $0xd48] sm:$0xff]  }
0x314d   :  { %13829 = vmatpush3.bf16.msra.mxu0 %v15043_v43  ;;  %13851 = vmatpush3.bf16.msra.mxu1 %v15044_v60  ;;  %v15070_v43 = vld [vmem:[%s18609_s2 + $0xdc8] sm:$0xff]  }
0x314e   :  { %13830 = vmatprep.subr.bf16.mxu0 %v15045_v55  ;;  %13852 = vmatprep.subr.bf16.mxu1 %v15046_v11 }
0x3151   :  { %13831 = vmatpush3.bf16.msra.mxu0 %v15047_v42  ;;  %13853 = vmatpush3.bf16.msra.mxu1 %v15048_v4 }
0x3152   :  { %13832 = vmatprep.subr.bf16.mxu0 %v15049_v25  ;;  %13854 = vmatprep.subr.bf16.mxu1 %v15050_v61 }
0x3155   :  { %13833 = vmatpush3.bf16.msra.mxu0 %v15051_v26  ;;  %13855 = vmatpush3.bf16.msra.mxu1 %v15052_v53  ;;  %v15071_v53 = vld [vmem:[%s18609_s2 + $0xd08] sm:$0xff]  }
0x3156   :  { %13834 = vmatprep.subr.bf16.mxu0 %v15053_v33  ;;  %13856 = vmatprep.subr.bf16.mxu1 %v15054_v35  ;;  %v15072_v33 = vld [vmem:[%s18609_s2 + $0xd88] sm:$0xff]  }
0x3159   :  { %13835 = vmatpush3.bf16.msra.mxu0 %v15055_v52  ;;  %13857 = vmatpush3.bf16.msra.mxu1 %v15056_v44  ;;  %v15073_v44 = vld [vmem:[%s18609_s2 + $0xd50] sm:$0xff]  }
0x315a   :  { %13836 = vmatprep.subr.bf16.mxu0 %v15057_v63  ;;  %13858 = vmatprep.subr.bf16.mxu1 %v15058_v17  ;;  %v15074_v63 = vld [vmem:[%s18609_s2 + $0xdd0] sm:$0xff]  }
0x315d   :  { %13837 = vmatpush3.bf16.msra.mxu0 %v15059_v5  ;;  %13859 = vmatpush3.bf16.msra.mxu1 %v15060_v6 }
0x315e   :  { %13838 = vmatprep.subr.bf16.mxu0 %v15061_v36  ;;  %13860 = vmatprep.subr.bf16.mxu1 %v15062_v22  ;;  %v15075_v22 = vld [vmem:[%s18609_s2 + $0xd10] sm:$0xff]  }
0x3161   :  { %13839 = vmatpush3.bf16.msra.mxu0 %v15063_v10  ;;  %13861 = vmatpush3.bf16.msra.mxu1 %v15064_v18  ;;  %v15076_v10 = vld [vmem:[%s18609_s2 + $0xd90] sm:$0xff]   ;;  %v15077_v18 = vld [vmem:[%s18609_s2 + $0xd58] sm:$0xff]  }
0x3162   :  { %13868 = vmatprep.subr.bf16.mxu0 %v15065_v19  ;;  %13890 = vmatprep.subr.bf16.mxu1 %v15066_v21  ;;  %v15078_v19 = vld [vmem:[%s18609_s2 + $0xdd8] sm:$0xff]  }
0x31ff   :  { %v10528_v30 = vpop.f32.mrb[220].mxu0  ;;  %v10569_v12 = vpop.f32.mrb[220].mxu1 }
0x3200   :  { %v10529_v62 = vadd.f32 %v10528_v30, %v10254_v51  ;;  %v10570_v34 = vadd.f32 %v10569_v12, %v10262_v28  ;;  %v10530_v23 = vpop.f32.mrb[221].mxu0  ;;  %v10571_v14 = vpop.f32.mrb[221].mxu1  ;;  %v15079_v12 = vld [vmem:[%s18609_s2 + $0xd18] sm:$0xff]  }
0x3201   :  { %v10531_v8 = vadd.f32 %v10530_v23, %v10258_v1  ;;  %v10572_v37 = vadd.f32 %v10571_v14, %v10266_v48  ;;  %v10532_v54 = vpop.f32.mrb[222].mxu0  ;;  %v10573_v39 = vpop.f32.mrb[222].mxu1  ;;  %v15081_v14 = vld [vmem:[%s18609_s2 + $0xd60] sm:$0xff]  }
0x3202   :  { %v10822_v46 = vmax.f32 %v10529_v62, 0.0  ;;  %v10824_v20 = vmax.f32 %v10570_v34, 0.0  ;;  %v10533_v56 = vpop.f32.mrb[223].mxu0  ;;  %v10574_v7 = vpop.f32.mrb[223].mxu1  ;;  %v15080_v62 = vld [vmem:[%s18609_s2 + $0xd98] sm:$0xff]   ;;  %v15083_v39 = vld [vmem:[%s18609_s2 + $0xd20] sm:$0xff]  }
0x3203   :  { %v10823_v40 = vmax.f32 %v10531_v8, 0.0  ;;  %v10825_v15 = vmax.f32 %v10572_v37, 0.0  ;;  %v15082_v8 = vld [vmem:[%s18609_s2 + $0xde0] sm:$0xff]   ;;  %v15086_v56 = vld [vmem:[%s18609_s2 + $0xde8] sm:$0xff]  }
0x3204   :  { %v10838_v58 = vpack.c.bf16 %v10822_v46, %v10822_v46  ;;  %v10840_v29 = vpack.c.bf16 %v10824_v20, %v10824_v20  ;;  %v18289_v37 = vld [vmem:[%s18611_s4 + $0x23] ss:$4 sm:$0xff] }
0x3205   :  { %v10839_v16 = vpack.c.bf16 %v10823_v40, %v10823_v40  ;;  %v10841_v32 = vpack.c.bf16 %v10825_v15, %v10825_v15  ;;  %v10310_v54 = vrot.slane %v18289_v37, %v15814_v59  ;;  %v15084_v46 = vld [vmem:[%s18609_s2 + $0xda0] sm:$0xff]   ;;  %v15085_v20 = vld [vmem:[%s18609_s2 + $0xd68] sm:$0xff]  }
0x3207   :  { %v18242_v60 = vpop.f32.mrb[224].mxu0  ;;  %v18244_v55 = vpop.f32.mrb[224].mxu1  ;;  %11915 = vmatprep.mubr.bf16.mxu0 %v10839_v16  ;;  %11955 = vmatprep.mubr.bf16.mxu1 %v10841_v32 }
0x3208   :  { %v10612_v11 = vpop.f32.mrb[225].mxu0  ;;  %v10653_v42 = vpop.f32.mrb[225].mxu1  ;;  %11916 = vmatmul.mubr.bf16.vlgmr.msra.gmra.mrb[236].mxu0 %v10838_v58  ;;  %11956 = vmatmul.mubr.bf16.vlgmr.msra.gmra.mrb[236].mxu1 %v10840_v29  ;;  %v10270_v58 = vrot.slane %v18216_v27, %v15836_v9  ;;  %v10278_v29 = vrot.slane %v18216_v27, %v15814_v59  ;;  %v15091_v59 = vld [vmem:[%s18609_s2 + $0xd30] sm:$0xff]  }
0x3209   :  { %v10613_v4 = vadd.f32 %v10612_v11, %v10274_v31  ;;  %v10654_v25 = vadd.f32 %v10653_v42, %v10282_v57  ;;  %13869 = vmatpush3.bf16.msra.mxu0 %v15067_v38  ;;  %13891 = vmatpush3.bf16.msra.mxu1 %v15068_v24  ;;  %v10614_v61 = vpop.f32.mrb[226].mxu0  ;;  %v10655_v26 = vpop.f32.mrb[226].mxu1  ;;  %v15087_v38 = vld [vmem:[%s18609_s2 + $0xd28] sm:$0xff]   ;;  %v15089_v11 = vld [vmem:[%s18609_s2 + $0xd70] sm:$0xff]  }
0x320a   :  { %v10615_v35 = vpop.f32.mrb[227].mxu0  ;;  %v10656_v52 = vpop.f32.mrb[227].mxu1  ;;  %13870 = vmatprep.subr.bf16.mxu0 %v15069_v41  ;;  %13892 = vmatprep.subr.bf16.mxu1 %v15070_v43  ;;  %v15088_v24 = vld [vmem:[%s18609_s2 + $0xda8] sm:$0xff]   ;;  %v15090_v42 = vld [vmem:[%s18609_s2 + $0xdf0] sm:$0xff]   ;;  %v10611_v61 = vadd.f32 %v18242_v60, %v10270_v58  ;;  %v10652_v26 = vadd.f32 %v18244_v55, %v10278_v29  ;;  %v15095_v60 = vld [vmem:[%s18609_s2 + $0xd38] sm:$0xff]  }
0x320b   :  { %v10827_v17 = vmax.f32 %v10613_v4, 0.0  ;;  %v10829_v5 = vmax.f32 %v10654_v25, 0.0  ;;  %v10290_v4 = vrot.slane %v18289_v37, %v15740_v49  ;;  %v10298_v25 = vrot.slane %v18289_v37, %v15743_v50  ;;  %v15092_v27 = vld [vmem:[%s18609_s2 + $0xdb0] sm:$0xff]   ;;  %v15093_v49 = vld [vmem:[%s18609_s2 + $0xd78] sm:$0xff]   ;;  %v15120_v58 = vld [vmem:[%s18609_s2 + $0xea8] sm:$0xff]  }
0x320c   :  { %v15094_v50 = vld [vmem:[%s18609_s2 + $0xdf8] sm:$0xff]   ;;  %v10826_v35 = vmax.f32 %v10611_v61, 0.0  ;;  %v10828_v52 = vmax.f32 %v10652_v26, 0.0  ;;  %v15121_v29 = vld [vmem:[%s18609_s2 + $0xe70] sm:$0xff]   ;;  %v15129_v26 = vld [vmem:[%s18609_s2 + $0xf40] sm:$0xff]  }
0x320d   :  { %v10843_v6 = vpack.c.bf16 %v10827_v17, %v10827_v17  ;;  %v10845_v36 = vpack.c.bf16 %v10829_v5, %v10829_v5  ;;  %13871 = vmatpush3.bf16.msra.mxu0 %v15071_v53  ;;  %13893 = vmatpush3.bf16.msra.mxu1 %v15072_v33  ;;  %v15096_v55 = vld [vmem:[%s18609_s2 + $0xdb8] sm:$0xff]  }
0x320e   :  { %13872 = vmatprep.subr.bf16.mxu0 %v15073_v44  ;;  %13894 = vmatprep.subr.bf16.mxu1 %v15074_v63  ;;  %v15097_v44 = vld [vmem:[%s18609_s2 + $0xe40] sm:$0xff]  }
0x320f   :  { %v18270_v21 = vpop.f32.mrb[228].mxu0  ;;  %v18272_v51 = vpop.f32.mrb[228].mxu1  ;;  %11995 = vmatprep.mubr.bf16.mxu0 %v10843_v6  ;;  %12035 = vmatprep.mubr.bf16.mxu1 %v10845_v36  ;;  %v15098_v63 = vld [vmem:[%s18609_s2 + $0xec0] sm:$0xff]   ;;  %v10842_v36 = vpack.c.bf16 %v10826_v35, %v10826_v35  ;;  %v15133_v35 = vld [vmem:[%s18609_s2 + $0xf48] sm:$0xff]  }
0x3210   :  { %v10694_v28 = vpop.f32.mrb[229].mxu0  ;;  %v10735_v1 = vpop.f32.mrb[229].mxu1  ;;  %v15099_v6 = vld [vmem:[%s18609_s2 + $0xe00] sm:$0xff]  }
0x3211   :  { %13873 = vmatpush3.bf16.msra.mxu0 %v15075_v22  ;;  %13895 = vmatpush3.bf16.msra.mxu1 %v15076_v10  ;;  %v10696_v48 = vpop.f32.mrb[230].mxu0  ;;  %v10737_v30 = vpop.f32.mrb[230].mxu1  ;;  %v10695_v53 = vadd.f32 %v10694_v28, %v10290_v4  ;;  %v10736_v33 = vadd.f32 %v10735_v1, %v10298_v25  ;;  %v10844_v22 = vpack.c.bf16 %v10828_v52, %v10828_v52  ;;  %v15100_v10 = vld [vmem:[%s18609_s2 + $0xe80] sm:$0xff]   ;;  %v15102_v28 = vld [vmem:[%s18609_s2 + $0xec8] sm:$0xff]  }
0x3212   :  { %v10697_v34 = vpop.f32.mrb[231].mxu0  ;;  %v10738_v23 = vpop.f32.mrb[231].mxu1  ;;  %13874 = vmatprep.subr.bf16.mxu0 %v15077_v18  ;;  %13896 = vmatprep.subr.bf16.mxu1 %v15078_v19  ;;  %v15101_v19 = vld [vmem:[%s18609_s2 + $0xe48] sm:$0xff]  }
0x3213   :  { %v10831_v17 = vmax.f32 %v10695_v53, 0.0  ;;  %v10833_v5 = vmax.f32 %v10736_v33, 0.0  ;;  %v15103_v48 = vld [vmem:[%s18609_s2 + $0xe08] sm:$0xff]   ;;  %v15107_v34 = vld [vmem:[%s18609_s2 + $0xe10] sm:$0xff]   ;;  %v15131_v53 = vld [vmem:[%s18609_s2 + $0xf00] sm:$0xff]  }
0x3214   :  { %v15104_v30 = vld [vmem:[%s18609_s2 + $0xe88] sm:$0xff]   ;;  %v15108_v23 = vld [vmem:[%s18609_s2 + $0xe90] sm:$0xff]  }
0x3215   :  { %13875 = vmatpush3.bf16.msra.mxu0 %v15079_v12  ;;  %13897 = vmatpush3.bf16.msra.mxu1 %v15080_v62  ;;  %v10847_v18 = vpack.c.bf16 %v10831_v17, %v10831_v17  ;;  %v10849_v1 = vpack.c.bf16 %v10833_v5, %v10833_v5  ;;  %v15105_v12 = vld [vmem:[%s18609_s2 + $0xe50] sm:$0xff]   ;;  %v15135_v17 = vld [vmem:[%s18609_s2 + $0xf08] sm:$0xff]  }
0x3216   :  { %13876 = vmatprep.subr.bf16.mxu0 %v15081_v14  ;;  %13898 = vmatprep.subr.bf16.mxu1 %v15082_v8  ;;  %v15106_v62 = vld [vmem:[%s18609_s2 + $0xed0] sm:$0xff]   ;;  %v15109_v14 = vld [vmem:[%s18609_s2 + $0xe58] sm:$0xff]   ;;  %v15136_v5 = vld [vmem:[%s18609_s2 + $0xf88] sm:$0xff]  }
0x3217   :  { %v18305_v7 = vpop.f32.mrb[232].mxu0  ;;  %v10815_v40 = vpop.f32.mrb[232].mxu1  ;;  %v15110_v8 = vld [vmem:[%s18609_s2 + $0xed8] sm:$0xff]  }
0x3218   :  { %v18307_v15 = vadd.f32 %v10815_v40, %v10310_v54  ;;  %v18309_v16 = vpop.f32.mrb[233].mxu0  ;;  %v18311_v32 = vpop.f32.mrb[233].mxu1  ;;  %v15111_v54 = vld [vmem:[%s18609_s2 + $0xe18] sm:$0xff]   ;;  %v15116_v40 = vld [vmem:[%s18609_s2 + $0xea0] sm:$0xff]  }
0x3219   :  { %13877 = vmatpush3.bf16.msra.mxu0 %v15083_v39  ;;  %13899 = vmatpush3.bf16.msra.mxu1 %v15084_v46  ;;  %v10778_v31 = vpop.f32.mrb[234].mxu0  ;;  %v10819_v57 = vpop.f32.mrb[234].mxu1  ;;  %v15112_v39 = vld [vmem:[%s18609_s2 + $0xe98] sm:$0xff]   ;;  %v15113_v46 = vld [vmem:[%s18609_s2 + $0xe60] sm:$0xff]  }
0x321a   :  { %v10779_v41 = vpop.f32.mrb[235].mxu0  ;;  %v10820_v43 = vpop.f32.mrb[235].mxu1  ;;  %13878 = vmatprep.subr.bf16.mxu0 %v15085_v20  ;;  %13900 = vmatprep.subr.bf16.mxu1 %v15086_v56  ;;  %v15114_v20 = vld [vmem:[%s18609_s2 + $0xee0] sm:$0xff]   ;;  %v15117_v31 = vld [vmem:[%s18609_s2 + $0xe68] sm:$0xff]  }
0x321b   :  { %v15115_v56 = vld [vmem:[%s18609_s2 + $0xe20] sm:$0xff]   ;;  %v15118_v57 = vld [vmem:[%s18609_s2 + $0xee8] sm:$0xff]   ;;  %v10294_v41 = vrot.slane %v18289_v37, %v15732_v47  ;;  %v15122_v43 = vld [vmem:[%s18609_s2 + $0xef0] sm:$0xff]  }
0x321c   :  { %v15124_v47 = vld [vmem:[%s18609_s2 + $0xeb0] sm:$0xff]  }
0x321d   :  { %13879 = vmatpush3.bf16.msra.mxu0 %v15087_v38  ;;  %13901 = vmatpush3.bf16.msra.mxu1 %v15088_v24  ;;  %v15119_v38 = vld [vmem:[%s18609_s2 + $0xe28] sm:$0xff]   ;;  %v10286_v24 = vrot.slane %v18289_v37, %v15729_v45  ;;  %v10306_v45 = vrot.slane %v18289_v37, %v15754_v2  ;;  %v15125_v2 = vld [vmem:[%s18609_s2 + $0xe78] sm:$0xff]   ;;  %v10734_v25 = vadd.f32 %v18272_v51, %v10294_v41 }
0x321e   :  { %13880 = vmatprep.subr.bf16.mxu0 %v15089_v11  ;;  %13902 = vmatprep.subr.bf16.mxu1 %v15090_v42  ;;  %v10314_v11 = vrot.slane %v18289_v37, %v15757_v3  ;;  %v15123_v42 = vld [vmem:[%s18609_s2 + $0xe30] sm:$0xff]   ;;  %v15126_v3 = vld [vmem:[%s18609_s2 + $0xef8] sm:$0xff]  }
0x321f   :  { %v10693_v4 = vadd.f32 %v18270_v21, %v10286_v24  ;;  %v15128_v51 = vld [vmem:[%s18609_s2 + $0xeb8] sm:$0xff]  }
0x3220   :  { %v10818_v21 = vadd.f32 %v18311_v32, %v10314_v11 }
0x3221   :  { %13881 = vmatpush3.bf16.msra.mxu0 %v15091_v59  ;;  %13903 = vmatpush3.bf16.msra.mxu1 %v15092_v27  ;;  %v10777_v59 = vadd.f32 %v18309_v16, %v10306_v45  ;;  %v15127_v27 = vld [vmem:[%s18609_s2 + $0xe38] sm:$0xff]   ;;  %v10830_v61 = vmax.f32 %v10693_v4, 0.0  ;;  %v15130_v16 = vld [vmem:[%s18609_s2 + $0xfc0] sm:$0xff]  }
0x3222   :  { %13882 = vmatprep.subr.bf16.mxu0 %v15093_v49  ;;  %13904 = vmatprep.subr.bf16.mxu1 %v15094_v50  ;;  %v10832_v49 = vmax.f32 %v10734_v25, 0.0  ;;  %v10837_v50 = vmax.f32 %v10818_v21, 0.0 }
0x3223   :  { %v10835_v32 = vmax.f32 %v10777_v59, 0.0  ;;  %v10846_v33 = vpack.c.bf16 %v10830_v61, %v10830_v61 }
0x3225   :  { %13883 = vmatpush3.bf16.msra.mxu0 %v15095_v60  ;;  %13905 = vmatpush3.bf16.msra.mxu1 %v15096_v55  ;;  %v15132_v60 = vld [vmem:[%s18609_s2 + $0xf80] sm:$0xff]   ;;  %v10848_v55 = vpack.c.bf16 %v10832_v49, %v10832_v49  ;;  %v10851_v52 = vpack.c.bf16 %v10835_v32, %v10835_v32 }
0x3226   :  { %13912 = vmatprep.subr.bf16.mxu0 %v15097_v44  ;;  %13934 = vmatprep.subr.bf16.mxu1 %v15098_v63  ;;  %v15134_v44 = vld [vmem:[%s18609_s2 + $0xfc8] sm:$0xff]   ;;  %v10853_v63 = vpack.c.bf16 %v10837_v50, %v10837_v50 }
0x3228   :  { %11996 = vmatmul.mubr.bf16.vlgmr.msra.gmra.mrb[240].mxu0 %v10842_v36  ;;  %12036 = vmatmul.mubr.bf16.vlgmr.msra.gmra.mrb[240].mxu1 %v10844_v22  ;;  %v15138_v36 = vld [vmem:[%s18609_s2 + $0xfd0] sm:$0xff]  }
0x3229   :  { %13913 = vmatpush3.bf16.msra.mxu0 %v15099_v6  ;;  %12075 = vmatprep.mubr.bf16.mxu0 %v10847_v18  ;;  %v15137_v6 = vld [vmem:[%s18609_s2 + $0xf50] sm:$0xff]   ;;  %v15141_v18 = vld [vmem:[%s18609_s2 + $0xf58] sm:$0xff]  }
0x322a   :  { %13935 = vmatpush3.bf16.msra.mxu1 %v15100_v10  ;;  %12115 = vmatprep.mubr.bf16.mxu1 %v10849_v1  ;;  %v15139_v22 = vld [vmem:[%s18609_s2 + $0xf10] sm:$0xff]   ;;  %v15144_v1 = vld [vmem:[%s18609_s2 + $0xf98] sm:$0xff]  }
0x322b   :  { %13914 = vmatprep.subr.bf16.mxu0 %v15101_v19  ;;  %13936 = vmatprep.subr.bf16.mxu1 %v15102_v28  ;;  %v15140_v10 = vld [vmem:[%s18609_s2 + $0xf90] sm:$0xff]   ;;  %v15142_v19 = vld [vmem:[%s18609_s2 + $0xfd8] sm:$0xff]  }
0x322c   :  { %v15143_v28 = vld [vmem:[%s18609_s2 + $0xf18] sm:$0xff]  }
0x322d   :  { %13915 = vmatpush3.bf16.msra.mxu0 %v15103_v48  ;;  %v15145_v48 = vld [vmem:[%s18609_s2 + $0xf60] sm:$0xff]  }
0x322e   :  { %13937 = vmatpush3.bf16.msra.mxu1 %v15104_v30  ;;  %13916 = vmatprep.subr.bf16.mxu0 %v15105_v12  ;;  %v15146_v30 = vld [vmem:[%s18609_s2 + $0xfe0] sm:$0xff]  }
0x322f   :  { %13938 = vmatprep.subr.bf16.mxu1 %v15106_v62  ;;  %v15147_v12 = vld [vmem:[%s18609_s2 + $0xf20] sm:$0xff]  }
0x3230   :  { %v15148_v62 = vld [vmem:[%s18609_s2 + $0xfa0] sm:$0xff]  }
0x3231   :  { %13917 = vmatpush3.bf16.msra.mxu0 %v15107_v34  ;;  %v15149_v34 = vld [vmem:[%s18609_s2 + $0xf68] sm:$0xff]  }
0x3232   :  { %13939 = vmatpush3.bf16.msra.mxu1 %v15108_v23  ;;  %13918 = vmatprep.subr.bf16.mxu0 %v15109_v14  ;;  %v15150_v23 = vld [vmem:[%s18609_s2 + $0xfe8] sm:$0xff]  }
0x3233   :  { %13940 = vmatprep.subr.bf16.mxu1 %v15110_v8  ;;  %v15151_v14 = vld [vmem:[%s18609_s2 + $0xf28] sm:$0xff]   ;;  %v10302_v8 = vrot.slane %v18289_v37, %v15836_v9  ;;  %v15155_v9 = vld [vmem:[%s18609_s2 + $0xf30] sm:$0xff]  }
0x3235   :  { %13919 = vmatpush3.bf16.msra.mxu0 %v15111_v54  ;;  %v15152_v54 = vld [vmem:[%s18609_s2 + $0xfa8] sm:$0xff]   ;;  %v10775_v37 = vadd.f32 %v18305_v7, %v10302_v8  ;;  %v15159_v7 = vld [vmem:[%s18609_s2 + $0xf38] sm:$0xff]  }
0x3236   :  { %13941 = vmatpush3.bf16.msra.mxu1 %v15112_v39  ;;  %13920 = vmatprep.subr.bf16.mxu0 %v15113_v46  ;;  %v15153_v39 = vld [vmem:[%s18609_s2 + $0xf70] sm:$0xff]  }
0x3237   :  { %13942 = vmatprep.subr.bf16.mxu1 %v15114_v20  ;;  %v15154_v46 = vld [vmem:[%s18609_s2 + $0xff0] sm:$0xff]  }
0x3238   :  { %v15156_v20 = vld [vmem:[%s18609_s2 + $0xfb0] sm:$0xff]  }
0x3239   :  { %13921 = vmatpush3.bf16.msra.mxu0 %v15115_v56  ;;  %v15157_v56 = vld [vmem:[%s18609_s2 + $0xf78] sm:$0xff]  }
0x323a   :  { %13943 = vmatpush3.bf16.msra.mxu1 %v15116_v40  ;;  %13922 = vmatprep.subr.bf16.mxu0 %v15117_v31  ;;  %v15158_v40 = vld [vmem:[%s18609_s2 + $0xff8] sm:$0xff]   ;;  %v10834_v31 = vmax.f32 %v10775_v37, 0.0 }
0x323b   :  { %13944 = vmatprep.subr.bf16.mxu1 %v15118_v57  ;;  %v15160_v57 = vld [vmem:[%s18609_s2 + $0xfb8] sm:$0xff]  }
0x323c   :  { %v10850_v24 = vpack.c.bf16 %v10834_v31, %v10834_v31 }
0x323d   :  { %13923 = vmatpush3.bf16.msra.mxu0 %v15119_v38  ;;  %v10836_v38 = vmax.f32 %v18307_v15, 0.0 }
0x323e   :  { %13945 = vmatpush3.bf16.msra.mxu1 %v15120_v58  ;;  %13924 = vmatprep.subr.bf16.mxu0 %v15121_v29 }
0x323f   :  { %13946 = vmatprep.subr.bf16.mxu1 %v15122_v43  ;;  %v10852_v58 = vpack.c.bf16 %v10836_v38, %v10836_v38  ;;  %v13021_v43 = vld [vmem:[%s18610_s3 + $0x1f] ss:$0 sm:$0xff] }
0x3241   :  { %13925 = vmatpush3.bf16.msra.mxu0 %v15123_v42 }
0x3242   :  { %13947 = vmatpush3.bf16.msra.mxu1 %v15124_v47  ;;  %13926 = vmatprep.subr.bf16.mxu0 %v15125_v2 }
0x3243   :  { %13948 = vmatprep.subr.bf16.mxu1 %v15126_v3 }
0x3245   :  { %13927 = vmatpush3.bf16.msra.mxu0 %v15127_v27 }
0x3246   :  { %13949 = vmatpush3.bf16.msra.mxu1 %v15128_v51  ;;  %13956 = vmatprep.subr.bf16.mxu0 %v15129_v26 }
0x3247   :  { %13978 = vmatprep.subr.bf16.mxu1 %v15130_v16 }
0x3248   :  { %12076 = vmatmul.mubr.bf16.vlgmr.msra.gmra.mrb[244].mxu0 %v10846_v33 }
0x3249   :  { %12116 = vmatmul.mubr.bf16.vlgmr.msra.gmra.mrb[244].mxu1 %v10848_v55  ;;  %13957 = vmatpush3.bf16.msra.mxu0 %v15131_v53 }
0x324a   :  { %12155 = vmatprep.mubr.bf16.mxu0 %v10851_v52  ;;  %13979 = vmatpush3.bf16.msra.mxu1 %v15132_v60 }
0x324b   :  { %12195 = vmatprep.mubr.bf16.mxu1 %v10853_v63  ;;  %13958 = vmatprep.subr.bf16.mxu0 %v15133_v35 }
0x324c   :  { %13980 = vmatprep.subr.bf16.mxu1 %v15134_v44 }
0x324d   :  { %13959 = vmatpush3.bf16.msra.mxu0 %v15135_v17 }
0x324e   :  { %13981 = vmatpush3.bf16.msra.mxu1 %v15136_v5  ;;  %13960 = vmatprep.subr.bf16.mxu0 %v15137_v6 }
0x324f   :  { %13982 = vmatprep.subr.bf16.mxu1 %v15138_v36 }
0x3251   :  { %13961 = vmatpush3.bf16.msra.mxu0 %v15139_v22 }
0x3252   :  { %13983 = vmatpush3.bf16.msra.mxu1 %v15140_v10  ;;  %13962 = vmatprep.subr.bf16.mxu0 %v15141_v18 }
0x3253   :  { %13984 = vmatprep.subr.bf16.mxu1 %v15142_v19 }
0x3255   :  { %13963 = vmatpush3.bf16.msra.mxu0 %v15143_v28 }
0x3256   :  { %13985 = vmatpush3.bf16.msra.mxu1 %v15144_v1  ;;  %13964 = vmatprep.subr.bf16.mxu0 %v15145_v48 }
0x3257   :  { %13986 = vmatprep.subr.bf16.mxu1 %v15146_v30 }
0x3259   :  { %13965 = vmatpush3.bf16.msra.mxu0 %v15147_v12 }
0x325a   :  { %13987 = vmatpush3.bf16.msra.mxu1 %v15148_v62  ;;  %13966 = vmatprep.subr.bf16.mxu0 %v15149_v34 }
0x325b   :  { %13988 = vmatprep.subr.bf16.mxu1 %v15150_v23 }
0x325d   :  { %13967 = vmatpush3.bf16.msra.mxu0 %v15151_v14 }
0x325e   :  { %13989 = vmatpush3.bf16.msra.mxu1 %v15152_v54  ;;  %13968 = vmatprep.subr.bf16.mxu0 %v15153_v39 }
0x325f   :  { %13990 = vmatprep.subr.bf16.mxu1 %v15154_v46 }
0x3261   :  { %13969 = vmatpush3.bf16.msra.mxu0 %v15155_v9 }
0x3262   :  { %13991 = vmatpush3.bf16.msra.mxu1 %v15156_v20  ;;  %13970 = vmatprep.subr.bf16.mxu0 %v15157_v56 }
0x3263   :  { %13992 = vmatprep.subr.bf16.mxu1 %v15158_v40 }
0x3265   :  { %13971 = vmatpush3.bf16.msra.mxu0 %v15159_v7 }
0x3266   :  { %13993 = vmatpush3.bf16.msra.mxu1 %v15160_v57  ;;  %14403 = vmatprep.subr.bf16.mxu0 %v15313_v0 }
0x3268   :  { %12156 = vmatmul.mubr.bf16.vlgmr.msra.gmra.mrb[248].mxu0 %v10850_v24  ;;  %v13150_v24 = vld [vmem:[%s18610_s3 + $0x24] ss:$0 sm:$0xff] }
0x3269   :  { %12196 = vmatmul.mubr.bf16.vlgmr.msra.gmra.mrb[248].mxu1 %v10852_v58  ;;  %14407 = vmatprep.mubr.msk.bf16.mxu0 %vm15314_vm0, %v15313_v0  ;;  %v13151_v58 = vld [vmem:[%s18610_s3 + $0x25] ss:$0 sm:$0xff] }
0x32db   :  { %v13840_v29 = vpop.f32.mrb[236].mxu0  ;;  %v13862_v41 = vpop.f32.mrb[236].mxu1 }
0x32dc   :  { %v13841_v45 = vpop.f32.mrb[237].mxu0  ;;  %v13863_v15 = vpop.f32.mrb[237].mxu1 }
0x32dd   :  { %v13842_v11 = vadd.f32 %v13841_v45, %v13840_v29  ;;  %v13864_v42 = vadd.f32 %v13863_v15, %v13862_v41  ;;  %v13843_v4 = vpop.f32.mrb[238].mxu0  ;;  %v13865_v47 = vpop.f32.mrb[238].mxu1 }
0x32de   :  { %v13844_v2 = vpop.f32.mrb[239].mxu0  ;;  %v13866_v25 = vpop.f32.mrb[239].mxu1  ;;  %v15161_v47 = vld [vmem:[%s18608_s1 + $0x138] ss:$316 sps:$4 sm:$0xff]  }
0x32df   :  { %v11918_v3 = vadd.f32 %v13842_v11, %v13021_v43  ;;  %14404 = vmatpush3.bf16.msra.mxu0 %v15161_v47  ;;  %v15162_v2 = vld [vmem:[%s18608_s1 + $0x3b0] ss:$316 sps:$4 sm:$0xff]  }
0x32e0   :  { %14405 = vmatprep.subr.bf16.mxu0 %v15313_v0  ;;  %v13154_v0 = vld [vmem:[%s18610_s3 + $0x2a] ss:$0 sm:$0xff] }
0x32e1   :  { %v11958_v59 = vadd.f32 %v13864_v42, %v11918_v3 }
0x32e3   :  { %14406 = vmatpush3.bf16.msra.mxu0 %v15162_v2 }
0x32fb   :  { %v13884_v21 = vpop.f32.mrb[240].mxu0  ;;  %v13906_v27 = vpop.f32.mrb[240].mxu1 }
0x32fc   :  { %v13885_v61 = vpop.f32.mrb[241].mxu0  ;;  %v13907_v51 = vpop.f32.mrb[241].mxu1 }
0x32fd   :  { %v13886_v26 = vadd.f32 %v13885_v61, %v13884_v21  ;;  %v13908_v49 = vadd.f32 %v13907_v51, %v13906_v27  ;;  %v13887_v16 = vpop.f32.mrb[242].mxu0  ;;  %v13909_v32 = vpop.f32.mrb[242].mxu1  ;;  %v13152_v27 = vld [vmem:[%s18610_s3 + $0x28] ss:$0 sm:$0xff]  ;;  %v13153_v51 = vld [vmem:[%s18610_s3 + $0x29] ss:$0 sm:$0xff] }
0x32fe   :  { %v13888_v50 = vpop.f32.mrb[243].mxu0  ;;  %v13910_v53 = vpop.f32.mrb[243].mxu1  ;;  %s15289_s3 = scalar_lea.vmem %s12336_s30, 128 }
0x32ff   :  { %v11998_v33 = vadd.f32 %v13886_v26, %v11958_v59  ;;  %p15290_p0 = scmp.ne.s32.totalorder %s12336_s30, %s15289_s3  ;;  %p15295_p2 = scmp.lt.s32.totalorder %s15289_s3, %s15289_s3 }
0x3301   :  { %v12038_v60 = vadd.f32 %v13908_v49, %v11998_v33  ;;  %p15296_p3 = por %p15295_p2, %p15294_p1 }
0x3303   :  { %p15297_p4 = pnand %p15296_p3, %p15290_p0 }
0x331b   :  { %v13928_v55 = vpop.f32.mrb[244].mxu0 }
0x331c   :  { %v13950_v35 = vpop.f32.mrb[244].mxu1  ;;  %v13929_v52 = vpop.f32.mrb[245].mxu0 }
0x331d   :  { %v13930_v44 = vadd.f32 %v13929_v52, %v13928_v55  ;;  %v13951_v63 = vpop.f32.mrb[245].mxu1  ;;  %v13931_v17 = vpop.f32.mrb[246].mxu0 }
0x331e   :  { %v13952_v5 = vadd.f32 %v13951_v63, %v13950_v35  ;;  %v13953_v6 = vpop.f32.mrb[246].mxu1  ;;  %v13932_v36 = vpop.f32.mrb[247].mxu0 }
0x331f   :  { %v12078_v22 = vadd.f32 %v13930_v44, %v12038_v60  ;;  %v13954_v10 = vpop.f32.mrb[247].mxu1 }
0x3321   :  { %v12118_v18 = vadd.f32 %v13952_v5, %v12078_v22 }
0x333b   :  { %v13972_v19 = vpop.f32.mrb[248].mxu0 }
0x333c   :  { %v13994_v28 = vpop.f32.mrb[248].mxu1  ;;  %v13973_v1 = vpop.f32.mrb[249].mxu0 }
0x333d   :  { %v13974_v48 = vadd.f32 %v13973_v1, %v13972_v19  ;;  %v13995_v30 = vpop.f32.mrb[249].mxu1  ;;  %v13975_v12 = vpop.f32.mrb[250].mxu0 }
0x333e   :  { %v13996_v62 = vadd.f32 %v13995_v30, %v13994_v28  ;;  %v13997_v34 = vpop.f32.mrb[250].mxu1  ;;  %v13976_v23 = vpop.f32.mrb[251].mxu0 }
0x333f   :  { %v12158_v14 = vadd.f32 %v13974_v48, %v12118_v18  ;;  %v13998_v8 = vpop.f32.mrb[251].mxu1 }
0x3341   :  { %v12198_v54 = vadd.f32 %v13996_v62, %v12158_v14 }
0x3343   :  { %v12203_v39 = vadd.f32 %v12198_v54, %v18017_v13 }
0x3345   :  { %v12204_v46 = vsel %vm45_vm1, %v12203_v39, 0.0 }
0x3346   :  { %12205 = vadd.xlane.f32.xlu0 %v12204_v46 }
0x33d3   :  { %v12206_v9 = vpop.xlane.xlu0 %12205 }
0x33d4   :  { %v12207_v37 = vmul.f32 0.03125, %v12206_v9 }
0x33d6   :  { %v12208_v20 = vsub.f32 %v12203_v39, %v12207_v37 }
0x33d8   :  { %v12209_v56 = vmul.f32 %v12208_v20, %v12208_v20 }
0x33da   :  { %v12210_v40 = vsel %vm45_vm1, %v12209_v56, 0.0 }
0x33db   :  { %12211 = vadd.xlane.f32.xlu0 %v12210_v40 }
0x3468   :  { %v12212_v7 = vpop.xlane.xlu0 %12211 }
0x3469   :  { %v12213_v31 = vmul.f32 0.03125, %v12212_v7 }
0x346b   :  { %v12214_v57 = vadd.f32 1e-05, %v12213_v31 }
0x346d   :  { %15279 = vrsqrt.f32 %v12214_v57 }
0x3477   :  { %v15280_v38 = vpop.eup %15279 }
0x3478   :  { %v12216_v13 = vmul.f32 %v15280_v38, %v12208_v20 }
0x347a   :  { %v12222_v29 = vmul.f32 %v13150_v24, %v12216_v13 }
0x347c   :  { %v12228_v41 = vadd.f32 %v13151_v58, %v12222_v29 }
0x347e   :  { %v12229_v43 = vsel %vm45_vm1, %v12228_v41, 0.0 }
0x347f   :  { %12230 = vadd.xlane.f32.xlu1 %v12229_v43 }
0x350c   :  { %v12231_v45 = vpop.xlane.xlu1 %12230 }
0x350d   :  { %v12232_v15 = vmul.f32 0.03125, %v12231_v45 }
0x350f   :  { %v12233_v11 = vsub.f32 %v12228_v41, %v12232_v15 }
0x3511   :  { %v12234_v42 = vmul.f32 %v12233_v11, %v12233_v11 }
0x3513   :  { %v12235_v4 = vsel %vm45_vm1, %v12234_v42, 0.0 }
0x3514   :  { %12236 = vadd.xlane.f32.xlu0 %v12235_v4 }
0x35a1   :  { %v12237_v25 = vpop.xlane.xlu0 %12236 }
0x35a2   :  { %v12238_v3 = vmul.f32 0.03125, %v12237_v25 }
0x35a4   :  { %v12239_v59 = vadd.f32 1e-05, %v12238_v3 }
0x35a6   :  { %15281 = vrsqrt.f32 %v12239_v59 }
0x35b0   :  { %v15282_v21 = vpop.eup %15281 }
0x35b1   :  { %v12241_v61 = vmul.f32 %v15282_v21, %v12233_v11 }
0x35b3   :  { %v12247_v26 = vmul.f32 %v13152_v27, %v12241_v61 }
0x35b5   :  { %v12253_v49 = vadd.f32 %v13153_v51, %v12247_v26 }
0x35b7   :  { %v12258_v16 = vpack.c.bf16 %v12253_v49, %v12253_v49 }
0x35b9   :  { %14408 = vmatmul.mubr.msk.bf16.vlgmr.msra.gmra.mrb[252].mxu0 %vm45_vm1, %v12258_v16 }
0x368c   :  { %v12313_v32 = vpop.f32.mrb[252].mxu0 }
0x368d   :  { %v12314_v50 = vadd.f32 %v13154_v0, %v12313_v32  ;;  %v14409_v53 = vpop.f32.mrb[253].mxu0 }
0x368e   :  { %v12316_v33 = vpop.f32.mrb[254].mxu0 }
0x368f   :  { %12319 = vmax.xlane.f32.xlu1 %v12314_v50  ;;  %v14410_v60 = vpop.f32.mrb[255].mxu0 }
0x371c   :  { %v12320_v55 = vpop.xlane.xlu1 %12319 }
0x371d   :  { %v12321_v35 = vsub.f32 %v12314_v50, %v12320_v55 }
0x371f   :  { %v12322_v52 = vmul.f32 1.442695, %v12321_v35 }
0x3721   :  { %15283 = vpow2.f32 %v12322_v52 }
0x372b   :  { %v15284_v44 = vpop.eup %15283 }
0x372c   :  { %12324 = vadd.xlane.f32.xlu0 %v15284_v44 }
0x37b9   :  { %v12325_v63 = vpop.xlane.xlu0 %12324 }
0x37ba   :  { %15285 = vrcp.f32 %v12325_v63 }
0x37c4   :  { %v15286_v17 = vpop.eup %15285 }
0x37c5   :  { %v12327_v5 = vmul.f32 %v15286_v17, %v15284_v44 }
0x37c7   :  { %12328 = vst [vmem:[#allocation4] sm:$0xff] %v12327_v5 }
0x37c8   :  { %15300 = shalt.err (!%p15297_p4)
}
0x37c9   :  { %s15301_s14 = scalar_lea.hbm %s18612_s5, 128 }
0x37ca   :  { %p15302_p5 = scmp.ne.s32.totalorder %s18612_s5, %s15301_s14  ;;  %p15305_p6 = scmp.lt.u32.totalorder %s15301_s14, %s18612_s5 }
0x37cc   :  { %p15307_p7 = pnand %p15305_p6, %p15302_p5 }
0x37ce   :  { %15310 = shalt.err (!%p15307_p7)
}
0x37cf   :  { %12338 = dma.vmem_to_hbm [thread:$0]  %s12336_s30, 128, %s18612_s5, [#allocation5]  }
0x37d0   :  { %15311 = dma.done.wait [#allocation5], 128  }
0x37d1   :  { %15312 = vsyncadd [#allocation5], 4294967168 }
0x37d2   :  { %12342 = vsyncpa [#allocation5], 1 }

</bundles_post_ra>
